<compile_context>
chip_gen: v6e
topology: v6e:2x2x1
jax: 0.10.0
libtpu: 0.0.40
codegen_flags: <defaults>
</compile_context>

<pallas_src>
import functools

import jax
import jax.numpy as jnp
from jax.experimental import pallas as pl
from jax.experimental.pallas import tpu as pltpu


def _linear_act_kernel(x_ref, w_ref, b_ref, o_ref, *, activation, tk):
    """One (N-tile, K-tile) grid step of y = act(x @ W + b).

    grid = (N // tn, K // tk); K is the reduction axis (last, "arbitrary").
    x_ref holds the FULL (M, K) activation (resident across the whole grid);
    the needed K-chunk is sliced in-kernel.  The f32 output block itself is
    the accumulator (its index_map is independent of k, so it stays resident
    in VMEM across the reduction).
    """
    k = pl.program_id(1)

    @pl.when(k == 0)
    def _():
        o_ref[...] = jnp.zeros_like(o_ref)

    k_start = pl.multiple_of(k * tk, tk)
    x_chunk = x_ref[:, pl.ds(k_start, tk)]
    o_ref[...] += jnp.dot(x_chunk, w_ref[...],
                          preferred_element_type=jnp.float32)

    @pl.when(k == pl.num_programs(1) - 1)
    def _():
        z = o_ref[...] + b_ref[...]
        if activation == "relu":
            z = jnp.maximum(z, 0.0)
        elif activation == "sigmoid":
            z = jax.nn.sigmoid(z)
        o_ref[...] = z.astype(o_ref.dtype)


def linear_act(x, w, b, *, activation, tn, tk):
    """Fused tiled Linear + activation.  x:(M,K)  w:(K,N)  b:(N,) -> (M,N)."""
    M, K = x.shape
    Kw, N = w.shape
    assert K == Kw and b.shape == (N,)
    assert K % tk == 0 and N % tn == 0

    b2 = b.reshape(1, N)

    kernel = functools.partial(_linear_act_kernel, activation=activation, tk=tk)
    return pl.pallas_call(
        kernel,
        out_shape=jax.ShapeDtypeStruct((M, N), jnp.float32),
        grid_spec=pltpu.PrefetchScalarGridSpec(
            num_scalar_prefetch=0,
            grid=(N // tn, K // tk),
            in_specs=[
                # x fully resident: constant block index -> DMA'd once.
                pl.BlockSpec((M, K), lambda j, k: (0, 0)),
                # W tile: the only big streaming input (8 MiB / 6 MiB tiles).
                pl.BlockSpec((tk, tn), lambda j, k: (k, j)),
                # bias tile.
                pl.BlockSpec((1, tn), lambda j, k: (0, j)),
            ],
            out_specs=pl.BlockSpec((M, tn), lambda j, k: (0, j)),
        ),
        compiler_params=pltpu.CompilerParams(
            dimension_semantics=("parallel", "arbitrary"),
            # Default scoped VMEM (16 MiB on v5e, 32 MiB on v6e/v7x) is too
            # tight for double-buffered 8 MiB W tiles; 48 MiB still leaves
            # headroom under v7x's 64 MiB physical VMEM.
            vmem_limit_bytes=48 * 1024 * 1024,
        ),
    )(x, w, b2)


class FullyConnect:
    """JAX/Pallas port of the PyTorch FullyConnect module."""

    IN1, OUT1 = 10240, 2048
    OUT2 = 16 * 8 * (2 * 5 + 2)  # 1536

    def __init__(self, key):
        k1, k2, k3, k4 = jax.random.split(key, 4)
        # Deterministic init mirroring nn.Linear's uniform(-1/sqrt(fan_in), +).
        bound1 = 1.0 / (self.IN1 ** 0.5)
        bound2 = 1.0 / (self.OUT1 ** 0.5)
        # Stored as (in, out) so the kernel does x @ W + b.
        self.w1 = jax.random.uniform(
            k1, (self.IN1, self.OUT1), jnp.float32, -bound1, bound1)
        self.b1 = jax.random.uniform(
            k2, (self.OUT1,), jnp.float32, -bound1, bound1)
        self.w2 = jax.random.uniform(
            k3, (self.OUT1, self.OUT2), jnp.float32, -bound2, bound2)
        self.b2 = jax.random.uniform(
            k4, (self.OUT2,), jnp.float32, -bound2, bound2)

    def __call__(self, x):
        # Per-layer tiles (feedback-tuned):
        #   layer1: tn=1024, tk=2048 -> grid (2,5)=10 steps, 8 MiB W tile
        #   layer2: tn=768,  tk=2048 -> grid (2,1)=2 steps,  6 MiB W tile
        # Both keep 2 N-tiles so v7x's dual TensorCores each get a shard.
        h = linear_act(x, self.w1, self.b1, activation="relu",
                       tn=1024, tk=2048)
        out = linear_act(h, self.w2, self.b2, activation="sigmoid",
                         tn=768, tk=2048)
        return out


if __name__ == "__main__":
    key = jax.random.PRNGKey(0)
    kp, kx = jax.random.split(key)

    model = FullyConnect(kp)

    batch = 2
    x = jax.random.normal(kx, (batch, FullyConnect.IN1), jnp.float32)

    out = model(x)
    out = jax.block_until_ready(out)

    # Pure-JAX reference check (same params, same math).
    ref = jax.nn.sigmoid(
        jnp.maximum(x @ model.w1 + model.b1, 0.0) @ model.w2 + model.b2)
    assert out.shape == (batch, FullyConnect.OUT2), out.shape
    assert jnp.allclose(out, ref, atol=1e-5, rtol=1e-5), float(
        jnp.max(jnp.abs(out - ref)))

    print("KERNEL_OK")
</pallas_src>

<mosaic_0001>
module attributes {stable_mosaic.version = 11 : i64} {
  func.func @_linear_act_kernel(%arg0: i32, %arg1: i32, %arg2: memref<2x10240xf32, #tpu.memory_space<vmem>>, %arg3: memref<2048x1024xf32, #tpu.memory_space<vmem>>, %arg4: memref<1x1024xf32, #tpu.memory_space<vmem>>, %arg5: memref<2x1024xf32, #tpu.memory_space<vmem>>) attributes {dimension_semantics = [#tpu.dimension_semantics<parallel>, #tpu.dimension_semantics<arbitrary>], iteration_bounds = array<i64: 2, 5>, scalar_prefetch = 0 : i64, scratch_operands = 0 : i64, tpu.core_type = #tpu.core_type<tc>, window_params = [{pipeline_mode = #tpu.pipeline_mode<synchronous>, transform_indices = @transform_0, window_bounds = array<i64: 2, 10240>}, {transform_indices = @transform_1, window_bounds = array<i64: 2048, 1024>}, {transform_indices = @transform_2, window_bounds = array<i64: 1, 1024>}, {transform_indices = @transform_3, window_bounds = array<i64: 2, 1024>}]} {
    %c0_i32 = arith.constant 0 : i32
    %0 = arith.cmpi eq, %arg1, %c0_i32 : i32
    %1 = arith.extui %0 : i1 to i32
    %c0_i32_0 = arith.constant 0 : i32
    %2 = arith.cmpi ne, %1, %c0_i32_0 : i32
    scf.if %2 {
      %cst_8 = arith.constant 0.000000e+00 : f32
      %15 = vector.broadcast %cst_8 : f32 to vector<2x1024xf32>
      %c0_9 = arith.constant 0 : index
      %c0_10 = arith.constant 0 : index
      %16 = vector.load %arg5[%c0_9, %c0_10] : memref<2x1024xf32, #tpu.memory_space<vmem>>, vector<2x1024xf32>
      tpu.vector_store %arg5[%c0_9, %c0_10], %15 {strides = array<i32>} : memref<2x1024xf32, #tpu.memory_space<vmem>>, vector<2x1024xf32>,
    } else {
    }
    %c2048_i32 = arith.constant 2048 : i32
    %3 = arith.muli %arg1, %c2048_i32 : i32
    %4 = tpu.assume_multiple %3, 2048 : i32
    %c0 = arith.constant 0 : index
    %5 = arith.index_cast %4 : i32 to index
    %6 = vector.load %arg2[%c0, %5] : memref<2x10240xf32, #tpu.memory_space<vmem>>, vector<2x2048xf32>
    %c0_1 = arith.constant 0 : index
    %c0_2 = arith.constant 0 : index
    %7 = vector.load %arg5[%c0_1, %c0_2] : memref<2x1024xf32, #tpu.memory_space<vmem>>, vector<2x1024xf32>
    %c0_3 = arith.constant 0 : index
    %c0_4 = arith.constant 0 : index
    %8 = vector.load %arg3[%c0_3, %c0_4] : memref<2048x1024xf32, #tpu.memory_space<vmem>>, vector<2048x1024xf32>
    %cst = arith.constant dense<0.000000e+00> : vector<2x1024xf32>
    %9 = tpu.matmul %6, %8, %cst {dimension_numbers = #tpu.dot_dimension_numbers<[1], [0], [0], [1], [0, 0, 1, 1], [], []>} : vector<2x2048xf32>, vector<2048x1024xf32>, vector<2x1024xf32> -> vector<2x1024xf32>
    %10 = arith.addf %7, %9 : vector<2x1024xf32>
    %c0_5 = arith.constant 0 : index
    %c0_6 = arith.constant 0 : index
    %11 = vector.load %arg5[%c0_5, %c0_6] : memref<2x1024xf32, #tpu.memory_space<vmem>>, vector<2x1024xf32>
    tpu.vector_store %arg5[%c0_5, %c0_6], %10 {strides = array<i32>} : memref<2x1024xf32, #tpu.memory_space<vmem>>, vector<2x1024xf32>,
    %c4_i32 = arith.constant 4 : i32
    %12 = arith.cmpi eq, %arg1, %c4_i32 : i32
    %13 = arith.extui %12 : i1 to i32
    %c0_i32_7 = arith.constant 0 : i32
    %14 = arith.cmpi ne, %13, %c0_i32_7 : i32
    scf.if %14 {
      %c0_8 = arith.constant 0 : index
      %c0_9 = arith.constant 0 : index
      %15 = vector.load %arg5[%c0_8, %c0_9] : memref<2x1024xf32, #tpu.memory_space<vmem>>, vector<2x1024xf32>
      %c0_10 = arith.constant 0 : index
      %c0_11 = arith.constant 0 : index
      %16 = vector.load %arg4[%c0_10, %c0_11] : memref<1x1024xf32, #tpu.memory_space<vmem>>, vector<1x1024xf32>
      %17 = vector.broadcast %16 : vector<1x1024xf32> to vector<2x1024xf32>
      %18 = arith.addf %15, %17 : vector<2x1024xf32>
      %cst_12 = arith.constant 0.000000e+00 : f32
      %19 = vector.broadcast %cst_12 : f32 to vector<2x1024xf32>
      %20 = arith.maximumf %18, %19 : vector<2x1024xf32>
      %c0_13 = arith.constant 0 : index
      %c0_14 = arith.constant 0 : index
      %21 = vector.load %arg5[%c0_13, %c0_14] : memref<2x1024xf32, #tpu.memory_space<vmem>>, vector<2x1024xf32>
      tpu.vector_store %arg5[%c0_13, %c0_14], %20 {strides = array<i32>} : memref<2x1024xf32, #tpu.memory_space<vmem>>, vector<2x1024xf32>,
    } else {
    }
    return
  }
  func.func @transform_0(%arg0: i32, %arg1: i32) -> (i32, i32) {
    %c0_i32 = arith.constant 0 : i32
    %c0_i32_0 = arith.constant 0 : i32
    %c0_i32_1 = arith.constant 0 : i32
    return %c0_i32, %c0_i32_0 : i32, i32
  }
  func.func @transform_1(%arg0: i32, %arg1: i32) -> (i32, i32) {
    %c0_i32 = arith.constant 0 : i32
    return %arg1, %arg0 : i32, i32
  }
  func.func @transform_2(%arg0: i32, %arg1: i32) -> (i32, i32) {
    %c0_i32 = arith.constant 0 : i32
    %c0_i32_0 = arith.constant 0 : i32
    return %c0_i32, %arg0 : i32, i32
  }
  func.func @transform_3(%arg0: i32, %arg1: i32) -> (i32, i32) {
    %c0_i32 = arith.constant 0 : i32
    %c0_i32_0 = arith.constant 0 : i32
    return %c0_i32, %arg0 : i32, i32
  }
}

</mosaic_0001>

<bundles_post_ra>
// kernel: tpu_custom_call.1
= control target key start
LH: loop header
LB: loop body
LE: loop exit
PB: predicated region body
PF: predicated region fallthrough
CT: control target
= control target key end

     0   :  { %s7883_s0 = inlined_call_operand.hbm [shape: f32[2,10240], index: 0, kind: input, shape index: {}]   ;;  %s7884_s1 = inlined_call_operand.hbm [shape: f32[10240,2048], index: 1, kind: input, shape index: {}]   ;;  %s7885_s2 = inlined_call_operand.hbm [shape: f32[1,2048], index: 2, kind: input, shape index: {}]   ;;  %s7886_s3 = inlined_call_operand.hbm [shape: f32[2,2048], index: 3, kind: output, shape index: {}]  }
   0x1   :  { %7894 = sst [smem:[#allocation16_spill]] %s7883_s0 }
   0x2   :  { %7895 = sst [smem:[#allocation17_spill]] %s7884_s1 }
   0x3   :  { %7896 = sst [smem:[#allocation18_spill]] %s7886_s3 }
   0x4   :  { %8 = vsyncpa [#allocation3], 0 }
   0x5   :  { %9 = vsyncpa [#allocation6], 0 }
   0x6   :  { %11 = vsyncpa [#allocation6 + $0x1], 0 }
   0x7   :  { %12 = vsyncpa [#allocation4], 0 }
   0x8   :  { %14 = vsyncpa [#allocation4 + $0x1], 0  ;;  %s5344_s12 = smov 0   ;;  %s5346_s13 = smov 0  }
   0x9   :  { %s5348_s14 = smov 0   ;;  %s5350_s15 = smov 0  }
   0xa   :  { %s5352_s16 = smov 0   ;;  %s5354_s17 = smov 0  }
   0xb   :  { %s5356_s18 = smov 0   ;;  %s5358_s19 = smov 0  }
   0xc   :  { %s5360_s20 = smov 0   ;;  %s5362_s21 = smov 0  }
   0xd   :  { %s5364_s22 = smov 0  }
   0xe LB: > { %7897 = sst [smem:[#allocation13_spill]] %s5301_s19  ;;  %s29_s23 = sadd.s32 1, %s5305_s20  ;;  %s5313_s22 = sphi %s5364_s22, %s20_s22   ;;  %s5309_s21 = sphi %s5362_s21, %s7932_s21   ;;  %s5305_s20 = sphi %s5360_s20, %s7931_s20   ;;  %s5301_s19 = sphi %s5358_s19, %s7930_s19   ;;  %s5297_s18 = sphi %s5356_s18, %s7929_s18   ;;  %s5293_s17 = sphi %s5354_s17, %s7928_s17   ;;  %s5289_s16 = sphi %s5352_s16, %s7927_s16   ;;  %s5285_s15 = sphi %s5350_s15, %s7926_s15   ;;  %s5281_s14 = sphi %s5348_s14, %s7925_s14   ;;  %s5277_s13 = sphi %s5346_s13, %s7924_s13   ;;  %s5273_s12 = sphi %s5344_s12, %s7923_s12  }
   0xf   : > { %s32_s24 = sadd.s32 1, %s5309_s21  ;;  %p30_p0 = scmp.ge.s32.totalorder %s29_s23, 5 }
  0x10   : > { %s62_s25 = sadd.s32 1, %s5293_s17  ;;  %p69_p1 = scmp.ne.s32.totalorder %s5293_s17, %s5289_s16 }
  0x11   : > { %p70_p2 = scmp.eq.s32.totalorder %s5313_s22, 0  ;;  %s7934_s23 = smov (%p30_p0, %s29_s23), 0 }
  0x12   : > { %7898 = sst [smem:[#allocation14_spill]] %s7934_s23  ;;  %s7936_s24 = smov (!%p30_p0, %s32_s24), %s5309_s21 }
  0x13   : > { %s57_s26 = ssub.s32 %s5305_s20, %s7934_s23  ;;  %p5412_p3 = por %p70_p2, %p69_p1 }
  0x14   : > { %p34_p4 = scmp.ge.s32.totalorder %s7936_s24, 2  ;;  %p7890_p5 = scmp.lt.s32.totalorder %s5313_s22, 10 }
  0x15   : > { %s162_s28 = sand.u32 1, %s5313_s22   ;;  %s164_s29 = sand.u32 1, %s5293_s17  }
  0x16   : > { %s7938_s24 = smov (%p34_p4, %s7936_s24), 0  ;;  %s4951_s4 = sshll.u32 %s164_s29, 14 }
  0x17   : > { %7900 = sst [smem:[#allocation15_spill]] %s7938_s24  ;;  %s5423_s30 = ssub.s32 %s5309_s21, %s7938_s24 }
  0x18   : > { %s59_s5 = sor.u32 %s5423_s30, %s57_s26  ;;  %s4953_s6 = sshll.u32 %s5309_s21, 3 }
  0x19   : > { %p60_p6 = scmp.eq.s32.totalorder %s59_s5, 0  ;;  %s4973_s7 = sshll.u32 %s5305_s20, 12 }
  0x1a   : > { %s166_s8 = scalar_lea.vmem [#allocation5], %s4951_s4  ;;  %s173_s11 = sadd.s32 %s4973_s7, %s4953_s6 }
  0x1b   : > { %s176_s9 = sshll.u32 %s166_s8, 4  ;;  %s4955_s23 = sshll.u32 %s173_s11, 7  ;;  %s177_s9 = int_to_ptr.vmem [resolvable:$true] %s176_s9 }
  0x1c   : > { %s5429_s10 = scalar_select %p60_p6, %s5293_s17, %s62_s25  }
  0x1d   : > { %p5435_p7 = pnand %p7890_p5, %p5412_p3  ;;  %s7902_s1 = sld [smem:[#allocation17_spill]] }
  0x1e   : > { %s5442_s29 = scalar_lea.sflag [#allocation6], %s162_s28  ;;  %s5116_s25 = scalar_lea.vmem %s177_s9, 262144 }
  0x1f   : > { %p5105_p8 = pneg %p5435_p7  ;;  %p5117_p9 = scmp.ne.s32.totalorder %s177_s9, %s5116_s25 }
  0x20   : > { %s5315_s4 = smov [#allocation5]  }
  0x21   : > { %p5119_p10 = pnand %p5117_p9, %p5105_p8  ;;  %s5121_s27 = sshll.u32 %s5315_s4, 4  ;;  %s5122_s27 = int_to_ptr.vmem [resolvable:$false] %s5121_s27 }
  0x22   : > { %s5123_s5 = scalar_lea.vmem %s5122_s27, 524288  ;;  %p5124_p12 = scmp.lt.s32.totalorder %s177_s9, %s5122_s27 }
  0x23   : > { %s175_s26 = scalar_lea.hbm %s7902_s1, %s4955_s23  ;;  %p5120_p11 = pneg %p5119_p10 }
  0x24   : > { %p5125_p13 = scmp.lt.s32.totalorder %s5123_s5, %s5116_s25 }
  0x26   : > { %p5126_p0 = por %p5125_p13, %p5124_p12 }
  0x28   : > { %p5127_p1 = pnand %p5126_p0, %p5120_p11 }
  0x2a   : > { %5130 = shalt.err (!%p5127_p1)
}
  0x2b   : > { %s5316_s19 = smov 2048   ;;  %s5317_s23 = smov 1024  }
  0x2c   : > { %s5318_s24 = smov 64   ;;  %s5450_s28 = sadd.s32 4294967295, %s5313_s22  }
  0x2d   : > { %4993 = dma.hbm_to_vmem [thread:$0]  (!%p5435_p7), %s175_s26, 262144, %s177_s9, %s5442_s29, %s5316_s19, %s5317_s23, %s5318_s24  }
  0x2e   : > { %s4947_s6 = sadd.s32 4294967294, %s5313_s22   ;;  %p75_p3 = scmp.ne.s32.totalorder %s5289_s16, %s5285_s15 }
  0x2f   : > { %p7891_p4 = scmp.eq.s32.totalorder %s5450_s28, 0  ;;  %p101_p6 = scmp.ne.s32.totalorder %s5277_s13, %s5273_s12 }
  0x30   : > { %p131_p9 = scmp.eq.s32.totalorder %s4947_s6, 9  ;;  %p4948_p12 = scmp.ge.s32.totalorder %s5313_s22, 1 }
  0x31   : > { %p5461_p7 = por %p7891_p4, %p75_p3  ;;  %p5467_p10 = por %p101_p6, %p7891_p4 }
  0x32   : > { %p5471_p11 = por %p131_p9, %p101_p6  ;;  %p138_p13 = scmp.lt.s32.totalorder %s5313_s22, 11 }
  0x33   : > { %s7903_s3 = scalar_select %p5461_p7, 1, 0 }
  0x34   : > { %s7904_s15 = scalar_select %p5467_p10, 1, 0 }
  0x35   : > { %s7905_s7 = scalar_select %p5471_p11, 1, 0 }
  0x36   : > { %p5477_p0 = pnand %p4948_p12, %p138_p13  ;;  %s5319_s9 = smov [#allocation2]  }
  0x37   : > { %s151_s11 = sshll.u32 %s5319_s9, 4  ;;  %p86_p3 = scmp.eq.s32.totalorder %s5423_s30, 0  ;;  %s152_s11 = int_to_ptr.vmem [resolvable:$true] %s151_s11 }
  0x38   : > { %p4986_p1 = pneg %p5477_p0  ;;  %s88_s26 = sadd.s32 1, %s5281_s14 }
  0x39   : > { %p95_p5 = scmp.ne.s32.totalorder %s5281_s14, %s5277_s13  ;;  %s188_s4 = sand.u32 1, %s5281_s14  }
  0x3a   : > { %p5489_p6 = pnand %p4986_p1, %p7891_p4  ;;  %s5142_s30 = scalar_lea.vmem %s152_s11, 2560 }
  0x3b   : > { %s5495_s27 = scalar_select %p86_p3, %s5281_s14, %s88_s26  }
  0x3c   : > { %p5502_p9 = por %p95_p5, %p70_p2  ;;  %p5133_p12 = pneg %p5489_p6 }
  0x3d   : > { %p5143_p13 = scmp.ne.s32.totalorder %s152_s11, %s5142_s30  ;;  %p5150_p1 = scmp.lt.s32.totalorder %s152_s11, %s152_s11 }
  0x3e   : > { %p5151_p4 = scmp.lt.s32.totalorder %s5142_s30, %s5142_s30 }
  0x3f   : > { %p5145_p8 = pnand %p5143_p13, %p5133_p12 }
  0x40   : > { %p5152_p10 = por %p5151_p4, %p5150_p1 }
  0x41   : > { %p5146_p11 = pneg %p5145_p8 }
  0x43   : > { %p5153_p7 = pnand %p5152_p10, %p5146_p11 }
  0x45   : > { %5156 = shalt.err (!%p5153_p7)
}
  0x46   : > { %s7909_s0 = sld [smem:[#allocation16_spill]]  ;;  %p7910_p2 = scmp.eq.s32.totalorder %s5450_s28, 9 }
  0x47   : > { %s4956_s6 = sshll.u32 %s188_s4, 3  ;;  %s4974_s9 = sshll.u32 %s5309_s21, 7 }
  0x48   : > { %p5518_p8 = por %p7910_p2, %p95_p5  ;;  %s196_s30 = scalar_lea.hbm %s7885_s2, %s4974_s9 }
  0x49   : > { %s190_s19 = scalar_lea.vmem [#allocation7], %s4956_s6  ;;  %p7912_p4 = scmp.lt.s32.totalorder %s5313_s22, 10 }
  0x4a   : > { %s198_s23 = sshll.u32 %s190_s19, 4  ;;  %s5320_s4 = smov [#allocation7]   ;;  %s199_s23 = int_to_ptr.vmem [resolvable:$true] %s198_s23 }
  0x4b   : > { %p5530_p7 = pnand %p7912_p4, %p5502_p9 }
  0x4c   : > { %4989 = dma.hbm_to_vmem [thread:$0]  (!%p5489_p6), %s7909_s0, 2560, %s152_s11, [#allocation3]  }
  0x4d   : > { %p5159_p5 = pneg %p5530_p7  ;;  %s5170_s11 = scalar_lea.vmem %s199_s23, 128 }
  0x4e   : > { %p5171_p10 = scmp.ne.s32.totalorder %s199_s23, %s5170_s11  ;;  %s5175_s0 = sshll.u32 %s5320_s4, 4  ;;  %s5176_s0 = int_to_ptr.vmem [resolvable:$false] %s5175_s0 }
  0x4f   : > { %s5177_s9 = scalar_lea.vmem %s5176_s0, 256  ;;  %p5178_p6 = scmp.lt.s32.totalorder %s199_s23, %s5176_s0 }
  0x50   : > { %p5173_p11 = pnand %p5171_p10, %p5159_p5  ;;  %p5179_p12 = scmp.lt.s32.totalorder %s5177_s9, %s5170_s11 }
  0x52   : > { %p5174_p3 = pneg %p5173_p11  ;;  %p5180_p13 = por %p5179_p12, %p5178_p6 }
  0x54   : > { %p5181_p1 = pnand %p5180_p13, %p5174_p3 }
  0x56   : > { %5184 = shalt.err (!%p5181_p1)
}
  0x57   : > { %4996 = dma.hbm_to_vmem [thread:$0]  (!%p5530_p7), %s196_s30, 128, %s199_s23, %s5442_s29  }
  0x58   : > { %207 = sbr.rel (%p5477_p0) target bundleno = 1416 (0x588), region = 32  ;;  %p7914_p9 = scmp.eq.s32.totalorder (!%p5477_p0), %s5450_s28, 0 }
  0x5d   : > { %5256 = dma.done.wait (%p7914_p9), [#allocation3], 2560   ;;  %p7915_p2 = pmov %p7914_p9 }
  0x5e   : > { %s213_s0 = sand.u32 1, %s5450_s28   ;;  %s215_s5 = sand.u32 1, %s5289_s16  }
  0x5f   : > { %5258 = vsyncadd (%p7915_p2), [#allocation3], 4294964736  ;;  %s4961_s6 = sshll.u32 %s215_s5, 14  ;;  %s214_s26 = scalar_lea.sflag [#allocation6], %s213_s0 }
  0x60   : > { %s5547_s25 = scalar_lea.vmem [#allocation5], %s4961_s6  ;;  %p7916_p4 = scmp.ne.s32.totalorder %s7903_s3, 0 }
  0x62   : > { %5260 = dma.done.wait (%p7916_p4), %s214_s26, 262144  }
  0x63   : > { %5262 = vsyncadd (%p7916_p4), %s214_s26, 4294705152  ;;  %s5554_s1 = sand.u32 1, %s5277_s13   ;;  %p7917_p0 = scmp.ne.s32.totalorder %s7904_s15, 0 }
  0x64   : > { %s4962_s29 = sshll.u32 %s5554_s1, 3 }
  0x65   : > { %s5557_s8 = scalar_lea.vmem [#allocation7], %s4962_s29 }
  0x66   : > { %5264 = dma.done.wait (%p7917_p0), %s214_s26, 128  }
  0x67   : > { %5266 = vsyncadd (%p7917_p0), %s214_s26, 4294967168  ;;  %s4963_s28 = sshll.u32 %s5554_s1, 4  ;;  %p4964_p7 = scmp.ne.s32.totalorder %s5297_s18, 0 }
  0x68   : > { %s5564_s30 = scalar_lea.vmem [#allocation8], %s4963_s28 }
  0x69   : > { %261 = sbr.rel (%p4964_p7) target bundleno = 112 (0x70), region = 48 }
  0x6e   : > { %v5321_v0 = vmov 0.0  }
  0x6f   : > { %262 = vst [vmem:[%s5564_s30] sm:$0xff] %v5321_v0  ;;  %263 = vst [vmem:[%s5564_s30 + $0x8] sm:$0xff] %v5321_v0 }
  0x70 PF: > { %v396_v1 = vld [vmem:[%s5547_s25 + $0x3c8] sm:$0xff]  ;;  %v395_v3 = vld [vmem:[%s5547_s25 + $0x3c0] sm:$0xff]  ;;  %s4965_s3 = sshll.u32 %s5297_s18, 11  ;;  %p4967_p5 = scmp.ne.s32.totalorder %s5297_s18, 4 }
  0x71   : > { %v652_v2 = vld [vmem:[%s5547_s25 + $0xbc8] sm:$0xff]  ;;  %2411 = vmatprep.subr.mxu0 %v396_v1  ;;  %v651_v4 = vld [vmem:[%s5547_s25 + $0xbc0] sm:$0xff]  ;;  %s5658_s15 = sshra.s32 %s4965_s3, 7 }
  0x72   : > { %2482 = vmatprep.subr.mxu1 %v652_v2  ;;  %v388_v5 = vld [vmem:[%s5547_s25 + $0x388] sm:$0xff]  ;;  %2412 = vmatpush1.msra.mxu0 %v395_v3  ;;  %v387_v7 = vld [vmem:[%s5547_s25 + $0x380] sm:$0xff]  ;;  %s4966_s19 = sshll.u32 %s5658_s15, 1 }
  0x73   : > { %v644_v6 = vld [vmem:[%s5547_s25 + $0xb88] sm:$0xff]  ;;  %2483 = vmatpush1.msra.mxu1 %v651_v4  ;;  %v643_v8 = vld [vmem:[%s5547_s25 + $0xb80] sm:$0xff]  ;;  %2413 = vmatprep.subr.mxu0 %v388_v5  ;;  %s5683_s23 = scalar_lea.vmem [#allocation2], %s4966_s19 }
  0x74   : > { %v380_v9 = vld [vmem:[%s5547_s25 + $0x348] sm:$0xff]  ;;  %2484 = vmatprep.subr.mxu1 %v644_v6  ;;  %v379_v11 = vld [vmem:[%s5547_s25 + $0x340] sm:$0xff]  ;;  %2414 = vmatpush1.msra.mxu0 %v387_v7 }
  0x75   : > { %v636_v10 = vld [vmem:[%s5547_s25 + $0xb48] sm:$0xff]  ;;  %v635_v12 = vld [vmem:[%s5547_s25 + $0xb40] sm:$0xff]  ;;  %2485 = vmatpush1.msra.mxu1 %v643_v8  ;;  %2415 = vmatprep.subr.mxu0 %v380_v9 }
  0x76   : > { %v372_v13 = vld [vmem:[%s5547_s25 + $0x308] sm:$0xff]  ;;  %2486 = vmatprep.subr.mxu1 %v636_v10  ;;  %v371_v15 = vld [vmem:[%s5547_s25 + $0x300] sm:$0xff]  ;;  %2416 = vmatpush1.msra.mxu0 %v379_v11 }
  0x77   : > { %v628_v14 = vld [vmem:[%s5547_s25 + $0xb08] sm:$0xff]  ;;  %v627_v16 = vld [vmem:[%s5547_s25 + $0xb00] sm:$0xff]  ;;  %2487 = vmatpush1.msra.mxu1 %v635_v12  ;;  %2417 = vmatprep.subr.mxu0 %v372_v13 }
  0x78   : > { %v364_v17 = vld [vmem:[%s5547_s25 + $0x2c8] sm:$0xff]  ;;  %2488 = vmatprep.subr.mxu1 %v628_v14  ;;  %v363_v19 = vld [vmem:[%s5547_s25 + $0x2c0] sm:$0xff]  ;;  %2418 = vmatpush1.msra.mxu0 %v371_v15 }
  0x79   : > { %v620_v18 = vld [vmem:[%s5547_s25 + $0xac8] sm:$0xff]  ;;  %v619_v20 = vld [vmem:[%s5547_s25 + $0xac0] sm:$0xff]  ;;  %2489 = vmatpush1.msra.mxu1 %v627_v16  ;;  %2419 = vmatprep.subr.mxu0 %v364_v17 }
  0x7a   : > { %v356_v21 = vld [vmem:[%s5547_s25 + $0x288] sm:$0xff]  ;;  %2490 = vmatprep.subr.mxu1 %v620_v18  ;;  %v355_v23 = vld [vmem:[%s5547_s25 + $0x280] sm:$0xff]  ;;  %2420 = vmatpush1.msra.mxu0 %v363_v19 }
  0x7b   : > { %v612_v22 = vld [vmem:[%s5547_s25 + $0xa88] sm:$0xff]  ;;  %v611_v24 = vld [vmem:[%s5547_s25 + $0xa80] sm:$0xff]  ;;  %2491 = vmatpush1.msra.mxu1 %v619_v20  ;;  %2421 = vmatprep.subr.mxu0 %v356_v21 }
  0x7c   : > { %v348_v25 = vld [vmem:[%s5547_s25 + $0x248] sm:$0xff]  ;;  %2492 = vmatprep.subr.mxu1 %v612_v22  ;;  %v347_v27 = vld [vmem:[%s5547_s25 + $0x240] sm:$0xff]  ;;  %2422 = vmatpush1.msra.mxu0 %v355_v23 }
  0x7d   : > { %v604_v26 = vld [vmem:[%s5547_s25 + $0xa48] sm:$0xff]  ;;  %v603_v28 = vld [vmem:[%s5547_s25 + $0xa40] sm:$0xff]  ;;  %2493 = vmatpush1.msra.mxu1 %v611_v24  ;;  %2423 = vmatprep.subr.mxu0 %v348_v25 }
  0x7e   : > { %v340_v29 = vld [vmem:[%s5547_s25 + $0x208] sm:$0xff]  ;;  %2494 = vmatprep.subr.mxu1 %v604_v26  ;;  %v339_v31 = vld [vmem:[%s5547_s25 + $0x200] sm:$0xff]  ;;  %2424 = vmatpush1.msra.mxu0 %v347_v27 }
  0x7f   : > { %v596_v30 = vld [vmem:[%s5547_s25 + $0xa08] sm:$0xff]  ;;  %v595_v32 = vld [vmem:[%s5547_s25 + $0xa00] sm:$0xff]  ;;  %2495 = vmatpush1.msra.mxu1 %v603_v28  ;;  %2425 = vmatprep.subr.mxu0 %v340_v29 }
  0x80   : > { %v332_v33 = vld [vmem:[%s5547_s25 + $0x1c8] sm:$0xff]  ;;  %2496 = vmatprep.subr.mxu1 %v596_v30  ;;  %v331_v35 = vld [vmem:[%s5547_s25 + $0x1c0] sm:$0xff]  ;;  %2426 = vmatpush1.msra.mxu0 %v339_v31  ;;  %v5322_v31 = vmov 1983009808  }
  0x81   : > { %v588_v34 = vld [vmem:[%s5547_s25 + $0x9c8] sm:$0xff]  ;;  %v587_v36 = vld [vmem:[%s5547_s25 + $0x9c0] sm:$0xff]  ;;  %2497 = vmatpush1.msra.mxu1 %v595_v32  ;;  %2427 = vmatprep.subr.mxu0 %v332_v33  ;;  %v2329_v32 = vunpack.c.l.s4 %v5322_v31  ;;  %v2331_v33 = vlaneseq }
  0x82   : > { %v324_v37 = vld [vmem:[%s5547_s25 + $0x188] sm:$0xff]  ;;  %2498 = vmatprep.subr.mxu1 %v588_v34  ;;  %v323_v39 = vld [vmem:[%s5547_s25 + $0x180] sm:$0xff]  ;;  %2428 = vmatpush1.msra.mxu0 %v331_v35 }
  0x83   : > { %v580_v38 = vld [vmem:[%s5547_s25 + $0x988] sm:$0xff]  ;;  %v579_v40 = vld [vmem:[%s5547_s25 + $0x980] sm:$0xff]  ;;  %2499 = vmatpush1.msra.mxu1 %v587_v36  ;;  %2429 = vmatprep.subr.mxu0 %v324_v37 }
  0x84   : > { %v316_v41 = vld [vmem:[%s5547_s25 + $0x148] sm:$0xff]  ;;  %2500 = vmatprep.subr.mxu1 %v580_v38  ;;  %v315_v43 = vld [vmem:[%s5547_s25 + $0x140] sm:$0xff]  ;;  %2430 = vmatpush1.msra.mxu0 %v323_v39 }
  0x85   : > { %v572_v42 = vld [vmem:[%s5547_s25 + $0x948] sm:$0xff]  ;;  %v571_v44 = vld [vmem:[%s5547_s25 + $0x940] sm:$0xff]  ;;  %2501 = vmatpush1.msra.mxu1 %v579_v40  ;;  %2431 = vmatprep.subr.mxu0 %v316_v41 }
  0x86   : > { %v308_v45 = vld [vmem:[%s5547_s25 + $0x108] sm:$0xff]  ;;  %2502 = vmatprep.subr.mxu1 %v572_v42  ;;  %v307_v47 = vld [vmem:[%s5547_s25 + $0x100] sm:$0xff]  ;;  %2432 = vmatpush1.msra.mxu0 %v315_v43  ;;  %v2330_v42 = vunpack.c.0.s8 %v2329_v32  ;;  %v5675_v43 = vshrl.u32 %v2331_v33, 7 }
  0x87   : > { %v564_v46 = vld [vmem:[%s5547_s25 + $0x908] sm:$0xff]  ;;  %v563_v48 = vld [vmem:[%s5547_s25 + $0x900] sm:$0xff]  ;;  %2503 = vmatpush1.msra.mxu1 %v571_v44  ;;  %2433 = vmatprep.subr.mxu0 %v308_v45 }
  0x88   : > { %v300_v49 = vld [vmem:[%s5547_s25 + $0xc8] sm:$0xff]  ;;  %2504 = vmatprep.subr.mxu1 %v564_v46  ;;  %v299_v51 = vld [vmem:[%s5547_s25 + $0xc0] sm:$0xff]  ;;  %2434 = vmatpush1.msra.mxu0 %v307_v47 }
  0x89   : > { %v556_v50 = vld [vmem:[%s5547_s25 + $0x8c8] sm:$0xff]  ;;  %v555_v52 = vld [vmem:[%s5547_s25 + $0x8c0] sm:$0xff]  ;;  %2505 = vmatpush1.msra.mxu1 %v563_v48  ;;  %2435 = vmatprep.subr.mxu0 %v300_v49 }
  0x8a   : > { %v292_v53 = vld [vmem:[%s5547_s25 + $0x88] sm:$0xff]  ;;  %2506 = vmatprep.subr.mxu1 %v556_v50  ;;  %v291_v55 = vld [vmem:[%s5547_s25 + $0x80] sm:$0xff]  ;;  %2436 = vmatpush1.msra.mxu0 %v299_v51 }
  0x8b   : > { %v548_v54 = vld [vmem:[%s5547_s25 + $0x888] sm:$0xff]  ;;  %v547_v56 = vld [vmem:[%s5547_s25 + $0x880] sm:$0xff]  ;;  %2507 = vmatpush1.msra.mxu1 %v555_v52  ;;  %2437 = vmatprep.subr.mxu0 %v292_v53  ;;  %v5691_v53 = vsub.s32 %v2330_v42, %v5675_v43 }
  0x8c   : > { %v284_v57 = vld [vmem:[%s5547_s25 + $0x48] sm:$0xff]  ;;  %2508 = vmatprep.subr.mxu1 %v548_v54  ;;  %v283_v59 = vld [vmem:[%s5547_s25 + $0x40] sm:$0xff]  ;;  %2438 = vmatpush1.msra.mxu0 %v291_v55 }
  0x8d   : > { %v540_v58 = vld [vmem:[%s5547_s25 + $0x848] sm:$0xff]  ;;  %v539_v60 = vld [vmem:[%s5547_s25 + $0x840] sm:$0xff]  ;;  %2509 = vmatpush1.msra.mxu1 %v547_v56  ;;  %2439 = vmatprep.subr.mxu0 %v284_v57 }
  0x8e   : > { %v276_v61 = vld [vmem:[%s5547_s25 + $0x8] sm:$0xff]  ;;  %2510 = vmatprep.subr.mxu1 %v540_v58  ;;  %v275_v63 = vld [vmem:[%s5547_s25] sm:$0xff]  ;;  %2440 = vmatpush1.msra.mxu0 %v283_v59 }
  0x8f   : > { %v532_v62 = vld [vmem:[%s5547_s25 + $0x808] sm:$0xff]  ;;  %v531_v0 = vld [vmem:[%s5547_s25 + $0x800] sm:$0xff]  ;;  %2511 = vmatpush1.msra.mxu1 %v539_v60  ;;  %2441 = vmatprep.subr.mxu0 %v276_v61 }
  0x90   : > { %v524_v1 = vld [vmem:[%s5547_s25 + $0x7c8] sm:$0xff]  ;;  %2512 = vmatprep.subr.mxu1 %v532_v62  ;;  %v523_v3 = vld [vmem:[%s5547_s25 + $0x7c0] sm:$0xff]  ;;  %2442 = vmatpush1.msra.mxu0 %v275_v63 }
  0x91   : > { %v780_v2 = vld [vmem:[%s5547_s25 + $0xfc8] sm:$0xff]  ;;  %v779_v4 = vld [vmem:[%s5547_s25 + $0xfc0] sm:$0xff]  ;;  %2513 = vmatpush1.msra.mxu1 %v531_v0  ;;  %2443 = vmatprep.subr.mxu0 %v524_v1 }
  0x92   : > { %v516_v5 = vld [vmem:[%s5547_s25 + $0x788] sm:$0xff]  ;;  %2514 = vmatprep.subr.mxu1 %v780_v2  ;;  %v515_v7 = vld [vmem:[%s5547_s25 + $0x780] sm:$0xff]  ;;  %2444 = vmatpush2.msra.mxu0 %v523_v3 }
  0x93   : > { %v772_v6 = vld [vmem:[%s5547_s25 + $0xf88] sm:$0xff]  ;;  %v771_v8 = vld [vmem:[%s5547_s25 + $0xf80] sm:$0xff]  ;;  %2515 = vmatpush2.msra.mxu1 %v779_v4  ;;  %2445 = vmatprep.subr.mxu0 %v516_v5 }
  0x94   : > { %v508_v9 = vld [vmem:[%s5547_s25 + $0x748] sm:$0xff]  ;;  %2516 = vmatprep.subr.mxu1 %v772_v6  ;;  %v507_v11 = vld [vmem:[%s5547_s25 + $0x740] sm:$0xff]  ;;  %2446 = vmatpush2.msra.mxu0 %v515_v7 }
  0x95   : > { %v764_v10 = vld [vmem:[%s5547_s25 + $0xf48] sm:$0xff]  ;;  %v763_v12 = vld [vmem:[%s5547_s25 + $0xf40] sm:$0xff]  ;;  %2517 = vmatpush2.msra.mxu1 %v771_v8  ;;  %2447 = vmatprep.subr.mxu0 %v508_v9 }
  0x96   : > { %v500_v13 = vld [vmem:[%s5547_s25 + $0x708] sm:$0xff]  ;;  %2518 = vmatprep.subr.mxu1 %v764_v10  ;;  %v499_v15 = vld [vmem:[%s5547_s25 + $0x700] sm:$0xff]  ;;  %2448 = vmatpush2.msra.mxu0 %v507_v11 }
  0x97   : > { %v756_v14 = vld [vmem:[%s5547_s25 + $0xf08] sm:$0xff]  ;;  %v755_v16 = vld [vmem:[%s5547_s25 + $0xf00] sm:$0xff]  ;;  %2519 = vmatpush2.msra.mxu1 %v763_v12  ;;  %2449 = vmatprep.subr.mxu0 %v500_v13 }
  0x98   : > { %v492_v17 = vld [vmem:[%s5547_s25 + $0x6c8] sm:$0xff]  ;;  %2520 = vmatprep.subr.mxu1 %v756_v14  ;;  %v491_v19 = vld [vmem:[%s5547_s25 + $0x6c0] sm:$0xff]  ;;  %2450 = vmatpush2.msra.mxu0 %v499_v15 }
  0x99   : > { %v748_v18 = vld [vmem:[%s5547_s25 + $0xec8] sm:$0xff]  ;;  %v747_v20 = vld [vmem:[%s5547_s25 + $0xec0] sm:$0xff]  ;;  %2521 = vmatpush2.msra.mxu1 %v755_v16  ;;  %2451 = vmatprep.subr.mxu0 %v492_v17 }
  0x9a   : > { %v484_v21 = vld [vmem:[%s5547_s25 + $0x688] sm:$0xff]  ;;  %2522 = vmatprep.subr.mxu1 %v748_v18  ;;  %v483_v23 = vld [vmem:[%s5547_s25 + $0x680] sm:$0xff]  ;;  %2452 = vmatpush2.msra.mxu0 %v491_v19 }
  0x9b   : > { %v740_v22 = vld [vmem:[%s5547_s25 + $0xe88] sm:$0xff]  ;;  %v739_v24 = vld [vmem:[%s5547_s25 + $0xe80] sm:$0xff]  ;;  %2523 = vmatpush2.msra.mxu1 %v747_v20  ;;  %2453 = vmatprep.subr.mxu0 %v484_v21 }
  0x9c   : > { %v476_v25 = vld [vmem:[%s5547_s25 + $0x648] sm:$0xff]  ;;  %2524 = vmatprep.subr.mxu1 %v740_v22  ;;  %v475_v27 = vld [vmem:[%s5547_s25 + $0x640] sm:$0xff]  ;;  %2454 = vmatpush2.msra.mxu0 %v483_v23 }
  0x9d   : > { %v732_v26 = vld [vmem:[%s5547_s25 + $0xe48] sm:$0xff]  ;;  %v731_v28 = vld [vmem:[%s5547_s25 + $0xe40] sm:$0xff]  ;;  %2525 = vmatpush2.msra.mxu1 %v739_v24  ;;  %2455 = vmatprep.subr.mxu0 %v476_v25 }
  0x9e   : > { %v468_v29 = vld [vmem:[%s5547_s25 + $0x608] sm:$0xff]  ;;  %2526 = vmatprep.subr.mxu1 %v732_v26  ;;  %v467_v34 = vld [vmem:[%s5547_s25 + $0x600] sm:$0xff]  ;;  %2456 = vmatpush2.msra.mxu0 %v475_v27 }
  0x9f   : > { %v724_v30 = vld [vmem:[%s5547_s25 + $0xe08] sm:$0xff]  ;;  %v723_v35 = vld [vmem:[%s5547_s25 + $0xe00] sm:$0xff]  ;;  %2527 = vmatpush2.msra.mxu1 %v731_v28  ;;  %2457 = vmatprep.subr.mxu0 %v468_v29 }
  0xa0   : > { %v460_v36 = vld [vmem:[%s5547_s25 + $0x5c8] sm:$0xff]  ;;  %2528 = vmatprep.subr.mxu1 %v724_v30  ;;  %v459_v38 = vld [vmem:[%s5547_s25 + $0x5c0] sm:$0xff]  ;;  %2458 = vmatpush2.msra.mxu0 %v467_v34 }
  0xa1   : > { %v716_v37 = vld [vmem:[%s5547_s25 + $0xdc8] sm:$0xff]  ;;  %v715_v39 = vld [vmem:[%s5547_s25 + $0xdc0] sm:$0xff]  ;;  %2529 = vmatpush2.msra.mxu1 %v723_v35  ;;  %2459 = vmatprep.subr.mxu0 %v460_v36 }
  0xa2   : > { %v452_v40 = vld [vmem:[%s5547_s25 + $0x588] sm:$0xff]  ;;  %2530 = vmatprep.subr.mxu1 %v716_v37  ;;  %v451_v44 = vld [vmem:[%s5547_s25 + $0x580] sm:$0xff]  ;;  %2460 = vmatpush2.msra.mxu0 %v459_v38 }
  0xa3   : > { %v708_v41 = vld [vmem:[%s5547_s25 + $0xd88] sm:$0xff]  ;;  %v707_v45 = vld [vmem:[%s5547_s25 + $0xd80] sm:$0xff]  ;;  %2531 = vmatpush2.msra.mxu1 %v715_v39  ;;  %2461 = vmatprep.subr.mxu0 %v452_v40 }
  0xa4   : > { %v444_v46 = vld [vmem:[%s5547_s25 + $0x548] sm:$0xff]  ;;  %v269_v48 = vld [vmem:[%s5683_s23] sm:$0xff]  ;;  %2532 = vmatprep.subr.mxu1 %v708_v41  ;;  %2462 = vmatpush2.msra.mxu0 %v451_v44 }
  0xa5   : > { %v700_v47 = vld [vmem:[%s5547_s25 + $0xd48] sm:$0xff]  ;;  %v443_v49 = vld [vmem:[%s5547_s25 + $0x540] sm:$0xff]  ;;  %2533 = vmatpush2.msra.mxu1 %v707_v45  ;;  %2463 = vmatprep.subr.mxu0 %v444_v46  ;;  %v2327_v56 = vcombine.high %v269_v48, %v269_v48  ;;  %v5702_v63 = vrot.slane %v269_v48, %v5691_v53 }
  0xa6   : > { %v699_v50 = vld [vmem:[%s5547_s25 + $0xd40] sm:$0xff]  ;;  %v436_v51 = vld [vmem:[%s5547_s25 + $0x508] sm:$0xff]  ;;  %2534 = vmatprep.subr.mxu1 %v700_v47  ;;  %2464 = vmatpush2.msra.mxu0 %v443_v49 }
  0xa7   : > { %v692_v52 = vld [vmem:[%s5547_s25 + $0xd08] sm:$0xff]  ;;  %v435_v54 = vld [vmem:[%s5547_s25 + $0x500] sm:$0xff]  ;;  %2535 = vmatpush2.msra.mxu1 %v699_v50  ;;  %2465 = vmatprep.subr.mxu0 %v436_v51  ;;  %v5707_v2 = vrot.slane %v2327_v56, %v5691_v53  ;;  %v5717_v9 = vcombine.high %v5702_v63, %v5702_v63 }
  0xa8   : > { %v691_v55 = vld [vmem:[%s5547_s25 + $0xd00] sm:$0xff]  ;;  %v428_v57 = vld [vmem:[%s5547_s25 + $0x4c8] sm:$0xff]  ;;  %2536 = vmatprep.subr.mxu1 %v692_v52  ;;  %2466 = vmatpush2.msra.mxu0 %v435_v54 }
  0xa9   : > { %v684_v58 = vld [vmem:[%s5547_s25 + $0xcc8] sm:$0xff]  ;;  %v427_v59 = vld [vmem:[%s5547_s25 + $0x4c0] sm:$0xff]  ;;  %2537 = vmatpush2.msra.mxu1 %v691_v55  ;;  %2467 = vmatprep.subr.mxu0 %v428_v57  ;;  %v5722_v11 = vcombine.high %v5707_v2, %v5707_v2 }
  0xaa   : > { %v683_v60 = vld [vmem:[%s5547_s25 + $0xcc0] sm:$0xff]  ;;  %v420_v61 = vld [vmem:[%s5547_s25 + $0x488] sm:$0xff]  ;;  %2538 = vmatprep.subr.mxu1 %v684_v58  ;;  %2468 = vmatpush2.msra.mxu0 %v427_v59 }
  0xab   : > { %v676_v62 = vld [vmem:[%s5547_s25 + $0xc88] sm:$0xff]  ;;  %v419_v0 = vld [vmem:[%s5547_s25 + $0x480] sm:$0xff]  ;;  %2539 = vmatpush2.msra.mxu1 %v683_v60  ;;  %2469 = vmatprep.subr.mxu0 %v420_v61 }
  0xac   : > { %v675_v1 = vld [vmem:[%s5547_s25 + $0xc80] sm:$0xff]  ;;  %v412_v3 = vld [vmem:[%s5547_s25 + $0x448] sm:$0xff]  ;;  %2540 = vmatprep.subr.mxu1 %v676_v62  ;;  %2470 = vmatpush2.msra.mxu0 %v419_v0 }
  0xad   : > { %v668_v4 = vld [vmem:[%s5547_s25 + $0xc48] sm:$0xff]  ;;  %v411_v5 = vld [vmem:[%s5547_s25 + $0x440] sm:$0xff]  ;;  %2541 = vmatpush2.msra.mxu1 %v675_v1  ;;  %2471 = vmatprep.subr.mxu0 %v412_v3 }
  0xae   : > { %v667_v6 = vld [vmem:[%s5547_s25 + $0xc40] sm:$0xff]  ;;  %v404_v7 = vld [vmem:[%s5547_s25 + $0x408] sm:$0xff]  ;;  %2542 = vmatprep.subr.mxu1 %v668_v4  ;;  %2472 = vmatpush2.msra.mxu0 %v411_v5 }
  0xaf   : > { %v660_v8 = vld [vmem:[%s5547_s25 + $0xc08] sm:$0xff]  ;;  %v403_v10 = vld [vmem:[%s5547_s25 + $0x400] sm:$0xff]  ;;  %2543 = vmatpush2.msra.mxu1 %v667_v6  ;;  %2473 = vmatprep.subr.mxu0 %v404_v7 }
  0xb0   : > { %v659_v12 = vld [vmem:[%s5547_s25 + $0xc00] sm:$0xff]  ;;  %2544 = vmatprep.subr.mxu1 %v660_v8  ;;  %2474 = vmatpush2.msra.mxu0 %v403_v10  ;;  %v908_v13 = vld [vmem:[%s5547_s25 + $0x13c8] sm:$0xff] }
  0xb1   : > { %2475 = vmatprep.mubr.f32.mxu0 %v5717_v9  ;;  %v1164_v14 = vld [vmem:[%s5547_s25 + $0x1bc8] sm:$0xff]  ;;  %2545 = vmatpush2.msra.mxu1 %v659_v12  ;;  %v907_v15 = vld [vmem:[%s5547_s25 + $0x13c0] sm:$0xff] }
  0xb2   : > { %2546 = vmatprep.mubr.f32.mxu1 %v5722_v11  ;;  %v1163_v16 = vld [vmem:[%s5547_s25 + $0x1bc0] sm:$0xff]  ;;  %2476 = vmatmul.mubr.f32.vlgmr.msra.gmra.mxu0 %v5702_v63  ;;  %v900_v17 = vld [vmem:[%s5547_s25 + $0x1388] sm:$0xff] }
  0xb3   : > { %2547 = vmatmul.mubr.f32.vlgmr.msra.gmra.mxu1 %v5707_v2  ;;  %v1156_v18 = vld [vmem:[%s5547_s25 + $0x1b88] sm:$0xff]  ;;  %2553 = vmatprep.subr.mxu0 %v908_v13  ;;  %v899_v19 = vld [vmem:[%s5547_s25 + $0x1380] sm:$0xff] }
  0xb4   : > { %2624 = vmatprep.subr.mxu1 %v1164_v14  ;;  %v1155_v20 = vld [vmem:[%s5547_s25 + $0x1b80] sm:$0xff]  ;;  %2554 = vmatpush1.msra.mxu0 %v907_v15  ;;  %v892_v21 = vld [vmem:[%s5547_s25 + $0x1348] sm:$0xff] }
  0xb5   : > { %2625 = vmatpush1.msra.mxu1 %v1163_v16  ;;  %v1148_v22 = vld [vmem:[%s5547_s25 + $0x1b48] sm:$0xff]  ;;  %2555 = vmatprep.subr.mxu0 %v900_v17  ;;  %v891_v23 = vld [vmem:[%s5547_s25 + $0x1340] sm:$0xff] }
  0xb6   : > { %2626 = vmatprep.subr.mxu1 %v1156_v18  ;;  %v1147_v24 = vld [vmem:[%s5547_s25 + $0x1b40] sm:$0xff]  ;;  %2556 = vmatpush1.msra.mxu0 %v899_v19  ;;  %v884_v25 = vld [vmem:[%s5547_s25 + $0x1308] sm:$0xff] }
  0xb7   : > { %2627 = vmatpush1.msra.mxu1 %v1155_v20  ;;  %v1140_v26 = vld [vmem:[%s5547_s25 + $0x1b08] sm:$0xff]  ;;  %2557 = vmatprep.subr.mxu0 %v892_v21  ;;  %v883_v27 = vld [vmem:[%s5547_s25 + $0x1300] sm:$0xff] }
  0xb8   : > { %2628 = vmatprep.subr.mxu1 %v1148_v22  ;;  %v1139_v28 = vld [vmem:[%s5547_s25 + $0x1b00] sm:$0xff]  ;;  %2558 = vmatpush1.msra.mxu0 %v891_v23  ;;  %v876_v29 = vld [vmem:[%s5547_s25 + $0x12c8] sm:$0xff] }
  0xb9   : > { %2629 = vmatpush1.msra.mxu1 %v1147_v24  ;;  %v1132_v30 = vld [vmem:[%s5547_s25 + $0x1ac8] sm:$0xff]  ;;  %2559 = vmatprep.subr.mxu0 %v884_v25  ;;  %v875_v31 = vld [vmem:[%s5547_s25 + $0x12c0] sm:$0xff] }
  0xba   : > { %2630 = vmatprep.subr.mxu1 %v1140_v26  ;;  %v1131_v32 = vld [vmem:[%s5547_s25 + $0x1ac0] sm:$0xff]  ;;  %2560 = vmatpush1.msra.mxu0 %v883_v27  ;;  %v868_v33 = vld [vmem:[%s5547_s25 + $0x1288] sm:$0xff] }
  0xbb   : > { %2631 = vmatpush1.msra.mxu1 %v1139_v28  ;;  %v1124_v34 = vld [vmem:[%s5547_s25 + $0x1a88] sm:$0xff]  ;;  %2561 = vmatprep.subr.mxu0 %v876_v29  ;;  %v867_v35 = vld [vmem:[%s5547_s25 + $0x1280] sm:$0xff] }
  0xbc   : > { %2632 = vmatprep.subr.mxu1 %v1132_v30  ;;  %v1123_v36 = vld [vmem:[%s5547_s25 + $0x1a80] sm:$0xff]  ;;  %2562 = vmatpush1.msra.mxu0 %v875_v31  ;;  %v860_v37 = vld [vmem:[%s5547_s25 + $0x1248] sm:$0xff] }
  0xbd   : > { %2633 = vmatpush1.msra.mxu1 %v1131_v32  ;;  %v1116_v38 = vld [vmem:[%s5547_s25 + $0x1a48] sm:$0xff]  ;;  %2563 = vmatprep.subr.mxu0 %v868_v33  ;;  %v859_v39 = vld [vmem:[%s5547_s25 + $0x1240] sm:$0xff] }
  0xbe   : > { %2634 = vmatprep.subr.mxu1 %v1124_v34  ;;  %v1115_v40 = vld [vmem:[%s5547_s25 + $0x1a40] sm:$0xff]  ;;  %2564 = vmatpush1.msra.mxu0 %v867_v35  ;;  %v852_v41 = vld [vmem:[%s5547_s25 + $0x1208] sm:$0xff] }
  0xbf   : > { %2635 = vmatpush1.msra.mxu1 %v1123_v36  ;;  %v1108_v42 = vld [vmem:[%s5547_s25 + $0x1a08] sm:$0xff]  ;;  %2565 = vmatprep.subr.mxu0 %v860_v37  ;;  %v851_v44 = vld [vmem:[%s5547_s25 + $0x1200] sm:$0xff] }
  0xc0   : > { %2636 = vmatprep.subr.mxu1 %v1116_v38  ;;  %v1107_v45 = vld [vmem:[%s5547_s25 + $0x1a00] sm:$0xff]  ;;  %2566 = vmatpush1.msra.mxu0 %v859_v39  ;;  %v844_v46 = vld [vmem:[%s5547_s25 + $0x11c8] sm:$0xff] }
  0xc1   : > { %2637 = vmatpush1.msra.mxu1 %v1115_v40  ;;  %v1100_v47 = vld [vmem:[%s5547_s25 + $0x19c8] sm:$0xff]  ;;  %2567 = vmatprep.subr.mxu0 %v852_v41  ;;  %v843_v48 = vld [vmem:[%s5547_s25 + $0x11c0] sm:$0xff] }
  0xc2   : > { %2638 = vmatprep.subr.mxu1 %v1108_v42  ;;  %v1099_v49 = vld [vmem:[%s5547_s25 + $0x19c0] sm:$0xff]  ;;  %2568 = vmatpush1.msra.mxu0 %v851_v44  ;;  %v836_v50 = vld [vmem:[%s5547_s25 + $0x1188] sm:$0xff] }
  0xc3   : > { %2639 = vmatpush1.msra.mxu1 %v1107_v45  ;;  %v1092_v51 = vld [vmem:[%s5547_s25 + $0x1988] sm:$0xff]  ;;  %2569 = vmatprep.subr.mxu0 %v844_v46  ;;  %v835_v52 = vld [vmem:[%s5547_s25 + $0x1180] sm:$0xff] }
  0xc4   : > { %2640 = vmatprep.subr.mxu1 %v1100_v47  ;;  %v1091_v54 = vld [vmem:[%s5547_s25 + $0x1980] sm:$0xff]  ;;  %2570 = vmatpush1.msra.mxu0 %v843_v48  ;;  %v828_v55 = vld [vmem:[%s5547_s25 + $0x1148] sm:$0xff] }
  0xc5   : > { %2641 = vmatpush1.msra.mxu1 %v1099_v49  ;;  %v1084_v56 = vld [vmem:[%s5547_s25 + $0x1948] sm:$0xff]  ;;  %2571 = vmatprep.subr.mxu0 %v836_v50  ;;  %v827_v57 = vld [vmem:[%s5547_s25 + $0x1140] sm:$0xff] }
  0xc6   : > { %2642 = vmatprep.subr.mxu1 %v1092_v51  ;;  %v1083_v58 = vld [vmem:[%s5547_s25 + $0x1940] sm:$0xff]  ;;  %2572 = vmatpush1.msra.mxu0 %v835_v52  ;;  %v820_v59 = vld [vmem:[%s5547_s25 + $0x1108] sm:$0xff] }
  0xc7   : > { %2643 = vmatpush1.msra.mxu1 %v1091_v54  ;;  %v1076_v60 = vld [vmem:[%s5547_s25 + $0x1908] sm:$0xff]  ;;  %2573 = vmatprep.subr.mxu0 %v828_v55  ;;  %v819_v61 = vld [vmem:[%s5547_s25 + $0x1100] sm:$0xff] }
  0xc8   : > { %2644 = vmatprep.subr.mxu1 %v1084_v56  ;;  %v1075_v62 = vld [vmem:[%s5547_s25 + $0x1900] sm:$0xff]  ;;  %2574 = vmatpush1.msra.mxu0 %v827_v57  ;;  %v812_v0 = vld [vmem:[%s5547_s25 + $0x10c8] sm:$0xff] }
  0xc9   : > { %2645 = vmatpush1.msra.mxu1 %v1083_v58  ;;  %v1068_v1 = vld [vmem:[%s5547_s25 + $0x18c8] sm:$0xff]  ;;  %2575 = vmatprep.subr.mxu0 %v820_v59  ;;  %v811_v3 = vld [vmem:[%s5547_s25 + $0x10c0] sm:$0xff] }
  0xca   : > { %2646 = vmatprep.subr.mxu1 %v1076_v60  ;;  %v1067_v4 = vld [vmem:[%s5547_s25 + $0x18c0] sm:$0xff]  ;;  %2576 = vmatpush1.msra.mxu0 %v819_v61  ;;  %v804_v5 = vld [vmem:[%s5547_s25 + $0x1088] sm:$0xff] }
  0xcb   : > { %2647 = vmatpush1.msra.mxu1 %v1075_v62  ;;  %v1060_v6 = vld [vmem:[%s5547_s25 + $0x1888] sm:$0xff]  ;;  %2577 = vmatprep.subr.mxu0 %v812_v0  ;;  %v803_v7 = vld [vmem:[%s5547_s25 + $0x1080] sm:$0xff] }
  0xcc   : > { %2648 = vmatprep.subr.mxu1 %v1068_v1  ;;  %v1059_v8 = vld [vmem:[%s5547_s25 + $0x1880] sm:$0xff]  ;;  %2578 = vmatpush1.msra.mxu0 %v811_v3  ;;  %v796_v10 = vld [vmem:[%s5547_s25 + $0x1048] sm:$0xff] }
  0xcd   : > { %2649 = vmatpush1.msra.mxu1 %v1067_v4  ;;  %v1052_v12 = vld [vmem:[%s5547_s25 + $0x1848] sm:$0xff]  ;;  %2579 = vmatprep.subr.mxu0 %v804_v5  ;;  %v795_v13 = vld [vmem:[%s5547_s25 + $0x1040] sm:$0xff] }
  0xce   : > { %2650 = vmatprep.subr.mxu1 %v1060_v6  ;;  %v1051_v14 = vld [vmem:[%s5547_s25 + $0x1840] sm:$0xff]  ;;  %2580 = vmatpush1.msra.mxu0 %v803_v7  ;;  %v788_v15 = vld [vmem:[%s5547_s25 + $0x1008] sm:$0xff] }
  0xcf   : > { %2651 = vmatpush1.msra.mxu1 %v1059_v8  ;;  %v1044_v16 = vld [vmem:[%s5547_s25 + $0x1808] sm:$0xff]  ;;  %2581 = vmatprep.subr.mxu0 %v796_v10  ;;  %v787_v17 = vld [vmem:[%s5547_s25 + $0x1000] sm:$0xff] }
  0xd0   : > { %2652 = vmatprep.subr.mxu1 %v1052_v12  ;;  %v1043_v18 = vld [vmem:[%s5547_s25 + $0x1800] sm:$0xff]  ;;  %2582 = vmatpush1.msra.mxu0 %v795_v13  ;;  %v1036_v19 = vld [vmem:[%s5547_s25 + $0x17c8] sm:$0xff] }
  0xd1   : > { %2653 = vmatpush1.msra.mxu1 %v1051_v14  ;;  %v1292_v20 = vld [vmem:[%s5547_s25 + $0x1fc8] sm:$0xff]  ;;  %2583 = vmatprep.subr.mxu0 %v788_v15  ;;  %v1035_v21 = vld [vmem:[%s5547_s25 + $0x17c0] sm:$0xff] }
  0xd2   : > { %2654 = vmatprep.subr.mxu1 %v1044_v16  ;;  %v1291_v22 = vld [vmem:[%s5547_s25 + $0x1fc0] sm:$0xff]  ;;  %2584 = vmatpush1.msra.mxu0 %v787_v17  ;;  %v1028_v23 = vld [vmem:[%s5547_s25 + $0x1788] sm:$0xff] }
  0xd3   : > { %2655 = vmatpush1.msra.mxu1 %v1043_v18  ;;  %v1284_v24 = vld [vmem:[%s5547_s25 + $0x1f88] sm:$0xff]  ;;  %2585 = vmatprep.subr.mxu0 %v1036_v19  ;;  %v1027_v25 = vld [vmem:[%s5547_s25 + $0x1780] sm:$0xff] }
  0xd4   : > { %2656 = vmatprep.subr.mxu1 %v1292_v20  ;;  %v1283_v26 = vld [vmem:[%s5547_s25 + $0x1f80] sm:$0xff]  ;;  %2586 = vmatpush2.msra.mxu0 %v1035_v21  ;;  %v1020_v27 = vld [vmem:[%s5547_s25 + $0x1748] sm:$0xff] }
  0xd5   : > { %2657 = vmatpush2.msra.mxu1 %v1291_v22  ;;  %v1276_v28 = vld [vmem:[%s5547_s25 + $0x1f48] sm:$0xff]  ;;  %2587 = vmatprep.subr.mxu0 %v1028_v23  ;;  %v1019_v29 = vld [vmem:[%s5547_s25 + $0x1740] sm:$0xff] }
  0xd6   : > { %2658 = vmatprep.subr.mxu1 %v1284_v24  ;;  %v1275_v30 = vld [vmem:[%s5547_s25 + $0x1f40] sm:$0xff]  ;;  %2588 = vmatpush2.msra.mxu0 %v1027_v25  ;;  %v1012_v31 = vld [vmem:[%s5547_s25 + $0x1708] sm:$0xff] }
  0xd7   : > { %2659 = vmatpush2.msra.mxu1 %v1283_v26  ;;  %v1268_v32 = vld [vmem:[%s5547_s25 + $0x1f08] sm:$0xff]  ;;  %2589 = vmatprep.subr.mxu0 %v1020_v27  ;;  %v1011_v33 = vld [vmem:[%s5547_s25 + $0x1700] sm:$0xff] }
  0xd8   : > { %2660 = vmatprep.subr.mxu1 %v1276_v28  ;;  %v1267_v34 = vld [vmem:[%s5547_s25 + $0x1f00] sm:$0xff]  ;;  %2590 = vmatpush2.msra.mxu0 %v1019_v29  ;;  %v1004_v35 = vld [vmem:[%s5547_s25 + $0x16c8] sm:$0xff] }
  0xd9   : > { %2661 = vmatpush2.msra.mxu1 %v1275_v30  ;;  %v1260_v36 = vld [vmem:[%s5547_s25 + $0x1ec8] sm:$0xff]  ;;  %2591 = vmatprep.subr.mxu0 %v1012_v31  ;;  %v1003_v37 = vld [vmem:[%s5547_s25 + $0x16c0] sm:$0xff] }
  0xda   : > { %2662 = vmatprep.subr.mxu1 %v1268_v32  ;;  %v1259_v38 = vld [vmem:[%s5547_s25 + $0x1ec0] sm:$0xff]  ;;  %2592 = vmatpush2.msra.mxu0 %v1011_v33  ;;  %v996_v39 = vld [vmem:[%s5547_s25 + $0x1688] sm:$0xff] }
  0xdb   : > { %2663 = vmatpush2.msra.mxu1 %v1267_v34  ;;  %v1252_v40 = vld [vmem:[%s5547_s25 + $0x1e88] sm:$0xff]  ;;  %2593 = vmatprep.subr.mxu0 %v1004_v35  ;;  %v995_v41 = vld [vmem:[%s5547_s25 + $0x1680] sm:$0xff] }
  0xdc   : > { %2664 = vmatprep.subr.mxu1 %v1260_v36  ;;  %v1251_v42 = vld [vmem:[%s5547_s25 + $0x1e80] sm:$0xff]  ;;  %2594 = vmatpush2.msra.mxu0 %v1003_v37  ;;  %v988_v44 = vld [vmem:[%s5547_s25 + $0x1648] sm:$0xff] }
  0xdd   : > { %2665 = vmatpush2.msra.mxu1 %v1259_v38  ;;  %v1244_v45 = vld [vmem:[%s5547_s25 + $0x1e48] sm:$0xff]  ;;  %2595 = vmatprep.subr.mxu0 %v996_v39  ;;  %v987_v46 = vld [vmem:[%s5547_s25 + $0x1640] sm:$0xff] }
  0xde   : > { %2666 = vmatprep.subr.mxu1 %v1252_v40  ;;  %v1243_v47 = vld [vmem:[%s5547_s25 + $0x1e40] sm:$0xff]  ;;  %2596 = vmatpush2.msra.mxu0 %v995_v41  ;;  %v980_v48 = vld [vmem:[%s5547_s25 + $0x1608] sm:$0xff] }
  0xdf   : > { %2667 = vmatpush2.msra.mxu1 %v1251_v42  ;;  %v1236_v49 = vld [vmem:[%s5547_s25 + $0x1e08] sm:$0xff]  ;;  %2597 = vmatprep.subr.mxu0 %v988_v44  ;;  %v979_v50 = vld [vmem:[%s5547_s25 + $0x1600] sm:$0xff] }
  0xe0   : > { %2668 = vmatprep.subr.mxu1 %v1244_v45  ;;  %v1235_v51 = vld [vmem:[%s5547_s25 + $0x1e00] sm:$0xff]  ;;  %2598 = vmatpush2.msra.mxu0 %v987_v46  ;;  %v972_v52 = vld [vmem:[%s5547_s25 + $0x15c8] sm:$0xff] }
  0xe1   : > { %2669 = vmatpush2.msra.mxu1 %v1243_v47  ;;  %v1228_v54 = vld [vmem:[%s5547_s25 + $0x1dc8] sm:$0xff]  ;;  %2599 = vmatprep.subr.mxu0 %v980_v48  ;;  %v971_v55 = vld [vmem:[%s5547_s25 + $0x15c0] sm:$0xff] }
  0xe2   : > { %2670 = vmatprep.subr.mxu1 %v1236_v49  ;;  %v1227_v56 = vld [vmem:[%s5547_s25 + $0x1dc0] sm:$0xff]  ;;  %2600 = vmatpush2.msra.mxu0 %v979_v50  ;;  %v964_v57 = vld [vmem:[%s5547_s25 + $0x1588] sm:$0xff] }
  0xe3   : > { %2671 = vmatpush2.msra.mxu1 %v1235_v51  ;;  %v1220_v58 = vld [vmem:[%s5547_s25 + $0x1d88] sm:$0xff]  ;;  %2601 = vmatprep.subr.mxu0 %v972_v52  ;;  %v963_v59 = vld [vmem:[%s5547_s25 + $0x1580] sm:$0xff] }
  0xe4   : > { %2672 = vmatprep.subr.mxu1 %v1228_v54  ;;  %v1219_v60 = vld [vmem:[%s5547_s25 + $0x1d80] sm:$0xff]  ;;  %2602 = vmatpush2.msra.mxu0 %v971_v55  ;;  %v956_v61 = vld [vmem:[%s5547_s25 + $0x1548] sm:$0xff] }
  0xe5   : > { %2673 = vmatpush2.msra.mxu1 %v1227_v56  ;;  %v1212_v62 = vld [vmem:[%s5547_s25 + $0x1d48] sm:$0xff]  ;;  %2603 = vmatprep.subr.mxu0 %v964_v57  ;;  %v955_v0 = vld [vmem:[%s5547_s25 + $0x1540] sm:$0xff] }
  0xe6   : > { %2674 = vmatprep.subr.mxu1 %v1220_v58  ;;  %v1211_v1 = vld [vmem:[%s5547_s25 + $0x1d40] sm:$0xff]  ;;  %v270_v3 = vld [vmem:[%s5683_s23 + $0x8] sm:$0xff]  ;;  %2604 = vmatpush2.msra.mxu0 %v963_v59 }
  0xe7   : > { %2675 = vmatpush2.msra.mxu1 %v1219_v60  ;;  %v948_v4 = vld [vmem:[%s5547_s25 + $0x1508] sm:$0xff]  ;;  %2605 = vmatprep.subr.mxu0 %v956_v61  ;;  %v947_v6 = vld [vmem:[%s5547_s25 + $0x1500] sm:$0xff]  ;;  %v2344_v12 = vcombine.high %v270_v3, %v270_v3  ;;  %v5849_v17 = vrot.slane %v270_v3, %v5691_v53 }
  0xe8   : > { %v1204_v5 = vld [vmem:[%s5547_s25 + $0x1d08] sm:$0xff]  ;;  %2676 = vmatprep.subr.mxu1 %v1212_v62  ;;  %v1203_v7 = vld [vmem:[%s5547_s25 + $0x1d00] sm:$0xff]  ;;  %2606 = vmatpush2.msra.mxu0 %v955_v0 }
  0xe9   : > { %2677 = vmatpush2.msra.mxu1 %v1211_v1  ;;  %v940_v8 = vld [vmem:[%s5547_s25 + $0x14c8] sm:$0xff]  ;;  %2607 = vmatprep.subr.mxu0 %v948_v4  ;;  %v939_v13 = vld [vmem:[%s5547_s25 + $0x14c0] sm:$0xff]  ;;  %v5856_v22 = vrot.slane %v2344_v12, %v5691_v53  ;;  %v5864_v27 = vcombine.high %v5849_v17, %v5849_v17 }
  0xea   : > { %v1196_v10 = vld [vmem:[%s5547_s25 + $0x1cc8] sm:$0xff]  ;;  %2678 = vmatprep.subr.mxu1 %v1204_v5  ;;  %v1195_v14 = vld [vmem:[%s5547_s25 + $0x1cc0] sm:$0xff]  ;;  %2608 = vmatpush2.msra.mxu0 %v947_v6 }
  0xeb   : > { %2679 = vmatpush2.msra.mxu1 %v1203_v7  ;;  %v932_v15 = vld [vmem:[%s5547_s25 + $0x1488] sm:$0xff]  ;;  %2609 = vmatprep.subr.mxu0 %v940_v8  ;;  %v931_v18 = vld [vmem:[%s5547_s25 + $0x1480] sm:$0xff]  ;;  %v5870_v30 = vcombine.high %v5856_v22, %v5856_v22 }
  0xec   : > { %v1188_v16 = vld [vmem:[%s5547_s25 + $0x1c88] sm:$0xff]  ;;  %2680 = vmatprep.subr.mxu1 %v1196_v10  ;;  %v1187_v19 = vld [vmem:[%s5547_s25 + $0x1c80] sm:$0xff]  ;;  %2610 = vmatpush2.msra.mxu0 %v939_v13 }
  0xed   : > { %2681 = vmatpush2.msra.mxu1 %v1195_v14  ;;  %v924_v20 = vld [vmem:[%s5547_s25 + $0x1448] sm:$0xff]  ;;  %2611 = vmatprep.subr.mxu0 %v932_v15  ;;  %v923_v23 = vld [vmem:[%s5547_s25 + $0x1440] sm:$0xff] }
  0xee   : > { %v1180_v21 = vld [vmem:[%s5547_s25 + $0x1c48] sm:$0xff]  ;;  %2682 = vmatprep.subr.mxu1 %v1188_v16  ;;  %v1179_v24 = vld [vmem:[%s5547_s25 + $0x1c40] sm:$0xff]  ;;  %2612 = vmatpush2.msra.mxu0 %v931_v18 }
  0xef   : > { %2683 = vmatpush2.msra.mxu1 %v1187_v19  ;;  %v916_v25 = vld [vmem:[%s5547_s25 + $0x1408] sm:$0xff]  ;;  %2613 = vmatprep.subr.mxu0 %v924_v20  ;;  %v915_v28 = vld [vmem:[%s5547_s25 + $0x1400] sm:$0xff] }
  0xf0   : > { %v1172_v26 = vld [vmem:[%s5547_s25 + $0x1c08] sm:$0xff]  ;;  %2684 = vmatprep.subr.mxu1 %v1180_v21  ;;  %2614 = vmatpush2.msra.mxu0 %v923_v23  ;;  %v1171_v29 = vld [vmem:[%s5547_s25 + $0x1c00] sm:$0xff] }
  0xf1   : > { %2685 = vmatpush2.msra.mxu1 %v1179_v24  ;;  %2615 = vmatprep.subr.mxu0 %v916_v25  ;;  %v1420_v31 = vld [vmem:[%s5547_s25 + $0x23c8] sm:$0xff]  ;;  %v1419_v33 = vld [vmem:[%s5547_s25 + $0x23c0] sm:$0xff] }
  0xf2   : > { %2686 = vmatprep.subr.mxu1 %v1172_v26  ;;  %2616 = vmatpush2.msra.mxu0 %v915_v28  ;;  %v1676_v32 = vld [vmem:[%s5547_s25 + $0x2bc8] sm:$0xff]  ;;  %v1675_v34 = vld [vmem:[%s5547_s25 + $0x2bc0] sm:$0xff] }
  0xf3   : > { %2617 = vmatprep.mubr.f32.mxu0 %v5864_v27  ;;  %2687 = vmatpush2.msra.mxu1 %v1171_v29  ;;  %v1412_v35 = vld [vmem:[%s5547_s25 + $0x2388] sm:$0xff]  ;;  %v1411_v37 = vld [vmem:[%s5547_s25 + $0x2380] sm:$0xff] }
  0xf4   : > { %2618 = vmatmul.mubr.f32.vlgmr.msra.gmra.mxu0 %v5849_v17  ;;  %2688 = vmatprep.mubr.f32.mxu1 %v5870_v30  ;;  %v1668_v36 = vld [vmem:[%s5547_s25 + $0x2b88] sm:$0xff]  ;;  %v1667_v38 = vld [vmem:[%s5547_s25 + $0x2b80] sm:$0xff] }
  0xf5   : > { %2695 = vmatprep.subr.mxu0 %v1420_v31  ;;  %2766 = vmatprep.subr.mxu1 %v1676_v32  ;;  %v1404_v39 = vld [vmem:[%s5547_s25 + $0x2348] sm:$0xff]  ;;  %v1403_v41 = vld [vmem:[%s5547_s25 + $0x2340] sm:$0xff] }
  0xf6   : > { %2689 = vmatmul.mubr.f32.vlgmr.msra.gmra.mxu1 %v5856_v22  ;;  %2696 = vmatpush1.msra.mxu0 %v1419_v33  ;;  %v1660_v40 = vld [vmem:[%s5547_s25 + $0x2b48] sm:$0xff]  ;;  %v1659_v42 = vld [vmem:[%s5547_s25 + $0x2b40] sm:$0xff] }
  0xf7   : > { %2767 = vmatpush1.msra.mxu1 %v1675_v34  ;;  %2697 = vmatprep.subr.mxu0 %v1412_v35  ;;  %v1396_v44 = vld [vmem:[%s5547_s25 + $0x2308] sm:$0xff]  ;;  %v1395_v46 = vld [vmem:[%s5547_s25 + $0x2300] sm:$0xff] }
  0xf8   : > { %2768 = vmatprep.subr.mxu1 %v1668_v36  ;;  %2698 = vmatpush1.msra.mxu0 %v1411_v37  ;;  %v1652_v45 = vld [vmem:[%s5547_s25 + $0x2b08] sm:$0xff]  ;;  %v1651_v47 = vld [vmem:[%s5547_s25 + $0x2b00] sm:$0xff] }
  0xf9   : > { %2769 = vmatpush1.msra.mxu1 %v1667_v38  ;;  %2699 = vmatprep.subr.mxu0 %v1404_v39  ;;  %v1388_v48 = vld [vmem:[%s5547_s25 + $0x22c8] sm:$0xff]  ;;  %v1387_v50 = vld [vmem:[%s5547_s25 + $0x22c0] sm:$0xff] }
  0xfa   : > { %2770 = vmatprep.subr.mxu1 %v1660_v40  ;;  %2700 = vmatpush1.msra.mxu0 %v1403_v41  ;;  %v1644_v49 = vld [vmem:[%s5547_s25 + $0x2ac8] sm:$0xff]  ;;  %v1643_v51 = vld [vmem:[%s5547_s25 + $0x2ac0] sm:$0xff] }
  0xfb   : > { %2771 = vmatpush1.msra.mxu1 %v1659_v42  ;;  %2701 = vmatprep.subr.mxu0 %v1396_v44  ;;  %v1380_v52 = vld [vmem:[%s5547_s25 + $0x2288] sm:$0xff]  ;;  %v1379_v55 = vld [vmem:[%s5547_s25 + $0x2280] sm:$0xff] }
  0xfc   : > { %2772 = vmatprep.subr.mxu1 %v1652_v45  ;;  %2702 = vmatpush1.msra.mxu0 %v1395_v46  ;;  %v1636_v54 = vld [vmem:[%s5547_s25 + $0x2a88] sm:$0xff]  ;;  %v1635_v56 = vld [vmem:[%s5547_s25 + $0x2a80] sm:$0xff] }
  0xfd   : > { %2773 = vmatpush1.msra.mxu1 %v1651_v47  ;;  %2703 = vmatprep.subr.mxu0 %v1388_v48  ;;  %v1372_v57 = vld [vmem:[%s5547_s25 + $0x2248] sm:$0xff]  ;;  %v1371_v59 = vld [vmem:[%s5547_s25 + $0x2240] sm:$0xff] }
  0xfe   : > { %2774 = vmatprep.subr.mxu1 %v1644_v49  ;;  %2704 = vmatpush1.msra.mxu0 %v1387_v50  ;;  %v1628_v58 = vld [vmem:[%s5547_s25 + $0x2a48] sm:$0xff]  ;;  %v1627_v60 = vld [vmem:[%s5547_s25 + $0x2a40] sm:$0xff] }
  0xff   : > { %2775 = vmatpush1.msra.mxu1 %v1643_v51  ;;  %2705 = vmatprep.subr.mxu0 %v1380_v52  ;;  %v1364_v61 = vld [vmem:[%s5547_s25 + $0x2208] sm:$0xff]  ;;  %v1363_v0 = vld [vmem:[%s5547_s25 + $0x2200] sm:$0xff] }
 0x100   : > { %2776 = vmatprep.subr.mxu1 %v1636_v54  ;;  %2706 = vmatpush1.msra.mxu0 %v1379_v55  ;;  %v1620_v62 = vld [vmem:[%s5547_s25 + $0x2a08] sm:$0xff]  ;;  %v1619_v1 = vld [vmem:[%s5547_s25 + $0x2a00] sm:$0xff] }
 0x101   : > { %2777 = vmatpush1.msra.mxu1 %v1635_v56  ;;  %2707 = vmatprep.subr.mxu0 %v1372_v57  ;;  %v1356_v3 = vld [vmem:[%s5547_s25 + $0x21c8] sm:$0xff]  ;;  %v1355_v5 = vld [vmem:[%s5547_s25 + $0x21c0] sm:$0xff] }
 0x102   : > { %2778 = vmatprep.subr.mxu1 %v1628_v58  ;;  %2708 = vmatpush1.msra.mxu0 %v1371_v59  ;;  %v1612_v4 = vld [vmem:[%s5547_s25 + $0x29c8] sm:$0xff]  ;;  %v1611_v6 = vld [vmem:[%s5547_s25 + $0x29c0] sm:$0xff] }
 0x103   : > { %2779 = vmatpush1.msra.mxu1 %v1627_v60  ;;  %2709 = vmatprep.subr.mxu0 %v1364_v61  ;;  %v1348_v7 = vld [vmem:[%s5547_s25 + $0x2188] sm:$0xff]  ;;  %v1347_v10 = vld [vmem:[%s5547_s25 + $0x2180] sm:$0xff] }
 0x104   : > { %2780 = vmatprep.subr.mxu1 %v1620_v62  ;;  %2710 = vmatpush1.msra.mxu0 %v1363_v0  ;;  %v1604_v8 = vld [vmem:[%s5547_s25 + $0x2988] sm:$0xff]  ;;  %v1603_v12 = vld [vmem:[%s5547_s25 + $0x2980] sm:$0xff] }
 0x105   : > { %2781 = vmatpush1.msra.mxu1 %v1619_v1  ;;  %2711 = vmatprep.subr.mxu0 %v1356_v3  ;;  %v1340_v13 = vld [vmem:[%s5547_s25 + $0x2148] sm:$0xff]  ;;  %v1339_v15 = vld [vmem:[%s5547_s25 + $0x2140] sm:$0xff] }
 0x106   : > { %2782 = vmatprep.subr.mxu1 %v1612_v4  ;;  %2712 = vmatpush1.msra.mxu0 %v1355_v5  ;;  %v1596_v14 = vld [vmem:[%s5547_s25 + $0x2948] sm:$0xff]  ;;  %v1595_v16 = vld [vmem:[%s5547_s25 + $0x2940] sm:$0xff] }
 0x107   : > { %2783 = vmatpush1.msra.mxu1 %v1611_v6  ;;  %2713 = vmatprep.subr.mxu0 %v1348_v7  ;;  %v1332_v18 = vld [vmem:[%s5547_s25 + $0x2108] sm:$0xff]  ;;  %v1331_v20 = vld [vmem:[%s5547_s25 + $0x2100] sm:$0xff] }
 0x108   : > { %2784 = vmatprep.subr.mxu1 %v1604_v8  ;;  %2714 = vmatpush1.msra.mxu0 %v1347_v10  ;;  %v1588_v19 = vld [vmem:[%s5547_s25 + $0x2908] sm:$0xff]  ;;  %v1587_v21 = vld [vmem:[%s5547_s25 + $0x2900] sm:$0xff] }
 0x109   : > { %2785 = vmatpush1.msra.mxu1 %v1603_v12  ;;  %2715 = vmatprep.subr.mxu0 %v1340_v13  ;;  %v1324_v23 = vld [vmem:[%s5547_s25 + $0x20c8] sm:$0xff]  ;;  %v1323_v25 = vld [vmem:[%s5547_s25 + $0x20c0] sm:$0xff] }
 0x10a   : > { %2786 = vmatprep.subr.mxu1 %v1596_v14  ;;  %2716 = vmatpush1.msra.mxu0 %v1339_v15  ;;  %v1580_v24 = vld [vmem:[%s5547_s25 + $0x28c8] sm:$0xff]  ;;  %v1579_v26 = vld [vmem:[%s5547_s25 + $0x28c0] sm:$0xff] }
 0x10b   : > { %2787 = vmatpush1.msra.mxu1 %v1595_v16  ;;  %2717 = vmatprep.subr.mxu0 %v1332_v18  ;;  %v1316_v28 = vld [vmem:[%s5547_s25 + $0x2088] sm:$0xff]  ;;  %v1315_v31 = vld [vmem:[%s5547_s25 + $0x2080] sm:$0xff] }
 0x10c   : > { %2788 = vmatprep.subr.mxu1 %v1588_v19  ;;  %2718 = vmatpush1.msra.mxu0 %v1331_v20  ;;  %v1572_v29 = vld [vmem:[%s5547_s25 + $0x2888] sm:$0xff]  ;;  %v1571_v32 = vld [vmem:[%s5547_s25 + $0x2880] sm:$0xff] }
 0x10d   : > { %2789 = vmatpush1.msra.mxu1 %v1587_v21  ;;  %2719 = vmatprep.subr.mxu0 %v1324_v23  ;;  %v1308_v33 = vld [vmem:[%s5547_s25 + $0x2048] sm:$0xff]  ;;  %v1307_v35 = vld [vmem:[%s5547_s25 + $0x2040] sm:$0xff] }
 0x10e   : > { %2790 = vmatprep.subr.mxu1 %v1580_v24  ;;  %2720 = vmatpush1.msra.mxu0 %v1323_v25  ;;  %v1564_v34 = vld [vmem:[%s5547_s25 + $0x2848] sm:$0xff]  ;;  %v1563_v36 = vld [vmem:[%s5547_s25 + $0x2840] sm:$0xff] }
 0x10f   : > { %2791 = vmatpush1.msra.mxu1 %v1579_v26  ;;  %2721 = vmatprep.subr.mxu0 %v1316_v28  ;;  %v1300_v37 = vld [vmem:[%s5547_s25 + $0x2008] sm:$0xff]  ;;  %v1299_v39 = vld [vmem:[%s5547_s25 + $0x2000] sm:$0xff] }
 0x110   : > { %2792 = vmatprep.subr.mxu1 %v1572_v29  ;;  %2722 = vmatpush1.msra.mxu0 %v1315_v31  ;;  %v1556_v38 = vld [vmem:[%s5547_s25 + $0x2808] sm:$0xff]  ;;  %v1555_v40 = vld [vmem:[%s5547_s25 + $0x2800] sm:$0xff]  ;;  %v271_v31 = vld [vmem:[%s5683_s23 + $0x10] sm:$0xff] }
 0x111   : > { %2793 = vmatpush1.msra.mxu1 %v1571_v32  ;;  %2723 = vmatprep.subr.mxu0 %v1308_v33  ;;  %v1548_v41 = vld [vmem:[%s5547_s25 + $0x27c8] sm:$0xff]  ;;  %v1547_v44 = vld [vmem:[%s5547_s25 + $0x27c0] sm:$0xff] }
 0x112   : > { %2794 = vmatprep.subr.mxu1 %v1564_v34  ;;  %2724 = vmatpush1.msra.mxu0 %v1307_v35  ;;  %v1804_v42 = vld [vmem:[%s5547_s25 + $0x2fc8] sm:$0xff]  ;;  %v1803_v45 = vld [vmem:[%s5547_s25 + $0x2fc0] sm:$0xff] }
 0x113   : > { %2795 = vmatpush1.msra.mxu1 %v1563_v36  ;;  %2725 = vmatprep.subr.mxu0 %v1300_v37  ;;  %v1540_v46 = vld [vmem:[%s5547_s25 + $0x2788] sm:$0xff]  ;;  %v1539_v48 = vld [vmem:[%s5547_s25 + $0x2780] sm:$0xff] }
 0x114   : > { %2796 = vmatprep.subr.mxu1 %v1556_v38  ;;  %2726 = vmatpush1.msra.mxu0 %v1299_v39  ;;  %v1796_v47 = vld [vmem:[%s5547_s25 + $0x2f88] sm:$0xff]  ;;  %v1795_v49 = vld [vmem:[%s5547_s25 + $0x2f80] sm:$0xff]  ;;  %v2361_v38 = vcombine.high %v271_v31, %v271_v31 }
 0x115   : > { %2797 = vmatpush1.msra.mxu1 %v1555_v40  ;;  %2727 = vmatprep.subr.mxu0 %v1548_v41  ;;  %v1532_v50 = vld [vmem:[%s5547_s25 + $0x2748] sm:$0xff]  ;;  %v1531_v52 = vld [vmem:[%s5547_s25 + $0x2740] sm:$0xff] }
 0x116   : > { %2798 = vmatprep.subr.mxu1 %v1804_v42  ;;  %2728 = vmatpush2.msra.mxu0 %v1547_v44  ;;  %v1788_v51 = vld [vmem:[%s5547_s25 + $0x2f48] sm:$0xff]  ;;  %v1787_v54 = vld [vmem:[%s5547_s25 + $0x2f40] sm:$0xff]  ;;  %v5996_v44 = vrot.slane %v271_v31, %v5691_v53 }
 0x117   : > { %2799 = vmatpush2.msra.mxu1 %v1803_v45  ;;  %2729 = vmatprep.subr.mxu0 %v1540_v46  ;;  %v1524_v55 = vld [vmem:[%s5547_s25 + $0x2708] sm:$0xff]  ;;  %v1523_v57 = vld [vmem:[%s5547_s25 + $0x2700] sm:$0xff] }
 0x118   : > { %2800 = vmatprep.subr.mxu1 %v1796_v47  ;;  %2730 = vmatpush2.msra.mxu0 %v1539_v48  ;;  %v1780_v56 = vld [vmem:[%s5547_s25 + $0x2f08] sm:$0xff]  ;;  %v1779_v58 = vld [vmem:[%s5547_s25 + $0x2f00] sm:$0xff] }
 0x119   : > { %2801 = vmatpush2.msra.mxu1 %v1795_v49  ;;  %2731 = vmatprep.subr.mxu0 %v1532_v50  ;;  %v1516_v59 = vld [vmem:[%s5547_s25 + $0x26c8] sm:$0xff]  ;;  %v1515_v61 = vld [vmem:[%s5547_s25 + $0x26c0] sm:$0xff]  ;;  %v6003_v49 = vrot.slane %v2361_v38, %v5691_v53 }
 0x11a   : > { %2802 = vmatprep.subr.mxu1 %v1788_v51  ;;  %2732 = vmatpush2.msra.mxu0 %v1531_v52  ;;  %v1772_v60 = vld [vmem:[%s5547_s25 + $0x2ec8] sm:$0xff]  ;;  %v1771_v62 = vld [vmem:[%s5547_s25 + $0x2ec0] sm:$0xff] }
 0x11b   : > { %2803 = vmatpush2.msra.mxu1 %v1787_v54  ;;  %2733 = vmatprep.subr.mxu0 %v1524_v55  ;;  %v1508_v0 = vld [vmem:[%s5547_s25 + $0x2688] sm:$0xff]  ;;  %v1507_v3 = vld [vmem:[%s5547_s25 + $0x2680] sm:$0xff]  ;;  %v6011_v55 = vcombine.high %v5996_v44, %v5996_v44 }
 0x11c   : > { %2804 = vmatprep.subr.mxu1 %v1780_v56  ;;  %2734 = vmatpush2.msra.mxu0 %v1523_v57  ;;  %v1764_v1 = vld [vmem:[%s5547_s25 + $0x2e88] sm:$0xff]  ;;  %v1763_v4 = vld [vmem:[%s5547_s25 + $0x2e80] sm:$0xff] }
 0x11d   : > { %2805 = vmatpush2.msra.mxu1 %v1779_v58  ;;  %2735 = vmatprep.subr.mxu0 %v1516_v59  ;;  %v1500_v5 = vld [vmem:[%s5547_s25 + $0x2648] sm:$0xff]  ;;  %v1499_v7 = vld [vmem:[%s5547_s25 + $0x2640] sm:$0xff]  ;;  %v6017_v58 = vcombine.high %v6003_v49, %v6003_v49 }
 0x11e   : > { %2806 = vmatprep.subr.mxu1 %v1772_v60  ;;  %2736 = vmatpush2.msra.mxu0 %v1515_v61  ;;  %v1756_v6 = vld [vmem:[%s5547_s25 + $0x2e48] sm:$0xff]  ;;  %v1755_v8 = vld [vmem:[%s5547_s25 + $0x2e40] sm:$0xff] }
 0x11f   : > { %2807 = vmatpush2.msra.mxu1 %v1771_v62  ;;  %2737 = vmatprep.subr.mxu0 %v1508_v0  ;;  %v1492_v10 = vld [vmem:[%s5547_s25 + $0x2608] sm:$0xff]  ;;  %v1491_v13 = vld [vmem:[%s5547_s25 + $0x2600] sm:$0xff] }
 0x120   : > { %2808 = vmatprep.subr.mxu1 %v1764_v1  ;;  %2738 = vmatpush2.msra.mxu0 %v1507_v3  ;;  %v1748_v12 = vld [vmem:[%s5547_s25 + $0x2e08] sm:$0xff]  ;;  %v1747_v14 = vld [vmem:[%s5547_s25 + $0x2e00] sm:$0xff] }
 0x121   : > { %2809 = vmatpush2.msra.mxu1 %v1763_v4  ;;  %2739 = vmatprep.subr.mxu0 %v1500_v5  ;;  %v1484_v15 = vld [vmem:[%s5547_s25 + $0x25c8] sm:$0xff]  ;;  %v1483_v18 = vld [vmem:[%s5547_s25 + $0x25c0] sm:$0xff] }
 0x122   : > { %2810 = vmatprep.subr.mxu1 %v1756_v6  ;;  %2740 = vmatpush2.msra.mxu0 %v1499_v7  ;;  %v1740_v16 = vld [vmem:[%s5547_s25 + $0x2dc8] sm:$0xff]  ;;  %v1739_v19 = vld [vmem:[%s5547_s25 + $0x2dc0] sm:$0xff] }
 0x123   : > { %2811 = vmatpush2.msra.mxu1 %v1755_v8  ;;  %2741 = vmatprep.subr.mxu0 %v1492_v10  ;;  %v1476_v20 = vld [vmem:[%s5547_s25 + $0x2588] sm:$0xff]  ;;  %v1475_v23 = vld [vmem:[%s5547_s25 + $0x2580] sm:$0xff] }
 0x124   : > { %2812 = vmatprep.subr.mxu1 %v1748_v12  ;;  %2742 = vmatpush2.msra.mxu0 %v1491_v13  ;;  %v1732_v21 = vld [vmem:[%s5547_s25 + $0x2d88] sm:$0xff]  ;;  %v1731_v24 = vld [vmem:[%s5547_s25 + $0x2d80] sm:$0xff] }
 0x125   : > { %2813 = vmatpush2.msra.mxu1 %v1747_v14  ;;  %2743 = vmatprep.subr.mxu0 %v1484_v15  ;;  %v1468_v25 = vld [vmem:[%s5547_s25 + $0x2548] sm:$0xff]  ;;  %v1467_v28 = vld [vmem:[%s5547_s25 + $0x2540] sm:$0xff] }
 0x126   : > { %2814 = vmatprep.subr.mxu1 %v1740_v16  ;;  %2744 = vmatpush2.msra.mxu0 %v1483_v18  ;;  %v1724_v26 = vld [vmem:[%s5547_s25 + $0x2d48] sm:$0xff]  ;;  %v1723_v29 = vld [vmem:[%s5547_s25 + $0x2d40] sm:$0xff] }
 0x127   : > { %2815 = vmatpush2.msra.mxu1 %v1739_v19  ;;  %2745 = vmatprep.subr.mxu0 %v1476_v20  ;;  %v1460_v32 = vld [vmem:[%s5547_s25 + $0x2508] sm:$0xff]  ;;  %v1459_v34 = vld [vmem:[%s5547_s25 + $0x2500] sm:$0xff] }
 0x128   : > { %2816 = vmatprep.subr.mxu1 %v1732_v21  ;;  %2746 = vmatpush2.msra.mxu0 %v1475_v23  ;;  %v1716_v33 = vld [vmem:[%s5547_s25 + $0x2d08] sm:$0xff]  ;;  %v1715_v35 = vld [vmem:[%s5547_s25 + $0x2d00] sm:$0xff] }
 0x129   : > { %2817 = vmatpush2.msra.mxu1 %v1731_v24  ;;  %2747 = vmatprep.subr.mxu0 %v1468_v25  ;;  %v1452_v36 = vld [vmem:[%s5547_s25 + $0x24c8] sm:$0xff]  ;;  %v1451_v39 = vld [vmem:[%s5547_s25 + $0x24c0] sm:$0xff] }
 0x12a   : > { %2818 = vmatprep.subr.mxu1 %v1724_v26  ;;  %2748 = vmatpush2.msra.mxu0 %v1467_v28  ;;  %v1708_v37 = vld [vmem:[%s5547_s25 + $0x2cc8] sm:$0xff]  ;;  %v1707_v40 = vld [vmem:[%s5547_s25 + $0x2cc0] sm:$0xff] }
 0x12b   : > { %2819 = vmatpush2.msra.mxu1 %v1723_v29  ;;  %2749 = vmatprep.subr.mxu0 %v1460_v32  ;;  %v1444_v41 = vld [vmem:[%s5547_s25 + $0x2488] sm:$0xff]  ;;  %v1443_v45 = vld [vmem:[%s5547_s25 + $0x2480] sm:$0xff] }
 0x12c   : > { %2820 = vmatprep.subr.mxu1 %v1716_v33  ;;  %2750 = vmatpush2.msra.mxu0 %v1459_v34  ;;  %v1700_v42 = vld [vmem:[%s5547_s25 + $0x2c88] sm:$0xff]  ;;  %v1699_v46 = vld [vmem:[%s5547_s25 + $0x2c80] sm:$0xff] }
 0x12d   : > { %2821 = vmatpush2.msra.mxu1 %v1715_v35  ;;  %2751 = vmatprep.subr.mxu0 %v1452_v36  ;;  %v1436_v47 = vld [vmem:[%s5547_s25 + $0x2448] sm:$0xff]  ;;  %v1435_v50 = vld [vmem:[%s5547_s25 + $0x2440] sm:$0xff] }
 0x12e   : > { %2822 = vmatprep.subr.mxu1 %v1708_v37  ;;  %2752 = vmatpush2.msra.mxu0 %v1451_v39  ;;  %v1692_v48 = vld [vmem:[%s5547_s25 + $0x2c48] sm:$0xff]  ;;  %v1691_v51 = vld [vmem:[%s5547_s25 + $0x2c40] sm:$0xff] }
 0x12f   : > { %2823 = vmatpush2.msra.mxu1 %v1707_v40  ;;  %2753 = vmatprep.subr.mxu0 %v1444_v41  ;;  %v1428_v52 = vld [vmem:[%s5547_s25 + $0x2408] sm:$0xff]  ;;  %v1427_v56 = vld [vmem:[%s5547_s25 + $0x2400] sm:$0xff] }
 0x130   : > { %2824 = vmatprep.subr.mxu1 %v1700_v42  ;;  %2754 = vmatpush2.msra.mxu0 %v1443_v45  ;;  %v1684_v54 = vld [vmem:[%s5547_s25 + $0x2c08] sm:$0xff]  ;;  %v1683_v57 = vld [vmem:[%s5547_s25 + $0x2c00] sm:$0xff] }
 0x131   : > { %2825 = vmatpush2.msra.mxu1 %v1699_v46  ;;  %2755 = vmatprep.subr.mxu0 %v1436_v47  ;;  %v1932_v59 = vld [vmem:[%s5547_s25 + $0x33c8] sm:$0xff]  ;;  %v1931_v61 = vld [vmem:[%s5547_s25 + $0x33c0] sm:$0xff] }
 0x132   : > { %2826 = vmatprep.subr.mxu1 %v1692_v48  ;;  %2756 = vmatpush2.msra.mxu0 %v1435_v50  ;;  %v2188_v60 = vld [vmem:[%s5547_s25 + $0x3bc8] sm:$0xff]  ;;  %v2187_v62 = vld [vmem:[%s5547_s25 + $0x3bc0] sm:$0xff] }
 0x133   : > { %2827 = vmatpush2.msra.mxu1 %v1691_v51  ;;  %2757 = vmatprep.subr.mxu0 %v1428_v52  ;;  %v1924_v0 = vld [vmem:[%s5547_s25 + $0x3388] sm:$0xff]  ;;  %v1923_v3 = vld [vmem:[%s5547_s25 + $0x3380] sm:$0xff] }
 0x134   : > { %2828 = vmatprep.subr.mxu1 %v1684_v54  ;;  %2758 = vmatpush2.msra.mxu0 %v1427_v56  ;;  %v2180_v1 = vld [vmem:[%s5547_s25 + $0x3b88] sm:$0xff]  ;;  %v2179_v4 = vld [vmem:[%s5547_s25 + $0x3b80] sm:$0xff] }
 0x135   : > { %2759 = vmatprep.mubr.f32.mxu0 %v6011_v55  ;;  %2829 = vmatpush2.msra.mxu1 %v1683_v57  ;;  %v1916_v5 = vld [vmem:[%s5547_s25 + $0x3348] sm:$0xff]  ;;  %v1915_v7 = vld [vmem:[%s5547_s25 + $0x3340] sm:$0xff] }
 0x136   : > { %2760 = vmatmul.mubr.f32.vlgmr.msra.gmra.mxu0 %v5996_v44  ;;  %2830 = vmatprep.mubr.f32.mxu1 %v6017_v58  ;;  %v2172_v6 = vld [vmem:[%s5547_s25 + $0x3b48] sm:$0xff]  ;;  %v2171_v8 = vld [vmem:[%s5547_s25 + $0x3b40] sm:$0xff] }
 0x137   : > { %2837 = vmatprep.subr.mxu0 %v1932_v59  ;;  %2908 = vmatprep.subr.mxu1 %v2188_v60  ;;  %v1908_v10 = vld [vmem:[%s5547_s25 + $0x3308] sm:$0xff]  ;;  %v1907_v13 = vld [vmem:[%s5547_s25 + $0x3300] sm:$0xff] }
 0x138   : > { %2831 = vmatmul.mubr.f32.vlgmr.msra.gmra.mxu1 %v6003_v49  ;;  %2838 = vmatpush1.msra.mxu0 %v1931_v61  ;;  %v2164_v12 = vld [vmem:[%s5547_s25 + $0x3b08] sm:$0xff]  ;;  %v2163_v14 = vld [vmem:[%s5547_s25 + $0x3b00] sm:$0xff] }
 0x139   : > { %2909 = vmatpush1.msra.mxu1 %v2187_v62  ;;  %2839 = vmatprep.subr.mxu0 %v1924_v0  ;;  %v1900_v15 = vld [vmem:[%s5547_s25 + $0x32c8] sm:$0xff]  ;;  %v1899_v18 = vld [vmem:[%s5547_s25 + $0x32c0] sm:$0xff] }
 0x13a   : > { %2910 = vmatprep.subr.mxu1 %v2180_v1  ;;  %2840 = vmatpush1.msra.mxu0 %v1923_v3  ;;  %v2156_v16 = vld [vmem:[%s5547_s25 + $0x3ac8] sm:$0xff]  ;;  %v2155_v19 = vld [vmem:[%s5547_s25 + $0x3ac0] sm:$0xff] }
 0x13b   : > { %2911 = vmatpush1.msra.mxu1 %v2179_v4  ;;  %2841 = vmatprep.subr.mxu0 %v1916_v5  ;;  %v1892_v20 = vld [vmem:[%s5547_s25 + $0x3288] sm:$0xff]  ;;  %v1891_v23 = vld [vmem:[%s5547_s25 + $0x3280] sm:$0xff] }
 0x13c   : > { %2912 = vmatprep.subr.mxu1 %v2172_v6  ;;  %2842 = vmatpush1.msra.mxu0 %v1915_v7  ;;  %v2148_v21 = vld [vmem:[%s5547_s25 + $0x3a88] sm:$0xff]  ;;  %v2147_v24 = vld [vmem:[%s5547_s25 + $0x3a80] sm:$0xff] }
 0x13d   : > { %2913 = vmatpush1.msra.mxu1 %v2171_v8  ;;  %2843 = vmatprep.subr.mxu0 %v1908_v10  ;;  %v1884_v25 = vld [vmem:[%s5547_s25 + $0x3248] sm:$0xff]  ;;  %v1883_v28 = vld [vmem:[%s5547_s25 + $0x3240] sm:$0xff] }
 0x13e   : > { %2914 = vmatprep.subr.mxu1 %v2164_v12  ;;  %2844 = vmatpush1.msra.mxu0 %v1907_v13  ;;  %v2140_v26 = vld [vmem:[%s5547_s25 + $0x3a48] sm:$0xff]  ;;  %v2139_v29 = vld [vmem:[%s5547_s25 + $0x3a40] sm:$0xff] }
 0x13f   : > { %2915 = vmatpush1.msra.mxu1 %v2163_v14  ;;  %2845 = vmatprep.subr.mxu0 %v1900_v15  ;;  %v1876_v31 = vld [vmem:[%s5547_s25 + $0x3208] sm:$0xff]  ;;  %v1875_v33 = vld [vmem:[%s5547_s25 + $0x3200] sm:$0xff] }
 0x140   : > { %2916 = vmatprep.subr.mxu1 %v2156_v16  ;;  %2846 = vmatpush1.msra.mxu0 %v1899_v18  ;;  %v2132_v32 = vld [vmem:[%s5547_s25 + $0x3a08] sm:$0xff]  ;;  %v2131_v34 = vld [vmem:[%s5547_s25 + $0x3a00] sm:$0xff] }
 0x141   : > { %2917 = vmatpush1.msra.mxu1 %v2155_v19  ;;  %2847 = vmatprep.subr.mxu0 %v1892_v20  ;;  %v1868_v35 = vld [vmem:[%s5547_s25 + $0x31c8] sm:$0xff]  ;;  %v1867_v37 = vld [vmem:[%s5547_s25 + $0x31c0] sm:$0xff] }
 0x142   : > { %2918 = vmatprep.subr.mxu1 %v2148_v21  ;;  %2848 = vmatpush1.msra.mxu0 %v1891_v23  ;;  %v2124_v36 = vld [vmem:[%s5547_s25 + $0x39c8] sm:$0xff]  ;;  %v2123_v38 = vld [vmem:[%s5547_s25 + $0x39c0] sm:$0xff] }
 0x143   : > { %2919 = vmatpush1.msra.mxu1 %v2147_v24  ;;  %2849 = vmatprep.subr.mxu0 %v1884_v25  ;;  %v1860_v39 = vld [vmem:[%s5547_s25 + $0x3188] sm:$0xff]  ;;  %v1859_v41 = vld [vmem:[%s5547_s25 + $0x3180] sm:$0xff] }
 0x144   : > { %2920 = vmatprep.subr.mxu1 %v2140_v26  ;;  %2850 = vmatpush1.msra.mxu0 %v1883_v28  ;;  %v2116_v40 = vld [vmem:[%s5547_s25 + $0x3988] sm:$0xff]  ;;  %v2115_v42 = vld [vmem:[%s5547_s25 + $0x3980] sm:$0xff] }
 0x145   : > { %2921 = vmatpush1.msra.mxu1 %v2139_v29  ;;  %2851 = vmatprep.subr.mxu0 %v1876_v31  ;;  %v1852_v45 = vld [vmem:[%s5547_s25 + $0x3148] sm:$0xff]  ;;  %v1851_v47 = vld [vmem:[%s5547_s25 + $0x3140] sm:$0xff] }
 0x146   : > { %2922 = vmatprep.subr.mxu1 %v2132_v32  ;;  %2852 = vmatpush1.msra.mxu0 %v1875_v33  ;;  %v2108_v46 = vld [vmem:[%s5547_s25 + $0x3948] sm:$0xff]  ;;  %v2107_v48 = vld [vmem:[%s5547_s25 + $0x3940] sm:$0xff] }
 0x147   : > { %2923 = vmatpush1.msra.mxu1 %v2131_v34  ;;  %2853 = vmatprep.subr.mxu0 %v1868_v35  ;;  %v1844_v50 = vld [vmem:[%s5547_s25 + $0x3108] sm:$0xff]  ;;  %v1843_v52 = vld [vmem:[%s5547_s25 + $0x3100] sm:$0xff] }
 0x148   : > { %2924 = vmatprep.subr.mxu1 %v2124_v36  ;;  %2854 = vmatpush1.msra.mxu0 %v1867_v37  ;;  %v2100_v51 = vld [vmem:[%s5547_s25 + $0x3908] sm:$0xff]  ;;  %v2099_v54 = vld [vmem:[%s5547_s25 + $0x3900] sm:$0xff] }
 0x149   : > { %2925 = vmatpush1.msra.mxu1 %v2123_v38  ;;  %2855 = vmatprep.subr.mxu0 %v1860_v39  ;;  %v1836_v56 = vld [vmem:[%s5547_s25 + $0x30c8] sm:$0xff]  ;;  %v1835_v59 = vld [vmem:[%s5547_s25 + $0x30c0] sm:$0xff] }
 0x14a   : > { %2926 = vmatprep.subr.mxu1 %v2116_v40  ;;  %2856 = vmatpush1.msra.mxu0 %v1859_v41  ;;  %v2092_v57 = vld [vmem:[%s5547_s25 + $0x38c8] sm:$0xff]  ;;  %v2091_v60 = vld [vmem:[%s5547_s25 + $0x38c0] sm:$0xff] }
 0x14b   : > { %2927 = vmatpush1.msra.mxu1 %v2115_v42  ;;  %2857 = vmatprep.subr.mxu0 %v1852_v45  ;;  %v1828_v61 = vld [vmem:[%s5547_s25 + $0x3088] sm:$0xff]  ;;  %v1827_v0 = vld [vmem:[%s5547_s25 + $0x3080] sm:$0xff] }
 0x14c   : > { %2928 = vmatprep.subr.mxu1 %v2108_v46  ;;  %2858 = vmatpush1.msra.mxu0 %v1851_v47  ;;  %v2084_v62 = vld [vmem:[%s5547_s25 + $0x3888] sm:$0xff]  ;;  %v2083_v1 = vld [vmem:[%s5547_s25 + $0x3880] sm:$0xff] }
 0x14d   : > { %2929 = vmatpush1.msra.mxu1 %v2107_v48  ;;  %2859 = vmatprep.subr.mxu0 %v1844_v50  ;;  %v1820_v3 = vld [vmem:[%s5547_s25 + $0x3048] sm:$0xff]  ;;  %v1819_v5 = vld [vmem:[%s5547_s25 + $0x3040] sm:$0xff] }
 0x14e   : > { %2930 = vmatprep.subr.mxu1 %v2100_v51  ;;  %2860 = vmatpush1.msra.mxu0 %v1843_v52  ;;  %v2076_v4 = vld [vmem:[%s5547_s25 + $0x3848] sm:$0xff]  ;;  %v2075_v6 = vld [vmem:[%s5547_s25 + $0x3840] sm:$0xff] }
 0x14f   : > { %2931 = vmatpush1.msra.mxu1 %v2099_v54  ;;  %2861 = vmatprep.subr.mxu0 %v1836_v56  ;;  %v1812_v7 = vld [vmem:[%s5547_s25 + $0x3008] sm:$0xff]  ;;  %v1811_v10 = vld [vmem:[%s5547_s25 + $0x3000] sm:$0xff] }
 0x150   : > { %2932 = vmatprep.subr.mxu1 %v2092_v57  ;;  %2862 = vmatpush1.msra.mxu0 %v1835_v59  ;;  %v2068_v8 = vld [vmem:[%s5547_s25 + $0x3808] sm:$0xff]  ;;  %v2067_v12 = vld [vmem:[%s5547_s25 + $0x3800] sm:$0xff] }
 0x151   : > { %2933 = vmatpush1.msra.mxu1 %v2091_v60  ;;  %2863 = vmatprep.subr.mxu0 %v1828_v61  ;;  %v2060_v13 = vld [vmem:[%s5547_s25 + $0x37c8] sm:$0xff]  ;;  %v2059_v15 = vld [vmem:[%s5547_s25 + $0x37c0] sm:$0xff] }
 0x152   : > { %2934 = vmatprep.subr.mxu1 %v2084_v62  ;;  %2864 = vmatpush1.msra.mxu0 %v1827_v0  ;;  %v2316_v14 = vld [vmem:[%s5547_s25 + $0x3fc8] sm:$0xff]  ;;  %v2315_v16 = vld [vmem:[%s5547_s25 + $0x3fc0] sm:$0xff] }
 0x153   : > { %2935 = vmatpush1.msra.mxu1 %v2083_v1  ;;  %2865 = vmatprep.subr.mxu0 %v1820_v3  ;;  %v2052_v18 = vld [vmem:[%s5547_s25 + $0x3788] sm:$0xff]  ;;  %v2051_v20 = vld [vmem:[%s5547_s25 + $0x3780] sm:$0xff] }
 0x154   : > { %2936 = vmatprep.subr.mxu1 %v2076_v4  ;;  %2866 = vmatpush1.msra.mxu0 %v1819_v5  ;;  %v2308_v19 = vld [vmem:[%s5547_s25 + $0x3f88] sm:$0xff]  ;;  %v2307_v21 = vld [vmem:[%s5547_s25 + $0x3f80] sm:$0xff]  ;;  %v272_v5 = vld [vmem:[%s5683_s23 + $0x18] sm:$0xff] }
 0x155   : > { %2937 = vmatpush1.msra.mxu1 %v2075_v6  ;;  %2867 = vmatprep.subr.mxu0 %v1812_v7  ;;  %v2044_v23 = vld [vmem:[%s5547_s25 + $0x3748] sm:$0xff]  ;;  %v2043_v25 = vld [vmem:[%s5547_s25 + $0x3740] sm:$0xff] }
 0x156   : > { %2938 = vmatprep.subr.mxu1 %v2068_v8  ;;  %2868 = vmatpush1.msra.mxu0 %v1811_v10  ;;  %v2300_v24 = vld [vmem:[%s5547_s25 + $0x3f48] sm:$0xff]  ;;  %v2299_v26 = vld [vmem:[%s5547_s25 + $0x3f40] sm:$0xff] }
 0x157   : > { %2939 = vmatpush1.msra.mxu1 %v2067_v12  ;;  %2869 = vmatprep.subr.mxu0 %v2060_v13  ;;  %v2036_v28 = vld [vmem:[%s5547_s25 + $0x3708] sm:$0xff]  ;;  %v2035_v31 = vld [vmem:[%s5547_s25 + $0x3700] sm:$0xff] }
 0x158   : > { %2940 = vmatprep.subr.mxu1 %v2316_v14  ;;  %2870 = vmatpush2.msra.mxu0 %v2059_v15  ;;  %v2292_v29 = vld [vmem:[%s5547_s25 + $0x3f08] sm:$0xff]  ;;  %v2291_v32 = vld [vmem:[%s5547_s25 + $0x3f00] sm:$0xff]  ;;  %v2378_v14 = vcombine.high %v272_v5, %v272_v5 }
 0x159   : > { %2941 = vmatpush2.msra.mxu1 %v2315_v16  ;;  %2871 = vmatprep.subr.mxu0 %v2052_v18  ;;  %v2028_v33 = vld [vmem:[%s5547_s25 + $0x36c8] sm:$0xff]  ;;  %v2027_v35 = vld [vmem:[%s5547_s25 + $0x36c0] sm:$0xff] }
 0x15a   : > { %2942 = vmatprep.subr.mxu1 %v2308_v19  ;;  %2872 = vmatpush2.msra.mxu0 %v2051_v20  ;;  %v2284_v34 = vld [vmem:[%s5547_s25 + $0x3ec8] sm:$0xff]  ;;  %v2283_v36 = vld [vmem:[%s5547_s25 + $0x3ec0] sm:$0xff]  ;;  %v6143_v20 = vrot.slane %v272_v5, %v5691_v53  ;;  %v350_v5 = vld [vmem:[%s5547_s25 + $0x258] sm:$0xff] }
 0x15b   : > { %2943 = vmatpush2.msra.mxu1 %v2307_v21  ;;  %2873 = vmatprep.subr.mxu0 %v2044_v23  ;;  %v2020_v37 = vld [vmem:[%s5547_s25 + $0x3688] sm:$0xff]  ;;  %v2019_v39 = vld [vmem:[%s5547_s25 + $0x3680] sm:$0xff] }
 0x15c   : > { %2944 = vmatprep.subr.mxu1 %v2300_v24  ;;  %2874 = vmatpush2.msra.mxu0 %v2043_v25  ;;  %v2276_v38 = vld [vmem:[%s5547_s25 + $0x3e88] sm:$0xff]  ;;  %v2275_v40 = vld [vmem:[%s5547_s25 + $0x3e80] sm:$0xff] }
 0x15d   : > { %2945 = vmatpush2.msra.mxu1 %v2299_v26  ;;  %2875 = vmatprep.subr.mxu0 %v2036_v28  ;;  %v2012_v41 = vld [vmem:[%s5547_s25 + $0x3648] sm:$0xff]  ;;  %v2011_v45 = vld [vmem:[%s5547_s25 + $0x3640] sm:$0xff]  ;;  %v6150_v26 = vrot.slane %v2378_v14, %v5691_v53  ;;  %v597_v14 = vld [vmem:[%s5547_s25 + $0xa10] sm:$0xff] }
 0x15e   : > { %2946 = vmatprep.subr.mxu1 %v2292_v29  ;;  %2876 = vmatpush2.msra.mxu0 %v2035_v31  ;;  %v2268_v42 = vld [vmem:[%s5547_s25 + $0x3e48] sm:$0xff]  ;;  %v2267_v46 = vld [vmem:[%s5547_s25 + $0x3e40] sm:$0xff] }
 0x15f   : > { %2947 = vmatpush2.msra.mxu1 %v2291_v32  ;;  %2877 = vmatprep.subr.mxu0 %v2028_v33  ;;  %v2004_v47 = vld [vmem:[%s5547_s25 + $0x3608] sm:$0xff]  ;;  %v2003_v50 = vld [vmem:[%s5547_s25 + $0x3600] sm:$0xff]  ;;  %v6158_v33 = vcombine.high %v6143_v20, %v6143_v20 }
 0x160   : > { %2948 = vmatprep.subr.mxu1 %v2284_v34  ;;  %2878 = vmatpush2.msra.mxu0 %v2027_v35  ;;  %v2260_v48 = vld [vmem:[%s5547_s25 + $0x3e08] sm:$0xff]  ;;  %v2259_v51 = vld [vmem:[%s5547_s25 + $0x3e00] sm:$0xff] }
 0x161   : > { %2949 = vmatpush2.msra.mxu1 %v2283_v36  ;;  %2879 = vmatprep.subr.mxu0 %v2020_v37  ;;  %v1996_v52 = vld [vmem:[%s5547_s25 + $0x35c8] sm:$0xff]  ;;  %v1995_v56 = vld [vmem:[%s5547_s25 + $0x35c0] sm:$0xff]  ;;  %v6164_v36 = vcombine.high %v6150_v26, %v6150_v26  ;;  %v398_v37 = vld [vmem:[%s5547_s25 + $0x3d8] sm:$0xff] }
 0x162   : > { %2950 = vmatprep.subr.mxu1 %v2276_v38  ;;  %2880 = vmatpush2.msra.mxu0 %v2019_v39  ;;  %v2252_v54 = vld [vmem:[%s5547_s25 + $0x3dc8] sm:$0xff]  ;;  %v2251_v57 = vld [vmem:[%s5547_s25 + $0x3dc0] sm:$0xff]  ;;  %v654_v38 = vld [vmem:[%s5547_s25 + $0xbd8] sm:$0xff] }
 0x163   : > { %2951 = vmatpush2.msra.mxu1 %v2275_v40  ;;  %2881 = vmatprep.subr.mxu0 %v2012_v41  ;;  %v1988_v59 = vld [vmem:[%s5547_s25 + $0x3588] sm:$0xff]  ;;  %v1987_v61 = vld [vmem:[%s5547_s25 + $0x3580] sm:$0xff]  ;;  %v397_v39 = vld [vmem:[%s5547_s25 + $0x3d0] sm:$0xff] }
 0x164   : > { %2952 = vmatprep.subr.mxu1 %v2268_v42  ;;  %2882 = vmatpush2.msra.mxu0 %v2011_v45  ;;  %v2244_v60 = vld [vmem:[%s5547_s25 + $0x3d88] sm:$0xff]  ;;  %v2243_v62 = vld [vmem:[%s5547_s25 + $0x3d80] sm:$0xff]  ;;  %v653_v40 = vld [vmem:[%s5547_s25 + $0xbd0] sm:$0xff] }
 0x165   : > { %2953 = vmatpush2.msra.mxu1 %v2267_v46  ;;  %2883 = vmatprep.subr.mxu0 %v2004_v47  ;;  %v1980_v0 = vld [vmem:[%s5547_s25 + $0x3548] sm:$0xff]  ;;  %v1979_v3 = vld [vmem:[%s5547_s25 + $0x3540] sm:$0xff]  ;;  %v390_v41 = vld [vmem:[%s5547_s25 + $0x398] sm:$0xff] }
 0x166   : > { %2954 = vmatprep.subr.mxu1 %v2260_v48  ;;  %2884 = vmatpush2.msra.mxu0 %v2003_v50  ;;  %v2236_v1 = vld [vmem:[%s5547_s25 + $0x3d48] sm:$0xff]  ;;  %v2235_v4 = vld [vmem:[%s5547_s25 + $0x3d40] sm:$0xff]  ;;  %v646_v42 = vld [vmem:[%s5547_s25 + $0xb98] sm:$0xff] }
 0x167   : > { %2955 = vmatpush2.msra.mxu1 %v2259_v51  ;;  %2885 = vmatprep.subr.mxu0 %v1996_v52  ;;  %v1972_v6 = vld [vmem:[%s5547_s25 + $0x3508] sm:$0xff]  ;;  %v1971_v8 = vld [vmem:[%s5547_s25 + $0x3500] sm:$0xff]  ;;  %v389_v45 = vld [vmem:[%s5547_s25 + $0x390] sm:$0xff] }
 0x168   : > { %2956 = vmatprep.subr.mxu1 %v2252_v54  ;;  %2886 = vmatpush2.msra.mxu0 %v1995_v56  ;;  %v2228_v7 = vld [vmem:[%s5547_s25 + $0x3d08] sm:$0xff]  ;;  %v2227_v10 = vld [vmem:[%s5547_s25 + $0x3d00] sm:$0xff]  ;;  %v645_v46 = vld [vmem:[%s5547_s25 + $0xb90] sm:$0xff] }
 0x169   : > { %2957 = vmatpush2.msra.mxu1 %v2251_v57  ;;  %2887 = vmatprep.subr.mxu0 %v1988_v59  ;;  %v1964_v12 = vld [vmem:[%s5547_s25 + $0x34c8] sm:$0xff]  ;;  %v1963_v15 = vld [vmem:[%s5547_s25 + $0x34c0] sm:$0xff]  ;;  %v382_v47 = vld [vmem:[%s5547_s25 + $0x358] sm:$0xff] }
 0x16a   : > { %2958 = vmatprep.subr.mxu1 %v2244_v60  ;;  %2888 = vmatpush2.msra.mxu0 %v1987_v61  ;;  %v2220_v13 = vld [vmem:[%s5547_s25 + $0x3cc8] sm:$0xff]  ;;  %v2219_v16 = vld [vmem:[%s5547_s25 + $0x3cc0] sm:$0xff]  ;;  %v638_v48 = vld [vmem:[%s5547_s25 + $0xb58] sm:$0xff] }
 0x16b   : > { %2959 = vmatpush2.msra.mxu1 %v2243_v62  ;;  %2889 = vmatprep.subr.mxu0 %v1980_v0  ;;  %v1956_v18 = vld [vmem:[%s5547_s25 + $0x3488] sm:$0xff]  ;;  %v1955_v21 = vld [vmem:[%s5547_s25 + $0x3480] sm:$0xff]  ;;  %v381_v50 = vld [vmem:[%s5547_s25 + $0x350] sm:$0xff] }
 0x16c   : > { %2960 = vmatprep.subr.mxu1 %v2236_v1  ;;  %2890 = vmatpush2.msra.mxu0 %v1979_v3  ;;  %v2212_v19 = vld [vmem:[%s5547_s25 + $0x3c88] sm:$0xff]  ;;  %v2211_v23 = vld [vmem:[%s5547_s25 + $0x3c80] sm:$0xff]  ;;  %v637_v51 = vld [vmem:[%s5547_s25 + $0xb50] sm:$0xff] }
 0x16d   : > { %2961 = vmatpush2.msra.mxu1 %v2235_v4  ;;  %2891 = vmatprep.subr.mxu0 %v1972_v6  ;;  %v1948_v24 = vld [vmem:[%s5547_s25 + $0x3448] sm:$0xff]  ;;  %v1947_v28 = vld [vmem:[%s5547_s25 + $0x3440] sm:$0xff]  ;;  %v374_v52 = vld [vmem:[%s5547_s25 + $0x318] sm:$0xff] }
 0x16e   : > { %2962 = vmatprep.subr.mxu1 %v2228_v7  ;;  %2892 = vmatpush2.msra.mxu0 %v1971_v8  ;;  %v2204_v25 = vld [vmem:[%s5547_s25 + $0x3c48] sm:$0xff]  ;;  %v2203_v29 = vld [vmem:[%s5547_s25 + $0x3c40] sm:$0xff]  ;;  %v630_v54 = vld [vmem:[%s5547_s25 + $0xb18] sm:$0xff] }
 0x16f   : > { %2963 = vmatpush2.msra.mxu1 %v2227_v10  ;;  %2893 = vmatprep.subr.mxu0 %v1964_v12  ;;  %v1940_v31 = vld [vmem:[%s5547_s25 + $0x3408] sm:$0xff]  ;;  %v1939_v34 = vld [vmem:[%s5547_s25 + $0x3400] sm:$0xff]  ;;  %v373_v56 = vld [vmem:[%s5547_s25 + $0x310] sm:$0xff] }
 0x170   : > { %2964 = vmatprep.subr.mxu1 %v2220_v13  ;;  %2894 = vmatpush2.msra.mxu0 %v1963_v15  ;;  %v2196_v32 = vld [vmem:[%s5547_s25 + $0x3c08] sm:$0xff]  ;;  %v2195_v35 = vld [vmem:[%s5547_s25 + $0x3c00] sm:$0xff]  ;;  %v629_v57 = vld [vmem:[%s5547_s25 + $0xb10] sm:$0xff] }
 0x171   : > { %2965 = vmatpush2.msra.mxu1 %v2219_v16  ;;  %2895 = vmatprep.subr.mxu0 %v1956_v18  ;;  %v366_v59 = vld [vmem:[%s5547_s25 + $0x2d8] sm:$0xff]  ;;  %v365_v61 = vld [vmem:[%s5547_s25 + $0x2d0] sm:$0xff] }
 0x172   : > { %2966 = vmatprep.subr.mxu1 %v2212_v19  ;;  %2896 = vmatpush2.msra.mxu0 %v1955_v21  ;;  %v622_v60 = vld [vmem:[%s5547_s25 + $0xad8] sm:$0xff]  ;;  %v621_v62 = vld [vmem:[%s5547_s25 + $0xad0] sm:$0xff] }
 0x173   : > { %2967 = vmatpush2.msra.mxu1 %v2211_v23  ;;  %2897 = vmatprep.subr.mxu0 %v1948_v24  ;;  %v358_v0 = vld [vmem:[%s5547_s25 + $0x298] sm:$0xff]  ;;  %v357_v3 = vld [vmem:[%s5547_s25 + $0x290] sm:$0xff] }
 0x174   : > { %2968 = vmatprep.subr.mxu1 %v2204_v25  ;;  %2898 = vmatpush2.msra.mxu0 %v1947_v28  ;;  %v614_v1 = vld [vmem:[%s5547_s25 + $0xa98] sm:$0xff]  ;;  %v613_v4 = vld [vmem:[%s5547_s25 + $0xa90] sm:$0xff] }
 0x175   : > { %2969 = vmatpush2.msra.mxu1 %v2203_v29  ;;  %2899 = vmatprep.subr.mxu0 %v1940_v31  ;;  %v606_v6 = vld [vmem:[%s5547_s25 + $0xa58] sm:$0xff]  ;;  %v349_v7 = vld [vmem:[%s5547_s25 + $0x250] sm:$0xff] }
 0x176   : > { %2970 = vmatprep.subr.mxu1 %v2196_v32  ;;  %2900 = vmatpush2.msra.mxu0 %v1939_v34  ;;  %v605_v8 = vld [vmem:[%s5547_s25 + $0xa50] sm:$0xff]  ;;  %v342_v10 = vld [vmem:[%s5547_s25 + $0x218] sm:$0xff] }
 0x177   : > { %2901 = vmatprep.mubr.f32.mxu0 %v6158_v33  ;;  %2971 = vmatpush2.msra.mxu1 %v2195_v35  ;;  %v598_v12 = vld [vmem:[%s5547_s25 + $0xa18] sm:$0xff]  ;;  %v341_v13 = vld [vmem:[%s5547_s25 + $0x210] sm:$0xff] }
 0x178   : > { %2902 = vmatmul.mubr.f32.vlgmr.msra.gmra.mxu0 %v6143_v20  ;;  %2972 = vmatprep.mubr.f32.mxu1 %v6164_v36  ;;  %v334_v15 = vld [vmem:[%s5547_s25 + $0x1d8] sm:$0xff]  ;;  %v333_v18 = vld [vmem:[%s5547_s25 + $0x1d0] sm:$0xff] }
 0x179   : > { %2979 = vmatprep.subr.mxu0 %v398_v37  ;;  %3050 = vmatprep.subr.mxu1 %v654_v38  ;;  %v590_v16 = vld [vmem:[%s5547_s25 + $0x9d8] sm:$0xff]  ;;  %v589_v19 = vld [vmem:[%s5547_s25 + $0x9d0] sm:$0xff] }
 0x17a   : > { %2973 = vmatmul.mubr.f32.vlgmr.msra.gmra.mxu1 %v6150_v26  ;;  %2980 = vmatpush1.msra.mxu0 %v397_v39  ;;  %v326_v21 = vld [vmem:[%s5547_s25 + $0x198] sm:$0xff]  ;;  %v325_v24 = vld [vmem:[%s5547_s25 + $0x190] sm:$0xff] }
 0x17b   : > { %3051 = vmatpush1.msra.mxu1 %v653_v40  ;;  %2981 = vmatprep.subr.mxu0 %v390_v41  ;;  %v582_v23 = vld [vmem:[%s5547_s25 + $0x998] sm:$0xff]  ;;  %v581_v25 = vld [vmem:[%s5547_s25 + $0x990] sm:$0xff] }
 0x17c   : > { %3052 = vmatprep.subr.mxu1 %v646_v42  ;;  %2982 = vmatpush1.msra.mxu0 %v389_v45  ;;  %v318_v28 = vld [vmem:[%s5547_s25 + $0x158] sm:$0xff]  ;;  %v317_v31 = vld [vmem:[%s5547_s25 + $0x150] sm:$0xff] }
 0x17d   : > { %3053 = vmatpush1.msra.mxu1 %v645_v46  ;;  %2983 = vmatprep.subr.mxu0 %v382_v47  ;;  %v574_v29 = vld [vmem:[%s5547_s25 + $0x958] sm:$0xff]  ;;  %v573_v32 = vld [vmem:[%s5547_s25 + $0x950] sm:$0xff] }
 0x17e   : > { %3054 = vmatprep.subr.mxu1 %v638_v48  ;;  %2984 = vmatpush1.msra.mxu0 %v381_v50  ;;  %v310_v34 = vld [vmem:[%s5547_s25 + $0x118] sm:$0xff]  ;;  %v309_v37 = vld [vmem:[%s5547_s25 + $0x110] sm:$0xff] }
 0x17f   : > { %3055 = vmatpush1.msra.mxu1 %v637_v51  ;;  %2985 = vmatprep.subr.mxu0 %v374_v52  ;;  %v566_v35 = vld [vmem:[%s5547_s25 + $0x918] sm:$0xff]  ;;  %v565_v38 = vld [vmem:[%s5547_s25 + $0x910] sm:$0xff] }
 0x180   : > { %3056 = vmatprep.subr.mxu1 %v630_v54  ;;  %2986 = vmatpush1.msra.mxu0 %v373_v56  ;;  %v302_v39 = vld [vmem:[%s5547_s25 + $0xd8] sm:$0xff]  ;;  %v301_v41 = vld [vmem:[%s5547_s25 + $0xd0] sm:$0xff] }
 0x181   : > { %3057 = vmatpush1.msra.mxu1 %v629_v57  ;;  %2987 = vmatprep.subr.mxu0 %v366_v59  ;;  %v558_v40 = vld [vmem:[%s5547_s25 + $0x8d8] sm:$0xff]  ;;  %v557_v42 = vld [vmem:[%s5547_s25 + $0x8d0] sm:$0xff] }
 0x182   : > { %3058 = vmatprep.subr.mxu1 %v622_v60  ;;  %2988 = vmatpush1.msra.mxu0 %v365_v61  ;;  %v294_v45 = vld [vmem:[%s5547_s25 + $0x98] sm:$0xff]  ;;  %v293_v47 = vld [vmem:[%s5547_s25 + $0x90] sm:$0xff] }
 0x183   : > { %3059 = vmatpush1.msra.mxu1 %v621_v62  ;;  %2989 = vmatprep.subr.mxu0 %v358_v0  ;;  %v550_v46 = vld [vmem:[%s5547_s25 + $0x898] sm:$0xff]  ;;  %v549_v48 = vld [vmem:[%s5547_s25 + $0x890] sm:$0xff] }
 0x184   : > { %3060 = vmatprep.subr.mxu1 %v614_v1  ;;  %2990 = vmatpush1.msra.mxu0 %v357_v3  ;;  %v286_v50 = vld [vmem:[%s5547_s25 + $0x58] sm:$0xff]  ;;  %v285_v52 = vld [vmem:[%s5547_s25 + $0x50] sm:$0xff] }
 0x185   : > { %3061 = vmatpush1.msra.mxu1 %v613_v4  ;;  %2991 = vmatprep.subr.mxu0 %v350_v5  ;;  %v542_v51 = vld [vmem:[%s5547_s25 + $0x858] sm:$0xff]  ;;  %v541_v54 = vld [vmem:[%s5547_s25 + $0x850] sm:$0xff] }
 0x186   : > { %3062 = vmatprep.subr.mxu1 %v606_v6  ;;  %2992 = vmatpush1.msra.mxu0 %v349_v7  ;;  %v278_v56 = vld [vmem:[%s5547_s25 + $0x18] sm:$0xff]  ;;  %v277_v59 = vld [vmem:[%s5547_s25 + $0x10] sm:$0xff] }
 0x187   : > { %3063 = vmatpush1.msra.mxu1 %v605_v8  ;;  %2993 = vmatprep.subr.mxu0 %v342_v10  ;;  %v534_v57 = vld [vmem:[%s5547_s25 + $0x818] sm:$0xff]  ;;  %v533_v60 = vld [vmem:[%s5547_s25 + $0x810] sm:$0xff] }
 0x188   : > { %3064 = vmatprep.subr.mxu1 %v598_v12  ;;  %2994 = vmatpush1.msra.mxu0 %v341_v13  ;;  %v526_v61 = vld [vmem:[%s5547_s25 + $0x7d8] sm:$0xff]  ;;  %v525_v0 = vld [vmem:[%s5547_s25 + $0x7d0] sm:$0xff] }
 0x189   : > { %3065 = vmatpush1.msra.mxu1 %v597_v14  ;;  %2995 = vmatprep.subr.mxu0 %v334_v15  ;;  %v782_v62 = vld [vmem:[%s5547_s25 + $0xfd8] sm:$0xff]  ;;  %v781_v1 = vld [vmem:[%s5547_s25 + $0xfd0] sm:$0xff] }
 0x18a   : > { %3066 = vmatprep.subr.mxu1 %v590_v16  ;;  %2996 = vmatpush1.msra.mxu0 %v333_v18  ;;  %v518_v3 = vld [vmem:[%s5547_s25 + $0x798] sm:$0xff]  ;;  %v517_v5 = vld [vmem:[%s5547_s25 + $0x790] sm:$0xff] }
 0x18b   : > { %3067 = vmatpush1.msra.mxu1 %v589_v19  ;;  %2997 = vmatprep.subr.mxu0 %v326_v21  ;;  %v774_v4 = vld [vmem:[%s5547_s25 + $0xf98] sm:$0xff]  ;;  %v773_v6 = vld [vmem:[%s5547_s25 + $0xf90] sm:$0xff] }
 0x18c   : > { %3068 = vmatprep.subr.mxu1 %v582_v23  ;;  %2998 = vmatpush1.msra.mxu0 %v325_v24  ;;  %v510_v7 = vld [vmem:[%s5547_s25 + $0x758] sm:$0xff]  ;;  %v509_v10 = vld [vmem:[%s5547_s25 + $0x750] sm:$0xff] }
 0x18d   : > { %3069 = vmatpush1.msra.mxu1 %v581_v25  ;;  %2999 = vmatprep.subr.mxu0 %v318_v28  ;;  %v766_v8 = vld [vmem:[%s5547_s25 + $0xf58] sm:$0xff]  ;;  %v765_v12 = vld [vmem:[%s5547_s25 + $0xf50] sm:$0xff] }
 0x18e   : > { %3070 = vmatprep.subr.mxu1 %v574_v29  ;;  %3000 = vmatpush1.msra.mxu0 %v317_v31  ;;  %v502_v13 = vld [vmem:[%s5547_s25 + $0x718] sm:$0xff]  ;;  %v501_v15 = vld [vmem:[%s5547_s25 + $0x710] sm:$0xff] }
 0x18f   : > { %3071 = vmatpush1.msra.mxu1 %v573_v32  ;;  %3001 = vmatprep.subr.mxu0 %v310_v34  ;;  %v758_v14 = vld [vmem:[%s5547_s25 + $0xf18] sm:$0xff]  ;;  %v757_v16 = vld [vmem:[%s5547_s25 + $0xf10] sm:$0xff] }
 0x190   : > { %3072 = vmatprep.subr.mxu1 %v566_v35  ;;  %3002 = vmatpush1.msra.mxu0 %v309_v37  ;;  %v494_v18 = vld [vmem:[%s5547_s25 + $0x6d8] sm:$0xff]  ;;  %v493_v21 = vld [vmem:[%s5547_s25 + $0x6d0] sm:$0xff] }
 0x191   : > { %3073 = vmatpush1.msra.mxu1 %v565_v38  ;;  %3003 = vmatprep.subr.mxu0 %v302_v39  ;;  %v750_v19 = vld [vmem:[%s5547_s25 + $0xed8] sm:$0xff]  ;;  %v749_v23 = vld [vmem:[%s5547_s25 + $0xed0] sm:$0xff] }
 0x192   : > { %3074 = vmatprep.subr.mxu1 %v558_v40  ;;  %3004 = vmatpush1.msra.mxu0 %v301_v41  ;;  %v486_v24 = vld [vmem:[%s5547_s25 + $0x698] sm:$0xff]  ;;  %v485_v28 = vld [vmem:[%s5547_s25 + $0x690] sm:$0xff] }
 0x193   : > { %3075 = vmatpush1.msra.mxu1 %v557_v42  ;;  %3005 = vmatprep.subr.mxu0 %v294_v45  ;;  %v742_v25 = vld [vmem:[%s5547_s25 + $0xe98] sm:$0xff]  ;;  %v741_v29 = vld [vmem:[%s5547_s25 + $0xe90] sm:$0xff] }
 0x194   : > { %3076 = vmatprep.subr.mxu1 %v550_v46  ;;  %3006 = vmatpush1.msra.mxu0 %v293_v47  ;;  %v478_v31 = vld [vmem:[%s5547_s25 + $0x658] sm:$0xff]  ;;  %v477_v34 = vld [vmem:[%s5547_s25 + $0x650] sm:$0xff] }
 0x195   : > { %3077 = vmatpush1.msra.mxu1 %v549_v48  ;;  %3007 = vmatprep.subr.mxu0 %v286_v50  ;;  %v734_v32 = vld [vmem:[%s5547_s25 + $0xe58] sm:$0xff]  ;;  %v733_v35 = vld [vmem:[%s5547_s25 + $0xe50] sm:$0xff] }
 0x196   : > { %3078 = vmatprep.subr.mxu1 %v542_v51  ;;  %3008 = vmatpush1.msra.mxu0 %v285_v52  ;;  %v470_v37 = vld [vmem:[%s5547_s25 + $0x618] sm:$0xff]  ;;  %v469_v39 = vld [vmem:[%s5547_s25 + $0x610] sm:$0xff] }
 0x197   : > { %3079 = vmatpush1.msra.mxu1 %v541_v54  ;;  %3009 = vmatprep.subr.mxu0 %v278_v56  ;;  %v726_v38 = vld [vmem:[%s5547_s25 + $0xe18] sm:$0xff]  ;;  %v725_v40 = vld [vmem:[%s5547_s25 + $0xe10] sm:$0xff] }
 0x198   : > { %3080 = vmatprep.subr.mxu1 %v534_v57  ;;  %3010 = vmatpush1.msra.mxu0 %v277_v59  ;;  %v462_v41 = vld [vmem:[%s5547_s25 + $0x5d8] sm:$0xff]  ;;  %v461_v45 = vld [vmem:[%s5547_s25 + $0x5d0] sm:$0xff] }
 0x199   : > { %3081 = vmatpush1.msra.mxu1 %v533_v60  ;;  %3011 = vmatprep.subr.mxu0 %v526_v61  ;;  %v718_v42 = vld [vmem:[%s5547_s25 + $0xdd8] sm:$0xff]  ;;  %v717_v46 = vld [vmem:[%s5547_s25 + $0xdd0] sm:$0xff] }
 0x19a   : > { %3082 = vmatprep.subr.mxu1 %v782_v62  ;;  %3012 = vmatpush2.msra.mxu0 %v525_v0  ;;  %v454_v47 = vld [vmem:[%s5547_s25 + $0x598] sm:$0xff]  ;;  %v453_v50 = vld [vmem:[%s5547_s25 + $0x590] sm:$0xff] }
 0x19b   : > { %3083 = vmatpush2.msra.mxu1 %v781_v1  ;;  %3013 = vmatprep.subr.mxu0 %v518_v3  ;;  %v710_v48 = vld [vmem:[%s5547_s25 + $0xd98] sm:$0xff]  ;;  %v709_v51 = vld [vmem:[%s5547_s25 + $0xd90] sm:$0xff] }
 0x19c   : > { %3084 = vmatprep.subr.mxu1 %v774_v4  ;;  %3014 = vmatpush2.msra.mxu0 %v517_v5  ;;  %v446_v52 = vld [vmem:[%s5547_s25 + $0x558] sm:$0xff]  ;;  %v445_v56 = vld [vmem:[%s5547_s25 + $0x550] sm:$0xff] }
 0x19d   : > { %3085 = vmatpush2.msra.mxu1 %v773_v6  ;;  %3015 = vmatprep.subr.mxu0 %v510_v7  ;;  %v702_v54 = vld [vmem:[%s5547_s25 + $0xd58] sm:$0xff]  ;;  %v701_v57 = vld [vmem:[%s5547_s25 + $0xd50] sm:$0xff] }
 0x19e   : > { %3086 = vmatprep.subr.mxu1 %v766_v8  ;;  %3016 = vmatpush2.msra.mxu0 %v509_v10  ;;  %v438_v59 = vld [vmem:[%s5547_s25 + $0x518] sm:$0xff]  ;;  %v437_v61 = vld [vmem:[%s5547_s25 + $0x510] sm:$0xff] }
 0x19f   : > { %3087 = vmatpush2.msra.mxu1 %v765_v12  ;;  %3017 = vmatprep.subr.mxu0 %v502_v13  ;;  %v694_v60 = vld [vmem:[%s5547_s25 + $0xd18] sm:$0xff]  ;;  %v693_v62 = vld [vmem:[%s5547_s25 + $0xd10] sm:$0xff] }
 0x1a0   : > { %3088 = vmatprep.subr.mxu1 %v758_v14  ;;  %3018 = vmatpush2.msra.mxu0 %v501_v15  ;;  %v430_v0 = vld [vmem:[%s5547_s25 + $0x4d8] sm:$0xff]  ;;  %v429_v3 = vld [vmem:[%s5547_s25 + $0x4d0] sm:$0xff] }
 0x1a1   : > { %3089 = vmatpush2.msra.mxu1 %v757_v16  ;;  %3019 = vmatprep.subr.mxu0 %v494_v18  ;;  %v686_v1 = vld [vmem:[%s5547_s25 + $0xcd8] sm:$0xff]  ;;  %v685_v4 = vld [vmem:[%s5547_s25 + $0xcd0] sm:$0xff] }
 0x1a2   : > { %3090 = vmatprep.subr.mxu1 %v750_v19  ;;  %3020 = vmatpush2.msra.mxu0 %v493_v21  ;;  %v422_v5 = vld [vmem:[%s5547_s25 + $0x498] sm:$0xff]  ;;  %v421_v7 = vld [vmem:[%s5547_s25 + $0x490] sm:$0xff] }
 0x1a3   : > { %3091 = vmatpush2.msra.mxu1 %v749_v23  ;;  %3021 = vmatprep.subr.mxu0 %v486_v24  ;;  %v678_v6 = vld [vmem:[%s5547_s25 + $0xc98] sm:$0xff]  ;;  %v677_v8 = vld [vmem:[%s5547_s25 + $0xc90] sm:$0xff] }
 0x1a4   : > { %3092 = vmatprep.subr.mxu1 %v742_v25  ;;  %3022 = vmatpush2.msra.mxu0 %v485_v28  ;;  %v414_v10 = vld [vmem:[%s5547_s25 + $0x458] sm:$0xff]  ;;  %v413_v13 = vld [vmem:[%s5547_s25 + $0x450] sm:$0xff] }
 0x1a5   : > { %3093 = vmatpush2.msra.mxu1 %v741_v29  ;;  %3023 = vmatprep.subr.mxu0 %v478_v31  ;;  %v670_v12 = vld [vmem:[%s5547_s25 + $0xc58] sm:$0xff]  ;;  %v669_v14 = vld [vmem:[%s5547_s25 + $0xc50] sm:$0xff] }
 0x1a6   : > { %3094 = vmatprep.subr.mxu1 %v734_v32  ;;  %3024 = vmatpush2.msra.mxu0 %v477_v34  ;;  %v406_v15 = vld [vmem:[%s5547_s25 + $0x418] sm:$0xff]  ;;  %v405_v18 = vld [vmem:[%s5547_s25 + $0x410] sm:$0xff] }
 0x1a7   : > { %3095 = vmatpush2.msra.mxu1 %v733_v35  ;;  %3025 = vmatprep.subr.mxu0 %v470_v37  ;;  %v662_v16 = vld [vmem:[%s5547_s25 + $0xc18] sm:$0xff]  ;;  %v661_v19 = vld [vmem:[%s5547_s25 + $0xc10] sm:$0xff] }
 0x1a8   : > { %3096 = vmatprep.subr.mxu1 %v726_v38  ;;  %3026 = vmatpush2.msra.mxu0 %v469_v39  ;;  %v910_v21 = vld [vmem:[%s5547_s25 + $0x13d8] sm:$0xff]  ;;  %v909_v24 = vld [vmem:[%s5547_s25 + $0x13d0] sm:$0xff] }
 0x1a9   : > { %3097 = vmatpush2.msra.mxu1 %v725_v40  ;;  %3027 = vmatprep.subr.mxu0 %v462_v41  ;;  %v1166_v23 = vld [vmem:[%s5547_s25 + $0x1bd8] sm:$0xff]  ;;  %v1165_v25 = vld [vmem:[%s5547_s25 + $0x1bd0] sm:$0xff] }
 0x1aa   : > { %3098 = vmatprep.subr.mxu1 %v718_v42  ;;  %3028 = vmatpush2.msra.mxu0 %v461_v45  ;;  %v902_v28 = vld [vmem:[%s5547_s25 + $0x1398] sm:$0xff]  ;;  %v901_v31 = vld [vmem:[%s5547_s25 + $0x1390] sm:$0xff] }
 0x1ab   : > { %3099 = vmatpush2.msra.mxu1 %v717_v46  ;;  %3029 = vmatprep.subr.mxu0 %v454_v47  ;;  %v1158_v29 = vld [vmem:[%s5547_s25 + $0x1b98] sm:$0xff]  ;;  %v1157_v32 = vld [vmem:[%s5547_s25 + $0x1b90] sm:$0xff] }
 0x1ac   : > { %3100 = vmatprep.subr.mxu1 %v710_v48  ;;  %3030 = vmatpush2.msra.mxu0 %v453_v50  ;;  %v894_v34 = vld [vmem:[%s5547_s25 + $0x1358] sm:$0xff]  ;;  %v893_v37 = vld [vmem:[%s5547_s25 + $0x1350] sm:$0xff] }
 0x1ad   : > { %3101 = vmatpush2.msra.mxu1 %v709_v51  ;;  %3031 = vmatprep.subr.mxu0 %v446_v52  ;;  %v1150_v35 = vld [vmem:[%s5547_s25 + $0x1b58] sm:$0xff]  ;;  %v1149_v38 = vld [vmem:[%s5547_s25 + $0x1b50] sm:$0xff] }
 0x1ae   : > { %3102 = vmatprep.subr.mxu1 %v702_v54  ;;  %3032 = vmatpush2.msra.mxu0 %v445_v56  ;;  %v886_v39 = vld [vmem:[%s5547_s25 + $0x1318] sm:$0xff]  ;;  %v885_v41 = vld [vmem:[%s5547_s25 + $0x1310] sm:$0xff] }
 0x1af   : > { %3103 = vmatpush2.msra.mxu1 %v701_v57  ;;  %3033 = vmatprep.subr.mxu0 %v438_v59  ;;  %v1142_v40 = vld [vmem:[%s5547_s25 + $0x1b18] sm:$0xff]  ;;  %v1141_v42 = vld [vmem:[%s5547_s25 + $0x1b10] sm:$0xff] }
 0x1b0   : > { %3104 = vmatprep.subr.mxu1 %v694_v60  ;;  %3034 = vmatpush2.msra.mxu0 %v437_v61  ;;  %v878_v45 = vld [vmem:[%s5547_s25 + $0x12d8] sm:$0xff]  ;;  %v877_v47 = vld [vmem:[%s5547_s25 + $0x12d0] sm:$0xff] }
 0x1b1   : > { %3105 = vmatpush2.msra.mxu1 %v693_v62  ;;  %3035 = vmatprep.subr.mxu0 %v430_v0  ;;  %v1134_v46 = vld [vmem:[%s5547_s25 + $0x1ad8] sm:$0xff]  ;;  %v1133_v48 = vld [vmem:[%s5547_s25 + $0x1ad0] sm:$0xff] }
 0x1b2   : > { %3106 = vmatprep.subr.mxu1 %v686_v1  ;;  %3036 = vmatpush2.msra.mxu0 %v429_v3  ;;  %v870_v50 = vld [vmem:[%s5547_s25 + $0x1298] sm:$0xff]  ;;  %v869_v52 = vld [vmem:[%s5547_s25 + $0x1290] sm:$0xff] }
 0x1b3   : > { %3107 = vmatpush2.msra.mxu1 %v685_v4  ;;  %3037 = vmatprep.subr.mxu0 %v422_v5  ;;  %v1126_v51 = vld [vmem:[%s5547_s25 + $0x1a98] sm:$0xff]  ;;  %v1125_v54 = vld [vmem:[%s5547_s25 + $0x1a90] sm:$0xff] }
 0x1b4   : > { %3108 = vmatprep.subr.mxu1 %v678_v6  ;;  %3038 = vmatpush2.msra.mxu0 %v421_v7  ;;  %v862_v56 = vld [vmem:[%s5547_s25 + $0x1258] sm:$0xff]  ;;  %v861_v59 = vld [vmem:[%s5547_s25 + $0x1250] sm:$0xff] }
 0x1b5   : > { %3109 = vmatpush2.msra.mxu1 %v677_v8  ;;  %3039 = vmatprep.subr.mxu0 %v414_v10  ;;  %v1118_v57 = vld [vmem:[%s5547_s25 + $0x1a58] sm:$0xff]  ;;  %v1117_v60 = vld [vmem:[%s5547_s25 + $0x1a50] sm:$0xff] }
 0x1b6   : > { %3110 = vmatprep.subr.mxu1 %v670_v12  ;;  %3040 = vmatpush2.msra.mxu0 %v413_v13  ;;  %v854_v61 = vld [vmem:[%s5547_s25 + $0x1218] sm:$0xff]  ;;  %v853_v0 = vld [vmem:[%s5547_s25 + $0x1210] sm:$0xff] }
 0x1b7   : > { %3111 = vmatpush2.msra.mxu1 %v669_v14  ;;  %3041 = vmatprep.subr.mxu0 %v406_v15  ;;  %v1110_v62 = vld [vmem:[%s5547_s25 + $0x1a18] sm:$0xff]  ;;  %v1109_v1 = vld [vmem:[%s5547_s25 + $0x1a10] sm:$0xff] }
 0x1b8   : > { %3112 = vmatprep.subr.mxu1 %v662_v16  ;;  %3042 = vmatpush2.msra.mxu0 %v405_v18  ;;  %v846_v3 = vld [vmem:[%s5547_s25 + $0x11d8] sm:$0xff]  ;;  %v845_v5 = vld [vmem:[%s5547_s25 + $0x11d0] sm:$0xff] }
 0x1b9   : > { %3043 = vmatprep.mubr.f32.mxu0 %v5717_v9  ;;  %3113 = vmatpush2.msra.mxu1 %v661_v19  ;;  %v1102_v4 = vld [vmem:[%s5547_s25 + $0x19d8] sm:$0xff]  ;;  %v1101_v6 = vld [vmem:[%s5547_s25 + $0x19d0] sm:$0xff] }
 0x1ba   : > { %3114 = vmatprep.mubr.f32.mxu1 %v5722_v11  ;;  %3044 = vmatmul.mubr.f32.vlgmr.msra.gmra.mxu0 %v5702_v63  ;;  %v838_v7 = vld [vmem:[%s5547_s25 + $0x1198] sm:$0xff]  ;;  %v837_v10 = vld [vmem:[%s5547_s25 + $0x1190] sm:$0xff] }
 0x1bb   : > { %3115 = vmatmul.mubr.f32.vlgmr.msra.gmra.mxu1 %v5707_v2  ;;  %3121 = vmatprep.subr.mxu0 %v910_v21  ;;  %v1094_v8 = vld [vmem:[%s5547_s25 + $0x1998] sm:$0xff]  ;;  %v1093_v12 = vld [vmem:[%s5547_s25 + $0x1990] sm:$0xff] }
 0x1bc   : > { %3192 = vmatprep.subr.mxu1 %v1166_v23  ;;  %3122 = vmatpush1.msra.mxu0 %v909_v24  ;;  %v830_v13 = vld [vmem:[%s5547_s25 + $0x1158] sm:$0xff]  ;;  %v829_v15 = vld [vmem:[%s5547_s25 + $0x1150] sm:$0xff] }
 0x1bd   : > { %3193 = vmatpush1.msra.mxu1 %v1165_v25  ;;  %3123 = vmatprep.subr.mxu0 %v902_v28  ;;  %v1086_v14 = vld [vmem:[%s5547_s25 + $0x1958] sm:$0xff]  ;;  %v1085_v16 = vld [vmem:[%s5547_s25 + $0x1950] sm:$0xff] }
 0x1be   : > { %3194 = vmatprep.subr.mxu1 %v1158_v29  ;;  %3124 = vmatpush1.msra.mxu0 %v901_v31  ;;  %v822_v18 = vld [vmem:[%s5547_s25 + $0x1118] sm:$0xff]  ;;  %v821_v21 = vld [vmem:[%s5547_s25 + $0x1110] sm:$0xff] }
 0x1bf   : > { %3195 = vmatpush1.msra.mxu1 %v1157_v32  ;;  %3125 = vmatprep.subr.mxu0 %v894_v34  ;;  %v1078_v19 = vld [vmem:[%s5547_s25 + $0x1918] sm:$0xff]  ;;  %v1077_v23 = vld [vmem:[%s5547_s25 + $0x1910] sm:$0xff] }
 0x1c0   : > { %3196 = vmatprep.subr.mxu1 %v1150_v35  ;;  %3126 = vmatpush1.msra.mxu0 %v893_v37  ;;  %v814_v24 = vld [vmem:[%s5547_s25 + $0x10d8] sm:$0xff]  ;;  %v813_v28 = vld [vmem:[%s5547_s25 + $0x10d0] sm:$0xff] }
 0x1c1   : > { %3197 = vmatpush1.msra.mxu1 %v1149_v38  ;;  %3127 = vmatprep.subr.mxu0 %v886_v39  ;;  %v1070_v25 = vld [vmem:[%s5547_s25 + $0x18d8] sm:$0xff]  ;;  %v1069_v29 = vld [vmem:[%s5547_s25 + $0x18d0] sm:$0xff] }
 0x1c2   : > { %3198 = vmatprep.subr.mxu1 %v1142_v40  ;;  %3128 = vmatpush1.msra.mxu0 %v885_v41  ;;  %v806_v31 = vld [vmem:[%s5547_s25 + $0x1098] sm:$0xff]  ;;  %v805_v34 = vld [vmem:[%s5547_s25 + $0x1090] sm:$0xff] }
 0x1c3   : > { %3199 = vmatpush1.msra.mxu1 %v1141_v42  ;;  %3129 = vmatprep.subr.mxu0 %v878_v45  ;;  %v1062_v32 = vld [vmem:[%s5547_s25 + $0x1898] sm:$0xff]  ;;  %v1061_v35 = vld [vmem:[%s5547_s25 + $0x1890] sm:$0xff] }
 0x1c4   : > { %3200 = vmatprep.subr.mxu1 %v1134_v46  ;;  %3130 = vmatpush1.msra.mxu0 %v877_v47  ;;  %v798_v37 = vld [vmem:[%s5547_s25 + $0x1058] sm:$0xff]  ;;  %v797_v39 = vld [vmem:[%s5547_s25 + $0x1050] sm:$0xff] }
 0x1c5   : > { %3201 = vmatpush1.msra.mxu1 %v1133_v48  ;;  %3131 = vmatprep.subr.mxu0 %v870_v50  ;;  %v1054_v38 = vld [vmem:[%s5547_s25 + $0x1858] sm:$0xff]  ;;  %v1053_v40 = vld [vmem:[%s5547_s25 + $0x1850] sm:$0xff] }
 0x1c6   : > { %3202 = vmatprep.subr.mxu1 %v1126_v51  ;;  %3132 = vmatpush1.msra.mxu0 %v869_v52  ;;  %v790_v41 = vld [vmem:[%s5547_s25 + $0x1018] sm:$0xff]  ;;  %v789_v45 = vld [vmem:[%s5547_s25 + $0x1010] sm:$0xff] }
 0x1c7   : > { %3203 = vmatpush1.msra.mxu1 %v1125_v54  ;;  %3133 = vmatprep.subr.mxu0 %v862_v56  ;;  %v1046_v42 = vld [vmem:[%s5547_s25 + $0x1818] sm:$0xff]  ;;  %v1045_v46 = vld [vmem:[%s5547_s25 + $0x1810] sm:$0xff] }
 0x1c8   : > { %3204 = vmatprep.subr.mxu1 %v1118_v57  ;;  %3134 = vmatpush1.msra.mxu0 %v861_v59  ;;  %v1038_v47 = vld [vmem:[%s5547_s25 + $0x17d8] sm:$0xff]  ;;  %v1037_v50 = vld [vmem:[%s5547_s25 + $0x17d0] sm:$0xff] }
 0x1c9   : > { %3205 = vmatpush1.msra.mxu1 %v1117_v60  ;;  %3135 = vmatprep.subr.mxu0 %v854_v61  ;;  %v1294_v48 = vld [vmem:[%s5547_s25 + $0x1fd8] sm:$0xff]  ;;  %v1293_v51 = vld [vmem:[%s5547_s25 + $0x1fd0] sm:$0xff] }
 0x1ca   : > { %3206 = vmatprep.subr.mxu1 %v1110_v62  ;;  %3136 = vmatpush1.msra.mxu0 %v853_v0  ;;  %v1030_v52 = vld [vmem:[%s5547_s25 + $0x1798] sm:$0xff]  ;;  %v1029_v56 = vld [vmem:[%s5547_s25 + $0x1790] sm:$0xff] }
 0x1cb   : > { %3207 = vmatpush1.msra.mxu1 %v1109_v1  ;;  %3137 = vmatprep.subr.mxu0 %v846_v3  ;;  %v1286_v54 = vld [vmem:[%s5547_s25 + $0x1f98] sm:$0xff]  ;;  %v1285_v57 = vld [vmem:[%s5547_s25 + $0x1f90] sm:$0xff] }
 0x1cc   : > { %3208 = vmatprep.subr.mxu1 %v1102_v4  ;;  %3138 = vmatpush1.msra.mxu0 %v845_v5  ;;  %v1022_v59 = vld [vmem:[%s5547_s25 + $0x1758] sm:$0xff]  ;;  %v1021_v61 = vld [vmem:[%s5547_s25 + $0x1750] sm:$0xff] }
 0x1cd   : > { %3209 = vmatpush1.msra.mxu1 %v1101_v6  ;;  %3139 = vmatprep.subr.mxu0 %v838_v7  ;;  %v1278_v60 = vld [vmem:[%s5547_s25 + $0x1f58] sm:$0xff]  ;;  %v1277_v62 = vld [vmem:[%s5547_s25 + $0x1f50] sm:$0xff] }
 0x1ce   : > { %3210 = vmatprep.subr.mxu1 %v1094_v8  ;;  %3140 = vmatpush1.msra.mxu0 %v837_v10  ;;  %v1014_v0 = vld [vmem:[%s5547_s25 + $0x1718] sm:$0xff]  ;;  %v1013_v3 = vld [vmem:[%s5547_s25 + $0x1710] sm:$0xff] }
 0x1cf   : > { %3211 = vmatpush1.msra.mxu1 %v1093_v12  ;;  %3141 = vmatprep.subr.mxu0 %v830_v13  ;;  %v1270_v1 = vld [vmem:[%s5547_s25 + $0x1f18] sm:$0xff]  ;;  %v1269_v4 = vld [vmem:[%s5547_s25 + $0x1f10] sm:$0xff] }
 0x1d0   : > { %3212 = vmatprep.subr.mxu1 %v1086_v14  ;;  %3142 = vmatpush1.msra.mxu0 %v829_v15  ;;  %v1006_v5 = vld [vmem:[%s5547_s25 + $0x16d8] sm:$0xff]  ;;  %v1005_v7 = vld [vmem:[%s5547_s25 + $0x16d0] sm:$0xff] }
 0x1d1   : > { %3213 = vmatpush1.msra.mxu1 %v1085_v16  ;;  %3143 = vmatprep.subr.mxu0 %v822_v18  ;;  %v1262_v6 = vld [vmem:[%s5547_s25 + $0x1ed8] sm:$0xff]  ;;  %v1261_v8 = vld [vmem:[%s5547_s25 + $0x1ed0] sm:$0xff] }
 0x1d2   : > { %3214 = vmatprep.subr.mxu1 %v1078_v19  ;;  %3144 = vmatpush1.msra.mxu0 %v821_v21  ;;  %v998_v10 = vld [vmem:[%s5547_s25 + $0x1698] sm:$0xff]  ;;  %v997_v13 = vld [vmem:[%s5547_s25 + $0x1690] sm:$0xff] }
 0x1d3   : > { %3215 = vmatpush1.msra.mxu1 %v1077_v23  ;;  %3145 = vmatprep.subr.mxu0 %v814_v24  ;;  %v1254_v12 = vld [vmem:[%s5547_s25 + $0x1e98] sm:$0xff]  ;;  %v1253_v14 = vld [vmem:[%s5547_s25 + $0x1e90] sm:$0xff] }
 0x1d4   : > { %3216 = vmatprep.subr.mxu1 %v1070_v25  ;;  %3146 = vmatpush1.msra.mxu0 %v813_v28  ;;  %v990_v15 = vld [vmem:[%s5547_s25 + $0x1658] sm:$0xff]  ;;  %v989_v18 = vld [vmem:[%s5547_s25 + $0x1650] sm:$0xff] }
 0x1d5   : > { %3217 = vmatpush1.msra.mxu1 %v1069_v29  ;;  %3147 = vmatprep.subr.mxu0 %v806_v31  ;;  %v1246_v16 = vld [vmem:[%s5547_s25 + $0x1e58] sm:$0xff]  ;;  %v1245_v19 = vld [vmem:[%s5547_s25 + $0x1e50] sm:$0xff] }
 0x1d6   : > { %3218 = vmatprep.subr.mxu1 %v1062_v32  ;;  %3148 = vmatpush1.msra.mxu0 %v805_v34  ;;  %v982_v21 = vld [vmem:[%s5547_s25 + $0x1618] sm:$0xff]  ;;  %v981_v24 = vld [vmem:[%s5547_s25 + $0x1610] sm:$0xff] }
 0x1d7   : > { %3219 = vmatpush1.msra.mxu1 %v1061_v35  ;;  %3149 = vmatprep.subr.mxu0 %v798_v37  ;;  %v1238_v23 = vld [vmem:[%s5547_s25 + $0x1e18] sm:$0xff]  ;;  %v1237_v25 = vld [vmem:[%s5547_s25 + $0x1e10] sm:$0xff] }
 0x1d8   : > { %3220 = vmatprep.subr.mxu1 %v1054_v38  ;;  %3150 = vmatpush1.msra.mxu0 %v797_v39  ;;  %v974_v28 = vld [vmem:[%s5547_s25 + $0x15d8] sm:$0xff]  ;;  %v973_v31 = vld [vmem:[%s5547_s25 + $0x15d0] sm:$0xff] }
 0x1d9   : > { %3221 = vmatpush1.msra.mxu1 %v1053_v40  ;;  %3151 = vmatprep.subr.mxu0 %v790_v41  ;;  %v1230_v29 = vld [vmem:[%s5547_s25 + $0x1dd8] sm:$0xff]  ;;  %v1229_v32 = vld [vmem:[%s5547_s25 + $0x1dd0] sm:$0xff] }
 0x1da   : > { %3222 = vmatprep.subr.mxu1 %v1046_v42  ;;  %3152 = vmatpush1.msra.mxu0 %v789_v45  ;;  %v966_v34 = vld [vmem:[%s5547_s25 + $0x1598] sm:$0xff]  ;;  %v965_v37 = vld [vmem:[%s5547_s25 + $0x1590] sm:$0xff] }
 0x1db   : > { %3223 = vmatpush1.msra.mxu1 %v1045_v46  ;;  %3153 = vmatprep.subr.mxu0 %v1038_v47  ;;  %v1222_v35 = vld [vmem:[%s5547_s25 + $0x1d98] sm:$0xff]  ;;  %v1221_v38 = vld [vmem:[%s5547_s25 + $0x1d90] sm:$0xff] }
 0x1dc   : > { %3224 = vmatprep.subr.mxu1 %v1294_v48  ;;  %3154 = vmatpush2.msra.mxu0 %v1037_v50  ;;  %v958_v39 = vld [vmem:[%s5547_s25 + $0x1558] sm:$0xff]  ;;  %v957_v41 = vld [vmem:[%s5547_s25 + $0x1550] sm:$0xff] }
 0x1dd   : > { %3225 = vmatpush2.msra.mxu1 %v1293_v51  ;;  %3155 = vmatprep.subr.mxu0 %v1030_v52  ;;  %v1214_v40 = vld [vmem:[%s5547_s25 + $0x1d58] sm:$0xff]  ;;  %v1213_v42 = vld [vmem:[%s5547_s25 + $0x1d50] sm:$0xff] }
 0x1de   : > { %3226 = vmatprep.subr.mxu1 %v1286_v54  ;;  %3156 = vmatpush2.msra.mxu0 %v1029_v56  ;;  %v950_v45 = vld [vmem:[%s5547_s25 + $0x1518] sm:$0xff]  ;;  %v949_v47 = vld [vmem:[%s5547_s25 + $0x1510] sm:$0xff] }
 0x1df   : > { %3227 = vmatpush2.msra.mxu1 %v1285_v57  ;;  %3157 = vmatprep.subr.mxu0 %v1022_v59  ;;  %v1206_v46 = vld [vmem:[%s5547_s25 + $0x1d18] sm:$0xff]  ;;  %v1205_v48 = vld [vmem:[%s5547_s25 + $0x1d10] sm:$0xff] }
 0x1e0   : > { %3228 = vmatprep.subr.mxu1 %v1278_v60  ;;  %3158 = vmatpush2.msra.mxu0 %v1021_v61  ;;  %v942_v50 = vld [vmem:[%s5547_s25 + $0x14d8] sm:$0xff]  ;;  %v941_v52 = vld [vmem:[%s5547_s25 + $0x14d0] sm:$0xff] }
 0x1e1   : > { %3229 = vmatpush2.msra.mxu1 %v1277_v62  ;;  %3159 = vmatprep.subr.mxu0 %v1014_v0  ;;  %v1198_v51 = vld [vmem:[%s5547_s25 + $0x1cd8] sm:$0xff]  ;;  %v1197_v54 = vld [vmem:[%s5547_s25 + $0x1cd0] sm:$0xff] }
 0x1e2   : > { %3230 = vmatprep.subr.mxu1 %v1270_v1  ;;  %3160 = vmatpush2.msra.mxu0 %v1013_v3  ;;  %v934_v56 = vld [vmem:[%s5547_s25 + $0x1498] sm:$0xff]  ;;  %v933_v59 = vld [vmem:[%s5547_s25 + $0x1490] sm:$0xff] }
 0x1e3   : > { %3231 = vmatpush2.msra.mxu1 %v1269_v4  ;;  %3161 = vmatprep.subr.mxu0 %v1006_v5  ;;  %v1190_v57 = vld [vmem:[%s5547_s25 + $0x1c98] sm:$0xff]  ;;  %v1189_v60 = vld [vmem:[%s5547_s25 + $0x1c90] sm:$0xff] }
 0x1e4   : > { %3232 = vmatprep.subr.mxu1 %v1262_v6  ;;  %3162 = vmatpush2.msra.mxu0 %v1005_v7  ;;  %v926_v61 = vld [vmem:[%s5547_s25 + $0x1458] sm:$0xff]  ;;  %v925_v0 = vld [vmem:[%s5547_s25 + $0x1450] sm:$0xff] }
 0x1e5   : > { %3233 = vmatpush2.msra.mxu1 %v1261_v8  ;;  %3163 = vmatprep.subr.mxu0 %v998_v10  ;;  %v1182_v62 = vld [vmem:[%s5547_s25 + $0x1c58] sm:$0xff]  ;;  %v1181_v1 = vld [vmem:[%s5547_s25 + $0x1c50] sm:$0xff] }
 0x1e6   : > { %3234 = vmatprep.subr.mxu1 %v1254_v12  ;;  %3164 = vmatpush2.msra.mxu0 %v997_v13  ;;  %v918_v3 = vld [vmem:[%s5547_s25 + $0x1418] sm:$0xff]  ;;  %v917_v5 = vld [vmem:[%s5547_s25 + $0x1410] sm:$0xff] }
 0x1e7   : > { %3235 = vmatpush2.msra.mxu1 %v1253_v14  ;;  %3165 = vmatprep.subr.mxu0 %v990_v15  ;;  %v1174_v4 = vld [vmem:[%s5547_s25 + $0x1c18] sm:$0xff]  ;;  %v1173_v6 = vld [vmem:[%s5547_s25 + $0x1c10] sm:$0xff] }
 0x1e8   : > { %3236 = vmatprep.subr.mxu1 %v1246_v16  ;;  %3166 = vmatpush2.msra.mxu0 %v989_v18  ;;  %v1422_v7 = vld [vmem:[%s5547_s25 + $0x23d8] sm:$0xff]  ;;  %v1421_v10 = vld [vmem:[%s5547_s25 + $0x23d0] sm:$0xff] }
 0x1e9   : > { %3237 = vmatpush2.msra.mxu1 %v1245_v19  ;;  %3167 = vmatprep.subr.mxu0 %v982_v21  ;;  %v1678_v8 = vld [vmem:[%s5547_s25 + $0x2bd8] sm:$0xff]  ;;  %v1677_v12 = vld [vmem:[%s5547_s25 + $0x2bd0] sm:$0xff] }
 0x1ea   : > { %3238 = vmatprep.subr.mxu1 %v1238_v23  ;;  %3168 = vmatpush2.msra.mxu0 %v981_v24  ;;  %v1414_v13 = vld [vmem:[%s5547_s25 + $0x2398] sm:$0xff]  ;;  %v1413_v15 = vld [vmem:[%s5547_s25 + $0x2390] sm:$0xff] }
 0x1eb   : > { %3239 = vmatpush2.msra.mxu1 %v1237_v25  ;;  %3169 = vmatprep.subr.mxu0 %v974_v28  ;;  %v1670_v14 = vld [vmem:[%s5547_s25 + $0x2b98] sm:$0xff]  ;;  %v1669_v16 = vld [vmem:[%s5547_s25 + $0x2b90] sm:$0xff] }
 0x1ec   : > { %3240 = vmatprep.subr.mxu1 %v1230_v29  ;;  %3170 = vmatpush2.msra.mxu0 %v973_v31  ;;  %v1406_v18 = vld [vmem:[%s5547_s25 + $0x2358] sm:$0xff]  ;;  %v1405_v21 = vld [vmem:[%s5547_s25 + $0x2350] sm:$0xff] }
 0x1ed   : > { %3241 = vmatpush2.msra.mxu1 %v1229_v32  ;;  %3171 = vmatprep.subr.mxu0 %v966_v34  ;;  %v1662_v19 = vld [vmem:[%s5547_s25 + $0x2b58] sm:$0xff]  ;;  %v1661_v23 = vld [vmem:[%s5547_s25 + $0x2b50] sm:$0xff] }
 0x1ee   : > { %3242 = vmatprep.subr.mxu1 %v1222_v35  ;;  %3172 = vmatpush2.msra.mxu0 %v965_v37  ;;  %v1398_v24 = vld [vmem:[%s5547_s25 + $0x2318] sm:$0xff]  ;;  %v1397_v28 = vld [vmem:[%s5547_s25 + $0x2310] sm:$0xff] }
 0x1ef   : > { %3243 = vmatpush2.msra.mxu1 %v1221_v38  ;;  %3173 = vmatprep.subr.mxu0 %v958_v39  ;;  %v1654_v25 = vld [vmem:[%s5547_s25 + $0x2b18] sm:$0xff]  ;;  %v1653_v29 = vld [vmem:[%s5547_s25 + $0x2b10] sm:$0xff] }
 0x1f0   : > { %3244 = vmatprep.subr.mxu1 %v1214_v40  ;;  %3174 = vmatpush2.msra.mxu0 %v957_v41  ;;  %v1390_v31 = vld [vmem:[%s5547_s25 + $0x22d8] sm:$0xff]  ;;  %v1389_v34 = vld [vmem:[%s5547_s25 + $0x22d0] sm:$0xff] }
 0x1f1   : > { %3245 = vmatpush2.msra.mxu1 %v1213_v42  ;;  %3175 = vmatprep.subr.mxu0 %v950_v45  ;;  %v1646_v32 = vld [vmem:[%s5547_s25 + $0x2ad8] sm:$0xff]  ;;  %v1645_v35 = vld [vmem:[%s5547_s25 + $0x2ad0] sm:$0xff] }
 0x1f2   : > { %3246 = vmatprep.subr.mxu1 %v1206_v46  ;;  %3176 = vmatpush2.msra.mxu0 %v949_v47  ;;  %v1382_v37 = vld [vmem:[%s5547_s25 + $0x2298] sm:$0xff]  ;;  %v1381_v39 = vld [vmem:[%s5547_s25 + $0x2290] sm:$0xff] }
 0x1f3   : > { %3247 = vmatpush2.msra.mxu1 %v1205_v48  ;;  %3177 = vmatprep.subr.mxu0 %v942_v50  ;;  %v1638_v38 = vld [vmem:[%s5547_s25 + $0x2a98] sm:$0xff]  ;;  %v1637_v40 = vld [vmem:[%s5547_s25 + $0x2a90] sm:$0xff] }
 0x1f4   : > { %3248 = vmatprep.subr.mxu1 %v1198_v51  ;;  %3178 = vmatpush2.msra.mxu0 %v941_v52  ;;  %v1374_v41 = vld [vmem:[%s5547_s25 + $0x2258] sm:$0xff]  ;;  %v1373_v45 = vld [vmem:[%s5547_s25 + $0x2250] sm:$0xff] }
 0x1f5   : > { %3249 = vmatpush2.msra.mxu1 %v1197_v54  ;;  %3179 = vmatprep.subr.mxu0 %v934_v56  ;;  %v1630_v42 = vld [vmem:[%s5547_s25 + $0x2a58] sm:$0xff]  ;;  %v1629_v46 = vld [vmem:[%s5547_s25 + $0x2a50] sm:$0xff] }
 0x1f6   : > { %3250 = vmatprep.subr.mxu1 %v1190_v57  ;;  %3180 = vmatpush2.msra.mxu0 %v933_v59  ;;  %v1366_v47 = vld [vmem:[%s5547_s25 + $0x2218] sm:$0xff]  ;;  %v1365_v50 = vld [vmem:[%s5547_s25 + $0x2210] sm:$0xff] }
 0x1f7   : > { %3251 = vmatpush2.msra.mxu1 %v1189_v60  ;;  %3181 = vmatprep.subr.mxu0 %v926_v61  ;;  %v1622_v48 = vld [vmem:[%s5547_s25 + $0x2a18] sm:$0xff]  ;;  %v1621_v51 = vld [vmem:[%s5547_s25 + $0x2a10] sm:$0xff] }
 0x1f8   : > { %3252 = vmatprep.subr.mxu1 %v1182_v62  ;;  %3182 = vmatpush2.msra.mxu0 %v925_v0  ;;  %v1358_v52 = vld [vmem:[%s5547_s25 + $0x21d8] sm:$0xff]  ;;  %v1357_v56 = vld [vmem:[%s5547_s25 + $0x21d0] sm:$0xff] }
 0x1f9   : > { %3253 = vmatpush2.msra.mxu1 %v1181_v1  ;;  %3183 = vmatprep.subr.mxu0 %v918_v3  ;;  %v1614_v54 = vld [vmem:[%s5547_s25 + $0x29d8] sm:$0xff]  ;;  %v1613_v57 = vld [vmem:[%s5547_s25 + $0x29d0] sm:$0xff] }
 0x1fa   : > { %3254 = vmatprep.subr.mxu1 %v1174_v4  ;;  %3184 = vmatpush2.msra.mxu0 %v917_v5  ;;  %v1350_v59 = vld [vmem:[%s5547_s25 + $0x2198] sm:$0xff]  ;;  %v1349_v61 = vld [vmem:[%s5547_s25 + $0x2190] sm:$0xff] }
 0x1fb   : > { %3185 = vmatprep.mubr.f32.mxu0 %v5864_v27  ;;  %3255 = vmatpush2.msra.mxu1 %v1173_v6  ;;  %v1606_v60 = vld [vmem:[%s5547_s25 + $0x2998] sm:$0xff]  ;;  %v1605_v62 = vld [vmem:[%s5547_s25 + $0x2990] sm:$0xff] }
 0x1fc   : > { %3186 = vmatmul.mubr.f32.vlgmr.msra.gmra.mxu0 %v5849_v17  ;;  %3256 = vmatprep.mubr.f32.mxu1 %v5870_v30  ;;  %v1342_v0 = vld [vmem:[%s5547_s25 + $0x2158] sm:$0xff]  ;;  %v1341_v3 = vld [vmem:[%s5547_s25 + $0x2150] sm:$0xff] }
 0x1fd   : > { %3263 = vmatprep.subr.mxu0 %v1422_v7  ;;  %3334 = vmatprep.subr.mxu1 %v1678_v8  ;;  %v1598_v1 = vld [vmem:[%s5547_s25 + $0x2958] sm:$0xff]  ;;  %v1597_v4 = vld [vmem:[%s5547_s25 + $0x2950] sm:$0xff] }
 0x1fe   : > { %3257 = vmatmul.mubr.f32.vlgmr.msra.gmra.mxu1 %v5856_v22  ;;  %3264 = vmatpush1.msra.mxu0 %v1421_v10  ;;  %v1334_v5 = vld [vmem:[%s5547_s25 + $0x2118] sm:$0xff]  ;;  %v1333_v7 = vld [vmem:[%s5547_s25 + $0x2110] sm:$0xff] }
 0x1ff   : > { %3335 = vmatpush1.msra.mxu1 %v1677_v12  ;;  %3265 = vmatprep.subr.mxu0 %v1414_v13  ;;  %v1590_v6 = vld [vmem:[%s5547_s25 + $0x2918] sm:$0xff]  ;;  %v1589_v8 = vld [vmem:[%s5547_s25 + $0x2910] sm:$0xff] }
 0x200   : > { %3336 = vmatprep.subr.mxu1 %v1670_v14  ;;  %3266 = vmatpush1.msra.mxu0 %v1413_v15  ;;  %v1326_v10 = vld [vmem:[%s5547_s25 + $0x20d8] sm:$0xff]  ;;  %v1325_v13 = vld [vmem:[%s5547_s25 + $0x20d0] sm:$0xff] }
 0x201   : > { %3337 = vmatpush1.msra.mxu1 %v1669_v16  ;;  %3267 = vmatprep.subr.mxu0 %v1406_v18  ;;  %v1582_v12 = vld [vmem:[%s5547_s25 + $0x28d8] sm:$0xff]  ;;  %v1581_v14 = vld [vmem:[%s5547_s25 + $0x28d0] sm:$0xff] }
 0x202   : > { %3338 = vmatprep.subr.mxu1 %v1662_v19  ;;  %3268 = vmatpush1.msra.mxu0 %v1405_v21  ;;  %v1318_v15 = vld [vmem:[%s5547_s25 + $0x2098] sm:$0xff]  ;;  %v1317_v18 = vld [vmem:[%s5547_s25 + $0x2090] sm:$0xff] }
 0x203   : > { %3339 = vmatpush1.msra.mxu1 %v1661_v23  ;;  %3269 = vmatprep.subr.mxu0 %v1398_v24  ;;  %v1574_v16 = vld [vmem:[%s5547_s25 + $0x2898] sm:$0xff]  ;;  %v1573_v19 = vld [vmem:[%s5547_s25 + $0x2890] sm:$0xff] }
 0x204   : > { %3340 = vmatprep.subr.mxu1 %v1654_v25  ;;  %3270 = vmatpush1.msra.mxu0 %v1397_v28  ;;  %v1310_v21 = vld [vmem:[%s5547_s25 + $0x2058] sm:$0xff]  ;;  %v1309_v24 = vld [vmem:[%s5547_s25 + $0x2050] sm:$0xff] }
 0x205   : > { %3341 = vmatpush1.msra.mxu1 %v1653_v29  ;;  %3271 = vmatprep.subr.mxu0 %v1390_v31  ;;  %v1566_v23 = vld [vmem:[%s5547_s25 + $0x2858] sm:$0xff]  ;;  %v1565_v25 = vld [vmem:[%s5547_s25 + $0x2850] sm:$0xff] }
 0x206   : > { %3342 = vmatprep.subr.mxu1 %v1646_v32  ;;  %3272 = vmatpush1.msra.mxu0 %v1389_v34  ;;  %v1302_v28 = vld [vmem:[%s5547_s25 + $0x2018] sm:$0xff]  ;;  %v1301_v31 = vld [vmem:[%s5547_s25 + $0x2010] sm:$0xff] }
 0x207   : > { %3343 = vmatpush1.msra.mxu1 %v1645_v35  ;;  %3273 = vmatprep.subr.mxu0 %v1382_v37  ;;  %v1558_v29 = vld [vmem:[%s5547_s25 + $0x2818] sm:$0xff]  ;;  %v1557_v32 = vld [vmem:[%s5547_s25 + $0x2810] sm:$0xff] }
 0x208   : > { %3344 = vmatprep.subr.mxu1 %v1638_v38  ;;  %3274 = vmatpush1.msra.mxu0 %v1381_v39  ;;  %v1550_v34 = vld [vmem:[%s5547_s25 + $0x27d8] sm:$0xff]  ;;  %v1549_v37 = vld [vmem:[%s5547_s25 + $0x27d0] sm:$0xff] }
 0x209   : > { %3345 = vmatpush1.msra.mxu1 %v1637_v40  ;;  %3275 = vmatprep.subr.mxu0 %v1374_v41  ;;  %v1806_v35 = vld [vmem:[%s5547_s25 + $0x2fd8] sm:$0xff]  ;;  %v1805_v38 = vld [vmem:[%s5547_s25 + $0x2fd0] sm:$0xff] }
 0x20a   : > { %3346 = vmatprep.subr.mxu1 %v1630_v42  ;;  %3276 = vmatpush1.msra.mxu0 %v1373_v45  ;;  %v1542_v39 = vld [vmem:[%s5547_s25 + $0x2798] sm:$0xff]  ;;  %v1541_v41 = vld [vmem:[%s5547_s25 + $0x2790] sm:$0xff] }
 0x20b   : > { %3347 = vmatpush1.msra.mxu1 %v1629_v46  ;;  %3277 = vmatprep.subr.mxu0 %v1366_v47  ;;  %v1798_v40 = vld [vmem:[%s5547_s25 + $0x2f98] sm:$0xff]  ;;  %v1797_v42 = vld [vmem:[%s5547_s25 + $0x2f90] sm:$0xff] }
 0x20c   : > { %3348 = vmatprep.subr.mxu1 %v1622_v48  ;;  %3278 = vmatpush1.msra.mxu0 %v1365_v50  ;;  %v1534_v45 = vld [vmem:[%s5547_s25 + $0x2758] sm:$0xff]  ;;  %v1533_v47 = vld [vmem:[%s5547_s25 + $0x2750] sm:$0xff] }
 0x20d   : > { %3349 = vmatpush1.msra.mxu1 %v1621_v51  ;;  %3279 = vmatprep.subr.mxu0 %v1358_v52  ;;  %v1790_v46 = vld [vmem:[%s5547_s25 + $0x2f58] sm:$0xff]  ;;  %v1789_v48 = vld [vmem:[%s5547_s25 + $0x2f50] sm:$0xff] }
 0x20e   : > { %3350 = vmatprep.subr.mxu1 %v1614_v54  ;;  %3280 = vmatpush1.msra.mxu0 %v1357_v56  ;;  %v1526_v50 = vld [vmem:[%s5547_s25 + $0x2718] sm:$0xff]  ;;  %v1525_v52 = vld [vmem:[%s5547_s25 + $0x2710] sm:$0xff] }
 0x20f   : > { %3351 = vmatpush1.msra.mxu1 %v1613_v57  ;;  %3281 = vmatprep.subr.mxu0 %v1350_v59  ;;  %v1782_v51 = vld [vmem:[%s5547_s25 + $0x2f18] sm:$0xff]  ;;  %v1781_v54 = vld [vmem:[%s5547_s25 + $0x2f10] sm:$0xff] }
 0x210   : > { %3352 = vmatprep.subr.mxu1 %v1606_v60  ;;  %3282 = vmatpush1.msra.mxu0 %v1349_v61  ;;  %v1518_v56 = vld [vmem:[%s5547_s25 + $0x26d8] sm:$0xff]  ;;  %v1517_v59 = vld [vmem:[%s5547_s25 + $0x26d0] sm:$0xff] }
 0x211   : > { %3353 = vmatpush1.msra.mxu1 %v1605_v62  ;;  %3283 = vmatprep.subr.mxu0 %v1342_v0  ;;  %v1774_v57 = vld [vmem:[%s5547_s25 + $0x2ed8] sm:$0xff]  ;;  %v1773_v60 = vld [vmem:[%s5547_s25 + $0x2ed0] sm:$0xff] }
 0x212   : > { %3354 = vmatprep.subr.mxu1 %v1598_v1  ;;  %3284 = vmatpush1.msra.mxu0 %v1341_v3  ;;  %v1510_v61 = vld [vmem:[%s5547_s25 + $0x2698] sm:$0xff]  ;;  %v1509_v0 = vld [vmem:[%s5547_s25 + $0x2690] sm:$0xff] }
 0x213   : > { %3355 = vmatpush1.msra.mxu1 %v1597_v4  ;;  %3285 = vmatprep.subr.mxu0 %v1334_v5  ;;  %v1766_v62 = vld [vmem:[%s5547_s25 + $0x2e98] sm:$0xff]  ;;  %v1765_v1 = vld [vmem:[%s5547_s25 + $0x2e90] sm:$0xff] }
 0x214   : > { %3356 = vmatprep.subr.mxu1 %v1590_v6  ;;  %3286 = vmatpush1.msra.mxu0 %v1333_v7  ;;  %v1502_v3 = vld [vmem:[%s5547_s25 + $0x2658] sm:$0xff]  ;;  %v1501_v5 = vld [vmem:[%s5547_s25 + $0x2650] sm:$0xff] }
 0x215   : > { %3357 = vmatpush1.msra.mxu1 %v1589_v8  ;;  %3287 = vmatprep.subr.mxu0 %v1326_v10  ;;  %v1758_v4 = vld [vmem:[%s5547_s25 + $0x2e58] sm:$0xff]  ;;  %v1757_v6 = vld [vmem:[%s5547_s25 + $0x2e50] sm:$0xff] }
 0x216   : > { %3358 = vmatprep.subr.mxu1 %v1582_v12  ;;  %3288 = vmatpush1.msra.mxu0 %v1325_v13  ;;  %v1494_v7 = vld [vmem:[%s5547_s25 + $0x2618] sm:$0xff]  ;;  %v1493_v10 = vld [vmem:[%s5547_s25 + $0x2610] sm:$0xff] }
 0x217   : > { %3359 = vmatpush1.msra.mxu1 %v1581_v14  ;;  %3289 = vmatprep.subr.mxu0 %v1318_v15  ;;  %v1750_v8 = vld [vmem:[%s5547_s25 + $0x2e18] sm:$0xff]  ;;  %v1749_v12 = vld [vmem:[%s5547_s25 + $0x2e10] sm:$0xff] }
 0x218   : > { %3360 = vmatprep.subr.mxu1 %v1574_v16  ;;  %3290 = vmatpush1.msra.mxu0 %v1317_v18  ;;  %v1486_v13 = vld [vmem:[%s5547_s25 + $0x25d8] sm:$0xff]  ;;  %v1485_v15 = vld [vmem:[%s5547_s25 + $0x25d0] sm:$0xff] }
 0x219   : > { %3361 = vmatpush1.msra.mxu1 %v1573_v19  ;;  %3291 = vmatprep.subr.mxu0 %v1310_v21  ;;  %v1742_v14 = vld [vmem:[%s5547_s25 + $0x2dd8] sm:$0xff]  ;;  %v1741_v16 = vld [vmem:[%s5547_s25 + $0x2dd0] sm:$0xff] }
 0x21a   : > { %3362 = vmatprep.subr.mxu1 %v1566_v23  ;;  %3292 = vmatpush1.msra.mxu0 %v1309_v24  ;;  %v1478_v18 = vld [vmem:[%s5547_s25 + $0x2598] sm:$0xff]  ;;  %v1477_v21 = vld [vmem:[%s5547_s25 + $0x2590] sm:$0xff] }
 0x21b   : > { %3363 = vmatpush1.msra.mxu1 %v1565_v25  ;;  %3293 = vmatprep.subr.mxu0 %v1302_v28  ;;  %v1734_v19 = vld [vmem:[%s5547_s25 + $0x2d98] sm:$0xff]  ;;  %v1733_v23 = vld [vmem:[%s5547_s25 + $0x2d90] sm:$0xff] }
 0x21c   : > { %3364 = vmatprep.subr.mxu1 %v1558_v29  ;;  %3294 = vmatpush1.msra.mxu0 %v1301_v31  ;;  %v1470_v24 = vld [vmem:[%s5547_s25 + $0x2558] sm:$0xff]  ;;  %v1469_v28 = vld [vmem:[%s5547_s25 + $0x2550] sm:$0xff] }
 0x21d   : > { %3365 = vmatpush1.msra.mxu1 %v1557_v32  ;;  %3295 = vmatprep.subr.mxu0 %v1550_v34  ;;  %v1726_v25 = vld [vmem:[%s5547_s25 + $0x2d58] sm:$0xff]  ;;  %v1725_v29 = vld [vmem:[%s5547_s25 + $0x2d50] sm:$0xff] }
 0x21e   : > { %3366 = vmatprep.subr.mxu1 %v1806_v35  ;;  %3296 = vmatpush2.msra.mxu0 %v1549_v37  ;;  %v1462_v31 = vld [vmem:[%s5547_s25 + $0x2518] sm:$0xff]  ;;  %v1461_v34 = vld [vmem:[%s5547_s25 + $0x2510] sm:$0xff] }
 0x21f   : > { %3367 = vmatpush2.msra.mxu1 %v1805_v38  ;;  %3297 = vmatprep.subr.mxu0 %v1542_v39  ;;  %v1718_v32 = vld [vmem:[%s5547_s25 + $0x2d18] sm:$0xff]  ;;  %v1717_v35 = vld [vmem:[%s5547_s25 + $0x2d10] sm:$0xff] }
 0x220   : > { %3368 = vmatprep.subr.mxu1 %v1798_v40  ;;  %3298 = vmatpush2.msra.mxu0 %v1541_v41  ;;  %v1454_v37 = vld [vmem:[%s5547_s25 + $0x24d8] sm:$0xff]  ;;  %v1453_v39 = vld [vmem:[%s5547_s25 + $0x24d0] sm:$0xff] }
 0x221   : > { %3369 = vmatpush2.msra.mxu1 %v1797_v42  ;;  %3299 = vmatprep.subr.mxu0 %v1534_v45  ;;  %v1710_v38 = vld [vmem:[%s5547_s25 + $0x2cd8] sm:$0xff]  ;;  %v1709_v40 = vld [vmem:[%s5547_s25 + $0x2cd0] sm:$0xff] }
 0x222   : > { %3370 = vmatprep.subr.mxu1 %v1790_v46  ;;  %3300 = vmatpush2.msra.mxu0 %v1533_v47  ;;  %v1446_v41 = vld [vmem:[%s5547_s25 + $0x2498] sm:$0xff]  ;;  %v1445_v45 = vld [vmem:[%s5547_s25 + $0x2490] sm:$0xff] }
 0x223   : > { %3371 = vmatpush2.msra.mxu1 %v1789_v48  ;;  %3301 = vmatprep.subr.mxu0 %v1526_v50  ;;  %v1702_v42 = vld [vmem:[%s5547_s25 + $0x2c98] sm:$0xff]  ;;  %v1701_v46 = vld [vmem:[%s5547_s25 + $0x2c90] sm:$0xff] }
 0x224   : > { %3372 = vmatprep.subr.mxu1 %v1782_v51  ;;  %3302 = vmatpush2.msra.mxu0 %v1525_v52  ;;  %v1438_v47 = vld [vmem:[%s5547_s25 + $0x2458] sm:$0xff]  ;;  %v1437_v50 = vld [vmem:[%s5547_s25 + $0x2450] sm:$0xff] }
 0x225   : > { %3373 = vmatpush2.msra.mxu1 %v1781_v54  ;;  %3303 = vmatprep.subr.mxu0 %v1518_v56  ;;  %v1694_v48 = vld [vmem:[%s5547_s25 + $0x2c58] sm:$0xff]  ;;  %v1693_v51 = vld [vmem:[%s5547_s25 + $0x2c50] sm:$0xff] }
 0x226   : > { %3374 = vmatprep.subr.mxu1 %v1774_v57  ;;  %3304 = vmatpush2.msra.mxu0 %v1517_v59  ;;  %v1430_v52 = vld [vmem:[%s5547_s25 + $0x2418] sm:$0xff]  ;;  %v1429_v56 = vld [vmem:[%s5547_s25 + $0x2410] sm:$0xff] }
 0x227   : > { %3375 = vmatpush2.msra.mxu1 %v1773_v60  ;;  %3305 = vmatprep.subr.mxu0 %v1510_v61  ;;  %v1686_v54 = vld [vmem:[%s5547_s25 + $0x2c18] sm:$0xff]  ;;  %v1685_v57 = vld [vmem:[%s5547_s25 + $0x2c10] sm:$0xff] }
 0x228   : > { %3376 = vmatprep.subr.mxu1 %v1766_v62  ;;  %3306 = vmatpush2.msra.mxu0 %v1509_v0  ;;  %v1934_v59 = vld [vmem:[%s5547_s25 + $0x33d8] sm:$0xff]  ;;  %v1933_v61 = vld [vmem:[%s5547_s25 + $0x33d0] sm:$0xff] }
 0x229   : > { %3377 = vmatpush2.msra.mxu1 %v1765_v1  ;;  %3307 = vmatprep.subr.mxu0 %v1502_v3  ;;  %v2190_v60 = vld [vmem:[%s5547_s25 + $0x3bd8] sm:$0xff]  ;;  %v2189_v62 = vld [vmem:[%s5547_s25 + $0x3bd0] sm:$0xff] }
 0x22a   : > { %3378 = vmatprep.subr.mxu1 %v1758_v4  ;;  %3308 = vmatpush2.msra.mxu0 %v1501_v5  ;;  %v1926_v0 = vld [vmem:[%s5547_s25 + $0x3398] sm:$0xff]  ;;  %v1925_v3 = vld [vmem:[%s5547_s25 + $0x3390] sm:$0xff] }
 0x22b   : > { %3379 = vmatpush2.msra.mxu1 %v1757_v6  ;;  %3309 = vmatprep.subr.mxu0 %v1494_v7  ;;  %v2182_v1 = vld [vmem:[%s5547_s25 + $0x3b98] sm:$0xff]  ;;  %v2181_v4 = vld [vmem:[%s5547_s25 + $0x3b90] sm:$0xff] }
 0x22c   : > { %3380 = vmatprep.subr.mxu1 %v1750_v8  ;;  %3310 = vmatpush2.msra.mxu0 %v1493_v10  ;;  %v1918_v5 = vld [vmem:[%s5547_s25 + $0x3358] sm:$0xff]  ;;  %v1917_v7 = vld [vmem:[%s5547_s25 + $0x3350] sm:$0xff] }
 0x22d   : > { %3381 = vmatpush2.msra.mxu1 %v1749_v12  ;;  %3311 = vmatprep.subr.mxu0 %v1486_v13  ;;  %v2174_v6 = vld [vmem:[%s5547_s25 + $0x3b58] sm:$0xff]  ;;  %v2173_v8 = vld [vmem:[%s5547_s25 + $0x3b50] sm:$0xff] }
 0x22e   : > { %3382 = vmatprep.subr.mxu1 %v1742_v14  ;;  %3312 = vmatpush2.msra.mxu0 %v1485_v15  ;;  %v1910_v10 = vld [vmem:[%s5547_s25 + $0x3318] sm:$0xff]  ;;  %v1909_v13 = vld [vmem:[%s5547_s25 + $0x3310] sm:$0xff] }
 0x22f   : > { %3383 = vmatpush2.msra.mxu1 %v1741_v16  ;;  %3313 = vmatprep.subr.mxu0 %v1478_v18  ;;  %v2166_v12 = vld [vmem:[%s5547_s25 + $0x3b18] sm:$0xff]  ;;  %v2165_v14 = vld [vmem:[%s5547_s25 + $0x3b10] sm:$0xff] }
 0x230   : > { %3384 = vmatprep.subr.mxu1 %v1734_v19  ;;  %3314 = vmatpush2.msra.mxu0 %v1477_v21  ;;  %v1902_v15 = vld [vmem:[%s5547_s25 + $0x32d8] sm:$0xff]  ;;  %v1901_v18 = vld [vmem:[%s5547_s25 + $0x32d0] sm:$0xff] }
 0x231   : > { %3385 = vmatpush2.msra.mxu1 %v1733_v23  ;;  %3315 = vmatprep.subr.mxu0 %v1470_v24  ;;  %v2158_v16 = vld [vmem:[%s5547_s25 + $0x3ad8] sm:$0xff]  ;;  %v2157_v19 = vld [vmem:[%s5547_s25 + $0x3ad0] sm:$0xff] }
 0x232   : > { %3386 = vmatprep.subr.mxu1 %v1726_v25  ;;  %3316 = vmatpush2.msra.mxu0 %v1469_v28  ;;  %v1894_v21 = vld [vmem:[%s5547_s25 + $0x3298] sm:$0xff]  ;;  %v1893_v24 = vld [vmem:[%s5547_s25 + $0x3290] sm:$0xff] }
 0x233   : > { %3387 = vmatpush2.msra.mxu1 %v1725_v29  ;;  %3317 = vmatprep.subr.mxu0 %v1462_v31  ;;  %v2150_v23 = vld [vmem:[%s5547_s25 + $0x3a98] sm:$0xff]  ;;  %v2149_v25 = vld [vmem:[%s5547_s25 + $0x3a90] sm:$0xff] }
 0x234   : > { %3388 = vmatprep.subr.mxu1 %v1718_v32  ;;  %3318 = vmatpush2.msra.mxu0 %v1461_v34  ;;  %v1886_v28 = vld [vmem:[%s5547_s25 + $0x3258] sm:$0xff]  ;;  %v1885_v31 = vld [vmem:[%s5547_s25 + $0x3250] sm:$0xff] }
 0x235   : > { %3389 = vmatpush2.msra.mxu1 %v1717_v35  ;;  %3319 = vmatprep.subr.mxu0 %v1454_v37  ;;  %v2142_v29 = vld [vmem:[%s5547_s25 + $0x3a58] sm:$0xff]  ;;  %v2141_v32 = vld [vmem:[%s5547_s25 + $0x3a50] sm:$0xff] }
 0x236   : > { %3390 = vmatprep.subr.mxu1 %v1710_v38  ;;  %3320 = vmatpush2.msra.mxu0 %v1453_v39  ;;  %v1878_v34 = vld [vmem:[%s5547_s25 + $0x3218] sm:$0xff]  ;;  %v1877_v37 = vld [vmem:[%s5547_s25 + $0x3210] sm:$0xff] }
 0x237   : > { %3391 = vmatpush2.msra.mxu1 %v1709_v40  ;;  %3321 = vmatprep.subr.mxu0 %v1446_v41  ;;  %v2134_v35 = vld [vmem:[%s5547_s25 + $0x3a18] sm:$0xff]  ;;  %v2133_v38 = vld [vmem:[%s5547_s25 + $0x3a10] sm:$0xff] }
 0x238   : > { %3392 = vmatprep.subr.mxu1 %v1702_v42  ;;  %3322 = vmatpush2.msra.mxu0 %v1445_v45  ;;  %v1870_v39 = vld [vmem:[%s5547_s25 + $0x31d8] sm:$0xff]  ;;  %v1869_v41 = vld [vmem:[%s5547_s25 + $0x31d0] sm:$0xff] }
 0x239   : > { %3393 = vmatpush2.msra.mxu1 %v1701_v46  ;;  %3323 = vmatprep.subr.mxu0 %v1438_v47  ;;  %v2126_v40 = vld [vmem:[%s5547_s25 + $0x39d8] sm:$0xff]  ;;  %v2125_v42 = vld [vmem:[%s5547_s25 + $0x39d0] sm:$0xff] }
 0x23a   : > { %3394 = vmatprep.subr.mxu1 %v1694_v48  ;;  %3324 = vmatpush2.msra.mxu0 %v1437_v50  ;;  %v1862_v45 = vld [vmem:[%s5547_s25 + $0x3198] sm:$0xff]  ;;  %v1861_v47 = vld [vmem:[%s5547_s25 + $0x3190] sm:$0xff] }
 0x23b   : > { %3395 = vmatpush2.msra.mxu1 %v1693_v51  ;;  %3325 = vmatprep.subr.mxu0 %v1430_v52  ;;  %v2118_v46 = vld [vmem:[%s5547_s25 + $0x3998] sm:$0xff]  ;;  %v2117_v48 = vld [vmem:[%s5547_s25 + $0x3990] sm:$0xff] }
 0x23c   : > { %3396 = vmatprep.subr.mxu1 %v1686_v54  ;;  %3326 = vmatpush2.msra.mxu0 %v1429_v56  ;;  %v1854_v50 = vld [vmem:[%s5547_s25 + $0x3158] sm:$0xff]  ;;  %v1853_v52 = vld [vmem:[%s5547_s25 + $0x3150] sm:$0xff] }
 0x23d   : > { %3327 = vmatprep.mubr.f32.mxu0 %v6011_v55  ;;  %3397 = vmatpush2.msra.mxu1 %v1685_v57  ;;  %v2110_v51 = vld [vmem:[%s5547_s25 + $0x3958] sm:$0xff]  ;;  %v2109_v54 = vld [vmem:[%s5547_s25 + $0x3950] sm:$0xff] }
 0x23e   : > { %3328 = vmatmul.mubr.f32.vlgmr.msra.gmra.mxu0 %v5996_v44  ;;  %3398 = vmatprep.mubr.f32.mxu1 %v6017_v58  ;;  %v1846_v56 = vld [vmem:[%s5547_s25 + $0x3118] sm:$0xff] }
 0x23f   : > { %3405 = vmatprep.subr.mxu0 %v1934_v59  ;;  %3476 = vmatprep.subr.mxu1 %v2190_v60  ;;  %v2102_v57 = vld [vmem:[%s5547_s25 + $0x3918] sm:$0xff]  ;;  %v1845_v59 = vld [vmem:[%s5547_s25 + $0x3110] sm:$0xff] }
 0x240   : > { %3399 = vmatmul.mubr.f32.vlgmr.msra.gmra.mxu1 %v6003_v49  ;;  %3406 = vmatpush1.msra.mxu0 %v1933_v61  ;;  %v2101_v60 = vld [vmem:[%s5547_s25 + $0x3910] sm:$0xff]  ;;  %v1838_v61 = vld [vmem:[%s5547_s25 + $0x30d8] sm:$0xff] }
 0x241   : > { %3477 = vmatpush1.msra.mxu1 %v2189_v62  ;;  %3407 = vmatprep.subr.mxu0 %v1926_v0  ;;  %v2094_v62 = vld [vmem:[%s5547_s25 + $0x38d8] sm:$0xff]  ;;  %v1837_v0 = vld [vmem:[%s5547_s25 + $0x30d0] sm:$0xff] }
 0x242   : > { %3478 = vmatprep.subr.mxu1 %v2182_v1  ;;  %3408 = vmatpush1.msra.mxu0 %v1925_v3  ;;  %v2093_v1 = vld [vmem:[%s5547_s25 + $0x38d0] sm:$0xff]  ;;  %v1830_v3 = vld [vmem:[%s5547_s25 + $0x3098] sm:$0xff] }
 0x243   : > { %3479 = vmatpush1.msra.mxu1 %v2181_v4  ;;  %3409 = vmatprep.subr.mxu0 %v1918_v5  ;;  %v2086_v4 = vld [vmem:[%s5547_s25 + $0x3898] sm:$0xff]  ;;  %v1829_v5 = vld [vmem:[%s5547_s25 + $0x3090] sm:$0xff] }
 0x244   : > { %3480 = vmatprep.subr.mxu1 %v2174_v6  ;;  %3410 = vmatpush1.msra.mxu0 %v1917_v7  ;;  %v2085_v6 = vld [vmem:[%s5547_s25 + $0x3890] sm:$0xff]  ;;  %v1822_v7 = vld [vmem:[%s5547_s25 + $0x3058] sm:$0xff] }
 0x245   : > { %3481 = vmatpush1.msra.mxu1 %v2173_v8  ;;  %3411 = vmatprep.subr.mxu0 %v1910_v10  ;;  %v2078_v8 = vld [vmem:[%s5547_s25 + $0x3858] sm:$0xff]  ;;  %v1821_v10 = vld [vmem:[%s5547_s25 + $0x3050] sm:$0xff] }
 0x246   : > { %3482 = vmatprep.subr.mxu1 %v2166_v12  ;;  %3412 = vmatpush1.msra.mxu0 %v1909_v13  ;;  %v2077_v12 = vld [vmem:[%s5547_s25 + $0x3850] sm:$0xff]  ;;  %v1814_v13 = vld [vmem:[%s5547_s25 + $0x3018] sm:$0xff] }
 0x247   : > { %3483 = vmatpush1.msra.mxu1 %v2165_v14  ;;  %3413 = vmatprep.subr.mxu0 %v1902_v15  ;;  %v2070_v14 = vld [vmem:[%s5547_s25 + $0x3818] sm:$0xff]  ;;  %v1813_v15 = vld [vmem:[%s5547_s25 + $0x3010] sm:$0xff] }
 0x248   : > { %3484 = vmatprep.subr.mxu1 %v2158_v16  ;;  %3414 = vmatpush1.msra.mxu0 %v1901_v18  ;;  %v2069_v16 = vld [vmem:[%s5547_s25 + $0x3810] sm:$0xff]  ;;  %v2062_v18 = vld [vmem:[%s5547_s25 + $0x37d8] sm:$0xff] }
 0x249   : > { %3485 = vmatpush1.msra.mxu1 %v2157_v19  ;;  %3415 = vmatprep.subr.mxu0 %v1894_v21  ;;  %v2318_v19 = vld [vmem:[%s5547_s25 + $0x3fd8] sm:$0xff]  ;;  %v2061_v21 = vld [vmem:[%s5547_s25 + $0x37d0] sm:$0xff] }
 0x24a   : > { %3486 = vmatprep.subr.mxu1 %v2150_v23  ;;  %3416 = vmatpush1.msra.mxu0 %v1893_v24  ;;  %v2317_v23 = vld [vmem:[%s5547_s25 + $0x3fd0] sm:$0xff]  ;;  %v2054_v24 = vld [vmem:[%s5547_s25 + $0x3798] sm:$0xff] }
 0x24b   : > { %3487 = vmatpush1.msra.mxu1 %v2149_v25  ;;  %3417 = vmatprep.subr.mxu0 %v1886_v28  ;;  %v2310_v25 = vld [vmem:[%s5547_s25 + $0x3f98] sm:$0xff]  ;;  %v2053_v28 = vld [vmem:[%s5547_s25 + $0x3790] sm:$0xff] }
 0x24c   : > { %3488 = vmatprep.subr.mxu1 %v2142_v29  ;;  %3418 = vmatpush1.msra.mxu0 %v1885_v31  ;;  %v2309_v29 = vld [vmem:[%s5547_s25 + $0x3f90] sm:$0xff]  ;;  %v2046_v31 = vld [vmem:[%s5547_s25 + $0x3758] sm:$0xff] }
 0x24d   : > { %3489 = vmatpush1.msra.mxu1 %v2141_v32  ;;  %3419 = vmatprep.subr.mxu0 %v1878_v34  ;;  %v2302_v32 = vld [vmem:[%s5547_s25 + $0x3f58] sm:$0xff]  ;;  %v2045_v34 = vld [vmem:[%s5547_s25 + $0x3750] sm:$0xff] }
 0x24e   : > { %3490 = vmatprep.subr.mxu1 %v2134_v35  ;;  %3420 = vmatpush1.msra.mxu0 %v1877_v37  ;;  %v2301_v35 = vld [vmem:[%s5547_s25 + $0x3f50] sm:$0xff]  ;;  %v2038_v37 = vld [vmem:[%s5547_s25 + $0x3718] sm:$0xff] }
 0x24f   : > { %3491 = vmatpush1.msra.mxu1 %v2133_v38  ;;  %3421 = vmatprep.subr.mxu0 %v1870_v39  ;;  %v2294_v38 = vld [vmem:[%s5547_s25 + $0x3f18] sm:$0xff]  ;;  %v2037_v39 = vld [vmem:[%s5547_s25 + $0x3710] sm:$0xff] }
 0x250   : > { %3492 = vmatprep.subr.mxu1 %v2126_v40  ;;  %3422 = vmatpush1.msra.mxu0 %v1869_v41  ;;  %v2293_v40 = vld [vmem:[%s5547_s25 + $0x3f10] sm:$0xff]  ;;  %v2030_v41 = vld [vmem:[%s5547_s25 + $0x36d8] sm:$0xff] }
 0x251   : > { %3493 = vmatpush1.msra.mxu1 %v2125_v42  ;;  %3423 = vmatprep.subr.mxu0 %v1862_v45  ;;  %v2286_v42 = vld [vmem:[%s5547_s25 + $0x3ed8] sm:$0xff]  ;;  %v2029_v45 = vld [vmem:[%s5547_s25 + $0x36d0] sm:$0xff] }
 0x252   : > { %3494 = vmatprep.subr.mxu1 %v2118_v46  ;;  %3424 = vmatpush1.msra.mxu0 %v1861_v47  ;;  %v2285_v46 = vld [vmem:[%s5547_s25 + $0x3ed0] sm:$0xff]  ;;  %v2022_v47 = vld [vmem:[%s5547_s25 + $0x3698] sm:$0xff] }
 0x253   : > { %3495 = vmatpush1.msra.mxu1 %v2117_v48  ;;  %3425 = vmatprep.subr.mxu0 %v1854_v50  ;;  %v2278_v48 = vld [vmem:[%s5547_s25 + $0x3e98] sm:$0xff]  ;;  %v2021_v50 = vld [vmem:[%s5547_s25 + $0x3690] sm:$0xff] }
 0x254   : > { %3496 = vmatprep.subr.mxu1 %v2110_v51  ;;  %3426 = vmatpush1.msra.mxu0 %v1853_v52  ;;  %v2277_v51 = vld [vmem:[%s5547_s25 + $0x3e90] sm:$0xff]  ;;  %v2014_v52 = vld [vmem:[%s5547_s25 + $0x3658] sm:$0xff] }
 0x255   : > { %3497 = vmatpush1.msra.mxu1 %v2109_v54  ;;  %3427 = vmatprep.subr.mxu0 %v1846_v56  ;;  %v2270_v54 = vld [vmem:[%s5547_s25 + $0x3e58] sm:$0xff]  ;;  %v2013_v56 = vld [vmem:[%s5547_s25 + $0x3650] sm:$0xff] }
 0x256   : > { %3498 = vmatprep.subr.mxu1 %v2102_v57  ;;  %3428 = vmatpush1.msra.mxu0 %v1845_v59  ;;  %v2269_v57 = vld [vmem:[%s5547_s25 + $0x3e50] sm:$0xff]  ;;  %v2006_v59 = vld [vmem:[%s5547_s25 + $0x3618] sm:$0xff] }
 0x257   : > { %3499 = vmatpush1.msra.mxu1 %v2101_v60  ;;  %3429 = vmatprep.subr.mxu0 %v1838_v61  ;;  %v2262_v60 = vld [vmem:[%s5547_s25 + $0x3e18] sm:$0xff]  ;;  %v2005_v61 = vld [vmem:[%s5547_s25 + $0x3610] sm:$0xff] }
 0x258   : > { %3500 = vmatprep.subr.mxu1 %v2094_v62  ;;  %3430 = vmatpush1.msra.mxu0 %v1837_v0  ;;  %v2261_v62 = vld [vmem:[%s5547_s25 + $0x3e10] sm:$0xff]  ;;  %v1998_v0 = vld [vmem:[%s5547_s25 + $0x35d8] sm:$0xff] }
 0x259   : > { %3501 = vmatpush1.msra.mxu1 %v2093_v1  ;;  %3431 = vmatprep.subr.mxu0 %v1830_v3  ;;  %v2254_v1 = vld [vmem:[%s5547_s25 + $0x3dd8] sm:$0xff]  ;;  %v1997_v3 = vld [vmem:[%s5547_s25 + $0x35d0] sm:$0xff] }
 0x25a   : > { %3502 = vmatprep.subr.mxu1 %v2086_v4  ;;  %3432 = vmatpush1.msra.mxu0 %v1829_v5  ;;  %v2253_v4 = vld [vmem:[%s5547_s25 + $0x3dd0] sm:$0xff]  ;;  %v1990_v5 = vld [vmem:[%s5547_s25 + $0x3598] sm:$0xff] }
 0x25b   : > { %3503 = vmatpush1.msra.mxu1 %v2085_v6  ;;  %3433 = vmatprep.subr.mxu0 %v1822_v7  ;;  %v2246_v6 = vld [vmem:[%s5547_s25 + $0x3d98] sm:$0xff]  ;;  %v1989_v7 = vld [vmem:[%s5547_s25 + $0x3590] sm:$0xff] }
 0x25c   : > { %3504 = vmatprep.subr.mxu1 %v2078_v8  ;;  %3434 = vmatpush1.msra.mxu0 %v1821_v10  ;;  %v2245_v8 = vld [vmem:[%s5547_s25 + $0x3d90] sm:$0xff]  ;;  %v1982_v10 = vld [vmem:[%s5547_s25 + $0x3558] sm:$0xff] }
 0x25d   : > { %3505 = vmatpush1.msra.mxu1 %v2077_v12  ;;  %3435 = vmatprep.subr.mxu0 %v1814_v13  ;;  %v2238_v12 = vld [vmem:[%s5547_s25 + $0x3d58] sm:$0xff]  ;;  %v1981_v13 = vld [vmem:[%s5547_s25 + $0x3550] sm:$0xff] }
 0x25e   : > { %3506 = vmatprep.subr.mxu1 %v2070_v14  ;;  %3436 = vmatpush1.msra.mxu0 %v1813_v15  ;;  %v2237_v14 = vld [vmem:[%s5547_s25 + $0x3d50] sm:$0xff]  ;;  %v1974_v15 = vld [vmem:[%s5547_s25 + $0x3518] sm:$0xff] }
 0x25f   : > { %3507 = vmatpush1.msra.mxu1 %v2069_v16  ;;  %3437 = vmatprep.subr.mxu0 %v2062_v18  ;;  %v2230_v16 = vld [vmem:[%s5547_s25 + $0x3d18] sm:$0xff]  ;;  %v1973_v18 = vld [vmem:[%s5547_s25 + $0x3510] sm:$0xff] }
 0x260   : > { %3508 = vmatprep.subr.mxu1 %v2318_v19  ;;  %3438 = vmatpush2.msra.mxu0 %v2061_v21  ;;  %v2229_v19 = vld [vmem:[%s5547_s25 + $0x3d10] sm:$0xff]  ;;  %v1966_v21 = vld [vmem:[%s5547_s25 + $0x34d8] sm:$0xff] }
 0x261   : > { %3509 = vmatpush2.msra.mxu1 %v2317_v23  ;;  %3439 = vmatprep.subr.mxu0 %v2054_v24  ;;  %v2222_v23 = vld [vmem:[%s5547_s25 + $0x3cd8] sm:$0xff]  ;;  %v1965_v24 = vld [vmem:[%s5547_s25 + $0x34d0] sm:$0xff] }
 0x262   : > { %3510 = vmatprep.subr.mxu1 %v2310_v25  ;;  %3440 = vmatpush2.msra.mxu0 %v2053_v28  ;;  %v2221_v25 = vld [vmem:[%s5547_s25 + $0x3cd0] sm:$0xff]  ;;  %v1958_v28 = vld [vmem:[%s5547_s25 + $0x3498] sm:$0xff] }
 0x263   : > { %3511 = vmatpush2.msra.mxu1 %v2309_v29  ;;  %3441 = vmatprep.subr.mxu0 %v2046_v31  ;;  %v2214_v29 = vld [vmem:[%s5547_s25 + $0x3c98] sm:$0xff]  ;;  %v1957_v31 = vld [vmem:[%s5547_s25 + $0x3490] sm:$0xff] }
 0x264   : > { %3512 = vmatprep.subr.mxu1 %v2302_v32  ;;  %3442 = vmatpush2.msra.mxu0 %v2045_v34  ;;  %v2213_v32 = vld [vmem:[%s5547_s25 + $0x3c90] sm:$0xff]  ;;  %v1950_v34 = vld [vmem:[%s5547_s25 + $0x3458] sm:$0xff] }
 0x265   : > { %3513 = vmatpush2.msra.mxu1 %v2301_v35  ;;  %3443 = vmatprep.subr.mxu0 %v2038_v37  ;;  %v2206_v35 = vld [vmem:[%s5547_s25 + $0x3c58] sm:$0xff]  ;;  %v1949_v37 = vld [vmem:[%s5547_s25 + $0x3450] sm:$0xff] }
 0x266   : > { %3514 = vmatprep.subr.mxu1 %v2294_v38  ;;  %3444 = vmatpush2.msra.mxu0 %v2037_v39  ;;  %v2205_v38 = vld [vmem:[%s5547_s25 + $0x3c50] sm:$0xff]  ;;  %v1942_v39 = vld [vmem:[%s5547_s25 + $0x3418] sm:$0xff] }
 0x267   : > { %3515 = vmatpush2.msra.mxu1 %v2293_v40  ;;  %3445 = vmatprep.subr.mxu0 %v2030_v41  ;;  %v2198_v40 = vld [vmem:[%s5547_s25 + $0x3c18] sm:$0xff]  ;;  %v1941_v41 = vld [vmem:[%s5547_s25 + $0x3410] sm:$0xff] }
 0x268   : > { %3516 = vmatprep.subr.mxu1 %v2286_v42  ;;  %3446 = vmatpush2.msra.mxu0 %v2029_v45  ;;  %v2197_v42 = vld [vmem:[%s5547_s25 + $0x3c10] sm:$0xff]  ;;  %v400_v45 = vld [vmem:[%s5547_s25 + $0x3e8] sm:$0xff] }
 0x269   : > { %3517 = vmatpush2.msra.mxu1 %v2285_v46  ;;  %3447 = vmatprep.subr.mxu0 %v2022_v47  ;;  %v656_v46 = vld [vmem:[%s5547_s25 + $0xbe8] sm:$0xff]  ;;  %v399_v47 = vld [vmem:[%s5547_s25 + $0x3e0] sm:$0xff] }
 0x26a   : > { %3518 = vmatprep.subr.mxu1 %v2278_v48  ;;  %3448 = vmatpush2.msra.mxu0 %v2021_v50  ;;  %v655_v48 = vld [vmem:[%s5547_s25 + $0xbe0] sm:$0xff]  ;;  %v392_v50 = vld [vmem:[%s5547_s25 + $0x3a8] sm:$0xff] }
 0x26b   : > { %3519 = vmatpush2.msra.mxu1 %v2277_v51  ;;  %3449 = vmatprep.subr.mxu0 %v2014_v52  ;;  %v648_v51 = vld [vmem:[%s5547_s25 + $0xba8] sm:$0xff]  ;;  %v391_v52 = vld [vmem:[%s5547_s25 + $0x3a0] sm:$0xff] }
 0x26c   : > { %3520 = vmatprep.subr.mxu1 %v2270_v54  ;;  %3450 = vmatpush2.msra.mxu0 %v2013_v56  ;;  %v647_v54 = vld [vmem:[%s5547_s25 + $0xba0] sm:$0xff]  ;;  %v384_v56 = vld [vmem:[%s5547_s25 + $0x368] sm:$0xff] }
 0x26d   : > { %3521 = vmatpush2.msra.mxu1 %v2269_v57  ;;  %3451 = vmatprep.subr.mxu0 %v2006_v59  ;;  %v640_v57 = vld [vmem:[%s5547_s25 + $0xb68] sm:$0xff]  ;;  %v383_v59 = vld [vmem:[%s5547_s25 + $0x360] sm:$0xff] }
 0x26e   : > { %3522 = vmatprep.subr.mxu1 %v2262_v60  ;;  %3452 = vmatpush2.msra.mxu0 %v2005_v61  ;;  %v639_v60 = vld [vmem:[%s5547_s25 + $0xb60] sm:$0xff]  ;;  %v376_v61 = vld [vmem:[%s5547_s25 + $0x328] sm:$0xff] }
 0x26f   : > { %3523 = vmatpush2.msra.mxu1 %v2261_v62  ;;  %3453 = vmatprep.subr.mxu0 %v1998_v0  ;;  %v632_v62 = vld [vmem:[%s5547_s25 + $0xb28] sm:$0xff]  ;;  %v375_v0 = vld [vmem:[%s5547_s25 + $0x320] sm:$0xff] }
 0x270   : > { %3524 = vmatprep.subr.mxu1 %v2254_v1  ;;  %3454 = vmatpush2.msra.mxu0 %v1997_v3  ;;  %v631_v1 = vld [vmem:[%s5547_s25 + $0xb20] sm:$0xff]  ;;  %v368_v3 = vld [vmem:[%s5547_s25 + $0x2e8] sm:$0xff] }
 0x271   : > { %3525 = vmatpush2.msra.mxu1 %v2253_v4  ;;  %3455 = vmatprep.subr.mxu0 %v1990_v5  ;;  %v624_v4 = vld [vmem:[%s5547_s25 + $0xae8] sm:$0xff]  ;;  %v367_v5 = vld [vmem:[%s5547_s25 + $0x2e0] sm:$0xff] }
 0x272   : > { %3526 = vmatprep.subr.mxu1 %v2246_v6  ;;  %3456 = vmatpush2.msra.mxu0 %v1989_v7  ;;  %v623_v6 = vld [vmem:[%s5547_s25 + $0xae0] sm:$0xff]  ;;  %v360_v7 = vld [vmem:[%s5547_s25 + $0x2a8] sm:$0xff] }
 0x273   : > { %3527 = vmatpush2.msra.mxu1 %v2245_v8  ;;  %3457 = vmatprep.subr.mxu0 %v1982_v10  ;;  %v616_v8 = vld [vmem:[%s5547_s25 + $0xaa8] sm:$0xff]  ;;  %v359_v10 = vld [vmem:[%s5547_s25 + $0x2a0] sm:$0xff] }
 0x274   : > { %3528 = vmatprep.subr.mxu1 %v2238_v12  ;;  %3458 = vmatpush2.msra.mxu0 %v1981_v13  ;;  %v615_v12 = vld [vmem:[%s5547_s25 + $0xaa0] sm:$0xff]  ;;  %v352_v13 = vld [vmem:[%s5547_s25 + $0x268] sm:$0xff] }
 0x275   : > { %3529 = vmatpush2.msra.mxu1 %v2237_v14  ;;  %3459 = vmatprep.subr.mxu0 %v1974_v15  ;;  %v608_v14 = vld [vmem:[%s5547_s25 + $0xa68] sm:$0xff]  ;;  %v351_v15 = vld [vmem:[%s5547_s25 + $0x260] sm:$0xff] }
 0x276   : > { %3530 = vmatprep.subr.mxu1 %v2230_v16  ;;  %3460 = vmatpush2.msra.mxu0 %v1973_v18  ;;  %v607_v16 = vld [vmem:[%s5547_s25 + $0xa60] sm:$0xff]  ;;  %v344_v18 = vld [vmem:[%s5547_s25 + $0x228] sm:$0xff] }
 0x277   : > { %3531 = vmatpush2.msra.mxu1 %v2229_v19  ;;  %3461 = vmatprep.subr.mxu0 %v1966_v21  ;;  %v600_v19 = vld [vmem:[%s5547_s25 + $0xa28] sm:$0xff]  ;;  %v343_v21 = vld [vmem:[%s5547_s25 + $0x220] sm:$0xff] }
 0x278   : > { %3532 = vmatprep.subr.mxu1 %v2222_v23  ;;  %3462 = vmatpush2.msra.mxu0 %v1965_v24  ;;  %v599_v23 = vld [vmem:[%s5547_s25 + $0xa20] sm:$0xff]  ;;  %v336_v24 = vld [vmem:[%s5547_s25 + $0x1e8] sm:$0xff] }
 0x279   : > { %3533 = vmatpush2.msra.mxu1 %v2221_v25  ;;  %3463 = vmatprep.subr.mxu0 %v1958_v28  ;;  %v592_v25 = vld [vmem:[%s5547_s25 + $0x9e8] sm:$0xff]  ;;  %v335_v28 = vld [vmem:[%s5547_s25 + $0x1e0] sm:$0xff] }
 0x27a   : > { %3534 = vmatprep.subr.mxu1 %v2214_v29  ;;  %3464 = vmatpush2.msra.mxu0 %v1957_v31  ;;  %v591_v29 = vld [vmem:[%s5547_s25 + $0x9e0] sm:$0xff]  ;;  %v328_v31 = vld [vmem:[%s5547_s25 + $0x1a8] sm:$0xff] }
 0x27b   : > { %3535 = vmatpush2.msra.mxu1 %v2213_v32  ;;  %3465 = vmatprep.subr.mxu0 %v1950_v34  ;;  %v584_v32 = vld [vmem:[%s5547_s25 + $0x9a8] sm:$0xff]  ;;  %v327_v34 = vld [vmem:[%s5547_s25 + $0x1a0] sm:$0xff] }
 0x27c   : > { %3536 = vmatprep.subr.mxu1 %v2206_v35  ;;  %3466 = vmatpush2.msra.mxu0 %v1949_v37  ;;  %v583_v35 = vld [vmem:[%s5547_s25 + $0x9a0] sm:$0xff]  ;;  %v320_v37 = vld [vmem:[%s5547_s25 + $0x168] sm:$0xff] }
 0x27d   : > { %3537 = vmatpush2.msra.mxu1 %v2205_v38  ;;  %3467 = vmatprep.subr.mxu0 %v1942_v39  ;;  %v576_v38 = vld [vmem:[%s5547_s25 + $0x968] sm:$0xff]  ;;  %v319_v39 = vld [vmem:[%s5547_s25 + $0x160] sm:$0xff] }
 0x27e   : > { %3538 = vmatprep.subr.mxu1 %v2198_v40  ;;  %3468 = vmatpush2.msra.mxu0 %v1941_v41  ;;  %v575_v40 = vld [vmem:[%s5547_s25 + $0x960] sm:$0xff]  ;;  %v312_v41 = vld [vmem:[%s5547_s25 + $0x128] sm:$0xff] }
 0x27f   : > { %3469 = vmatprep.mubr.f32.mxu0 %v6158_v33  ;;  %3539 = vmatpush2.msra.mxu1 %v2197_v42  ;;  %v568_v42 = vld [vmem:[%s5547_s25 + $0x928] sm:$0xff] }
 0x280   : > { %3470 = vmatmul.mubr.f32.vlgmr.msra.gmra.mxu0 %v6143_v20  ;;  %3540 = vmatprep.mubr.f32.mxu1 %v6164_v36 }
 0x281   : > { %3547 = vmatprep.subr.mxu0 %v400_v45  ;;  %3618 = vmatprep.subr.mxu1 %v656_v46  ;;  %v311_v45 = vld [vmem:[%s5547_s25 + $0x120] sm:$0xff] }
 0x282   : > { %3541 = vmatmul.mubr.f32.vlgmr.msra.gmra.mxu1 %v6150_v26  ;;  %3548 = vmatpush1.msra.mxu0 %v399_v47  ;;  %v567_v46 = vld [vmem:[%s5547_s25 + $0x920] sm:$0xff]  ;;  %v304_v47 = vld [vmem:[%s5547_s25 + $0xe8] sm:$0xff] }
 0x283   : > { %3619 = vmatpush1.msra.mxu1 %v655_v48  ;;  %3549 = vmatprep.subr.mxu0 %v392_v50  ;;  %v560_v48 = vld [vmem:[%s5547_s25 + $0x8e8] sm:$0xff]  ;;  %v303_v50 = vld [vmem:[%s5547_s25 + $0xe0] sm:$0xff] }
 0x284   : > { %3620 = vmatprep.subr.mxu1 %v648_v51  ;;  %3550 = vmatpush1.msra.mxu0 %v391_v52  ;;  %v559_v51 = vld [vmem:[%s5547_s25 + $0x8e0] sm:$0xff]  ;;  %v296_v52 = vld [vmem:[%s5547_s25 + $0xa8] sm:$0xff] }
 0x285   : > { %3621 = vmatpush1.msra.mxu1 %v647_v54  ;;  %3551 = vmatprep.subr.mxu0 %v384_v56  ;;  %v552_v54 = vld [vmem:[%s5547_s25 + $0x8a8] sm:$0xff]  ;;  %v295_v56 = vld [vmem:[%s5547_s25 + $0xa0] sm:$0xff] }
 0x286   : > { %3622 = vmatprep.subr.mxu1 %v640_v57  ;;  %3552 = vmatpush1.msra.mxu0 %v383_v59  ;;  %v551_v57 = vld [vmem:[%s5547_s25 + $0x8a0] sm:$0xff]  ;;  %v288_v59 = vld [vmem:[%s5547_s25 + $0x68] sm:$0xff] }
 0x287   : > { %3623 = vmatpush1.msra.mxu1 %v639_v60  ;;  %3553 = vmatprep.subr.mxu0 %v376_v61  ;;  %v544_v60 = vld [vmem:[%s5547_s25 + $0x868] sm:$0xff]  ;;  %v287_v61 = vld [vmem:[%s5547_s25 + $0x60] sm:$0xff] }
 0x288   : > { %3624 = vmatprep.subr.mxu1 %v632_v62  ;;  %3554 = vmatpush1.msra.mxu0 %v375_v0  ;;  %v543_v62 = vld [vmem:[%s5547_s25 + $0x860] sm:$0xff]  ;;  %v280_v0 = vld [vmem:[%s5547_s25 + $0x28] sm:$0xff] }
 0x289   : > { %3625 = vmatpush1.msra.mxu1 %v631_v1  ;;  %3555 = vmatprep.subr.mxu0 %v368_v3  ;;  %v536_v1 = vld [vmem:[%s5547_s25 + $0x828] sm:$0xff]  ;;  %v279_v3 = vld [vmem:[%s5547_s25 + $0x20] sm:$0xff] }
 0x28a   : > { %3626 = vmatprep.subr.mxu1 %v624_v4  ;;  %3556 = vmatpush1.msra.mxu0 %v367_v5  ;;  %v535_v4 = vld [vmem:[%s5547_s25 + $0x820] sm:$0xff]  ;;  %v528_v5 = vld [vmem:[%s5547_s25 + $0x7e8] sm:$0xff] }
 0x28b   : > { %3627 = vmatpush1.msra.mxu1 %v623_v6  ;;  %3557 = vmatprep.subr.mxu0 %v360_v7  ;;  %v784_v6 = vld [vmem:[%s5547_s25 + $0xfe8] sm:$0xff]  ;;  %v527_v7 = vld [vmem:[%s5547_s25 + $0x7e0] sm:$0xff] }
 0x28c   : > { %3628 = vmatprep.subr.mxu1 %v616_v8  ;;  %3558 = vmatpush1.msra.mxu0 %v359_v10  ;;  %v783_v8 = vld [vmem:[%s5547_s25 + $0xfe0] sm:$0xff]  ;;  %v520_v10 = vld [vmem:[%s5547_s25 + $0x7a8] sm:$0xff] }
 0x28d   : > { %3629 = vmatpush1.msra.mxu1 %v615_v12  ;;  %3559 = vmatprep.subr.mxu0 %v352_v13  ;;  %v776_v12 = vld [vmem:[%s5547_s25 + $0xfa8] sm:$0xff]  ;;  %v519_v13 = vld [vmem:[%s5547_s25 + $0x7a0] sm:$0xff] }
 0x28e   : > { %3630 = vmatprep.subr.mxu1 %v608_v14  ;;  %3560 = vmatpush1.msra.mxu0 %v351_v15  ;;  %v775_v14 = vld [vmem:[%s5547_s25 + $0xfa0] sm:$0xff]  ;;  %v512_v15 = vld [vmem:[%s5547_s25 + $0x768] sm:$0xff] }
 0x28f   : > { %3631 = vmatpush1.msra.mxu1 %v607_v16  ;;  %3561 = vmatprep.subr.mxu0 %v344_v18  ;;  %v768_v16 = vld [vmem:[%s5547_s25 + $0xf68] sm:$0xff]  ;;  %v511_v18 = vld [vmem:[%s5547_s25 + $0x760] sm:$0xff] }
 0x290   : > { %3632 = vmatprep.subr.mxu1 %v600_v19  ;;  %3562 = vmatpush1.msra.mxu0 %v343_v21  ;;  %v767_v19 = vld [vmem:[%s5547_s25 + $0xf60] sm:$0xff]  ;;  %v504_v21 = vld [vmem:[%s5547_s25 + $0x728] sm:$0xff] }
 0x291   : > { %3633 = vmatpush1.msra.mxu1 %v599_v23  ;;  %3563 = vmatprep.subr.mxu0 %v336_v24  ;;  %v760_v23 = vld [vmem:[%s5547_s25 + $0xf28] sm:$0xff]  ;;  %v503_v24 = vld [vmem:[%s5547_s25 + $0x720] sm:$0xff] }
 0x292   : > { %3634 = vmatprep.subr.mxu1 %v592_v25  ;;  %3564 = vmatpush1.msra.mxu0 %v335_v28  ;;  %v759_v25 = vld [vmem:[%s5547_s25 + $0xf20] sm:$0xff]  ;;  %v496_v28 = vld [vmem:[%s5547_s25 + $0x6e8] sm:$0xff] }
 0x293   : > { %3635 = vmatpush1.msra.mxu1 %v591_v29  ;;  %3565 = vmatprep.subr.mxu0 %v328_v31  ;;  %v752_v29 = vld [vmem:[%s5547_s25 + $0xee8] sm:$0xff]  ;;  %v495_v31 = vld [vmem:[%s5547_s25 + $0x6e0] sm:$0xff] }
 0x294   : > { %3636 = vmatprep.subr.mxu1 %v584_v32  ;;  %3566 = vmatpush1.msra.mxu0 %v327_v34  ;;  %v751_v32 = vld [vmem:[%s5547_s25 + $0xee0] sm:$0xff]  ;;  %v488_v34 = vld [vmem:[%s5547_s25 + $0x6a8] sm:$0xff] }
 0x295   : > { %3637 = vmatpush1.msra.mxu1 %v583_v35  ;;  %3567 = vmatprep.subr.mxu0 %v320_v37  ;;  %v744_v35 = vld [vmem:[%s5547_s25 + $0xea8] sm:$0xff]  ;;  %v487_v37 = vld [vmem:[%s5547_s25 + $0x6a0] sm:$0xff] }
 0x296   : > { %3638 = vmatprep.subr.mxu1 %v576_v38  ;;  %3568 = vmatpush1.msra.mxu0 %v319_v39  ;;  %v743_v38 = vld [vmem:[%s5547_s25 + $0xea0] sm:$0xff]  ;;  %v480_v39 = vld [vmem:[%s5547_s25 + $0x668] sm:$0xff] }
 0x297   : > { %3639 = vmatpush1.msra.mxu1 %v575_v40  ;;  %3569 = vmatprep.subr.mxu0 %v312_v41  ;;  %v736_v40 = vld [vmem:[%s5547_s25 + $0xe68] sm:$0xff]  ;;  %v479_v41 = vld [vmem:[%s5547_s25 + $0x660] sm:$0xff] }
 0x298   : > { %3640 = vmatprep.subr.mxu1 %v568_v42  ;;  %3570 = vmatpush1.msra.mxu0 %v311_v45  ;;  %v735_v42 = vld [vmem:[%s5547_s25 + $0xe60] sm:$0xff]  ;;  %v472_v45 = vld [vmem:[%s5547_s25 + $0x628] sm:$0xff] }
 0x299   : > { %3641 = vmatpush1.msra.mxu1 %v567_v46  ;;  %3571 = vmatprep.subr.mxu0 %v304_v47  ;;  %v728_v46 = vld [vmem:[%s5547_s25 + $0xe28] sm:$0xff]  ;;  %v471_v47 = vld [vmem:[%s5547_s25 + $0x620] sm:$0xff] }
 0x29a   : > { %3642 = vmatprep.subr.mxu1 %v560_v48  ;;  %3572 = vmatpush1.msra.mxu0 %v303_v50  ;;  %v727_v48 = vld [vmem:[%s5547_s25 + $0xe20] sm:$0xff]  ;;  %v464_v50 = vld [vmem:[%s5547_s25 + $0x5e8] sm:$0xff] }
 0x29b   : > { %3643 = vmatpush1.msra.mxu1 %v559_v51  ;;  %3573 = vmatprep.subr.mxu0 %v296_v52  ;;  %v720_v51 = vld [vmem:[%s5547_s25 + $0xde8] sm:$0xff]  ;;  %v463_v52 = vld [vmem:[%s5547_s25 + $0x5e0] sm:$0xff] }
 0x29c   : > { %3644 = vmatprep.subr.mxu1 %v552_v54  ;;  %3574 = vmatpush1.msra.mxu0 %v295_v56  ;;  %v719_v54 = vld [vmem:[%s5547_s25 + $0xde0] sm:$0xff]  ;;  %v456_v56 = vld [vmem:[%s5547_s25 + $0x5a8] sm:$0xff] }
 0x29d   : > { %3645 = vmatpush1.msra.mxu1 %v551_v57  ;;  %3575 = vmatprep.subr.mxu0 %v288_v59  ;;  %v712_v57 = vld [vmem:[%s5547_s25 + $0xda8] sm:$0xff]  ;;  %v455_v59 = vld [vmem:[%s5547_s25 + $0x5a0] sm:$0xff] }
 0x29e   : > { %3646 = vmatprep.subr.mxu1 %v544_v60  ;;  %3576 = vmatpush1.msra.mxu0 %v287_v61  ;;  %v711_v60 = vld [vmem:[%s5547_s25 + $0xda0] sm:$0xff]  ;;  %v448_v61 = vld [vmem:[%s5547_s25 + $0x568] sm:$0xff] }
 0x29f   : > { %3647 = vmatpush1.msra.mxu1 %v543_v62  ;;  %3577 = vmatprep.subr.mxu0 %v280_v0  ;;  %v704_v62 = vld [vmem:[%s5547_s25 + $0xd68] sm:$0xff]  ;;  %v447_v0 = vld [vmem:[%s5547_s25 + $0x560] sm:$0xff] }
 0x2a0   : > { %3648 = vmatprep.subr.mxu1 %v536_v1  ;;  %3578 = vmatpush1.msra.mxu0 %v279_v3  ;;  %v703_v1 = vld [vmem:[%s5547_s25 + $0xd60] sm:$0xff]  ;;  %v440_v3 = vld [vmem:[%s5547_s25 + $0x528] sm:$0xff] }
 0x2a1   : > { %3649 = vmatpush1.msra.mxu1 %v535_v4  ;;  %3579 = vmatprep.subr.mxu0 %v528_v5  ;;  %v696_v4 = vld [vmem:[%s5547_s25 + $0xd28] sm:$0xff]  ;;  %v439_v5 = vld [vmem:[%s5547_s25 + $0x520] sm:$0xff] }
 0x2a2   : > { %3650 = vmatprep.subr.mxu1 %v784_v6  ;;  %3580 = vmatpush2.msra.mxu0 %v527_v7  ;;  %v695_v6 = vld [vmem:[%s5547_s25 + $0xd20] sm:$0xff]  ;;  %v432_v7 = vld [vmem:[%s5547_s25 + $0x4e8] sm:$0xff] }
 0x2a3   : > { %3651 = vmatpush2.msra.mxu1 %v783_v8  ;;  %3581 = vmatprep.subr.mxu0 %v520_v10  ;;  %v688_v8 = vld [vmem:[%s5547_s25 + $0xce8] sm:$0xff]  ;;  %v431_v10 = vld [vmem:[%s5547_s25 + $0x4e0] sm:$0xff] }
 0x2a4   : > { %3652 = vmatprep.subr.mxu1 %v776_v12  ;;  %3582 = vmatpush2.msra.mxu0 %v519_v13  ;;  %v687_v12 = vld [vmem:[%s5547_s25 + $0xce0] sm:$0xff]  ;;  %v424_v13 = vld [vmem:[%s5547_s25 + $0x4a8] sm:$0xff] }
 0x2a5   : > { %3653 = vmatpush2.msra.mxu1 %v775_v14  ;;  %3583 = vmatprep.subr.mxu0 %v512_v15  ;;  %v680_v14 = vld [vmem:[%s5547_s25 + $0xca8] sm:$0xff]  ;;  %v423_v15 = vld [vmem:[%s5547_s25 + $0x4a0] sm:$0xff] }
 0x2a6   : > { %3654 = vmatprep.subr.mxu1 %v768_v16  ;;  %3584 = vmatpush2.msra.mxu0 %v511_v18  ;;  %v679_v16 = vld [vmem:[%s5547_s25 + $0xca0] sm:$0xff]  ;;  %v416_v18 = vld [vmem:[%s5547_s25 + $0x468] sm:$0xff] }
 0x2a7   : > { %3655 = vmatpush2.msra.mxu1 %v767_v19  ;;  %3585 = vmatprep.subr.mxu0 %v504_v21  ;;  %v672_v19 = vld [vmem:[%s5547_s25 + $0xc68] sm:$0xff]  ;;  %v415_v21 = vld [vmem:[%s5547_s25 + $0x460] sm:$0xff] }
 0x2a8   : > { %3656 = vmatprep.subr.mxu1 %v760_v23  ;;  %3586 = vmatpush2.msra.mxu0 %v503_v24  ;;  %v671_v23 = vld [vmem:[%s5547_s25 + $0xc60] sm:$0xff]  ;;  %v408_v24 = vld [vmem:[%s5547_s25 + $0x428] sm:$0xff] }
 0x2a9   : > { %3657 = vmatpush2.msra.mxu1 %v759_v25  ;;  %3587 = vmatprep.subr.mxu0 %v496_v28  ;;  %v664_v25 = vld [vmem:[%s5547_s25 + $0xc28] sm:$0xff]  ;;  %v407_v28 = vld [vmem:[%s5547_s25 + $0x420] sm:$0xff] }
 0x2aa   : > { %3658 = vmatprep.subr.mxu1 %v752_v29  ;;  %3588 = vmatpush2.msra.mxu0 %v495_v31  ;;  %v663_v29 = vld [vmem:[%s5547_s25 + $0xc20] sm:$0xff]  ;;  %v912_v31 = vld [vmem:[%s5547_s25 + $0x13e8] sm:$0xff] }
 0x2ab   : > { %3659 = vmatpush2.msra.mxu1 %v751_v32  ;;  %3589 = vmatprep.subr.mxu0 %v488_v34  ;;  %v1168_v32 = vld [vmem:[%s5547_s25 + $0x1be8] sm:$0xff]  ;;  %v911_v34 = vld [vmem:[%s5547_s25 + $0x13e0] sm:$0xff] }
 0x2ac   : > { %3660 = vmatprep.subr.mxu1 %v744_v35  ;;  %3590 = vmatpush2.msra.mxu0 %v487_v37  ;;  %v1167_v35 = vld [vmem:[%s5547_s25 + $0x1be0] sm:$0xff]  ;;  %v904_v37 = vld [vmem:[%s5547_s25 + $0x13a8] sm:$0xff] }
 0x2ad   : > { %3661 = vmatpush2.msra.mxu1 %v743_v38  ;;  %3591 = vmatprep.subr.mxu0 %v480_v39  ;;  %v1160_v38 = vld [vmem:[%s5547_s25 + $0x1ba8] sm:$0xff]  ;;  %v903_v39 = vld [vmem:[%s5547_s25 + $0x13a0] sm:$0xff] }
 0x2ae   : > { %3662 = vmatprep.subr.mxu1 %v736_v40  ;;  %3592 = vmatpush2.msra.mxu0 %v479_v41  ;;  %v1159_v40 = vld [vmem:[%s5547_s25 + $0x1ba0] sm:$0xff]  ;;  %v896_v41 = vld [vmem:[%s5547_s25 + $0x1368] sm:$0xff] }
 0x2af   : > { %3663 = vmatpush2.msra.mxu1 %v735_v42  ;;  %3593 = vmatprep.subr.mxu0 %v472_v45  ;;  %v1152_v42 = vld [vmem:[%s5547_s25 + $0x1b68] sm:$0xff]  ;;  %v895_v45 = vld [vmem:[%s5547_s25 + $0x1360] sm:$0xff] }
 0x2b0   : > { %3664 = vmatprep.subr.mxu1 %v728_v46  ;;  %3594 = vmatpush2.msra.mxu0 %v471_v47  ;;  %v1151_v46 = vld [vmem:[%s5547_s25 + $0x1b60] sm:$0xff]  ;;  %v888_v47 = vld [vmem:[%s5547_s25 + $0x1328] sm:$0xff] }
 0x2b1   : > { %3665 = vmatpush2.msra.mxu1 %v727_v48  ;;  %3595 = vmatprep.subr.mxu0 %v464_v50  ;;  %v1144_v48 = vld [vmem:[%s5547_s25 + $0x1b28] sm:$0xff]  ;;  %v887_v50 = vld [vmem:[%s5547_s25 + $0x1320] sm:$0xff] }
 0x2b2   : > { %3666 = vmatprep.subr.mxu1 %v720_v51  ;;  %3596 = vmatpush2.msra.mxu0 %v463_v52  ;;  %v1143_v51 = vld [vmem:[%s5547_s25 + $0x1b20] sm:$0xff]  ;;  %v880_v52 = vld [vmem:[%s5547_s25 + $0x12e8] sm:$0xff] }
 0x2b3   : > { %3667 = vmatpush2.msra.mxu1 %v719_v54  ;;  %3597 = vmatprep.subr.mxu0 %v456_v56  ;;  %v1136_v54 = vld [vmem:[%s5547_s25 + $0x1ae8] sm:$0xff]  ;;  %v879_v56 = vld [vmem:[%s5547_s25 + $0x12e0] sm:$0xff] }
 0x2b4   : > { %3668 = vmatprep.subr.mxu1 %v712_v57  ;;  %3598 = vmatpush2.msra.mxu0 %v455_v59  ;;  %v1135_v57 = vld [vmem:[%s5547_s25 + $0x1ae0] sm:$0xff]  ;;  %v872_v59 = vld [vmem:[%s5547_s25 + $0x12a8] sm:$0xff] }
 0x2b5   : > { %3669 = vmatpush2.msra.mxu1 %v711_v60  ;;  %3599 = vmatprep.subr.mxu0 %v448_v61  ;;  %v1128_v60 = vld [vmem:[%s5547_s25 + $0x1aa8] sm:$0xff]  ;;  %v871_v61 = vld [vmem:[%s5547_s25 + $0x12a0] sm:$0xff] }
 0x2b6   : > { %3670 = vmatprep.subr.mxu1 %v704_v62  ;;  %3600 = vmatpush2.msra.mxu0 %v447_v0  ;;  %v1127_v62 = vld [vmem:[%s5547_s25 + $0x1aa0] sm:$0xff]  ;;  %v864_v0 = vld [vmem:[%s5547_s25 + $0x1268] sm:$0xff] }
 0x2b7   : > { %3671 = vmatpush2.msra.mxu1 %v703_v1  ;;  %3601 = vmatprep.subr.mxu0 %v440_v3  ;;  %v1120_v1 = vld [vmem:[%s5547_s25 + $0x1a68] sm:$0xff]  ;;  %v863_v3 = vld [vmem:[%s5547_s25 + $0x1260] sm:$0xff] }
 0x2b8   : > { %3672 = vmatprep.subr.mxu1 %v696_v4  ;;  %3602 = vmatpush2.msra.mxu0 %v439_v5  ;;  %v1119_v4 = vld [vmem:[%s5547_s25 + $0x1a60] sm:$0xff]  ;;  %v856_v5 = vld [vmem:[%s5547_s25 + $0x1228] sm:$0xff] }
 0x2b9   : > { %3673 = vmatpush2.msra.mxu1 %v695_v6  ;;  %3603 = vmatprep.subr.mxu0 %v432_v7  ;;  %v1112_v6 = vld [vmem:[%s5547_s25 + $0x1a28] sm:$0xff]  ;;  %v855_v7 = vld [vmem:[%s5547_s25 + $0x1220] sm:$0xff] }
 0x2ba   : > { %3674 = vmatprep.subr.mxu1 %v688_v8  ;;  %3604 = vmatpush2.msra.mxu0 %v431_v10  ;;  %v1111_v8 = vld [vmem:[%s5547_s25 + $0x1a20] sm:$0xff]  ;;  %v848_v10 = vld [vmem:[%s5547_s25 + $0x11e8] sm:$0xff] }
 0x2bb   : > { %3675 = vmatpush2.msra.mxu1 %v687_v12  ;;  %3605 = vmatprep.subr.mxu0 %v424_v13  ;;  %v1104_v12 = vld [vmem:[%s5547_s25 + $0x19e8] sm:$0xff]  ;;  %v847_v13 = vld [vmem:[%s5547_s25 + $0x11e0] sm:$0xff] }
 0x2bc   : > { %3676 = vmatprep.subr.mxu1 %v680_v14  ;;  %3606 = vmatpush2.msra.mxu0 %v423_v15  ;;  %v1103_v14 = vld [vmem:[%s5547_s25 + $0x19e0] sm:$0xff]  ;;  %v840_v15 = vld [vmem:[%s5547_s25 + $0x11a8] sm:$0xff] }
 0x2bd   : > { %3677 = vmatpush2.msra.mxu1 %v679_v16  ;;  %3607 = vmatprep.subr.mxu0 %v416_v18  ;;  %v1096_v16 = vld [vmem:[%s5547_s25 + $0x19a8] sm:$0xff]  ;;  %v839_v18 = vld [vmem:[%s5547_s25 + $0x11a0] sm:$0xff] }
 0x2be   : > { %3678 = vmatprep.subr.mxu1 %v672_v19  ;;  %3608 = vmatpush2.msra.mxu0 %v415_v21  ;;  %v1095_v19 = vld [vmem:[%s5547_s25 + $0x19a0] sm:$0xff]  ;;  %v832_v21 = vld [vmem:[%s5547_s25 + $0x1168] sm:$0xff] }
 0x2bf   : > { %3679 = vmatpush2.msra.mxu1 %v671_v23  ;;  %3609 = vmatprep.subr.mxu0 %v408_v24  ;;  %v1088_v23 = vld [vmem:[%s5547_s25 + $0x1968] sm:$0xff]  ;;  %v831_v24 = vld [vmem:[%s5547_s25 + $0x1160] sm:$0xff] }
 0x2c0   : > { %3680 = vmatprep.subr.mxu1 %v664_v25  ;;  %3610 = vmatpush2.msra.mxu0 %v407_v28  ;;  %v1087_v25 = vld [vmem:[%s5547_s25 + $0x1960] sm:$0xff]  ;;  %v824_v28 = vld [vmem:[%s5547_s25 + $0x1128] sm:$0xff] }
 0x2c1   : > { %3611 = vmatprep.mubr.f32.mxu0 %v5717_v9  ;;  %3681 = vmatpush2.msra.mxu1 %v663_v29  ;;  %v1080_v29 = vld [vmem:[%s5547_s25 + $0x1928] sm:$0xff] }
 0x2c2   : > { %3682 = vmatprep.mubr.f32.mxu1 %v5722_v11  ;;  %3612 = vmatmul.mubr.f32.vlgmr.msra.gmra.mxu0 %v5702_v63 }
 0x2c3   : > { %3683 = vmatmul.mubr.f32.vlgmr.msra.gmra.mxu1 %v5707_v2  ;;  %3689 = vmatprep.subr.mxu0 %v912_v31  ;;  %v823_v31 = vld [vmem:[%s5547_s25 + $0x1120] sm:$0xff] }
 0x2c4   : > { %3760 = vmatprep.subr.mxu1 %v1168_v32  ;;  %3690 = vmatpush1.msra.mxu0 %v911_v34  ;;  %v1079_v32 = vld [vmem:[%s5547_s25 + $0x1920] sm:$0xff]  ;;  %v816_v34 = vld [vmem:[%s5547_s25 + $0x10e8] sm:$0xff] }
 0x2c5   : > { %3761 = vmatpush1.msra.mxu1 %v1167_v35  ;;  %3691 = vmatprep.subr.mxu0 %v904_v37  ;;  %v1072_v35 = vld [vmem:[%s5547_s25 + $0x18e8] sm:$0xff]  ;;  %v815_v37 = vld [vmem:[%s5547_s25 + $0x10e0] sm:$0xff] }
 0x2c6   : > { %3762 = vmatprep.subr.mxu1 %v1160_v38  ;;  %3692 = vmatpush1.msra.mxu0 %v903_v39  ;;  %v1071_v38 = vld [vmem:[%s5547_s25 + $0x18e0] sm:$0xff]  ;;  %v808_v39 = vld [vmem:[%s5547_s25 + $0x10a8] sm:$0xff] }
 0x2c7   : > { %3763 = vmatpush1.msra.mxu1 %v1159_v40  ;;  %3693 = vmatprep.subr.mxu0 %v896_v41  ;;  %v1064_v40 = vld [vmem:[%s5547_s25 + $0x18a8] sm:$0xff]  ;;  %v807_v41 = vld [vmem:[%s5547_s25 + $0x10a0] sm:$0xff] }
 0x2c8   : > { %3764 = vmatprep.subr.mxu1 %v1152_v42  ;;  %3694 = vmatpush1.msra.mxu0 %v895_v45  ;;  %v1063_v42 = vld [vmem:[%s5547_s25 + $0x18a0] sm:$0xff]  ;;  %v800_v45 = vld [vmem:[%s5547_s25 + $0x1068] sm:$0xff] }
 0x2c9   : > { %3765 = vmatpush1.msra.mxu1 %v1151_v46  ;;  %3695 = vmatprep.subr.mxu0 %v888_v47  ;;  %v1056_v46 = vld [vmem:[%s5547_s25 + $0x1868] sm:$0xff]  ;;  %v799_v47 = vld [vmem:[%s5547_s25 + $0x1060] sm:$0xff] }
 0x2ca   : > { %3766 = vmatprep.subr.mxu1 %v1144_v48  ;;  %3696 = vmatpush1.msra.mxu0 %v887_v50  ;;  %v1055_v48 = vld [vmem:[%s5547_s25 + $0x1860] sm:$0xff]  ;;  %v792_v50 = vld [vmem:[%s5547_s25 + $0x1028] sm:$0xff] }
 0x2cb   : > { %3767 = vmatpush1.msra.mxu1 %v1143_v51  ;;  %3697 = vmatprep.subr.mxu0 %v880_v52  ;;  %v1048_v51 = vld [vmem:[%s5547_s25 + $0x1828] sm:$0xff]  ;;  %v791_v52 = vld [vmem:[%s5547_s25 + $0x1020] sm:$0xff] }
 0x2cc   : > { %3768 = vmatprep.subr.mxu1 %v1136_v54  ;;  %3698 = vmatpush1.msra.mxu0 %v879_v56  ;;  %v1047_v54 = vld [vmem:[%s5547_s25 + $0x1820] sm:$0xff]  ;;  %v1040_v56 = vld [vmem:[%s5547_s25 + $0x17e8] sm:$0xff] }
 0x2cd   : > { %3769 = vmatpush1.msra.mxu1 %v1135_v57  ;;  %3699 = vmatprep.subr.mxu0 %v872_v59  ;;  %v1296_v57 = vld [vmem:[%s5547_s25 + $0x1fe8] sm:$0xff]  ;;  %v1039_v59 = vld [vmem:[%s5547_s25 + $0x17e0] sm:$0xff] }
 0x2ce   : > { %3770 = vmatprep.subr.mxu1 %v1128_v60  ;;  %3700 = vmatpush1.msra.mxu0 %v871_v61  ;;  %v1295_v60 = vld [vmem:[%s5547_s25 + $0x1fe0] sm:$0xff]  ;;  %v1032_v61 = vld [vmem:[%s5547_s25 + $0x17a8] sm:$0xff] }
 0x2cf   : > { %3771 = vmatpush1.msra.mxu1 %v1127_v62  ;;  %3701 = vmatprep.subr.mxu0 %v864_v0  ;;  %v1288_v62 = vld [vmem:[%s5547_s25 + $0x1fa8] sm:$0xff]  ;;  %v1031_v0 = vld [vmem:[%s5547_s25 + $0x17a0] sm:$0xff] }
 0x2d0   : > { %3772 = vmatprep.subr.mxu1 %v1120_v1  ;;  %3702 = vmatpush1.msra.mxu0 %v863_v3  ;;  %v1287_v1 = vld [vmem:[%s5547_s25 + $0x1fa0] sm:$0xff]  ;;  %v1024_v3 = vld [vmem:[%s5547_s25 + $0x1768] sm:$0xff] }
 0x2d1   : > { %3773 = vmatpush1.msra.mxu1 %v1119_v4  ;;  %3703 = vmatprep.subr.mxu0 %v856_v5  ;;  %v1280_v4 = vld [vmem:[%s5547_s25 + $0x1f68] sm:$0xff]  ;;  %v1023_v5 = vld [vmem:[%s5547_s25 + $0x1760] sm:$0xff] }
 0x2d2   : > { %3774 = vmatprep.subr.mxu1 %v1112_v6  ;;  %3704 = vmatpush1.msra.mxu0 %v855_v7  ;;  %v1279_v6 = vld [vmem:[%s5547_s25 + $0x1f60] sm:$0xff]  ;;  %v1016_v7 = vld [vmem:[%s5547_s25 + $0x1728] sm:$0xff] }
 0x2d3   : > { %3775 = vmatpush1.msra.mxu1 %v1111_v8  ;;  %3705 = vmatprep.subr.mxu0 %v848_v10  ;;  %v1272_v8 = vld [vmem:[%s5547_s25 + $0x1f28] sm:$0xff]  ;;  %v1015_v10 = vld [vmem:[%s5547_s25 + $0x1720] sm:$0xff] }
 0x2d4   : > { %3776 = vmatprep.subr.mxu1 %v1104_v12  ;;  %3706 = vmatpush1.msra.mxu0 %v847_v13  ;;  %v1271_v12 = vld [vmem:[%s5547_s25 + $0x1f20] sm:$0xff]  ;;  %v1008_v13 = vld [vmem:[%s5547_s25 + $0x16e8] sm:$0xff] }
 0x2d5   : > { %3777 = vmatpush1.msra.mxu1 %v1103_v14  ;;  %3707 = vmatprep.subr.mxu0 %v840_v15  ;;  %v1264_v14 = vld [vmem:[%s5547_s25 + $0x1ee8] sm:$0xff]  ;;  %v1007_v15 = vld [vmem:[%s5547_s25 + $0x16e0] sm:$0xff] }
 0x2d6   : > { %3778 = vmatprep.subr.mxu1 %v1096_v16  ;;  %3708 = vmatpush1.msra.mxu0 %v839_v18  ;;  %v1263_v16 = vld [vmem:[%s5547_s25 + $0x1ee0] sm:$0xff]  ;;  %v1000_v18 = vld [vmem:[%s5547_s25 + $0x16a8] sm:$0xff] }
 0x2d7   : > { %3779 = vmatpush1.msra.mxu1 %v1095_v19  ;;  %3709 = vmatprep.subr.mxu0 %v832_v21  ;;  %v1256_v19 = vld [vmem:[%s5547_s25 + $0x1ea8] sm:$0xff]  ;;  %v999_v21 = vld [vmem:[%s5547_s25 + $0x16a0] sm:$0xff] }
 0x2d8   : > { %3780 = vmatprep.subr.mxu1 %v1088_v23  ;;  %3710 = vmatpush1.msra.mxu0 %v831_v24  ;;  %v1255_v23 = vld [vmem:[%s5547_s25 + $0x1ea0] sm:$0xff]  ;;  %v992_v24 = vld [vmem:[%s5547_s25 + $0x1668] sm:$0xff] }
 0x2d9   : > { %3781 = vmatpush1.msra.mxu1 %v1087_v25  ;;  %3711 = vmatprep.subr.mxu0 %v824_v28  ;;  %v1248_v25 = vld [vmem:[%s5547_s25 + $0x1e68] sm:$0xff]  ;;  %v991_v28 = vld [vmem:[%s5547_s25 + $0x1660] sm:$0xff] }
 0x2da   : > { %3782 = vmatprep.subr.mxu1 %v1080_v29  ;;  %3712 = vmatpush1.msra.mxu0 %v823_v31  ;;  %v1247_v29 = vld [vmem:[%s5547_s25 + $0x1e60] sm:$0xff]  ;;  %v984_v31 = vld [vmem:[%s5547_s25 + $0x1628] sm:$0xff] }
 0x2db   : > { %3783 = vmatpush1.msra.mxu1 %v1079_v32  ;;  %3713 = vmatprep.subr.mxu0 %v816_v34  ;;  %v1240_v32 = vld [vmem:[%s5547_s25 + $0x1e28] sm:$0xff]  ;;  %v983_v34 = vld [vmem:[%s5547_s25 + $0x1620] sm:$0xff] }
 0x2dc   : > { %3784 = vmatprep.subr.mxu1 %v1072_v35  ;;  %3714 = vmatpush1.msra.mxu0 %v815_v37  ;;  %v1239_v35 = vld [vmem:[%s5547_s25 + $0x1e20] sm:$0xff]  ;;  %v976_v37 = vld [vmem:[%s5547_s25 + $0x15e8] sm:$0xff] }
 0x2dd   : > { %3785 = vmatpush1.msra.mxu1 %v1071_v38  ;;  %3715 = vmatprep.subr.mxu0 %v808_v39  ;;  %v1232_v38 = vld [vmem:[%s5547_s25 + $0x1de8] sm:$0xff]  ;;  %v975_v39 = vld [vmem:[%s5547_s25 + $0x15e0] sm:$0xff] }
 0x2de   : > { %3786 = vmatprep.subr.mxu1 %v1064_v40  ;;  %3716 = vmatpush1.msra.mxu0 %v807_v41  ;;  %v1231_v40 = vld [vmem:[%s5547_s25 + $0x1de0] sm:$0xff]  ;;  %v968_v41 = vld [vmem:[%s5547_s25 + $0x15a8] sm:$0xff] }
 0x2df   : > { %3787 = vmatpush1.msra.mxu1 %v1063_v42  ;;  %3717 = vmatprep.subr.mxu0 %v800_v45  ;;  %v1224_v42 = vld [vmem:[%s5547_s25 + $0x1da8] sm:$0xff]  ;;  %v967_v45 = vld [vmem:[%s5547_s25 + $0x15a0] sm:$0xff] }
 0x2e0   : > { %3788 = vmatprep.subr.mxu1 %v1056_v46  ;;  %3718 = vmatpush1.msra.mxu0 %v799_v47  ;;  %v1223_v46 = vld [vmem:[%s5547_s25 + $0x1da0] sm:$0xff]  ;;  %v960_v47 = vld [vmem:[%s5547_s25 + $0x1568] sm:$0xff] }
 0x2e1   : > { %3789 = vmatpush1.msra.mxu1 %v1055_v48  ;;  %3719 = vmatprep.subr.mxu0 %v792_v50  ;;  %v1216_v48 = vld [vmem:[%s5547_s25 + $0x1d68] sm:$0xff]  ;;  %v959_v50 = vld [vmem:[%s5547_s25 + $0x1560] sm:$0xff] }
 0x2e2   : > { %3790 = vmatprep.subr.mxu1 %v1048_v51  ;;  %3720 = vmatpush1.msra.mxu0 %v791_v52  ;;  %v1215_v51 = vld [vmem:[%s5547_s25 + $0x1d60] sm:$0xff]  ;;  %v952_v52 = vld [vmem:[%s5547_s25 + $0x1528] sm:$0xff] }
 0x2e3   : > { %3791 = vmatpush1.msra.mxu1 %v1047_v54  ;;  %3721 = vmatprep.subr.mxu0 %v1040_v56  ;;  %v1208_v54 = vld [vmem:[%s5547_s25 + $0x1d28] sm:$0xff]  ;;  %v951_v56 = vld [vmem:[%s5547_s25 + $0x1520] sm:$0xff] }
 0x2e4   : > { %3792 = vmatprep.subr.mxu1 %v1296_v57  ;;  %3722 = vmatpush2.msra.mxu0 %v1039_v59  ;;  %v1207_v57 = vld [vmem:[%s5547_s25 + $0x1d20] sm:$0xff]  ;;  %v944_v59 = vld [vmem:[%s5547_s25 + $0x14e8] sm:$0xff] }
 0x2e5   : > { %3793 = vmatpush2.msra.mxu1 %v1295_v60  ;;  %3723 = vmatprep.subr.mxu0 %v1032_v61  ;;  %v1200_v60 = vld [vmem:[%s5547_s25 + $0x1ce8] sm:$0xff]  ;;  %v943_v61 = vld [vmem:[%s5547_s25 + $0x14e0] sm:$0xff] }
 0x2e6   : > { %3794 = vmatprep.subr.mxu1 %v1288_v62  ;;  %3724 = vmatpush2.msra.mxu0 %v1031_v0  ;;  %v1199_v62 = vld [vmem:[%s5547_s25 + $0x1ce0] sm:$0xff]  ;;  %v936_v0 = vld [vmem:[%s5547_s25 + $0x14a8] sm:$0xff] }
 0x2e7   : > { %3795 = vmatpush2.msra.mxu1 %v1287_v1  ;;  %3725 = vmatprep.subr.mxu0 %v1024_v3  ;;  %v1192_v1 = vld [vmem:[%s5547_s25 + $0x1ca8] sm:$0xff]  ;;  %v935_v3 = vld [vmem:[%s5547_s25 + $0x14a0] sm:$0xff] }
 0x2e8   : > { %3796 = vmatprep.subr.mxu1 %v1280_v4  ;;  %3726 = vmatpush2.msra.mxu0 %v1023_v5  ;;  %v1191_v4 = vld [vmem:[%s5547_s25 + $0x1ca0] sm:$0xff]  ;;  %v928_v5 = vld [vmem:[%s5547_s25 + $0x1468] sm:$0xff] }
 0x2e9   : > { %3797 = vmatpush2.msra.mxu1 %v1279_v6  ;;  %3727 = vmatprep.subr.mxu0 %v1016_v7  ;;  %v1184_v6 = vld [vmem:[%s5547_s25 + $0x1c68] sm:$0xff]  ;;  %v927_v7 = vld [vmem:[%s5547_s25 + $0x1460] sm:$0xff] }
 0x2ea   : > { %3798 = vmatprep.subr.mxu1 %v1272_v8  ;;  %3728 = vmatpush2.msra.mxu0 %v1015_v10  ;;  %v1183_v8 = vld [vmem:[%s5547_s25 + $0x1c60] sm:$0xff]  ;;  %v920_v10 = vld [vmem:[%s5547_s25 + $0x1428] sm:$0xff] }
 0x2eb   : > { %3799 = vmatpush2.msra.mxu1 %v1271_v12  ;;  %3729 = vmatprep.subr.mxu0 %v1008_v13  ;;  %v1176_v12 = vld [vmem:[%s5547_s25 + $0x1c28] sm:$0xff]  ;;  %v919_v13 = vld [vmem:[%s5547_s25 + $0x1420] sm:$0xff] }
 0x2ec   : > { %3800 = vmatprep.subr.mxu1 %v1264_v14  ;;  %3730 = vmatpush2.msra.mxu0 %v1007_v15  ;;  %v1175_v14 = vld [vmem:[%s5547_s25 + $0x1c20] sm:$0xff]  ;;  %v1424_v15 = vld [vmem:[%s5547_s25 + $0x23e8] sm:$0xff] }
 0x2ed   : > { %3801 = vmatpush2.msra.mxu1 %v1263_v16  ;;  %3731 = vmatprep.subr.mxu0 %v1000_v18  ;;  %v1680_v16 = vld [vmem:[%s5547_s25 + $0x2be8] sm:$0xff]  ;;  %v1423_v18 = vld [vmem:[%s5547_s25 + $0x23e0] sm:$0xff] }
 0x2ee   : > { %3802 = vmatprep.subr.mxu1 %v1256_v19  ;;  %3732 = vmatpush2.msra.mxu0 %v999_v21  ;;  %v1679_v19 = vld [vmem:[%s5547_s25 + $0x2be0] sm:$0xff]  ;;  %v1416_v21 = vld [vmem:[%s5547_s25 + $0x23a8] sm:$0xff] }
 0x2ef   : > { %3803 = vmatpush2.msra.mxu1 %v1255_v23  ;;  %3733 = vmatprep.subr.mxu0 %v992_v24  ;;  %v1672_v23 = vld [vmem:[%s5547_s25 + $0x2ba8] sm:$0xff]  ;;  %v1415_v24 = vld [vmem:[%s5547_s25 + $0x23a0] sm:$0xff] }
 0x2f0   : > { %3804 = vmatprep.subr.mxu1 %v1248_v25  ;;  %3734 = vmatpush2.msra.mxu0 %v991_v28  ;;  %v1671_v25 = vld [vmem:[%s5547_s25 + $0x2ba0] sm:$0xff]  ;;  %v1408_v28 = vld [vmem:[%s5547_s25 + $0x2368] sm:$0xff] }
 0x2f1   : > { %3805 = vmatpush2.msra.mxu1 %v1247_v29  ;;  %3735 = vmatprep.subr.mxu0 %v984_v31  ;;  %v1664_v29 = vld [vmem:[%s5547_s25 + $0x2b68] sm:$0xff]  ;;  %v1407_v31 = vld [vmem:[%s5547_s25 + $0x2360] sm:$0xff] }
 0x2f2   : > { %3806 = vmatprep.subr.mxu1 %v1240_v32  ;;  %3736 = vmatpush2.msra.mxu0 %v983_v34  ;;  %v1663_v32 = vld [vmem:[%s5547_s25 + $0x2b60] sm:$0xff]  ;;  %v1400_v34 = vld [vmem:[%s5547_s25 + $0x2328] sm:$0xff] }
 0x2f3   : > { %3807 = vmatpush2.msra.mxu1 %v1239_v35  ;;  %3737 = vmatprep.subr.mxu0 %v976_v37  ;;  %v1656_v35 = vld [vmem:[%s5547_s25 + $0x2b28] sm:$0xff]  ;;  %v1399_v37 = vld [vmem:[%s5547_s25 + $0x2320] sm:$0xff] }
 0x2f4   : > { %3808 = vmatprep.subr.mxu1 %v1232_v38  ;;  %3738 = vmatpush2.msra.mxu0 %v975_v39  ;;  %v1655_v38 = vld [vmem:[%s5547_s25 + $0x2b20] sm:$0xff]  ;;  %v1392_v39 = vld [vmem:[%s5547_s25 + $0x22e8] sm:$0xff] }
 0x2f5   : > { %3809 = vmatpush2.msra.mxu1 %v1231_v40  ;;  %3739 = vmatprep.subr.mxu0 %v968_v41  ;;  %v1648_v40 = vld [vmem:[%s5547_s25 + $0x2ae8] sm:$0xff]  ;;  %v1391_v41 = vld [vmem:[%s5547_s25 + $0x22e0] sm:$0xff] }
 0x2f6   : > { %3810 = vmatprep.subr.mxu1 %v1224_v42  ;;  %3740 = vmatpush2.msra.mxu0 %v967_v45  ;;  %v1647_v42 = vld [vmem:[%s5547_s25 + $0x2ae0] sm:$0xff]  ;;  %v1384_v45 = vld [vmem:[%s5547_s25 + $0x22a8] sm:$0xff] }
 0x2f7   : > { %3811 = vmatpush2.msra.mxu1 %v1223_v46  ;;  %3741 = vmatprep.subr.mxu0 %v960_v47  ;;  %v1640_v46 = vld [vmem:[%s5547_s25 + $0x2aa8] sm:$0xff]  ;;  %v1383_v47 = vld [vmem:[%s5547_s25 + $0x22a0] sm:$0xff] }
 0x2f8   : > { %3812 = vmatprep.subr.mxu1 %v1216_v48  ;;  %3742 = vmatpush2.msra.mxu0 %v959_v50  ;;  %v1639_v48 = vld [vmem:[%s5547_s25 + $0x2aa0] sm:$0xff]  ;;  %v1376_v50 = vld [vmem:[%s5547_s25 + $0x2268] sm:$0xff] }
 0x2f9   : > { %3813 = vmatpush2.msra.mxu1 %v1215_v51  ;;  %3743 = vmatprep.subr.mxu0 %v952_v52  ;;  %v1632_v51 = vld [vmem:[%s5547_s25 + $0x2a68] sm:$0xff]  ;;  %v1375_v52 = vld [vmem:[%s5547_s25 + $0x2260] sm:$0xff] }
 0x2fa   : > { %3814 = vmatprep.subr.mxu1 %v1208_v54  ;;  %3744 = vmatpush2.msra.mxu0 %v951_v56  ;;  %v1631_v54 = vld [vmem:[%s5547_s25 + $0x2a60] sm:$0xff]  ;;  %v1368_v56 = vld [vmem:[%s5547_s25 + $0x2228] sm:$0xff] }
 0x2fb   : > { %3815 = vmatpush2.msra.mxu1 %v1207_v57  ;;  %3745 = vmatprep.subr.mxu0 %v944_v59  ;;  %v1624_v57 = vld [vmem:[%s5547_s25 + $0x2a28] sm:$0xff]  ;;  %v6992_v59 = vpop.f32.mrf.mxu0 }
 0x2fc   : > { %3816 = vmatprep.subr.mxu1 %v1200_v60  ;;  %3746 = vmatpush2.msra.mxu0 %v943_v61  ;;  %v1367_v60 = vld [vmem:[%s5547_s25 + $0x2220] sm:$0xff] }
 0x2fd   : > { %3817 = vmatpush2.msra.mxu1 %v1199_v62  ;;  %3747 = vmatprep.subr.mxu0 %v936_v0  ;;  %v1623_v61 = vld [vmem:[%s5547_s25 + $0x2a20] sm:$0xff]  ;;  %v1360_v62 = vld [vmem:[%s5547_s25 + $0x21e8] sm:$0xff] }
 0x2fe   : > { %3818 = vmatprep.subr.mxu1 %v1192_v1  ;;  %3748 = vmatpush2.msra.mxu0 %v935_v3  ;;  %v1616_v0 = vld [vmem:[%s5547_s25 + $0x29e8] sm:$0xff]  ;;  %v1359_v1 = vld [vmem:[%s5547_s25 + $0x21e0] sm:$0xff] }
 0x2ff   : > { %3819 = vmatpush2.msra.mxu1 %v1191_v4  ;;  %3749 = vmatprep.subr.mxu0 %v928_v5  ;;  %v1615_v3 = vld [vmem:[%s5547_s25 + $0x29e0] sm:$0xff]  ;;  %v1352_v4 = vld [vmem:[%s5547_s25 + $0x21a8] sm:$0xff] }
 0x300   : > { %3820 = vmatprep.subr.mxu1 %v1184_v6  ;;  %3750 = vmatpush2.msra.mxu0 %v927_v7  ;;  %v1608_v5 = vld [vmem:[%s5547_s25 + $0x29a8] sm:$0xff]  ;;  %v7002_v6 = vpop.f32.mrf.mxu1  ;;  %v7004_v7 = vpop.f32.mrf.mxu0 }
 0x301   : > { %3821 = vmatpush2.msra.mxu1 %v1183_v8  ;;  %3751 = vmatprep.subr.mxu0 %v920_v10  ;;  %v1351_v8 = vld [vmem:[%s5547_s25 + $0x21a0] sm:$0xff] }
 0x302   : > { %3822 = vmatprep.subr.mxu1 %v1176_v12  ;;  %3752 = vmatpush2.msra.mxu0 %v919_v13  ;;  %v1607_v10 = vld [vmem:[%s5547_s25 + $0x29a0] sm:$0xff]  ;;  %v1344_v12 = vld [vmem:[%s5547_s25 + $0x2168] sm:$0xff] }
 0x303   : > { %3753 = vmatprep.mubr.f32.mxu0 %v5864_v27  ;;  %3823 = vmatpush2.msra.mxu1 %v1175_v14  ;;  %v1600_v13 = vld [vmem:[%s5547_s25 + $0x2968] sm:$0xff]  ;;  %v7010_v14 = vpop.f32.mrf.mxu0 }
 0x304   : > { %3754 = vmatmul.mubr.f32.vlgmr.msra.gmra.mxu0 %v5849_v17  ;;  %3824 = vmatprep.mubr.f32.mxu1 %v5870_v30 }
 0x305   : > { %3831 = vmatprep.subr.mxu0 %v1424_v15  ;;  %3902 = vmatprep.subr.mxu1 %v1680_v16  ;;  %v1343_v15 = vld [vmem:[%s5547_s25 + $0x2160] sm:$0xff] }
 0x306   : > { %3825 = vmatmul.mubr.f32.vlgmr.msra.gmra.mxu1 %v5856_v22  ;;  %3832 = vmatpush1.msra.mxu0 %v1423_v18  ;;  %v1599_v16 = vld [vmem:[%s5547_s25 + $0x2960] sm:$0xff]  ;;  %v1336_v18 = vld [vmem:[%s5547_s25 + $0x2128] sm:$0xff] }
 0x307   : > { %3903 = vmatpush1.msra.mxu1 %v1679_v19  ;;  %3833 = vmatprep.subr.mxu0 %v1416_v21  ;;  %v1592_v19 = vld [vmem:[%s5547_s25 + $0x2928] sm:$0xff]  ;;  %v7016_v21 = vpop.f32.mrf.mxu1 }
 0x308   : > { %3904 = vmatprep.subr.mxu1 %v1672_v23  ;;  %3834 = vmatpush1.msra.mxu0 %v1415_v24  ;;  %v1335_v23 = vld [vmem:[%s5547_s25 + $0x2120] sm:$0xff] }
 0x309   : > { %3905 = vmatpush1.msra.mxu1 %v1671_v25  ;;  %3835 = vmatprep.subr.mxu0 %v1408_v28  ;;  %v1591_v24 = vld [vmem:[%s5547_s25 + $0x2920] sm:$0xff]  ;;  %v1328_v25 = vld [vmem:[%s5547_s25 + $0x20e8] sm:$0xff] }
 0x30a   : > { %3906 = vmatprep.subr.mxu1 %v1664_v29  ;;  %3836 = vmatpush1.msra.mxu0 %v1407_v31  ;;  %v1584_v28 = vld [vmem:[%s5547_s25 + $0x28e8] sm:$0xff]  ;;  %v7022_v29 = vpop.f32.mrf.mxu1  ;;  %v7024_v31 = vpop.f32.mrf.mxu0 }
 0x30b   : > { %3907 = vmatpush1.msra.mxu1 %v1663_v32  ;;  %3837 = vmatprep.subr.mxu0 %v1400_v34  ;;  %v1327_v32 = vld [vmem:[%s5547_s25 + $0x20e0] sm:$0xff] }
 0x30c   : > { %3908 = vmatprep.subr.mxu1 %v1656_v35  ;;  %3838 = vmatpush1.msra.mxu0 %v1399_v37  ;;  %v1583_v34 = vld [vmem:[%s5547_s25 + $0x28e0] sm:$0xff]  ;;  %v1320_v35 = vld [vmem:[%s5547_s25 + $0x20a8] sm:$0xff] }
 0x30d   : > { %3909 = vmatpush1.msra.mxu1 %v1655_v38  ;;  %3839 = vmatprep.subr.mxu0 %v1392_v39  ;;  %v1576_v37 = vld [vmem:[%s5547_s25 + $0x28a8] sm:$0xff]  ;;  %v7030_v38 = vpop.f32.mrf.mxu0  ;;  %v1319_v39 = vld [vmem:[%s5547_s25 + $0x20a0] sm:$0xff] }
 0x30e   : > { %3910 = vmatprep.subr.mxu1 %v1648_v40  ;;  %3840 = vmatpush1.msra.mxu0 %v1391_v41  ;;  %v1575_v40 = vld [vmem:[%s5547_s25 + $0x28a0] sm:$0xff]  ;;  %v1312_v41 = vld [vmem:[%s5547_s25 + $0x2068] sm:$0xff] }
 0x30f   : > { %3911 = vmatpush1.msra.mxu1 %v1647_v42  ;;  %3841 = vmatprep.subr.mxu0 %v1384_v45  ;;  %v1568_v42 = vld [vmem:[%s5547_s25 + $0x2868] sm:$0xff]  ;;  %v7036_v45 = vpop.f32.mrf.mxu1 }
 0x310   : > { %3912 = vmatprep.subr.mxu1 %v1640_v46  ;;  %3842 = vmatpush1.msra.mxu0 %v1383_v47  ;;  %v1311_v46 = vld [vmem:[%s5547_s25 + $0x2060] sm:$0xff] }
 0x311   : > { %3913 = vmatpush1.msra.mxu1 %v1639_v48  ;;  %3843 = vmatprep.subr.mxu0 %v1376_v50  ;;  %v1567_v47 = vld [vmem:[%s5547_s25 + $0x2860] sm:$0xff]  ;;  %v1304_v48 = vld [vmem:[%s5547_s25 + $0x2028] sm:$0xff] }
 0x312   : > { %3914 = vmatprep.subr.mxu1 %v1632_v51  ;;  %3844 = vmatpush1.msra.mxu0 %v1375_v52  ;;  %v1560_v50 = vld [vmem:[%s5547_s25 + $0x2828] sm:$0xff]  ;;  %v7042_v51 = vpop.f32.mrf.mxu1  ;;  %v7044_v52 = vpop.f32.mrf.mxu0 }
 0x313   : > { %3915 = vmatpush1.msra.mxu1 %v1631_v54  ;;  %3845 = vmatprep.subr.mxu0 %v1368_v56  ;;  %v1303_v54 = vld [vmem:[%s5547_s25 + $0x2020] sm:$0xff] }
 0x314   : > { %3916 = vmatprep.subr.mxu1 %v1624_v57  ;;  %3846 = vmatpush1.msra.mxu0 %v1367_v60  ;;  %v1559_v56 = vld [vmem:[%s5547_s25 + $0x2820] sm:$0xff]  ;;  %v1552_v57 = vld [vmem:[%s5547_s25 + $0x27e8] sm:$0xff] }
 0x315   : > { %3917 = vmatpush1.msra.mxu1 %v1623_v61  ;;  %3847 = vmatprep.subr.mxu0 %v1360_v62  ;;  %v1808_v60 = vld [vmem:[%s5547_s25 + $0x2fe8] sm:$0xff]  ;;  %v7050_v61 = vpop.f32.mrf.mxu0  ;;  %v1551_v62 = vld [vmem:[%s5547_s25 + $0x27e0] sm:$0xff] }
 0x316   : > { %3918 = vmatprep.subr.mxu1 %v1616_v0  ;;  %3848 = vmatpush1.msra.mxu0 %v1359_v1  ;;  %v1807_v0 = vld [vmem:[%s5547_s25 + $0x2fe0] sm:$0xff]  ;;  %v1544_v1 = vld [vmem:[%s5547_s25 + $0x27a8] sm:$0xff] }
 0x317   : > { %3919 = vmatpush1.msra.mxu1 %v1615_v3  ;;  %3849 = vmatprep.subr.mxu0 %v1352_v4  ;;  %v1800_v3 = vld [vmem:[%s5547_s25 + $0x2fa8] sm:$0xff]  ;;  %v7056_v4 = vpop.f32.mrf.mxu1 }
 0x318   : > { %3920 = vmatprep.subr.mxu1 %v1608_v5  ;;  %3850 = vmatpush1.msra.mxu0 %v1351_v8  ;;  %v1543_v5 = vld [vmem:[%s5547_s25 + $0x27a0] sm:$0xff] }
 0x319   : > { %3921 = vmatpush1.msra.mxu1 %v1607_v10  ;;  %3851 = vmatprep.subr.mxu0 %v1344_v12  ;;  %v1799_v8 = vld [vmem:[%s5547_s25 + $0x2fa0] sm:$0xff]  ;;  %v1536_v10 = vld [vmem:[%s5547_s25 + $0x2768] sm:$0xff] }
 0x31a   : > { %3922 = vmatprep.subr.mxu1 %v1600_v13  ;;  %3852 = vmatpush1.msra.mxu0 %v1343_v15  ;;  %v1792_v12 = vld [vmem:[%s5547_s25 + $0x2f68] sm:$0xff]  ;;  %v7062_v13 = vpop.f32.mrf.mxu1  ;;  %v7064_v15 = vpop.f32.mrf.mxu0 }
 0x31b   : > { %3923 = vmatpush1.msra.mxu1 %v1599_v16  ;;  %3853 = vmatprep.subr.mxu0 %v1336_v18  ;;  %v1535_v16 = vld [vmem:[%s5547_s25 + $0x2760] sm:$0xff] }
 0x31c   : > { %3924 = vmatprep.subr.mxu1 %v1592_v19  ;;  %3854 = vmatpush1.msra.mxu0 %v1335_v23  ;;  %v1791_v18 = vld [vmem:[%s5547_s25 + $0x2f60] sm:$0xff]  ;;  %v1528_v19 = vld [vmem:[%s5547_s25 + $0x2728] sm:$0xff] }
 0x31d   : > { %3925 = vmatpush1.msra.mxu1 %v1591_v24  ;;  %3855 = vmatprep.subr.mxu0 %v1328_v25  ;;  %v1784_v23 = vld [vmem:[%s5547_s25 + $0x2f28] sm:$0xff]  ;;  %v3045_v24 = vpop.f32.mrf.mxu0  ;;  %v1527_v25 = vld [vmem:[%s5547_s25 + $0x2720] sm:$0xff] }
 0x31e   : > { %3926 = vmatprep.subr.mxu1 %v1584_v28  ;;  %3856 = vmatpush1.msra.mxu0 %v1327_v32  ;;  %v1783_v28 = vld [vmem:[%s5547_s25 + $0x2f20] sm:$0xff]  ;;  %v1520_v32 = vld [vmem:[%s5547_s25 + $0x26e8] sm:$0xff] }
 0x31f   : > { %3927 = vmatpush1.msra.mxu1 %v1583_v34  ;;  %3857 = vmatprep.subr.mxu0 %v1320_v35  ;;  %v1776_v34 = vld [vmem:[%s5547_s25 + $0x2ee8] sm:$0xff]  ;;  %v7074_v35 = vpop.f32.mrf.mxu1 }
 0x320   : > { %3928 = vmatprep.subr.mxu1 %v1576_v37  ;;  %3858 = vmatpush1.msra.mxu0 %v1319_v39  ;;  %v1519_v37 = vld [vmem:[%s5547_s25 + $0x26e0] sm:$0xff] }
 0x321   : > { %3929 = vmatpush1.msra.mxu1 %v1575_v40  ;;  %3859 = vmatprep.subr.mxu0 %v1312_v41  ;;  %v1775_v39 = vld [vmem:[%s5547_s25 + $0x2ee0] sm:$0xff]  ;;  %v1512_v40 = vld [vmem:[%s5547_s25 + $0x26a8] sm:$0xff] }
 0x322   : > { %3930 = vmatprep.subr.mxu1 %v1568_v42  ;;  %3860 = vmatpush1.msra.mxu0 %v1311_v46  ;;  %v1768_v41 = vld [vmem:[%s5547_s25 + $0x2ea8] sm:$0xff]  ;;  %v3116_v42 = vpop.f32.mrf.mxu1  ;;  %v3047_v46 = vpop.f32.mrf.mxu0 }
 0x323   : > { %3931 = vmatpush1.msra.mxu1 %v1567_v47  ;;  %3861 = vmatprep.subr.mxu0 %v1304_v48  ;;  %v1511_v47 = vld [vmem:[%s5547_s25 + $0x26a0] sm:$0xff] }
 0x324   : > { %3932 = vmatprep.subr.mxu1 %v1560_v50  ;;  %3862 = vmatpush1.msra.mxu0 %v1303_v54  ;;  %v1767_v48 = vld [vmem:[%s5547_s25 + $0x2ea0] sm:$0xff]  ;;  %v2551_v50 = vadd.f32 %v7016_v21, %v7004_v7  ;;  %v1504_v54 = vld [vmem:[%s5547_s25 + $0x2668] sm:$0xff] }
 0x325   : > { %3933 = vmatpush1.msra.mxu1 %v1559_v56  ;;  %3863 = vmatprep.subr.mxu0 %v1552_v57  ;;  %v1760_v56 = vld [vmem:[%s5547_s25 + $0x2e68] sm:$0xff]  ;;  %v3187_v57 = vpop.f32.mrf.mxu0 }
 0x326   : > { %3934 = vmatprep.subr.mxu1 %v1808_v60  ;;  %3864 = vmatpush2.msra.mxu0 %v1551_v62  ;;  %v1503_v60 = vld [vmem:[%s5547_s25 + $0x2660] sm:$0xff]  ;;  %v1496_v7 = vld [vmem:[%s5547_s25 + $0x2628] sm:$0xff] }
 0x327   : > { %3935 = vmatpush2.msra.mxu1 %v1807_v0  ;;  %3865 = vmatprep.subr.mxu0 %v1544_v1  ;;  %v1759_v62 = vld [vmem:[%s5547_s25 + $0x2e60] sm:$0xff]  ;;  %v2549_v0 = vadd.f32 %v7002_v6, %v6992_v59  ;;  %v2622_v1 = vadd.f32 %v7024_v31, %v2551_v50  ;;  %v1752_v21 = vld [vmem:[%s5547_s25 + $0x2e28] sm:$0xff] }
 0x328   : > { %3936 = vmatprep.subr.mxu1 %v1800_v3  ;;  %3866 = vmatpush2.msra.mxu0 %v1543_v5  ;;  %v3118_v3 = vpop.f32.mrf.mxu1  ;;  %v1495_v5 = vld [vmem:[%s5547_s25 + $0x2620] sm:$0xff]  ;;  %v1488_v59 = vld [vmem:[%s5547_s25 + $0x25e8] sm:$0xff] }
 0x329   : > { %3937 = vmatpush2.msra.mxu1 %v1799_v8  ;;  %3867 = vmatprep.subr.mxu0 %v1536_v10  ;;  %v1751_v8 = vld [vmem:[%s5547_s25 + $0x2e20] sm:$0xff]  ;;  %v2620_v10 = vadd.f32 %v7010_v14, %v2549_v0  ;;  %v1744_v6 = vld [vmem:[%s5547_s25 + $0x2de8] sm:$0xff] }
 0x32a   : > { %3938 = vmatprep.subr.mxu1 %v1792_v12  ;;  %3868 = vmatpush2.msra.mxu0 %v1535_v16  ;;  %v3117_v12 = vadd.f32 %v3116_v42, %v3045_v24  ;;  %v3258_v31 = vpop.f32.mrf.mxu1  ;;  %v3189_v16 = vpop.f32.mrf.mxu0  ;;  %v1480_v24 = vld [vmem:[%s5547_s25 + $0x25a8] sm:$0xff] }
 0x32b   : > { %3939 = vmatpush2.msra.mxu1 %v1791_v18  ;;  %3869 = vmatprep.subr.mxu0 %v1528_v19  ;;  %v1487_v18 = vld [vmem:[%s5547_s25 + $0x25e0] sm:$0xff]  ;;  %v1728_v42 = vld [vmem:[%s5547_s25 + $0x2d68] sm:$0xff] }
 0x32c   : > { %3940 = vmatprep.subr.mxu1 %v1784_v23  ;;  %3870 = vmatpush2.msra.mxu0 %v1527_v25  ;;  %v1743_v19 = vld [vmem:[%s5547_s25 + $0x2de0] sm:$0xff]  ;;  %v2693_v23 = vadd.f32 %v7036_v45, %v2622_v1  ;;  %v3119_v25 = vadd.f32 %v3118_v3, %v3047_v46  ;;  %v3188_v14 = vadd.f32 %v3187_v57, %v3117_v12  ;;  %v3260_v46 = vpop.f32.mrf.mxu1  ;;  %v1448_v12 = vld [vmem:[%s5547_s25 + $0x24a8] sm:$0xff] }
 0x32d   : > { %3941 = vmatpush2.msra.mxu1 %v1783_v28  ;;  %3871 = vmatprep.subr.mxu0 %v1520_v32  ;;  %v1736_v28 = vld [vmem:[%s5547_s25 + $0x2da8] sm:$0xff]  ;;  %v3329_v32 = vpop.f32.mrf.mxu0  ;;  %v1455_v3 = vld [vmem:[%s5547_s25 + $0x24e0] sm:$0xff] }
 0x32e   : > { %3942 = vmatprep.subr.mxu1 %v1776_v34  ;;  %3872 = vmatpush2.msra.mxu0 %v1519_v37  ;;  %v1479_v34 = vld [vmem:[%s5547_s25 + $0x25a0] sm:$0xff]  ;;  %v2764_v45 = vadd.f32 %v7044_v52, %v2693_v23  ;;  %v1720_v52 = vld [vmem:[%s5547_s25 + $0x2d28] sm:$0xff] }
 0x32f   : > { %3943 = vmatpush2.msra.mxu1 %v1775_v39  ;;  %3873 = vmatprep.subr.mxu0 %v1512_v40  ;;  %v1735_v37 = vld [vmem:[%s5547_s25 + $0x2da0] sm:$0xff]  ;;  %v2691_v39 = vadd.f32 %v7022_v29, %v2620_v10  ;;  %v3190_v40 = vadd.f32 %v3189_v16, %v3119_v25  ;;  %v1464_v29 = vld [vmem:[%s5547_s25 + $0x2528] sm:$0xff]  ;;  %v3331_v57 = vpop.f32.mrf.mxu0 }
 0x330   : > { %3944 = vmatprep.subr.mxu1 %v1768_v41  ;;  %3874 = vmatpush2.msra.mxu0 %v1511_v47  ;;  %v1472_v41 = vld [vmem:[%s5547_s25 + $0x2568] sm:$0xff]  ;;  %v1471_v47 = vld [vmem:[%s5547_s25 + $0x2560] sm:$0xff]  ;;  %v2835_v0 = vadd.f32 %v7056_v4, %v2764_v45 }
 0x331   : > { %3945 = vmatpush2.msra.mxu1 %v1767_v48  ;;  %3875 = vmatprep.subr.mxu0 %v1504_v54  ;;  %v1727_v48 = vld [vmem:[%s5547_s25 + $0x2d60] sm:$0xff]  ;;  %v2762_v50 = vadd.f32 %v7030_v38, %v2691_v39  ;;  %v3259_v54 = vadd.f32 %v3258_v31, %v3188_v14  ;;  %v3261_v1 = vadd.f32 %v3260_v46, %v3190_v40 }
 0x332   : > { %3946 = vmatprep.subr.mxu1 %v1760_v56  ;;  %3876 = vmatpush2.msra.mxu0 %v1503_v60  ;;  %v3400_v56 = vpop.f32.mrf.mxu1  ;;  %v1463_v60 = vld [vmem:[%s5547_s25 + $0x2520] sm:$0xff]  ;;  %v2906_v10 = vadd.f32 %v7064_v15, %v2835_v0  ;;  %v1440_v15 = vld [vmem:[%s5547_s25 + $0x2468] sm:$0xff] }
 0x333   : > { %3947 = vmatpush2.msra.mxu1 %v1759_v62  ;;  %3877 = vmatprep.subr.mxu0 %v1496_v7  ;;  %v1719_v62 = vld [vmem:[%s5547_s25 + $0x2d20] sm:$0xff]  ;;  %v3330_v38 = vadd.f32 %v3329_v32, %v3259_v54  ;;  %v1456_v7 = vld [vmem:[%s5547_s25 + $0x24e8] sm:$0xff]  ;;  %v3332_v4 = vadd.f32 %v3331_v57, %v3261_v1 }
 0x334   : > { %3948 = vmatprep.subr.mxu1 %v1752_v21  ;;  %3878 = vmatpush2.msra.mxu0 %v1495_v5  ;;  %v1712_v21 = vld [vmem:[%s5547_s25 + $0x2ce8] sm:$0xff]  ;;  %v1711_v5 = vld [vmem:[%s5547_s25 + $0x2ce0] sm:$0xff] }
 0x335   : > { %3949 = vmatpush2.msra.mxu1 %v1751_v8  ;;  %3879 = vmatprep.subr.mxu0 %v1488_v59  ;;  %v2833_v8 = vadd.f32 %v7042_v51, %v2762_v50  ;;  %v1704_v59 = vld [vmem:[%s5547_s25 + $0x2ca8] sm:$0xff]  ;;  %v1447_v31 = vld [vmem:[%s5547_s25 + $0x24a0] sm:$0xff]  ;;  %v3401_v51 = vadd.f32 %v3400_v56, %v3330_v38 }
 0x336   : > { %3950 = vmatprep.subr.mxu1 %v1744_v6  ;;  %3880 = vmatpush2.msra.mxu0 %v1487_v18  ;;  %v3402_v6 = vpop.f32.mrf.mxu1  ;;  %v1703_v16 = vld [vmem:[%s5547_s25 + $0x2ca0] sm:$0xff]  ;;  %v1688_v32 = vld [vmem:[%s5547_s25 + $0x2c28] sm:$0xff] }
 0x337   : > { %3951 = vmatpush2.msra.mxu1 %v1743_v19  ;;  %3881 = vmatprep.subr.mxu0 %v1480_v24  ;;  %v2904_v18 = vadd.f32 %v7050_v61, %v2833_v8  ;;  %v1696_v19 = vld [vmem:[%s5547_s25 + $0x2c68] sm:$0xff]  ;;  %v1439_v23 = vld [vmem:[%s5547_s25 + $0x2460] sm:$0xff]  ;;  %v2977_v24 = vadd.f32 %v7074_v35, %v2906_v10 }
 0x338   : > { %3952 = vmatprep.subr.mxu1 %v1736_v28  ;;  %3882 = vmatpush2.msra.mxu0 %v1479_v34  ;;  %v1695_v25 = vld [vmem:[%s5547_s25 + $0x2c60] sm:$0xff]  ;;  %v3403_v28 = vadd.f32 %v3402_v6, %v3332_v4  ;;  %v1432_v61 = vld [vmem:[%s5547_s25 + $0x2428] sm:$0xff] }
 0x339   : > { %3953 = vmatpush2.msra.mxu1 %v1735_v37  ;;  %3883 = vmatprep.subr.mxu0 %v1472_v41  ;;  %v1431_v37 = vld [vmem:[%s5547_s25 + $0x2420] sm:$0xff]  ;;  %v2975_v40 = vadd.f32 %v7062_v13, %v2904_v18  ;;  %v2184_v56 = vld [vmem:[%s5547_s25 + $0x3ba8] sm:$0xff] }
 0x33a   : > { %3954 = vmatprep.subr.mxu1 %v1728_v42  ;;  %3884 = vmatpush2.msra.mxu0 %v1471_v47  ;;  %v1687_v35 = vld [vmem:[%s5547_s25 + $0x2c20] sm:$0xff]  ;;  %v1936_v42 = vld [vmem:[%s5547_s25 + $0x33e8] sm:$0xff] }
 0x33b   : > { %3955 = vmatpush2.msra.mxu1 %v1727_v48  ;;  %3885 = vmatprep.subr.mxu0 %v1464_v29  ;;  %v4691_v47 = vcombine.low %v2975_v40, %v2977_v24  ;;  %v2192_v48 = vld [vmem:[%s5547_s25 + $0x3be8] sm:$0xff]  ;;  %v1935_v54 = vld [vmem:[%s5547_s25 + $0x33e0] sm:$0xff] }
 0x33c   : > { %3956 = vmatprep.subr.mxu1 %v1720_v52  ;;  %3886 = vmatpush2.msra.mxu0 %v1463_v60  ;;  %v2191_v29 = vld [vmem:[%s5547_s25 + $0x3be0] sm:$0xff]  ;;  %v1928_v52 = vld [vmem:[%s5547_s25 + $0x33a8] sm:$0xff] }
 0x33d   : > { %3957 = vmatpush2.msra.mxu1 %v1719_v62  ;;  %3887 = vmatprep.subr.mxu0 %v1456_v7  ;;  %v1927_v60 = vld [vmem:[%s5547_s25 + $0x33a0] sm:$0xff]  ;;  %v4699_v0 = vrot.slane %v4691_v47, %v5691_v53  ;;  %v1920_v38 = vld [vmem:[%s5547_s25 + $0x3368] sm:$0xff] }
 0x33e   : > { %3958 = vmatprep.subr.mxu1 %v1712_v21  ;;  %3888 = vmatpush2.msra.mxu0 %v1455_v3  ;;  %v2183_v62 = vld [vmem:[%s5547_s25 + $0x3ba0] sm:$0xff]  ;;  %v2176_v7 = vld [vmem:[%s5547_s25 + $0x3b68] sm:$0xff] }
 0x33f   : > { %3959 = vmatpush2.msra.mxu1 %v1711_v5  ;;  %3889 = vmatprep.subr.mxu0 %v1448_v12  ;;  %v273_v21 = vld [vmem:[%s5564_s30] sm:$0xff]  ;;  %v1912_v10 = vld [vmem:[%s5547_s25 + $0x3328] sm:$0xff] }
 0x340   : > { %3960 = vmatprep.subr.mxu1 %v1704_v59  ;;  %v3471_v14 = vpop.f32.mrf.mxu0  ;;  %3890 = vmatpush2.msra.mxu0 %v1447_v31  ;;  %v1919_v3 = vld [vmem:[%s5547_s25 + $0x3360] sm:$0xff]  ;;  %v2168_v4 = vld [vmem:[%s5547_s25 + $0x3b28] sm:$0xff] }
 0x341   : > { %3961 = vmatpush2.msra.mxu1 %v1703_v16  ;;  %v3472_v34 = vadd.f32 %v3471_v14, %v3401_v51  ;;  %3891 = vmatprep.subr.mxu0 %v1440_v15  ;;  %v2175_v5 = vld [vmem:[%s5547_s25 + $0x3b60] sm:$0xff]  ;;  %v1904_v31 = vld [vmem:[%s5547_s25 + $0x32e8] sm:$0xff] }
 0x342   : > { %3962 = vmatprep.subr.mxu1 %v1696_v19  ;;  %v3542_v39 = vpop.f32.mrf.mxu1  ;;  %v3473_v45 = vpop.f32.mrf.mxu0  ;;  %3892 = vmatpush2.msra.mxu0 %v1439_v23  ;;  %v1911_v12 = vld [vmem:[%s5547_s25 + $0x3320] sm:$0xff]  ;;  %v2160_v16 = vld [vmem:[%s5547_s25 + $0x3ae8] sm:$0xff] }
 0x343   : > { %3963 = vmatpush2.msra.mxu1 %v1695_v25  ;;  %v3474_v41 = vadd.f32 %v3473_v45, %v3403_v28  ;;  %3893 = vmatprep.subr.mxu0 %v1432_v61  ;;  %v3543_v13 = vadd.f32 %v3542_v39, %v3472_v34  ;;  %v2167_v59 = vld [vmem:[%s5547_s25 + $0x3b20] sm:$0xff]  ;;  %v1896_v15 = vld [vmem:[%s5547_s25 + $0x32a8] sm:$0xff] }
 0x344   : > { %3964 = vmatprep.subr.mxu1 %v1688_v32  ;;  %v3544_v46 = vpop.f32.mrf.mxu1  ;;  %3894 = vmatpush2.msra.mxu0 %v1431_v37  ;;  %v1903_v18 = vld [vmem:[%s5547_s25 + $0x32e0] sm:$0xff]  ;;  %v2152_v19 = vld [vmem:[%s5547_s25 + $0x3aa8] sm:$0xff] }
 0x345   : > { %3895 = vmatprep.mubr.f32.mxu0 %v6011_v55  ;;  %v3545_v50 = vadd.f32 %v3544_v46, %v3474_v41  ;;  %3965 = vmatpush2.msra.mxu1 %v1687_v35  ;;  %v2159_v51 = vld [vmem:[%s5547_s25 + $0x3ae0] sm:$0xff]  ;;  %v1888_v14 = vld [vmem:[%s5547_s25 + $0x3268] sm:$0xff] }
 0x346   : > { %3896 = vmatmul.mubr.f32.vlgmr.msra.gmra.mxu0 %v5996_v44  ;;  %3966 = vmatprep.mubr.f32.mxu1 %v6017_v58  ;;  %v1895_v23 = vld [vmem:[%s5547_s25 + $0x32a0] sm:$0xff]  ;;  %v2144_v24 = vld [vmem:[%s5547_s25 + $0x3a68] sm:$0xff] }
 0x347   : > { %3973 = vmatprep.subr.mxu0 %v1936_v42  ;;  %v4692_v57 = vcombine.low %v3543_v13, %v3545_v50  ;;  %4044 = vmatprep.subr.mxu1 %v2192_v48  ;;  %v2151_v25 = vld [vmem:[%s5547_s25 + $0x3aa0] sm:$0xff]  ;;  %v1880_v32 = vld [vmem:[%s5547_s25 + $0x3228] sm:$0xff] }
 0x348   : > { %3967 = vmatmul.mubr.f32.vlgmr.msra.gmra.mxu1 %v6003_v49  ;;  %3974 = vmatpush1.msra.mxu0 %v1935_v54  ;;  %v1887_v28 = vld [vmem:[%s5547_s25 + $0x3260] sm:$0xff]  ;;  %v2136_v34 = vld [vmem:[%s5547_s25 + $0x3a28] sm:$0xff] }
 0x349   : > { %4045 = vmatpush1.msra.mxu1 %v2191_v29  ;;  %v4706_v1 = vrot.slane %v4692_v57, %v5691_v53  ;;  %3975 = vmatprep.subr.mxu0 %v1928_v52  ;;  %v2143_v61 = vld [vmem:[%s5547_s25 + $0x3a60] sm:$0xff]  ;;  %v1872_v45 = vld [vmem:[%s5547_s25 + $0x31e8] sm:$0xff] }
 0x34a   : > { %4046 = vmatprep.subr.mxu1 %v2184_v56  ;;  %3976 = vmatpush1.msra.mxu0 %v1927_v60  ;;  %v1879_v37 = vld [vmem:[%s5547_s25 + $0x3220] sm:$0xff]  ;;  %v2128_v40 = vld [vmem:[%s5547_s25 + $0x39e8] sm:$0xff] }
 0x34b   : > { %v4707_v8 = vcombine.low %v4699_v0, %v4706_v1  ;;  %4047 = vmatpush1.msra.mxu1 %v2183_v62  ;;  %3977 = vmatprep.subr.mxu0 %v1920_v38  ;;  %v2135_v39 = vld [vmem:[%s5547_s25 + $0x3a20] sm:$0xff]  ;;  %v1864_v42 = vld [vmem:[%s5547_s25 + $0x31a8] sm:$0xff] }
 0x34c   : > { %4048 = vmatprep.subr.mxu1 %v2176_v7  ;;  %3978 = vmatpush1.msra.mxu0 %v1919_v3  ;;  %v1871_v35 = vld [vmem:[%s5547_s25 + $0x31e0] sm:$0xff]  ;;  %v2120_v46 = vld [vmem:[%s5547_s25 + $0x39a8] sm:$0xff] }
 0x34d   : > { %v4727_v6 = vadd.f32 %v4707_v8, %v273_v21  ;;  %4049 = vmatpush1.msra.mxu1 %v2175_v5  ;;  %3979 = vmatprep.subr.mxu0 %v1912_v10  ;;  %v2127_v41 = vld [vmem:[%s5547_s25 + $0x39e0] sm:$0xff]  ;;  %v1856_v13 = vld [vmem:[%s5547_s25 + $0x3168] sm:$0xff] }
 0x34e   : > { %4050 = vmatprep.subr.mxu1 %v2168_v4  ;;  %3980 = vmatpush1.msra.mxu0 %v1911_v12  ;;  %v1863_v47 = vld [vmem:[%s5547_s25 + $0x31a0] sm:$0xff]  ;;  %v2112_v50 = vld [vmem:[%s5547_s25 + $0x3968] sm:$0xff] }
 0x34f   : > { %4729 = vst [vmem:[%s5564_s30] sm:$0xff] %v4727_v6  ;;  %4051 = vmatpush1.msra.mxu1 %v2167_v59  ;;  %3981 = vmatprep.subr.mxu0 %v1904_v31  ;;  %v2119_v48 = vld [vmem:[%s5547_s25 + $0x39a0] sm:$0xff]  ;;  %v1848_v52 = vld [vmem:[%s5547_s25 + $0x3128] sm:$0xff] }
 0x350   : > { %4052 = vmatprep.subr.mxu1 %v2160_v16  ;;  %3982 = vmatpush1.msra.mxu0 %v1903_v18  ;;  %v1855_v54 = vld [vmem:[%s5547_s25 + $0x3160] sm:$0xff]  ;;  %v2104_v56 = vld [vmem:[%s5547_s25 + $0x3928] sm:$0xff] }
 0x351   : > { %4053 = vmatpush1.msra.mxu1 %v2159_v51  ;;  %3983 = vmatprep.subr.mxu0 %v1896_v15  ;;  %v2111_v29 = vld [vmem:[%s5547_s25 + $0x3960] sm:$0xff]  ;;  %v1840_v62 = vld [vmem:[%s5547_s25 + $0x30e8] sm:$0xff] }
 0x352   : > { %4054 = vmatprep.subr.mxu1 %v2152_v19  ;;  %3984 = vmatpush1.msra.mxu0 %v1895_v23  ;;  %v1847_v57 = vld [vmem:[%s5547_s25 + $0x3120] sm:$0xff]  ;;  %v2096_v0 = vld [vmem:[%s5547_s25 + $0x38e8] sm:$0xff] }
 0x353   : > { %4055 = vmatpush1.msra.mxu1 %v2151_v25  ;;  %3985 = vmatprep.subr.mxu0 %v1888_v14  ;;  %v2103_v60 = vld [vmem:[%s5547_s25 + $0x3920] sm:$0xff]  ;;  %v1832_v7 = vld [vmem:[%s5547_s25 + $0x30a8] sm:$0xff] }
 0x354   : > { %4056 = vmatprep.subr.mxu1 %v2144_v24  ;;  %3986 = vmatpush1.msra.mxu0 %v1887_v28  ;;  %v1839_v1 = vld [vmem:[%s5547_s25 + $0x30e0] sm:$0xff]  ;;  %v2088_v21 = vld [vmem:[%s5547_s25 + $0x38a8] sm:$0xff] }
 0x355   : > { %4057 = vmatpush1.msra.mxu1 %v2143_v61  ;;  %3987 = vmatprep.subr.mxu0 %v1880_v32  ;;  %v2095_v38 = vld [vmem:[%s5547_s25 + $0x38e0] sm:$0xff]  ;;  %v1824_v8 = vld [vmem:[%s5547_s25 + $0x3068] sm:$0xff] }
 0x356   : > { %4058 = vmatprep.subr.mxu1 %v2136_v34  ;;  %3988 = vmatpush1.msra.mxu0 %v1879_v37  ;;  %v1831_v3 = vld [vmem:[%s5547_s25 + $0x30a0] sm:$0xff]  ;;  %v2080_v10 = vld [vmem:[%s5547_s25 + $0x3868] sm:$0xff] }
 0x357   : > { %4059 = vmatpush1.msra.mxu1 %v2135_v39  ;;  %3989 = vmatprep.subr.mxu0 %v1872_v45  ;;  %v2087_v5 = vld [vmem:[%s5547_s25 + $0x38a0] sm:$0xff]  ;;  %v1816_v59 = vld [vmem:[%s5547_s25 + $0x3028] sm:$0xff] }
 0x358   : > { %4060 = vmatprep.subr.mxu1 %v2128_v40  ;;  %3990 = vmatpush1.msra.mxu0 %v1871_v35  ;;  %v1823_v4 = vld [vmem:[%s5547_s25 + $0x3060] sm:$0xff]  ;;  %v2072_v6 = vld [vmem:[%s5547_s25 + $0x3828] sm:$0xff] }
 0x359   : > { %4061 = vmatpush1.msra.mxu1 %v2127_v41  ;;  %3991 = vmatprep.subr.mxu0 %v1864_v42  ;;  %v2079_v12 = vld [vmem:[%s5547_s25 + $0x3860] sm:$0xff]  ;;  %v2064_v18 = vld [vmem:[%s5547_s25 + $0x37e8] sm:$0xff] }
 0x35a   : > { %4062 = vmatprep.subr.mxu1 %v2120_v46  ;;  %3992 = vmatpush1.msra.mxu0 %v1863_v47  ;;  %v1815_v31 = vld [vmem:[%s5547_s25 + $0x3020] sm:$0xff]  ;;  %v2320_v51 = vld [vmem:[%s5547_s25 + $0x3fe8] sm:$0xff] }
 0x35b   : > { %4063 = vmatpush1.msra.mxu1 %v2119_v48  ;;  %3993 = vmatprep.subr.mxu0 %v1856_v13  ;;  %v2071_v16 = vld [vmem:[%s5547_s25 + $0x3820] sm:$0xff]  ;;  %v2056_v23 = vld [vmem:[%s5547_s25 + $0x37a8] sm:$0xff] }
 0x35c   : > { %4064 = vmatprep.subr.mxu1 %v2112_v50  ;;  %3994 = vmatpush1.msra.mxu0 %v1855_v54  ;;  %v2063_v15 = vld [vmem:[%s5547_s25 + $0x37e0] sm:$0xff]  ;;  %v2312_v25 = vld [vmem:[%s5547_s25 + $0x3fa8] sm:$0xff] }
 0x35d   : > { %4065 = vmatpush1.msra.mxu1 %v2111_v29  ;;  %3995 = vmatprep.subr.mxu0 %v1848_v52  ;;  %v2319_v19 = vld [vmem:[%s5547_s25 + $0x3fe0] sm:$0xff]  ;;  %v2048_v28 = vld [vmem:[%s5547_s25 + $0x3768] sm:$0xff] }
 0x35e   : > { %4066 = vmatprep.subr.mxu1 %v2104_v56  ;;  %3996 = vmatpush1.msra.mxu0 %v1847_v57  ;;  %v2055_v14 = vld [vmem:[%s5547_s25 + $0x37a0] sm:$0xff]  ;;  %v2304_v61 = vld [vmem:[%s5547_s25 + $0x3f68] sm:$0xff] }
 0x35f   : > { %4067 = vmatpush1.msra.mxu1 %v2103_v60  ;;  %3997 = vmatprep.subr.mxu0 %v1840_v62  ;;  %v2311_v24 = vld [vmem:[%s5547_s25 + $0x3fa0] sm:$0xff]  ;;  %v2040_v37 = vld [vmem:[%s5547_s25 + $0x3728] sm:$0xff] }
 0x360   : > { %4068 = vmatprep.subr.mxu1 %v2096_v0  ;;  %3998 = vmatpush1.msra.mxu0 %v1839_v1  ;;  %v2047_v32 = vld [vmem:[%s5547_s25 + $0x3760] sm:$0xff]  ;;  %v2296_v39 = vld [vmem:[%s5547_s25 + $0x3f28] sm:$0xff] }
 0x361   : > { %4069 = vmatpush1.msra.mxu1 %v2095_v38  ;;  %3999 = vmatprep.subr.mxu0 %v1832_v7  ;;  %v2303_v34 = vld [vmem:[%s5547_s25 + $0x3f60] sm:$0xff]  ;;  %v2032_v35 = vld [vmem:[%s5547_s25 + $0x36e8] sm:$0xff] }
 0x362   : > { %4070 = vmatprep.subr.mxu1 %v2088_v21  ;;  %4000 = vmatpush1.msra.mxu0 %v1831_v3  ;;  %v2039_v45 = vld [vmem:[%s5547_s25 + $0x3720] sm:$0xff]  ;;  %v2288_v41 = vld [vmem:[%s5547_s25 + $0x3ee8] sm:$0xff] }
 0x363   : > { %4071 = vmatpush1.msra.mxu1 %v2087_v5  ;;  %4001 = vmatprep.subr.mxu0 %v1824_v8  ;;  %v2295_v40 = vld [vmem:[%s5547_s25 + $0x3f20] sm:$0xff]  ;;  %v2024_v47 = vld [vmem:[%s5547_s25 + $0x36a8] sm:$0xff] }
 0x364   : > { %4072 = vmatprep.subr.mxu1 %v2080_v10  ;;  %4002 = vmatpush1.msra.mxu0 %v1823_v4  ;;  %v2031_v42 = vld [vmem:[%s5547_s25 + $0x36e0] sm:$0xff]  ;;  %v2280_v48 = vld [vmem:[%s5547_s25 + $0x3ea8] sm:$0xff] }
 0x365   : > { %4073 = vmatpush1.msra.mxu1 %v2079_v12  ;;  %4003 = vmatprep.subr.mxu0 %v1816_v59  ;;  %v2287_v46 = vld [vmem:[%s5547_s25 + $0x3ee0] sm:$0xff]  ;;  %v2016_v54 = vld [vmem:[%s5547_s25 + $0x3668] sm:$0xff] }
 0x366   : > { %4074 = vmatprep.subr.mxu1 %v2072_v6  ;;  %4004 = vmatpush1.msra.mxu0 %v1815_v31  ;;  %v2023_v13 = vld [vmem:[%s5547_s25 + $0x36a0] sm:$0xff]  ;;  %v2272_v29 = vld [vmem:[%s5547_s25 + $0x3e68] sm:$0xff] }
 0x367   : > { %4075 = vmatpush1.msra.mxu1 %v2071_v16  ;;  %4005 = vmatprep.subr.mxu0 %v2064_v18  ;;  %v2279_v50 = vld [vmem:[%s5547_s25 + $0x3ea0] sm:$0xff]  ;;  %v2008_v57 = vld [vmem:[%s5547_s25 + $0x3628] sm:$0xff] }
 0x368   : > { %4076 = vmatprep.subr.mxu1 %v2320_v51  ;;  %4006 = vmatpush2.msra.mxu0 %v2063_v15  ;;  %v2015_v52 = vld [vmem:[%s5547_s25 + $0x3660] sm:$0xff]  ;;  %v2264_v60 = vld [vmem:[%s5547_s25 + $0x3e28] sm:$0xff] }
 0x369   : > { %4077 = vmatpush2.msra.mxu1 %v2319_v19  ;;  %4007 = vmatprep.subr.mxu0 %v2056_v23  ;;  %v2271_v56 = vld [vmem:[%s5547_s25 + $0x3e60] sm:$0xff]  ;;  %v2000_v1 = vld [vmem:[%s5547_s25 + $0x35e8] sm:$0xff] }
 0x36a   : > { %4078 = vmatprep.subr.mxu1 %v2312_v25  ;;  %4008 = vmatpush2.msra.mxu0 %v2055_v14  ;;  %v2007_v62 = vld [vmem:[%s5547_s25 + $0x3620] sm:$0xff]  ;;  %v2256_v38 = vld [vmem:[%s5547_s25 + $0x3de8] sm:$0xff] }
 0x36b   : > { %4079 = vmatpush2.msra.mxu1 %v2311_v24  ;;  %4009 = vmatprep.subr.mxu0 %v2048_v28  ;;  %v2263_v0 = vld [vmem:[%s5547_s25 + $0x3e20] sm:$0xff]  ;;  %v1992_v3 = vld [vmem:[%s5547_s25 + $0x35a8] sm:$0xff] }
 0x36c   : > { %4080 = vmatprep.subr.mxu1 %v2304_v61  ;;  %4010 = vmatpush2.msra.mxu0 %v2047_v32  ;;  %v1999_v7 = vld [vmem:[%s5547_s25 + $0x35e0] sm:$0xff]  ;;  %v2248_v5 = vld [vmem:[%s5547_s25 + $0x3da8] sm:$0xff] }
 0x36d   : > { %4081 = vmatpush2.msra.mxu1 %v2303_v34  ;;  %4011 = vmatprep.subr.mxu0 %v2040_v37  ;;  %v2255_v21 = vld [vmem:[%s5547_s25 + $0x3de0] sm:$0xff]  ;;  %v1984_v4 = vld [vmem:[%s5547_s25 + $0x3568] sm:$0xff] }
 0x36e   : > { %4082 = vmatprep.subr.mxu1 %v2296_v39  ;;  %4012 = vmatpush2.msra.mxu0 %v2039_v45  ;;  %v1991_v8 = vld [vmem:[%s5547_s25 + $0x35a0] sm:$0xff]  ;;  %v2240_v12 = vld [vmem:[%s5547_s25 + $0x3d68] sm:$0xff] }
 0x36f   : > { %4083 = vmatpush2.msra.mxu1 %v2295_v40  ;;  %4013 = vmatprep.subr.mxu0 %v2032_v35  ;;  %v2247_v10 = vld [vmem:[%s5547_s25 + $0x3da0] sm:$0xff]  ;;  %v1976_v31 = vld [vmem:[%s5547_s25 + $0x3528] sm:$0xff] }
 0x370   : > { %4084 = vmatprep.subr.mxu1 %v2288_v41  ;;  %4014 = vmatpush2.msra.mxu0 %v2031_v42  ;;  %v1983_v59 = vld [vmem:[%s5547_s25 + $0x3560] sm:$0xff]  ;;  %v2232_v16 = vld [vmem:[%s5547_s25 + $0x3d28] sm:$0xff]  ;;  %v402_v42 = vld [vmem:[%s5547_s25 + $0x3f8] sm:$0xff] }
 0x371   : > { %4085 = vmatpush2.msra.mxu1 %v2287_v46  ;;  %4015 = vmatprep.subr.mxu0 %v2024_v47  ;;  %v2239_v6 = vld [vmem:[%s5547_s25 + $0x3d60] sm:$0xff]  ;;  %v1968_v15 = vld [vmem:[%s5547_s25 + $0x34e8] sm:$0xff]  ;;  %v658_v46 = vld [vmem:[%s5547_s25 + $0xbf8] sm:$0xff] }
 0x372   : > { %4086 = vmatprep.subr.mxu1 %v2280_v48  ;;  %4016 = vmatpush2.msra.mxu0 %v2023_v13  ;;  %v1975_v18 = vld [vmem:[%s5547_s25 + $0x3520] sm:$0xff]  ;;  %v2224_v19 = vld [vmem:[%s5547_s25 + $0x3ce8] sm:$0xff]  ;;  %v401_v47 = vld [vmem:[%s5547_s25 + $0x3f0] sm:$0xff] }
 0x373   : > { %4087 = vmatpush2.msra.mxu1 %v2279_v50  ;;  %4017 = vmatprep.subr.mxu0 %v2016_v54  ;;  %v2231_v51 = vld [vmem:[%s5547_s25 + $0x3d20] sm:$0xff]  ;;  %v1960_v14 = vld [vmem:[%s5547_s25 + $0x34a8] sm:$0xff]  ;;  %v657_v48 = vld [vmem:[%s5547_s25 + $0xbf0] sm:$0xff] }
 0x374   : > { %4088 = vmatprep.subr.mxu1 %v2272_v29  ;;  %4018 = vmatpush2.msra.mxu0 %v2015_v52  ;;  %v1967_v23 = vld [vmem:[%s5547_s25 + $0x34e0] sm:$0xff]  ;;  %v2216_v24 = vld [vmem:[%s5547_s25 + $0x3ca8] sm:$0xff]  ;;  %v394_v13 = vld [vmem:[%s5547_s25 + $0x3b8] sm:$0xff] }
 0x375   : > { %4089 = vmatpush2.msra.mxu1 %v2271_v56  ;;  %4019 = vmatprep.subr.mxu0 %v2008_v57  ;;  %v2223_v25 = vld [vmem:[%s5547_s25 + $0x3ce0] sm:$0xff]  ;;  %v1952_v32 = vld [vmem:[%s5547_s25 + $0x3468] sm:$0xff]  ;;  %v650_v50 = vld [vmem:[%s5547_s25 + $0xbb8] sm:$0xff] }
 0x376   : > { %4090 = vmatprep.subr.mxu1 %v2264_v60  ;;  %4020 = vmatpush2.msra.mxu0 %v2007_v62  ;;  %v1959_v28 = vld [vmem:[%s5547_s25 + $0x34a0] sm:$0xff]  ;;  %v2208_v34 = vld [vmem:[%s5547_s25 + $0x3c68] sm:$0xff]  ;;  %v393_v54 = vld [vmem:[%s5547_s25 + $0x3b0] sm:$0xff] }
 0x377   : > { %4091 = vmatpush2.msra.mxu1 %v2263_v0  ;;  %4021 = vmatprep.subr.mxu0 %v2000_v1  ;;  %v2215_v61 = vld [vmem:[%s5547_s25 + $0x3ca0] sm:$0xff]  ;;  %v1944_v45 = vld [vmem:[%s5547_s25 + $0x3428] sm:$0xff]  ;;  %v649_v29 = vld [vmem:[%s5547_s25 + $0xbb0] sm:$0xff] }
 0x378   : > { %4092 = vmatprep.subr.mxu1 %v2256_v38  ;;  %4022 = vmatpush2.msra.mxu0 %v1999_v7  ;;  %v1951_v37 = vld [vmem:[%s5547_s25 + $0x3460] sm:$0xff]  ;;  %v2200_v40 = vld [vmem:[%s5547_s25 + $0x3c28] sm:$0xff]  ;;  %v386_v52 = vld [vmem:[%s5547_s25 + $0x378] sm:$0xff] }
 0x379   : > { %4093 = vmatpush2.msra.mxu1 %v2255_v21  ;;  %4023 = vmatprep.subr.mxu0 %v1992_v3  ;;  %v2207_v39 = vld [vmem:[%s5547_s25 + $0x3c60] sm:$0xff]  ;;  %v642_v56 = vld [vmem:[%s5547_s25 + $0xb78] sm:$0xff]  ;;  %v385_v57 = vld [vmem:[%s5547_s25 + $0x370] sm:$0xff] }
 0x37a   : > { %4094 = vmatprep.subr.mxu1 %v2248_v5  ;;  %4024 = vmatpush2.msra.mxu0 %v1991_v8  ;;  %v1943_v35 = vld [vmem:[%s5547_s25 + $0x3420] sm:$0xff]  ;;  %v641_v60 = vld [vmem:[%s5547_s25 + $0xb70] sm:$0xff]  ;;  %v378_v62 = vld [vmem:[%s5547_s25 + $0x338] sm:$0xff] }
 0x37b   : > { %4095 = vmatpush2.msra.mxu1 %v2247_v10  ;;  %4025 = vmatprep.subr.mxu0 %v1984_v4  ;;  %v2199_v41 = vld [vmem:[%s5547_s25 + $0x3c20] sm:$0xff]  ;;  %v634_v0 = vld [vmem:[%s5547_s25 + $0xb38] sm:$0xff]  ;;  %v377_v1 = vld [vmem:[%s5547_s25 + $0x330] sm:$0xff] }
 0x37c   : > { %4096 = vmatprep.subr.mxu1 %v2240_v12  ;;  %4026 = vmatpush2.msra.mxu0 %v1983_v59  ;;  %v633_v38 = vld [vmem:[%s5547_s25 + $0xb30] sm:$0xff]  ;;  %v370_v7 = vld [vmem:[%s5547_s25 + $0x2f8] sm:$0xff] }
 0x37d   : > { %4097 = vmatpush2.msra.mxu1 %v2239_v6  ;;  %4027 = vmatprep.subr.mxu0 %v1976_v31  ;;  %v626_v21 = vld [vmem:[%s5547_s25 + $0xaf8] sm:$0xff]  ;;  %v369_v3 = vld [vmem:[%s5547_s25 + $0x2f0] sm:$0xff] }
 0x37e   : > { %4098 = vmatprep.subr.mxu1 %v2232_v16  ;;  %4028 = vmatpush2.msra.mxu0 %v1975_v18  ;;  %v625_v5 = vld [vmem:[%s5547_s25 + $0xaf0] sm:$0xff]  ;;  %v362_v8 = vld [vmem:[%s5547_s25 + $0x2b8] sm:$0xff] }
 0x37f   : > { %4099 = vmatpush2.msra.mxu1 %v2231_v51  ;;  %4029 = vmatprep.subr.mxu0 %v1968_v15  ;;  %v618_v10 = vld [vmem:[%s5547_s25 + $0xab8] sm:$0xff]  ;;  %v361_v4 = vld [vmem:[%s5547_s25 + $0x2b0] sm:$0xff] }
 0x380   : > { %4100 = vmatprep.subr.mxu1 %v2224_v19  ;;  %4030 = vmatpush2.msra.mxu0 %v1967_v23  ;;  %v617_v12 = vld [vmem:[%s5547_s25 + $0xab0] sm:$0xff]  ;;  %v354_v59 = vld [vmem:[%s5547_s25 + $0x278] sm:$0xff] }
 0x381   : > { %4101 = vmatpush2.msra.mxu1 %v2223_v25  ;;  %4031 = vmatprep.subr.mxu0 %v1960_v14  ;;  %v610_v6 = vld [vmem:[%s5547_s25 + $0xa78] sm:$0xff]  ;;  %v353_v31 = vld [vmem:[%s5547_s25 + $0x270] sm:$0xff] }
 0x382   : > { %4102 = vmatprep.subr.mxu1 %v2216_v24  ;;  %4032 = vmatpush2.msra.mxu0 %v1959_v28  ;;  %v609_v16 = vld [vmem:[%s5547_s25 + $0xa70] sm:$0xff]  ;;  %v346_v18 = vld [vmem:[%s5547_s25 + $0x238] sm:$0xff] }
 0x383   : > { %4103 = vmatpush2.msra.mxu1 %v2215_v61  ;;  %4033 = vmatprep.subr.mxu0 %v1952_v32  ;;  %v602_v51 = vld [vmem:[%s5547_s25 + $0xa38] sm:$0xff]  ;;  %v345_v15 = vld [vmem:[%s5547_s25 + $0x230] sm:$0xff] }
 0x384   : > { %4104 = vmatprep.subr.mxu1 %v2208_v34  ;;  %4034 = vmatpush2.msra.mxu0 %v1951_v37  ;;  %v601_v19 = vld [vmem:[%s5547_s25 + $0xa30] sm:$0xff]  ;;  %v338_v23 = vld [vmem:[%s5547_s25 + $0x1f8] sm:$0xff] }
 0x385   : > { %4105 = vmatpush2.msra.mxu1 %v2207_v39  ;;  %4035 = vmatprep.subr.mxu0 %v1944_v45  ;;  %v594_v25 = vld [vmem:[%s5547_s25 + $0x9f8] sm:$0xff]  ;;  %v337_v14 = vld [vmem:[%s5547_s25 + $0x1f0] sm:$0xff] }
 0x386   : > { %4106 = vmatprep.subr.mxu1 %v2200_v40  ;;  %4036 = vmatpush2.msra.mxu0 %v1943_v35  ;;  %v593_v24 = vld [vmem:[%s5547_s25 + $0x9f0] sm:$0xff]  ;;  %v330_v28 = vld [vmem:[%s5547_s25 + $0x1b8] sm:$0xff] }
 0x387   : > { %4037 = vmatprep.mubr.f32.mxu0 %v6158_v33  ;;  %4107 = vmatpush2.msra.mxu1 %v2199_v41  ;;  %v586_v61 = vld [vmem:[%s5547_s25 + $0x9b8] sm:$0xff]  ;;  %v329_v32 = vld [vmem:[%s5547_s25 + $0x1b0] sm:$0xff] }
 0x388   : > { %4038 = vmatmul.mubr.f32.vlgmr.msra.gmra.mxu0 %v6143_v20  ;;  %4108 = vmatprep.mubr.f32.mxu1 %v6164_v36  ;;  %v585_v34 = vld [vmem:[%s5547_s25 + $0x9b0] sm:$0xff]  ;;  %v322_v37 = vld [vmem:[%s5547_s25 + $0x178] sm:$0xff] }
 0x389   : > { %4115 = vmatprep.subr.mxu0 %v402_v42  ;;  %4186 = vmatprep.subr.mxu1 %v658_v46  ;;  %v578_v39 = vld [vmem:[%s5547_s25 + $0x978] sm:$0xff]  ;;  %v321_v45 = vld [vmem:[%s5547_s25 + $0x170] sm:$0xff] }
 0x38a   : > { %4109 = vmatmul.mubr.f32.vlgmr.msra.gmra.mxu1 %v6150_v26  ;;  %4116 = vmatpush1.msra.mxu0 %v401_v47  ;;  %v577_v40 = vld [vmem:[%s5547_s25 + $0x970] sm:$0xff]  ;;  %v314_v35 = vld [vmem:[%s5547_s25 + $0x138] sm:$0xff] }
 0x38b   : > { %4187 = vmatpush1.msra.mxu1 %v657_v48  ;;  %4117 = vmatprep.subr.mxu0 %v394_v13  ;;  %v570_v41 = vld [vmem:[%s5547_s25 + $0x938] sm:$0xff]  ;;  %v313_v42 = vld [vmem:[%s5547_s25 + $0x130] sm:$0xff] }
 0x38c   : > { %4188 = vmatprep.subr.mxu1 %v650_v50  ;;  %4118 = vmatpush1.msra.mxu0 %v393_v54  ;;  %v569_v46 = vld [vmem:[%s5547_s25 + $0x930] sm:$0xff]  ;;  %v306_v47 = vld [vmem:[%s5547_s25 + $0xf8] sm:$0xff] }
 0x38d   : > { %4189 = vmatpush1.msra.mxu1 %v649_v29  ;;  %4119 = vmatprep.subr.mxu0 %v386_v52  ;;  %v562_v48 = vld [vmem:[%s5547_s25 + $0x8f8] sm:$0xff]  ;;  %v305_v13 = vld [vmem:[%s5547_s25 + $0xf0] sm:$0xff] }
 0x38e   : > { %4190 = vmatprep.subr.mxu1 %v642_v56  ;;  %4120 = vmatpush1.msra.mxu0 %v385_v57  ;;  %v561_v50 = vld [vmem:[%s5547_s25 + $0x8f0] sm:$0xff]  ;;  %v298_v54 = vld [vmem:[%s5547_s25 + $0xb8] sm:$0xff] }
 0x38f   : > { %4191 = vmatpush1.msra.mxu1 %v641_v60  ;;  %4121 = vmatprep.subr.mxu0 %v378_v62  ;;  %v554_v29 = vld [vmem:[%s5547_s25 + $0x8b8] sm:$0xff]  ;;  %v297_v52 = vld [vmem:[%s5547_s25 + $0xb0] sm:$0xff] }
 0x390   : > { %4192 = vmatprep.subr.mxu1 %v634_v0  ;;  %4122 = vmatpush1.msra.mxu0 %v377_v1  ;;  %v553_v56 = vld [vmem:[%s5547_s25 + $0x8b0] sm:$0xff]  ;;  %v290_v57 = vld [vmem:[%s5547_s25 + $0x78] sm:$0xff] }
 0x391   : > { %4193 = vmatpush1.msra.mxu1 %v633_v38  ;;  %4123 = vmatprep.subr.mxu0 %v370_v7  ;;  %v546_v60 = vld [vmem:[%s5547_s25 + $0x878] sm:$0xff]  ;;  %v289_v62 = vld [vmem:[%s5547_s25 + $0x70] sm:$0xff] }
 0x392   : > { %4194 = vmatprep.subr.mxu1 %v626_v21  ;;  %4124 = vmatpush1.msra.mxu0 %v369_v3  ;;  %v545_v0 = vld [vmem:[%s5547_s25 + $0x870] sm:$0xff]  ;;  %v282_v1 = vld [vmem:[%s5547_s25 + $0x38] sm:$0xff] }
 0x393   : > { %4195 = vmatpush1.msra.mxu1 %v625_v5  ;;  %4125 = vmatprep.subr.mxu0 %v362_v8  ;;  %v538_v38 = vld [vmem:[%s5547_s25 + $0x838] sm:$0xff]  ;;  %v281_v7 = vld [vmem:[%s5547_s25 + $0x30] sm:$0xff] }
 0x394   : > { %4196 = vmatprep.subr.mxu1 %v618_v10  ;;  %4126 = vmatpush1.msra.mxu0 %v361_v4  ;;  %v537_v21 = vld [vmem:[%s5547_s25 + $0x830] sm:$0xff]  ;;  %v530_v3 = vld [vmem:[%s5547_s25 + $0x7f8] sm:$0xff] }
 0x395   : > { %4197 = vmatpush1.msra.mxu1 %v617_v12  ;;  %4127 = vmatprep.subr.mxu0 %v354_v59  ;;  %v786_v5 = vld [vmem:[%s5547_s25 + $0xff8] sm:$0xff]  ;;  %v529_v8 = vld [vmem:[%s5547_s25 + $0x7f0] sm:$0xff] }
 0x396   : > { %4198 = vmatprep.subr.mxu1 %v610_v6  ;;  %4128 = vmatpush1.msra.mxu0 %v353_v31  ;;  %v785_v10 = vld [vmem:[%s5547_s25 + $0xff0] sm:$0xff]  ;;  %v522_v4 = vld [vmem:[%s5547_s25 + $0x7b8] sm:$0xff] }
 0x397   : > { %4199 = vmatpush1.msra.mxu1 %v609_v16  ;;  %4129 = vmatprep.subr.mxu0 %v346_v18  ;;  %v778_v12 = vld [vmem:[%s5547_s25 + $0xfb8] sm:$0xff]  ;;  %v521_v59 = vld [vmem:[%s5547_s25 + $0x7b0] sm:$0xff] }
 0x398   : > { %4200 = vmatprep.subr.mxu1 %v602_v51  ;;  %4130 = vmatpush1.msra.mxu0 %v345_v15  ;;  %v777_v6 = vld [vmem:[%s5547_s25 + $0xfb0] sm:$0xff]  ;;  %v514_v31 = vld [vmem:[%s5547_s25 + $0x778] sm:$0xff] }
 0x399   : > { %4201 = vmatpush1.msra.mxu1 %v601_v19  ;;  %4131 = vmatprep.subr.mxu0 %v338_v23  ;;  %v770_v16 = vld [vmem:[%s5547_s25 + $0xf78] sm:$0xff]  ;;  %v513_v18 = vld [vmem:[%s5547_s25 + $0x770] sm:$0xff] }
 0x39a   : > { %4202 = vmatprep.subr.mxu1 %v594_v25  ;;  %4132 = vmatpush1.msra.mxu0 %v337_v14  ;;  %v769_v51 = vld [vmem:[%s5547_s25 + $0xf70] sm:$0xff]  ;;  %v506_v15 = vld [vmem:[%s5547_s25 + $0x738] sm:$0xff] }
 0x39b   : > { %4203 = vmatpush1.msra.mxu1 %v593_v24  ;;  %4133 = vmatprep.subr.mxu0 %v330_v28  ;;  %v762_v19 = vld [vmem:[%s5547_s25 + $0xf38] sm:$0xff]  ;;  %v505_v23 = vld [vmem:[%s5547_s25 + $0x730] sm:$0xff] }
 0x39c   : > { %4204 = vmatprep.subr.mxu1 %v586_v61  ;;  %4134 = vmatpush1.msra.mxu0 %v329_v32  ;;  %v761_v25 = vld [vmem:[%s5547_s25 + $0xf30] sm:$0xff]  ;;  %v498_v14 = vld [vmem:[%s5547_s25 + $0x6f8] sm:$0xff] }
 0x39d   : > { %4205 = vmatpush1.msra.mxu1 %v585_v34  ;;  %4135 = vmatprep.subr.mxu0 %v322_v37  ;;  %v754_v24 = vld [vmem:[%s5547_s25 + $0xef8] sm:$0xff]  ;;  %v497_v28 = vld [vmem:[%s5547_s25 + $0x6f0] sm:$0xff] }
 0x39e   : > { %4206 = vmatprep.subr.mxu1 %v578_v39  ;;  %4136 = vmatpush1.msra.mxu0 %v321_v45  ;;  %v753_v61 = vld [vmem:[%s5547_s25 + $0xef0] sm:$0xff]  ;;  %v490_v32 = vld [vmem:[%s5547_s25 + $0x6b8] sm:$0xff] }
 0x39f   : > { %4207 = vmatpush1.msra.mxu1 %v577_v40  ;;  %4137 = vmatprep.subr.mxu0 %v314_v35  ;;  %v746_v34 = vld [vmem:[%s5547_s25 + $0xeb8] sm:$0xff]  ;;  %v489_v37 = vld [vmem:[%s5547_s25 + $0x6b0] sm:$0xff] }
 0x3a0   : > { %4208 = vmatprep.subr.mxu1 %v570_v41  ;;  %4138 = vmatpush1.msra.mxu0 %v313_v42  ;;  %v745_v39 = vld [vmem:[%s5547_s25 + $0xeb0] sm:$0xff]  ;;  %v482_v45 = vld [vmem:[%s5547_s25 + $0x678] sm:$0xff] }
 0x3a1   : > { %4209 = vmatpush1.msra.mxu1 %v569_v46  ;;  %4139 = vmatprep.subr.mxu0 %v306_v47  ;;  %v738_v40 = vld [vmem:[%s5547_s25 + $0xe78] sm:$0xff]  ;;  %v481_v35 = vld [vmem:[%s5547_s25 + $0x670] sm:$0xff] }
 0x3a2   : > { %4210 = vmatprep.subr.mxu1 %v562_v48  ;;  %4140 = vmatpush1.msra.mxu0 %v305_v13  ;;  %v737_v41 = vld [vmem:[%s5547_s25 + $0xe70] sm:$0xff]  ;;  %v474_v42 = vld [vmem:[%s5547_s25 + $0x638] sm:$0xff] }
 0x3a3   : > { %4211 = vmatpush1.msra.mxu1 %v561_v50  ;;  %4141 = vmatprep.subr.mxu0 %v298_v54  ;;  %v730_v46 = vld [vmem:[%s5547_s25 + $0xe38] sm:$0xff]  ;;  %v473_v47 = vld [vmem:[%s5547_s25 + $0x630] sm:$0xff] }
 0x3a4   : > { %4212 = vmatprep.subr.mxu1 %v554_v29  ;;  %4142 = vmatpush1.msra.mxu0 %v297_v52  ;;  %v729_v48 = vld [vmem:[%s5547_s25 + $0xe30] sm:$0xff]  ;;  %v466_v13 = vld [vmem:[%s5547_s25 + $0x5f8] sm:$0xff] }
 0x3a5   : > { %4213 = vmatpush1.msra.mxu1 %v553_v56  ;;  %4143 = vmatprep.subr.mxu0 %v290_v57  ;;  %v722_v50 = vld [vmem:[%s5547_s25 + $0xdf8] sm:$0xff]  ;;  %v465_v54 = vld [vmem:[%s5547_s25 + $0x5f0] sm:$0xff] }
 0x3a6   : > { %4214 = vmatprep.subr.mxu1 %v546_v60  ;;  %4144 = vmatpush1.msra.mxu0 %v289_v62  ;;  %v721_v29 = vld [vmem:[%s5547_s25 + $0xdf0] sm:$0xff]  ;;  %v458_v52 = vld [vmem:[%s5547_s25 + $0x5b8] sm:$0xff] }
 0x3a7   : > { %4215 = vmatpush1.msra.mxu1 %v545_v0  ;;  %4145 = vmatprep.subr.mxu0 %v282_v1  ;;  %v714_v56 = vld [vmem:[%s5547_s25 + $0xdb8] sm:$0xff]  ;;  %v457_v57 = vld [vmem:[%s5547_s25 + $0x5b0] sm:$0xff] }
 0x3a8   : > { %4216 = vmatprep.subr.mxu1 %v538_v38  ;;  %4146 = vmatpush1.msra.mxu0 %v281_v7  ;;  %v713_v60 = vld [vmem:[%s5547_s25 + $0xdb0] sm:$0xff]  ;;  %v450_v62 = vld [vmem:[%s5547_s25 + $0x578] sm:$0xff] }
 0x3a9   : > { %4217 = vmatpush1.msra.mxu1 %v537_v21  ;;  %4147 = vmatprep.subr.mxu0 %v530_v3  ;;  %v706_v0 = vld [vmem:[%s5547_s25 + $0xd78] sm:$0xff]  ;;  %v449_v1 = vld [vmem:[%s5547_s25 + $0x570] sm:$0xff] }
 0x3aa   : > { %4218 = vmatprep.subr.mxu1 %v786_v5  ;;  %4148 = vmatpush2.msra.mxu0 %v529_v8  ;;  %v705_v38 = vld [vmem:[%s5547_s25 + $0xd70] sm:$0xff]  ;;  %v442_v7 = vld [vmem:[%s5547_s25 + $0x538] sm:$0xff] }
 0x3ab   : > { %4219 = vmatpush2.msra.mxu1 %v785_v10  ;;  %4149 = vmatprep.subr.mxu0 %v522_v4  ;;  %v698_v21 = vld [vmem:[%s5547_s25 + $0xd38] sm:$0xff]  ;;  %v441_v3 = vld [vmem:[%s5547_s25 + $0x530] sm:$0xff] }
 0x3ac   : > { %4220 = vmatprep.subr.mxu1 %v778_v12  ;;  %4150 = vmatpush2.msra.mxu0 %v521_v59  ;;  %v697_v5 = vld [vmem:[%s5547_s25 + $0xd30] sm:$0xff]  ;;  %v434_v8 = vld [vmem:[%s5547_s25 + $0x4f8] sm:$0xff] }
 0x3ad   : > { %4221 = vmatpush2.msra.mxu1 %v777_v6  ;;  %4151 = vmatprep.subr.mxu0 %v514_v31  ;;  %v690_v10 = vld [vmem:[%s5547_s25 + $0xcf8] sm:$0xff]  ;;  %v433_v4 = vld [vmem:[%s5547_s25 + $0x4f0] sm:$0xff] }
 0x3ae   : > { %4222 = vmatprep.subr.mxu1 %v770_v16  ;;  %4152 = vmatpush2.msra.mxu0 %v513_v18  ;;  %v689_v12 = vld [vmem:[%s5547_s25 + $0xcf0] sm:$0xff]  ;;  %v426_v59 = vld [vmem:[%s5547_s25 + $0x4b8] sm:$0xff] }
 0x3af   : > { %4223 = vmatpush2.msra.mxu1 %v769_v51  ;;  %4153 = vmatprep.subr.mxu0 %v506_v15  ;;  %v682_v6 = vld [vmem:[%s5547_s25 + $0xcb8] sm:$0xff]  ;;  %v425_v31 = vld [vmem:[%s5547_s25 + $0x4b0] sm:$0xff] }
 0x3b0   : > { %4224 = vmatprep.subr.mxu1 %v762_v19  ;;  %4154 = vmatpush2.msra.mxu0 %v505_v23  ;;  %v681_v16 = vld [vmem:[%s5547_s25 + $0xcb0] sm:$0xff]  ;;  %v418_v18 = vld [vmem:[%s5547_s25 + $0x478] sm:$0xff] }
 0x3b1   : > { %4225 = vmatpush2.msra.mxu1 %v761_v25  ;;  %4155 = vmatprep.subr.mxu0 %v498_v14  ;;  %v674_v51 = vld [vmem:[%s5547_s25 + $0xc78] sm:$0xff]  ;;  %v417_v15 = vld [vmem:[%s5547_s25 + $0x470] sm:$0xff] }
 0x3b2   : > { %4226 = vmatprep.subr.mxu1 %v754_v24  ;;  %4156 = vmatpush2.msra.mxu0 %v497_v28  ;;  %v673_v19 = vld [vmem:[%s5547_s25 + $0xc70] sm:$0xff]  ;;  %v410_v23 = vld [vmem:[%s5547_s25 + $0x438] sm:$0xff] }
 0x3b3   : > { %4227 = vmatpush2.msra.mxu1 %v753_v61  ;;  %4157 = vmatprep.subr.mxu0 %v490_v32  ;;  %v666_v25 = vld [vmem:[%s5547_s25 + $0xc38] sm:$0xff]  ;;  %v409_v14 = vld [vmem:[%s5547_s25 + $0x430] sm:$0xff] }
 0x3b4   : > { %4228 = vmatprep.subr.mxu1 %v746_v34  ;;  %4158 = vmatpush2.msra.mxu0 %v489_v37  ;;  %v665_v24 = vld [vmem:[%s5547_s25 + $0xc30] sm:$0xff]  ;;  %v914_v28 = vld [vmem:[%s5547_s25 + $0x13f8] sm:$0xff] }
 0x3b5   : > { %4229 = vmatpush2.msra.mxu1 %v745_v39  ;;  %4159 = vmatprep.subr.mxu0 %v482_v45  ;;  %v1170_v61 = vld [vmem:[%s5547_s25 + $0x1bf8] sm:$0xff]  ;;  %v913_v32 = vld [vmem:[%s5547_s25 + $0x13f0] sm:$0xff] }
 0x3b6   : > { %4230 = vmatprep.subr.mxu1 %v738_v40  ;;  %4160 = vmatpush2.msra.mxu0 %v481_v35  ;;  %v1169_v34 = vld [vmem:[%s5547_s25 + $0x1bf0] sm:$0xff]  ;;  %v906_v37 = vld [vmem:[%s5547_s25 + $0x13b8] sm:$0xff] }
 0x3b7   : > { %4231 = vmatpush2.msra.mxu1 %v737_v41  ;;  %4161 = vmatprep.subr.mxu0 %v474_v42  ;;  %v1162_v39 = vld [vmem:[%s5547_s25 + $0x1bb8] sm:$0xff]  ;;  %v1161_v45 = vld [vmem:[%s5547_s25 + $0x1bb0] sm:$0xff] }
 0x3b8   : > { %4232 = vmatprep.subr.mxu1 %v730_v46  ;;  %4162 = vmatpush2.msra.mxu0 %v473_v47  ;;  %v1154_v40 = vld [vmem:[%s5547_s25 + $0x1b78] sm:$0xff]  ;;  %v889_v42 = vld [vmem:[%s5547_s25 + $0x1330] sm:$0xff] }
 0x3b9   : > { %4233 = vmatpush2.msra.mxu1 %v729_v48  ;;  %4163 = vmatprep.subr.mxu0 %v466_v13  ;;  %v890_v35 = vld [vmem:[%s5547_s25 + $0x1338] sm:$0xff]  ;;  %v1145_v46 = vld [vmem:[%s5547_s25 + $0x1b30] sm:$0xff] }
 0x3ba   : > { %4234 = vmatprep.subr.mxu1 %v722_v50  ;;  %4164 = vmatpush2.msra.mxu0 %v465_v54  ;;  %v1146_v41 = vld [vmem:[%s5547_s25 + $0x1b38] sm:$0xff]  ;;  %v881_v13 = vld [vmem:[%s5547_s25 + $0x12f0] sm:$0xff] }
 0x3bb   : > { %4235 = vmatpush2.msra.mxu1 %v721_v29  ;;  %4165 = vmatprep.subr.mxu0 %v458_v52  ;;  %v882_v47 = vld [vmem:[%s5547_s25 + $0x12f8] sm:$0xff]  ;;  %v1137_v50 = vld [vmem:[%s5547_s25 + $0x1af0] sm:$0xff] }
 0x3bc   : > { %4236 = vmatprep.subr.mxu1 %v714_v56  ;;  %4166 = vmatpush2.msra.mxu0 %v457_v57  ;;  %v1138_v48 = vld [vmem:[%s5547_s25 + $0x1af8] sm:$0xff]  ;;  %v873_v52 = vld [vmem:[%s5547_s25 + $0x12b0] sm:$0xff] }
 0x3bd   : > { %4237 = vmatpush2.msra.mxu1 %v713_v60  ;;  %4167 = vmatprep.subr.mxu0 %v450_v62  ;;  %v874_v54 = vld [vmem:[%s5547_s25 + $0x12b8] sm:$0xff]  ;;  %v1129_v56 = vld [vmem:[%s5547_s25 + $0x1ab0] sm:$0xff] }
 0x3be   : > { %4238 = vmatprep.subr.mxu1 %v706_v0  ;;  %4168 = vmatpush2.msra.mxu0 %v449_v1  ;;  %v1130_v29 = vld [vmem:[%s5547_s25 + $0x1ab8] sm:$0xff]  ;;  %v865_v62 = vld [vmem:[%s5547_s25 + $0x1270] sm:$0xff] }
 0x3bf   : > { %4239 = vmatpush2.msra.mxu1 %v705_v38  ;;  %4169 = vmatprep.subr.mxu0 %v442_v7  ;;  %v866_v57 = vld [vmem:[%s5547_s25 + $0x1278] sm:$0xff]  ;;  %v1121_v0 = vld [vmem:[%s5547_s25 + $0x1a70] sm:$0xff] }
 0x3c0   : > { %4240 = vmatprep.subr.mxu1 %v698_v21  ;;  %4170 = vmatpush2.msra.mxu0 %v441_v3  ;;  %v1122_v60 = vld [vmem:[%s5547_s25 + $0x1a78] sm:$0xff]  ;;  %v857_v7 = vld [vmem:[%s5547_s25 + $0x1230] sm:$0xff] }
 0x3c1   : > { %4241 = vmatpush2.msra.mxu1 %v697_v5  ;;  %4171 = vmatprep.subr.mxu0 %v434_v8  ;;  %v858_v1 = vld [vmem:[%s5547_s25 + $0x1238] sm:$0xff]  ;;  %v1113_v21 = vld [vmem:[%s5547_s25 + $0x1a30] sm:$0xff] }
 0x3c2   : > { %4242 = vmatprep.subr.mxu1 %v690_v10  ;;  %4172 = vmatpush2.msra.mxu0 %v433_v4  ;;  %v1114_v38 = vld [vmem:[%s5547_s25 + $0x1a38] sm:$0xff]  ;;  %v849_v8 = vld [vmem:[%s5547_s25 + $0x11f0] sm:$0xff] }
 0x3c3   : > { %4243 = vmatpush2.msra.mxu1 %v689_v12  ;;  %4173 = vmatprep.subr.mxu0 %v426_v59  ;;  %v850_v3 = vld [vmem:[%s5547_s25 + $0x11f8] sm:$0xff]  ;;  %v1105_v10 = vld [vmem:[%s5547_s25 + $0x19f0] sm:$0xff] }
 0x3c4   : > { %4244 = vmatprep.subr.mxu1 %v682_v6  ;;  %4174 = vmatpush2.msra.mxu0 %v425_v31  ;;  %v1106_v5 = vld [vmem:[%s5547_s25 + $0x19f8] sm:$0xff]  ;;  %v841_v59 = vld [vmem:[%s5547_s25 + $0x11b0] sm:$0xff] }
 0x3c5   : > { %4245 = vmatpush2.msra.mxu1 %v681_v16  ;;  %4175 = vmatprep.subr.mxu0 %v418_v18  ;;  %v842_v4 = vld [vmem:[%s5547_s25 + $0x11b8] sm:$0xff]  ;;  %v1097_v6 = vld [vmem:[%s5547_s25 + $0x19b0] sm:$0xff] }
 0x3c6   : > { %4246 = vmatprep.subr.mxu1 %v674_v51  ;;  %4176 = vmatpush2.msra.mxu0 %v417_v15  ;;  %v1098_v12 = vld [vmem:[%s5547_s25 + $0x19b8] sm:$0xff]  ;;  %v833_v18 = vld [vmem:[%s5547_s25 + $0x1170] sm:$0xff] }
 0x3c7   : > { %4247 = vmatpush2.msra.mxu1 %v673_v19  ;;  %4177 = vmatprep.subr.mxu0 %v410_v23  ;;  %v834_v31 = vld [vmem:[%s5547_s25 + $0x1178] sm:$0xff]  ;;  %v1089_v51 = vld [vmem:[%s5547_s25 + $0x1970] sm:$0xff] }
 0x3c8   : > { %4248 = vmatprep.subr.mxu1 %v666_v25  ;;  %4178 = vmatpush2.msra.mxu0 %v409_v14  ;;  %v1090_v16 = vld [vmem:[%s5547_s25 + $0x1978] sm:$0xff]  ;;  %v825_v23 = vld [vmem:[%s5547_s25 + $0x1130] sm:$0xff] }
 0x3c9   : > { %4179 = vmatprep.mubr.f32.mxu0 %v5717_v9  ;;  %4249 = vmatpush2.msra.mxu1 %v665_v24  ;;  %v905_v9 = vld [vmem:[%s5547_s25 + $0x13b0] sm:$0xff]  ;;  %v826_v15 = vld [vmem:[%s5547_s25 + $0x1138] sm:$0xff] }
 0x3ca   : > { %4250 = vmatprep.mubr.f32.mxu1 %v5722_v11  ;;  %4180 = vmatmul.mubr.f32.vlgmr.msra.gmra.mxu0 %v5702_v63  ;;  %v898_v11 = vld [vmem:[%s5547_s25 + $0x1378] sm:$0xff]  ;;  %v897_v63 = vld [vmem:[%s5547_s25 + $0x1370] sm:$0xff] }
 0x3cb   : > { %4251 = vmatmul.mubr.f32.vlgmr.msra.gmra.mxu1 %v5707_v2  ;;  %4257 = vmatprep.subr.mxu0 %v914_v28  ;;  %v1153_v2 = vld [vmem:[%s5547_s25 + $0x1b70] sm:$0xff]  ;;  %v1082_v19 = vld [vmem:[%s5547_s25 + $0x1938] sm:$0xff] }
 0x3cc   : > { %4328 = vmatprep.subr.mxu1 %v1170_v61  ;;  %4258 = vmatpush1.msra.mxu0 %v913_v32  ;;  %v1081_v25 = vld [vmem:[%s5547_s25 + $0x1930] sm:$0xff]  ;;  %v818_v14 = vld [vmem:[%s5547_s25 + $0x10f8] sm:$0xff] }
 0x3cd   : > { %4329 = vmatpush1.msra.mxu1 %v1169_v34  ;;  %4259 = vmatprep.subr.mxu0 %v906_v37  ;;  %v1074_v24 = vld [vmem:[%s5547_s25 + $0x18f8] sm:$0xff]  ;;  %v817_v28 = vld [vmem:[%s5547_s25 + $0x10f0] sm:$0xff] }
 0x3ce   : > { %4330 = vmatprep.subr.mxu1 %v1162_v39  ;;  %4260 = vmatpush1.msra.mxu0 %v905_v9  ;;  %v1073_v61 = vld [vmem:[%s5547_s25 + $0x18f0] sm:$0xff]  ;;  %v810_v32 = vld [vmem:[%s5547_s25 + $0x10b8] sm:$0xff] }
 0x3cf   : > { %4331 = vmatpush1.msra.mxu1 %v1161_v45  ;;  %4261 = vmatprep.subr.mxu0 %v898_v11  ;;  %v1066_v34 = vld [vmem:[%s5547_s25 + $0x18b8] sm:$0xff]  ;;  %v809_v37 = vld [vmem:[%s5547_s25 + $0x10b0] sm:$0xff] }
 0x3d0   : > { %4332 = vmatprep.subr.mxu1 %v1154_v40  ;;  %4262 = vmatpush1.msra.mxu0 %v897_v63  ;;  %v1065_v39 = vld [vmem:[%s5547_s25 + $0x18b0] sm:$0xff]  ;;  %v802_v9 = vld [vmem:[%s5547_s25 + $0x1078] sm:$0xff] }
 0x3d1   : > { %4333 = vmatpush1.msra.mxu1 %v1153_v2  ;;  %4263 = vmatprep.subr.mxu0 %v890_v35  ;;  %v1058_v45 = vld [vmem:[%s5547_s25 + $0x1878] sm:$0xff]  ;;  %v801_v11 = vld [vmem:[%s5547_s25 + $0x1070] sm:$0xff] }
 0x3d2   : > { %4334 = vmatprep.subr.mxu1 %v1146_v41  ;;  %4264 = vmatpush1.msra.mxu0 %v889_v42  ;;  %v1057_v40 = vld [vmem:[%s5547_s25 + $0x1870] sm:$0xff]  ;;  %v794_v63 = vld [vmem:[%s5547_s25 + $0x1038] sm:$0xff] }
 0x3d3   : > { %4335 = vmatpush1.msra.mxu1 %v1145_v46  ;;  %4265 = vmatprep.subr.mxu0 %v882_v47  ;;  %v1050_v2 = vld [vmem:[%s5547_s25 + $0x1838] sm:$0xff]  ;;  %v793_v35 = vld [vmem:[%s5547_s25 + $0x1030] sm:$0xff] }
 0x3d4   : > { %4336 = vmatprep.subr.mxu1 %v1138_v48  ;;  %4266 = vmatpush1.msra.mxu0 %v881_v13  ;;  %v1049_v41 = vld [vmem:[%s5547_s25 + $0x1830] sm:$0xff]  ;;  %v1042_v42 = vld [vmem:[%s5547_s25 + $0x17f8] sm:$0xff] }
 0x3d5   : > { %4337 = vmatpush1.msra.mxu1 %v1137_v50  ;;  %4267 = vmatprep.subr.mxu0 %v874_v54  ;;  %v1298_v46 = vld [vmem:[%s5547_s25 + $0x1ff8] sm:$0xff]  ;;  %v1041_v47 = vld [vmem:[%s5547_s25 + $0x17f0] sm:$0xff] }
 0x3d6   : > { %4338 = vmatprep.subr.mxu1 %v1130_v29  ;;  %4268 = vmatpush1.msra.mxu0 %v873_v52  ;;  %v1297_v48 = vld [vmem:[%s5547_s25 + $0x1ff0] sm:$0xff]  ;;  %v1034_v13 = vld [vmem:[%s5547_s25 + $0x17b8] sm:$0xff] }
 0x3d7   : > { %4339 = vmatpush1.msra.mxu1 %v1129_v56  ;;  %4269 = vmatprep.subr.mxu0 %v866_v57  ;;  %v1290_v50 = vld [vmem:[%s5547_s25 + $0x1fb8] sm:$0xff]  ;;  %v1033_v54 = vld [vmem:[%s5547_s25 + $0x17b0] sm:$0xff] }
 0x3d8   : > { %4340 = vmatprep.subr.mxu1 %v1122_v60  ;;  %4270 = vmatpush1.msra.mxu0 %v865_v62  ;;  %v1289_v29 = vld [vmem:[%s5547_s25 + $0x1fb0] sm:$0xff]  ;;  %v1026_v52 = vld [vmem:[%s5547_s25 + $0x1778] sm:$0xff] }
 0x3d9   : > { %4341 = vmatpush1.msra.mxu1 %v1121_v0  ;;  %4271 = vmatprep.subr.mxu0 %v858_v1  ;;  %v1282_v56 = vld [vmem:[%s5547_s25 + $0x1f78] sm:$0xff]  ;;  %v1025_v57 = vld [vmem:[%s5547_s25 + $0x1770] sm:$0xff] }
 0x3da   : > { %4342 = vmatprep.subr.mxu1 %v1114_v38  ;;  %4272 = vmatpush1.msra.mxu0 %v857_v7  ;;  %v1281_v60 = vld [vmem:[%s5547_s25 + $0x1f70] sm:$0xff]  ;;  %v1018_v62 = vld [vmem:[%s5547_s25 + $0x1738] sm:$0xff] }
 0x3db   : > { %4343 = vmatpush1.msra.mxu1 %v1113_v21  ;;  %4273 = vmatprep.subr.mxu0 %v850_v3  ;;  %v1274_v0 = vld [vmem:[%s5547_s25 + $0x1f38] sm:$0xff]  ;;  %v1017_v1 = vld [vmem:[%s5547_s25 + $0x1730] sm:$0xff] }
 0x3dc   : > { %4344 = vmatprep.subr.mxu1 %v1106_v5  ;;  %4274 = vmatpush1.msra.mxu0 %v849_v8  ;;  %v1273_v38 = vld [vmem:[%s5547_s25 + $0x1f30] sm:$0xff]  ;;  %v1010_v7 = vld [vmem:[%s5547_s25 + $0x16f8] sm:$0xff] }
 0x3dd   : > { %4345 = vmatpush1.msra.mxu1 %v1105_v10  ;;  %4275 = vmatprep.subr.mxu0 %v842_v4  ;;  %v1266_v21 = vld [vmem:[%s5547_s25 + $0x1ef8] sm:$0xff]  ;;  %v1009_v3 = vld [vmem:[%s5547_s25 + $0x16f0] sm:$0xff] }
 0x3de   : > { %4346 = vmatprep.subr.mxu1 %v1098_v12  ;;  %4276 = vmatpush1.msra.mxu0 %v841_v59  ;;  %v1265_v5 = vld [vmem:[%s5547_s25 + $0x1ef0] sm:$0xff]  ;;  %v1002_v8 = vld [vmem:[%s5547_s25 + $0x16b8] sm:$0xff] }
 0x3df   : > { %4347 = vmatpush1.msra.mxu1 %v1097_v6  ;;  %4277 = vmatprep.subr.mxu0 %v834_v31  ;;  %v1258_v10 = vld [vmem:[%s5547_s25 + $0x1eb8] sm:$0xff]  ;;  %v1001_v4 = vld [vmem:[%s5547_s25 + $0x16b0] sm:$0xff] }
 0x3e0   : > { %4348 = vmatprep.subr.mxu1 %v1090_v16  ;;  %4278 = vmatpush1.msra.mxu0 %v833_v18  ;;  %v1257_v12 = vld [vmem:[%s5547_s25 + $0x1eb0] sm:$0xff]  ;;  %v994_v59 = vld [vmem:[%s5547_s25 + $0x1678] sm:$0xff] }
 0x3e1   : > { %4349 = vmatpush1.msra.mxu1 %v1089_v51  ;;  %4279 = vmatprep.subr.mxu0 %v826_v15  ;;  %v1250_v6 = vld [vmem:[%s5547_s25 + $0x1e78] sm:$0xff]  ;;  %v993_v31 = vld [vmem:[%s5547_s25 + $0x1670] sm:$0xff] }
 0x3e2   : > { %4350 = vmatprep.subr.mxu1 %v1082_v19  ;;  %4280 = vmatpush1.msra.mxu0 %v825_v23  ;;  %v1249_v16 = vld [vmem:[%s5547_s25 + $0x1e70] sm:$0xff]  ;;  %v986_v18 = vld [vmem:[%s5547_s25 + $0x1638] sm:$0xff] }
 0x3e3   : > { %4351 = vmatpush1.msra.mxu1 %v1081_v25  ;;  %4281 = vmatprep.subr.mxu0 %v818_v14  ;;  %v1242_v51 = vld [vmem:[%s5547_s25 + $0x1e38] sm:$0xff]  ;;  %v985_v15 = vld [vmem:[%s5547_s25 + $0x1630] sm:$0xff] }
 0x3e4   : > { %4352 = vmatprep.subr.mxu1 %v1074_v24  ;;  %4282 = vmatpush1.msra.mxu0 %v817_v28  ;;  %v1241_v19 = vld [vmem:[%s5547_s25 + $0x1e30] sm:$0xff]  ;;  %v978_v23 = vld [vmem:[%s5547_s25 + $0x15f8] sm:$0xff] }
 0x3e5   : > { %4353 = vmatpush1.msra.mxu1 %v1073_v61  ;;  %4283 = vmatprep.subr.mxu0 %v810_v32  ;;  %v1234_v25 = vld [vmem:[%s5547_s25 + $0x1df8] sm:$0xff]  ;;  %v977_v14 = vld [vmem:[%s5547_s25 + $0x15f0] sm:$0xff] }
 0x3e6   : > { %4354 = vmatprep.subr.mxu1 %v1066_v34  ;;  %4284 = vmatpush1.msra.mxu0 %v809_v37  ;;  %v1233_v24 = vld [vmem:[%s5547_s25 + $0x1df0] sm:$0xff]  ;;  %v970_v28 = vld [vmem:[%s5547_s25 + $0x15b8] sm:$0xff] }
 0x3e7   : > { %4355 = vmatpush1.msra.mxu1 %v1065_v39  ;;  %4285 = vmatprep.subr.mxu0 %v802_v9  ;;  %v1226_v61 = vld [vmem:[%s5547_s25 + $0x1db8] sm:$0xff]  ;;  %v969_v32 = vld [vmem:[%s5547_s25 + $0x15b0] sm:$0xff] }
 0x3e8   : > { %4356 = vmatprep.subr.mxu1 %v1058_v45  ;;  %4286 = vmatpush1.msra.mxu0 %v801_v11  ;;  %v1225_v34 = vld [vmem:[%s5547_s25 + $0x1db0] sm:$0xff]  ;;  %v962_v37 = vld [vmem:[%s5547_s25 + $0x1578] sm:$0xff] }
 0x3e9   : > { %4357 = vmatpush1.msra.mxu1 %v1057_v40  ;;  %4287 = vmatprep.subr.mxu0 %v794_v63  ;;  %v1218_v39 = vld [vmem:[%s5547_s25 + $0x1d78] sm:$0xff]  ;;  %v961_v9 = vld [vmem:[%s5547_s25 + $0x1570] sm:$0xff] }
 0x3ea   : > { %4358 = vmatprep.subr.mxu1 %v1050_v2  ;;  %4288 = vmatpush1.msra.mxu0 %v793_v35  ;;  %v1217_v45 = vld [vmem:[%s5547_s25 + $0x1d70] sm:$0xff]  ;;  %v954_v11 = vld [vmem:[%s5547_s25 + $0x1538] sm:$0xff] }
 0x3eb   : > { %4359 = vmatpush1.msra.mxu1 %v1049_v41  ;;  %4289 = vmatprep.subr.mxu0 %v1042_v42  ;;  %v1210_v40 = vld [vmem:[%s5547_s25 + $0x1d38] sm:$0xff]  ;;  %v953_v63 = vld [vmem:[%s5547_s25 + $0x1530] sm:$0xff] }
 0x3ec   : > { %4360 = vmatprep.subr.mxu1 %v1298_v46  ;;  %4290 = vmatpush2.msra.mxu0 %v1041_v47  ;;  %v1209_v2 = vld [vmem:[%s5547_s25 + $0x1d30] sm:$0xff]  ;;  %v946_v35 = vld [vmem:[%s5547_s25 + $0x14f8] sm:$0xff] }
 0x3ed   : > { %4361 = vmatpush2.msra.mxu1 %v1297_v48  ;;  %4291 = vmatprep.subr.mxu0 %v1034_v13  ;;  %v1202_v41 = vld [vmem:[%s5547_s25 + $0x1cf8] sm:$0xff]  ;;  %v945_v42 = vld [vmem:[%s5547_s25 + $0x14f0] sm:$0xff] }
 0x3ee   : > { %4362 = vmatprep.subr.mxu1 %v1290_v50  ;;  %4292 = vmatpush2.msra.mxu0 %v1033_v54  ;;  %v1201_v46 = vld [vmem:[%s5547_s25 + $0x1cf0] sm:$0xff]  ;;  %v938_v47 = vld [vmem:[%s5547_s25 + $0x14b8] sm:$0xff] }
 0x3ef   : > { %4363 = vmatpush2.msra.mxu1 %v1289_v29  ;;  %4293 = vmatprep.subr.mxu0 %v1026_v52  ;;  %v1194_v48 = vld [vmem:[%s5547_s25 + $0x1cb8] sm:$0xff]  ;;  %v937_v13 = vld [vmem:[%s5547_s25 + $0x14b0] sm:$0xff] }
 0x3f0   : > { %4364 = vmatprep.subr.mxu1 %v1282_v56  ;;  %4294 = vmatpush2.msra.mxu0 %v1025_v57  ;;  %v1193_v50 = vld [vmem:[%s5547_s25 + $0x1cb0] sm:$0xff]  ;;  %v930_v54 = vld [vmem:[%s5547_s25 + $0x1478] sm:$0xff] }
 0x3f1   : > { %4365 = vmatpush2.msra.mxu1 %v1281_v60  ;;  %4295 = vmatprep.subr.mxu0 %v1018_v62  ;;  %v1186_v29 = vld [vmem:[%s5547_s25 + $0x1c78] sm:$0xff]  ;;  %v929_v52 = vld [vmem:[%s5547_s25 + $0x1470] sm:$0xff] }
 0x3f2   : > { %4366 = vmatprep.subr.mxu1 %v1274_v0  ;;  %4296 = vmatpush2.msra.mxu0 %v1017_v1  ;;  %v1185_v56 = vld [vmem:[%s5547_s25 + $0x1c70] sm:$0xff]  ;;  %v922_v57 = vld [vmem:[%s5547_s25 + $0x1438] sm:$0xff] }
 0x3f3   : > { %4367 = vmatpush2.msra.mxu1 %v1273_v38  ;;  %4297 = vmatprep.subr.mxu0 %v1010_v7  ;;  %v1178_v60 = vld [vmem:[%s5547_s25 + $0x1c38] sm:$0xff]  ;;  %v921_v62 = vld [vmem:[%s5547_s25 + $0x1430] sm:$0xff] }
 0x3f4   : > { %4368 = vmatprep.subr.mxu1 %v1266_v21  ;;  %4298 = vmatpush2.msra.mxu0 %v1009_v3  ;;  %v1177_v0 = vld [vmem:[%s5547_s25 + $0x1c30] sm:$0xff]  ;;  %v1426_v1 = vld [vmem:[%s5547_s25 + $0x23f8] sm:$0xff] }
 0x3f5   : > { %4369 = vmatpush2.msra.mxu1 %v1265_v5  ;;  %4299 = vmatprep.subr.mxu0 %v1002_v8  ;;  %v1682_v38 = vld [vmem:[%s5547_s25 + $0x2bf8] sm:$0xff]  ;;  %v1425_v7 = vld [vmem:[%s5547_s25 + $0x23f0] sm:$0xff] }
 0x3f6   : > { %4370 = vmatprep.subr.mxu1 %v1258_v10  ;;  %4300 = vmatpush2.msra.mxu0 %v1001_v4  ;;  %v1681_v21 = vld [vmem:[%s5547_s25 + $0x2bf0] sm:$0xff]  ;;  %v1418_v3 = vld [vmem:[%s5547_s25 + $0x23b8] sm:$0xff] }
 0x3f7   : > { %4371 = vmatpush2.msra.mxu1 %v1257_v12  ;;  %4301 = vmatprep.subr.mxu0 %v994_v59  ;;  %v1674_v5 = vld [vmem:[%s5547_s25 + $0x2bb8] sm:$0xff]  ;;  %v1673_v8 = vld [vmem:[%s5547_s25 + $0x2bb0] sm:$0xff] }
 0x3f8   : > { %4372 = vmatprep.subr.mxu1 %v1250_v6  ;;  %4302 = vmatpush2.msra.mxu0 %v993_v31  ;;  %v1666_v10 = vld [vmem:[%s5547_s25 + $0x2b78] sm:$0xff]  ;;  %v1665_v4 = vld [vmem:[%s5547_s25 + $0x2b70] sm:$0xff] }
 0x3f9   : > { %4373 = vmatpush2.msra.mxu1 %v1249_v16  ;;  %4303 = vmatprep.subr.mxu0 %v986_v18  ;;  %v1402_v12 = vld [vmem:[%s5547_s25 + $0x2338] sm:$0xff]  ;;  %v1401_v59 = vld [vmem:[%s5547_s25 + $0x2330] sm:$0xff] }
 0x3fa   : > { %4374 = vmatprep.subr.mxu1 %v1242_v51  ;;  %4304 = vmatpush2.msra.mxu0 %v985_v15  ;;  %v1657_v6 = vld [vmem:[%s5547_s25 + $0x2b30] sm:$0xff]  ;;  %v1394_v31 = vld [vmem:[%s5547_s25 + $0x22f8] sm:$0xff] }
 0x3fb   : > { %4375 = vmatpush2.msra.mxu1 %v1241_v19  ;;  %4305 = vmatprep.subr.mxu0 %v978_v23  ;;  %v1650_v16 = vld [vmem:[%s5547_s25 + $0x2af8] sm:$0xff]  ;;  %v1393_v18 = vld [vmem:[%s5547_s25 + $0x22f0] sm:$0xff] }
 0x3fc   : > { %4376 = vmatprep.subr.mxu1 %v1234_v25  ;;  %4306 = vmatpush2.msra.mxu0 %v977_v14  ;;  %v1649_v51 = vld [vmem:[%s5547_s25 + $0x2af0] sm:$0xff]  ;;  %v1386_v15 = vld [vmem:[%s5547_s25 + $0x22b8] sm:$0xff] }
 0x3fd   : > { %4377 = vmatpush2.msra.mxu1 %v1233_v24  ;;  %4307 = vmatprep.subr.mxu0 %v970_v28  ;;  %v1642_v19 = vld [vmem:[%s5547_s25 + $0x2ab8] sm:$0xff]  ;;  %v1385_v23 = vld [vmem:[%s5547_s25 + $0x22b0] sm:$0xff] }
 0x3fe   : > { %4378 = vmatprep.subr.mxu1 %v1226_v61  ;;  %4308 = vmatpush2.msra.mxu0 %v969_v32  ;;  %v1641_v25 = vld [vmem:[%s5547_s25 + $0x2ab0] sm:$0xff]  ;;  %v1378_v14 = vld [vmem:[%s5547_s25 + $0x2278] sm:$0xff] }
 0x3ff   : > { %4379 = vmatpush2.msra.mxu1 %v1225_v34  ;;  %4309 = vmatprep.subr.mxu0 %v962_v37  ;;  %v1634_v24 = vld [vmem:[%s5547_s25 + $0x2a78] sm:$0xff]  ;;  %v1377_v28 = vld [vmem:[%s5547_s25 + $0x2270] sm:$0xff] }
 0x400   : > { %4380 = vmatprep.subr.mxu1 %v1218_v39  ;;  %4310 = vmatpush2.msra.mxu0 %v961_v9  ;;  %v1633_v61 = vld [vmem:[%s5547_s25 + $0x2a70] sm:$0xff]  ;;  %v1370_v32 = vld [vmem:[%s5547_s25 + $0x2238] sm:$0xff] }
 0x401   : > { %4381 = vmatpush2.msra.mxu1 %v1217_v45  ;;  %4311 = vmatprep.subr.mxu0 %v954_v11  ;;  %v1626_v34 = vld [vmem:[%s5547_s25 + $0x2a38] sm:$0xff]  ;;  %v1369_v37 = vld [vmem:[%s5547_s25 + $0x2230] sm:$0xff] }
 0x402   : > { %4382 = vmatprep.subr.mxu1 %v1210_v40  ;;  %4312 = vmatpush2.msra.mxu0 %v953_v63  ;;  %v1625_v39 = vld [vmem:[%s5547_s25 + $0x2a30] sm:$0xff]  ;;  %v1362_v9 = vld [vmem:[%s5547_s25 + $0x21f8] sm:$0xff] }
 0x403   : > { %4383 = vmatpush2.msra.mxu1 %v1209_v2  ;;  %4313 = vmatprep.subr.mxu0 %v946_v35  ;;  %v1618_v45 = vld [vmem:[%s5547_s25 + $0x29f8] sm:$0xff]  ;;  %v1361_v11 = vld [vmem:[%s5547_s25 + $0x21f0] sm:$0xff] }
 0x404   : > { %4384 = vmatprep.subr.mxu1 %v1202_v41  ;;  %4314 = vmatpush2.msra.mxu0 %v945_v42  ;;  %v1617_v40 = vld [vmem:[%s5547_s25 + $0x29f0] sm:$0xff]  ;;  %v1354_v63 = vld [vmem:[%s5547_s25 + $0x21b8] sm:$0xff] }
 0x405   : > { %4385 = vmatpush2.msra.mxu1 %v1201_v46  ;;  %4315 = vmatprep.subr.mxu0 %v938_v47  ;;  %v1610_v2 = vld [vmem:[%s5547_s25 + $0x29b8] sm:$0xff]  ;;  %v1353_v35 = vld [vmem:[%s5547_s25 + $0x21b0] sm:$0xff] }
 0x406   : > { %4386 = vmatprep.subr.mxu1 %v1194_v48  ;;  %4316 = vmatpush2.msra.mxu0 %v937_v13  ;;  %v1609_v41 = vld [vmem:[%s5547_s25 + $0x29b0] sm:$0xff]  ;;  %v1346_v42 = vld [vmem:[%s5547_s25 + $0x2178] sm:$0xff] }
 0x407   : > { %4387 = vmatpush2.msra.mxu1 %v1193_v50  ;;  %4317 = vmatprep.subr.mxu0 %v930_v54  ;;  %v1602_v46 = vld [vmem:[%s5547_s25 + $0x2978] sm:$0xff]  ;;  %v1345_v47 = vld [vmem:[%s5547_s25 + $0x2170] sm:$0xff] }
 0x408   : > { %4388 = vmatprep.subr.mxu1 %v1186_v29  ;;  %4318 = vmatpush2.msra.mxu0 %v929_v52  ;;  %v1601_v48 = vld [vmem:[%s5547_s25 + $0x2970] sm:$0xff]  ;;  %v1338_v13 = vld [vmem:[%s5547_s25 + $0x2138] sm:$0xff] }
 0x409   : > { %4389 = vmatpush2.msra.mxu1 %v1185_v56  ;;  %4319 = vmatprep.subr.mxu0 %v922_v57  ;;  %v1594_v50 = vld [vmem:[%s5547_s25 + $0x2938] sm:$0xff]  ;;  %v1337_v54 = vld [vmem:[%s5547_s25 + $0x2130] sm:$0xff] }
 0x40a   : > { %4390 = vmatprep.subr.mxu1 %v1178_v60  ;;  %4320 = vmatpush2.msra.mxu0 %v921_v62  ;;  %v1593_v29 = vld [vmem:[%s5547_s25 + $0x2930] sm:$0xff]  ;;  %v1330_v52 = vld [vmem:[%s5547_s25 + $0x20f8] sm:$0xff] }
 0x40b   : > { %4321 = vmatprep.mubr.f32.mxu0 %v5864_v27  ;;  %4391 = vmatpush2.msra.mxu1 %v1177_v0  ;;  %v1417_v27 = vld [vmem:[%s5547_s25 + $0x23b0] sm:$0xff]  ;;  %v1586_v56 = vld [vmem:[%s5547_s25 + $0x28f8] sm:$0xff] }
 0x40c   : > { %4322 = vmatmul.mubr.f32.vlgmr.msra.gmra.mxu0 %v5849_v17  ;;  %4392 = vmatprep.mubr.f32.mxu1 %v5870_v30  ;;  %v1410_v17 = vld [vmem:[%s5547_s25 + $0x2378] sm:$0xff]  ;;  %v1409_v30 = vld [vmem:[%s5547_s25 + $0x2370] sm:$0xff] }
 0x40d   : > { %4399 = vmatprep.subr.mxu0 %v1426_v1  ;;  %4470 = vmatprep.subr.mxu1 %v1682_v38  ;;  %v1329_v57 = vld [vmem:[%s5547_s25 + $0x20f0] sm:$0xff]  ;;  %v1322_v62 = vld [vmem:[%s5547_s25 + $0x20b8] sm:$0xff] }
 0x40e   : > { %4393 = vmatmul.mubr.f32.vlgmr.msra.gmra.mxu1 %v5856_v22  ;;  %4400 = vmatpush1.msra.mxu0 %v1425_v7  ;;  %v1658_v22 = vld [vmem:[%s5547_s25 + $0x2b38] sm:$0xff]  ;;  %v1585_v60 = vld [vmem:[%s5547_s25 + $0x28f0] sm:$0xff] }
 0x40f   : > { %4471 = vmatpush1.msra.mxu1 %v1681_v21  ;;  %4401 = vmatprep.subr.mxu0 %v1418_v3  ;;  %v1578_v0 = vld [vmem:[%s5547_s25 + $0x28b8] sm:$0xff]  ;;  %v1321_v1 = vld [vmem:[%s5547_s25 + $0x20b0] sm:$0xff] }
 0x410   : > { %4472 = vmatprep.subr.mxu1 %v1674_v5  ;;  %4402 = vmatpush1.msra.mxu0 %v1417_v27  ;;  %v1577_v38 = vld [vmem:[%s5547_s25 + $0x28b0] sm:$0xff]  ;;  %v1314_v7 = vld [vmem:[%s5547_s25 + $0x2078] sm:$0xff] }
 0x411   : > { %4473 = vmatpush1.msra.mxu1 %v1673_v8  ;;  %4403 = vmatprep.subr.mxu0 %v1410_v17  ;;  %v1570_v21 = vld [vmem:[%s5547_s25 + $0x2878] sm:$0xff]  ;;  %v1313_v3 = vld [vmem:[%s5547_s25 + $0x2070] sm:$0xff] }
 0x412   : > { %4474 = vmatprep.subr.mxu1 %v1666_v10  ;;  %4404 = vmatpush1.msra.mxu0 %v1409_v30  ;;  %v1569_v5 = vld [vmem:[%s5547_s25 + $0x2870] sm:$0xff]  ;;  %v1306_v27 = vld [vmem:[%s5547_s25 + $0x2038] sm:$0xff] }
 0x413   : > { %4475 = vmatpush1.msra.mxu1 %v1665_v4  ;;  %4405 = vmatprep.subr.mxu0 %v1402_v12  ;;  %v1562_v8 = vld [vmem:[%s5547_s25 + $0x2838] sm:$0xff]  ;;  %v1305_v17 = vld [vmem:[%s5547_s25 + $0x2030] sm:$0xff] }
 0x414   : > { %4476 = vmatprep.subr.mxu1 %v1658_v22  ;;  %4406 = vmatpush1.msra.mxu0 %v1401_v59  ;;  %v1561_v10 = vld [vmem:[%s5547_s25 + $0x2830] sm:$0xff]  ;;  %v1554_v30 = vld [vmem:[%s5547_s25 + $0x27f8] sm:$0xff] }
 0x415   : > { %4477 = vmatpush1.msra.mxu1 %v1657_v6  ;;  %4407 = vmatprep.subr.mxu0 %v1394_v31  ;;  %v1810_v4 = vld [vmem:[%s5547_s25 + $0x2ff8] sm:$0xff]  ;;  %v1553_v12 = vld [vmem:[%s5547_s25 + $0x27f0] sm:$0xff] }
 0x416   : > { %4478 = vmatprep.subr.mxu1 %v1650_v16  ;;  %4408 = vmatpush1.msra.mxu0 %v1393_v18  ;;  %v1809_v22 = vld [vmem:[%s5547_s25 + $0x2ff0] sm:$0xff]  ;;  %v1546_v59 = vld [vmem:[%s5547_s25 + $0x27b8] sm:$0xff] }
 0x417   : > { %4479 = vmatpush1.msra.mxu1 %v1649_v51  ;;  %4409 = vmatprep.subr.mxu0 %v1386_v15  ;;  %v1802_v6 = vld [vmem:[%s5547_s25 + $0x2fb8] sm:$0xff]  ;;  %v1545_v31 = vld [vmem:[%s5547_s25 + $0x27b0] sm:$0xff] }
 0x418   : > { %4480 = vmatprep.subr.mxu1 %v1642_v19  ;;  %4410 = vmatpush1.msra.mxu0 %v1385_v23  ;;  %v1801_v16 = vld [vmem:[%s5547_s25 + $0x2fb0] sm:$0xff]  ;;  %v1538_v18 = vld [vmem:[%s5547_s25 + $0x2778] sm:$0xff] }
 0x419   : > { %4481 = vmatpush1.msra.mxu1 %v1641_v25  ;;  %4411 = vmatprep.subr.mxu0 %v1378_v14  ;;  %v1794_v51 = vld [vmem:[%s5547_s25 + $0x2f78] sm:$0xff]  ;;  %v1537_v15 = vld [vmem:[%s5547_s25 + $0x2770] sm:$0xff] }
 0x41a   : > { %4482 = vmatprep.subr.mxu1 %v1634_v24  ;;  %4412 = vmatpush1.msra.mxu0 %v1377_v28  ;;  %v1793_v19 = vld [vmem:[%s5547_s25 + $0x2f70] sm:$0xff]  ;;  %v1530_v23 = vld [vmem:[%s5547_s25 + $0x2738] sm:$0xff] }
 0x41b   : > { %4483 = vmatpush1.msra.mxu1 %v1633_v61  ;;  %4413 = vmatprep.subr.mxu0 %v1370_v32  ;;  %v1786_v25 = vld [vmem:[%s5547_s25 + $0x2f38] sm:$0xff]  ;;  %v1529_v14 = vld [vmem:[%s5547_s25 + $0x2730] sm:$0xff] }
 0x41c   : > { %4484 = vmatprep.subr.mxu1 %v1626_v34  ;;  %4414 = vmatpush1.msra.mxu0 %v1369_v37  ;;  %v1785_v24 = vld [vmem:[%s5547_s25 + $0x2f30] sm:$0xff]  ;;  %v1522_v28 = vld [vmem:[%s5547_s25 + $0x26f8] sm:$0xff] }
 0x41d   : > { %4485 = vmatpush1.msra.mxu1 %v1625_v39  ;;  %4415 = vmatprep.subr.mxu0 %v1362_v9  ;;  %v1778_v61 = vld [vmem:[%s5547_s25 + $0x2ef8] sm:$0xff]  ;;  %v1521_v32 = vld [vmem:[%s5547_s25 + $0x26f0] sm:$0xff] }
 0x41e   : > { %4486 = vmatprep.subr.mxu1 %v1618_v45  ;;  %4416 = vmatpush1.msra.mxu0 %v1361_v11  ;;  %v1777_v34 = vld [vmem:[%s5547_s25 + $0x2ef0] sm:$0xff]  ;;  %v1514_v37 = vld [vmem:[%s5547_s25 + $0x26b8] sm:$0xff] }
 0x41f   : > { %4487 = vmatpush1.msra.mxu1 %v1617_v40  ;;  %4417 = vmatprep.subr.mxu0 %v1354_v63  ;;  %v1770_v39 = vld [vmem:[%s5547_s25 + $0x2eb8] sm:$0xff]  ;;  %v1513_v9 = vld [vmem:[%s5547_s25 + $0x26b0] sm:$0xff] }
 0x420   : > { %4488 = vmatprep.subr.mxu1 %v1610_v2  ;;  %4418 = vmatpush1.msra.mxu0 %v1353_v35  ;;  %v1769_v45 = vld [vmem:[%s5547_s25 + $0x2eb0] sm:$0xff]  ;;  %v1506_v11 = vld [vmem:[%s5547_s25 + $0x2678] sm:$0xff] }
 0x421   : > { %4489 = vmatpush1.msra.mxu1 %v1609_v41  ;;  %4419 = vmatprep.subr.mxu0 %v1346_v42  ;;  %v1762_v40 = vld [vmem:[%s5547_s25 + $0x2e78] sm:$0xff]  ;;  %v1505_v63 = vld [vmem:[%s5547_s25 + $0x2670] sm:$0xff] }
 0x422   : > { %4490 = vmatprep.subr.mxu1 %v1602_v46  ;;  %4420 = vmatpush1.msra.mxu0 %v1345_v47  ;;  %v1761_v2 = vld [vmem:[%s5547_s25 + $0x2e70] sm:$0xff]  ;;  %v1498_v35 = vld [vmem:[%s5547_s25 + $0x2638] sm:$0xff] }
 0x423   : > { %4491 = vmatpush1.msra.mxu1 %v1601_v48  ;;  %4421 = vmatprep.subr.mxu0 %v1338_v13  ;;  %v1754_v41 = vld [vmem:[%s5547_s25 + $0x2e38] sm:$0xff]  ;;  %v1497_v42 = vld [vmem:[%s5547_s25 + $0x2630] sm:$0xff] }
 0x424   : > { %4492 = vmatprep.subr.mxu1 %v1594_v50  ;;  %4422 = vmatpush1.msra.mxu0 %v1337_v54  ;;  %v1753_v46 = vld [vmem:[%s5547_s25 + $0x2e30] sm:$0xff]  ;;  %v1490_v47 = vld [vmem:[%s5547_s25 + $0x25f8] sm:$0xff] }
 0x425   : > { %4493 = vmatpush1.msra.mxu1 %v1593_v29  ;;  %4423 = vmatprep.subr.mxu0 %v1330_v52  ;;  %v1746_v48 = vld [vmem:[%s5547_s25 + $0x2df8] sm:$0xff]  ;;  %v1489_v13 = vld [vmem:[%s5547_s25 + $0x25f0] sm:$0xff] }
 0x426   : > { %4494 = vmatprep.subr.mxu1 %v1586_v56  ;;  %4424 = vmatpush1.msra.mxu0 %v1329_v57  ;;  %v1745_v50 = vld [vmem:[%s5547_s25 + $0x2df0] sm:$0xff]  ;;  %v1482_v54 = vld [vmem:[%s5547_s25 + $0x25b8] sm:$0xff] }
 0x427   : > { %4495 = vmatpush1.msra.mxu1 %v1585_v60  ;;  %4425 = vmatprep.subr.mxu0 %v1322_v62  ;;  %v1738_v29 = vld [vmem:[%s5547_s25 + $0x2db8] sm:$0xff]  ;;  %v1481_v52 = vld [vmem:[%s5547_s25 + $0x25b0] sm:$0xff] }
 0x428   : > { %4496 = vmatprep.subr.mxu1 %v1578_v0  ;;  %4426 = vmatpush1.msra.mxu0 %v1321_v1  ;;  %v1737_v56 = vld [vmem:[%s5547_s25 + $0x2db0] sm:$0xff]  ;;  %v1474_v57 = vld [vmem:[%s5547_s25 + $0x2578] sm:$0xff] }
 0x429   : > { %4497 = vmatpush1.msra.mxu1 %v1577_v38  ;;  %4427 = vmatprep.subr.mxu0 %v1314_v7  ;;  %v1730_v60 = vld [vmem:[%s5547_s25 + $0x2d78] sm:$0xff]  ;;  %v1473_v62 = vld [vmem:[%s5547_s25 + $0x2570] sm:$0xff] }
 0x42a   : > { %4498 = vmatprep.subr.mxu1 %v1570_v21  ;;  %4428 = vmatpush1.msra.mxu0 %v1313_v3  ;;  %v1729_v0 = vld [vmem:[%s5547_s25 + $0x2d70] sm:$0xff]  ;;  %v1466_v1 = vld [vmem:[%s5547_s25 + $0x2538] sm:$0xff] }
 0x42b   : > { %4499 = vmatpush1.msra.mxu1 %v1569_v5  ;;  %4429 = vmatprep.subr.mxu0 %v1306_v27  ;;  %v1722_v38 = vld [vmem:[%s5547_s25 + $0x2d38] sm:$0xff]  ;;  %v1465_v7 = vld [vmem:[%s5547_s25 + $0x2530] sm:$0xff] }
 0x42c   : > { %4500 = vmatprep.subr.mxu1 %v1562_v8  ;;  %4430 = vmatpush1.msra.mxu0 %v1305_v17  ;;  %v1721_v21 = vld [vmem:[%s5547_s25 + $0x2d30] sm:$0xff]  ;;  %v1458_v3 = vld [vmem:[%s5547_s25 + $0x24f8] sm:$0xff] }
 0x42d   : > { %4501 = vmatpush1.msra.mxu1 %v1561_v10  ;;  %4431 = vmatprep.subr.mxu0 %v1554_v30  ;;  %v1714_v5 = vld [vmem:[%s5547_s25 + $0x2cf8] sm:$0xff]  ;;  %v1457_v27 = vld [vmem:[%s5547_s25 + $0x24f0] sm:$0xff] }
 0x42e   : > { %4502 = vmatprep.subr.mxu1 %v1810_v4  ;;  %4432 = vmatpush2.msra.mxu0 %v1553_v12  ;;  %v1713_v8 = vld [vmem:[%s5547_s25 + $0x2cf0] sm:$0xff]  ;;  %v1450_v17 = vld [vmem:[%s5547_s25 + $0x24b8] sm:$0xff] }
 0x42f   : > { %4503 = vmatpush2.msra.mxu1 %v1809_v22  ;;  %4433 = vmatprep.subr.mxu0 %v1546_v59  ;;  %v1706_v10 = vld [vmem:[%s5547_s25 + $0x2cb8] sm:$0xff]  ;;  %v1449_v30 = vld [vmem:[%s5547_s25 + $0x24b0] sm:$0xff] }
 0x430   : > { %4504 = vmatprep.subr.mxu1 %v1802_v6  ;;  %4434 = vmatpush2.msra.mxu0 %v1545_v31  ;;  %v1705_v4 = vld [vmem:[%s5547_s25 + $0x2cb0] sm:$0xff]  ;;  %v1442_v12 = vld [vmem:[%s5547_s25 + $0x2478] sm:$0xff] }
 0x431   : > { %4505 = vmatpush2.msra.mxu1 %v1801_v16  ;;  %4435 = vmatprep.subr.mxu0 %v1538_v18  ;;  %v1698_v22 = vld [vmem:[%s5547_s25 + $0x2c78] sm:$0xff]  ;;  %v1441_v59 = vld [vmem:[%s5547_s25 + $0x2470] sm:$0xff] }
 0x432   : > { %4506 = vmatprep.subr.mxu1 %v1794_v51  ;;  %4436 = vmatpush2.msra.mxu0 %v1537_v15  ;;  %v1697_v6 = vld [vmem:[%s5547_s25 + $0x2c70] sm:$0xff]  ;;  %v1434_v31 = vld [vmem:[%s5547_s25 + $0x2438] sm:$0xff] }
 0x433   : > { %4507 = vmatpush2.msra.mxu1 %v1793_v19  ;;  %4437 = vmatprep.subr.mxu0 %v1530_v23  ;;  %v1690_v16 = vld [vmem:[%s5547_s25 + $0x2c38] sm:$0xff]  ;;  %v1433_v18 = vld [vmem:[%s5547_s25 + $0x2430] sm:$0xff] }
 0x434   : > { %4508 = vmatprep.subr.mxu1 %v1786_v25  ;;  %4438 = vmatpush2.msra.mxu0 %v1529_v14  ;;  %v1689_v51 = vld [vmem:[%s5547_s25 + $0x2c30] sm:$0xff]  ;;  %v1938_v15 = vld [vmem:[%s5547_s25 + $0x33f8] sm:$0xff] }
 0x435   : > { %4509 = vmatpush2.msra.mxu1 %v1785_v24  ;;  %4439 = vmatprep.subr.mxu0 %v1522_v28  ;;  %v2194_v19 = vld [vmem:[%s5547_s25 + $0x3bf8] sm:$0xff]  ;;  %v1937_v23 = vld [vmem:[%s5547_s25 + $0x33f0] sm:$0xff] }
 0x436   : > { %4510 = vmatprep.subr.mxu1 %v1778_v61  ;;  %4440 = vmatpush2.msra.mxu0 %v1521_v32  ;;  %v2193_v25 = vld [vmem:[%s5547_s25 + $0x3bf0] sm:$0xff]  ;;  %v1930_v14 = vld [vmem:[%s5547_s25 + $0x33b8] sm:$0xff] }
 0x437   : > { %4511 = vmatpush2.msra.mxu1 %v1777_v34  ;;  %4441 = vmatprep.subr.mxu0 %v1514_v37  ;;  %v2186_v24 = vld [vmem:[%s5547_s25 + $0x3bb8] sm:$0xff]  ;;  %v2185_v28 = vld [vmem:[%s5547_s25 + $0x3bb0] sm:$0xff] }
 0x438   : > { %4512 = vmatprep.subr.mxu1 %v1770_v39  ;;  %4442 = vmatpush2.msra.mxu0 %v1513_v9  ;;  %v2178_v61 = vld [vmem:[%s5547_s25 + $0x3b78] sm:$0xff]  ;;  %v2177_v32 = vld [vmem:[%s5547_s25 + $0x3b70] sm:$0xff] }
 0x439   : > { %4513 = vmatpush2.msra.mxu1 %v1769_v45  ;;  %4443 = vmatprep.subr.mxu0 %v1506_v11  ;;  %v1914_v34 = vld [vmem:[%s5547_s25 + $0x3338] sm:$0xff]  ;;  %v1913_v37 = vld [vmem:[%s5547_s25 + $0x3330] sm:$0xff] }
 0x43a   : > { %4514 = vmatprep.subr.mxu1 %v1762_v40  ;;  %4444 = vmatpush2.msra.mxu0 %v1505_v63  ;;  %v2169_v39 = vld [vmem:[%s5547_s25 + $0x3b30] sm:$0xff]  ;;  %v1906_v9 = vld [vmem:[%s5547_s25 + $0x32f8] sm:$0xff] }
 0x43b   : > { %4515 = vmatpush2.msra.mxu1 %v1761_v2  ;;  %4445 = vmatprep.subr.mxu0 %v1498_v35  ;;  %v2162_v45 = vld [vmem:[%s5547_s25 + $0x3af8] sm:$0xff]  ;;  %v1905_v11 = vld [vmem:[%s5547_s25 + $0x32f0] sm:$0xff] }
 0x43c   : > { %4516 = vmatprep.subr.mxu1 %v1754_v41  ;;  %4446 = vmatpush2.msra.mxu0 %v1497_v42  ;;  %v2161_v40 = vld [vmem:[%s5547_s25 + $0x3af0] sm:$0xff]  ;;  %v1898_v63 = vld [vmem:[%s5547_s25 + $0x32b8] sm:$0xff] }
 0x43d   : > { %4517 = vmatpush2.msra.mxu1 %v1753_v46  ;;  %4447 = vmatprep.subr.mxu0 %v1490_v47  ;;  %v2154_v2 = vld [vmem:[%s5547_s25 + $0x3ab8] sm:$0xff]  ;;  %v1897_v35 = vld [vmem:[%s5547_s25 + $0x32b0] sm:$0xff] }
 0x43e   : > { %4518 = vmatprep.subr.mxu1 %v1746_v48  ;;  %4448 = vmatpush2.msra.mxu0 %v1489_v13  ;;  %v2153_v41 = vld [vmem:[%s5547_s25 + $0x3ab0] sm:$0xff]  ;;  %v1890_v42 = vld [vmem:[%s5547_s25 + $0x3278] sm:$0xff] }
 0x43f   : > { %4519 = vmatpush2.msra.mxu1 %v1745_v50  ;;  %4449 = vmatprep.subr.mxu0 %v1482_v54  ;;  %v2146_v46 = vld [vmem:[%s5547_s25 + $0x3a78] sm:$0xff]  ;;  %v1889_v47 = vld [vmem:[%s5547_s25 + $0x3270] sm:$0xff] }
 0x440   : > { %4520 = vmatprep.subr.mxu1 %v1738_v29  ;;  %4450 = vmatpush2.msra.mxu0 %v1481_v52  ;;  %v2145_v48 = vld [vmem:[%s5547_s25 + $0x3a70] sm:$0xff]  ;;  %v1882_v13 = vld [vmem:[%s5547_s25 + $0x3238] sm:$0xff] }
 0x441   : > { %4521 = vmatpush2.msra.mxu1 %v1737_v56  ;;  %4451 = vmatprep.subr.mxu0 %v1474_v57  ;;  %v2138_v50 = vld [vmem:[%s5547_s25 + $0x3a38] sm:$0xff]  ;;  %v1881_v54 = vld [vmem:[%s5547_s25 + $0x3230] sm:$0xff] }
 0x442   : > { %4522 = vmatprep.subr.mxu1 %v1730_v60  ;;  %4452 = vmatpush2.msra.mxu0 %v1473_v62  ;;  %v2137_v29 = vld [vmem:[%s5547_s25 + $0x3a30] sm:$0xff]  ;;  %v1874_v52 = vld [vmem:[%s5547_s25 + $0x31f8] sm:$0xff] }
 0x443   : > { %4523 = vmatpush2.msra.mxu1 %v1729_v0  ;;  %4453 = vmatprep.subr.mxu0 %v1466_v1  ;;  %v2130_v56 = vld [vmem:[%s5547_s25 + $0x39f8] sm:$0xff]  ;;  %v1873_v57 = vld [vmem:[%s5547_s25 + $0x31f0] sm:$0xff] }
 0x444   : > { %4524 = vmatprep.subr.mxu1 %v1722_v38  ;;  %4454 = vmatpush2.msra.mxu0 %v1465_v7  ;;  %v2129_v60 = vld [vmem:[%s5547_s25 + $0x39f0] sm:$0xff]  ;;  %v1866_v62 = vld [vmem:[%s5547_s25 + $0x31b8] sm:$0xff] }
 0x445   : > { %4525 = vmatpush2.msra.mxu1 %v1721_v21  ;;  %4455 = vmatprep.subr.mxu0 %v1458_v3  ;;  %v2122_v0 = vld [vmem:[%s5547_s25 + $0x39b8] sm:$0xff]  ;;  %v1865_v1 = vld [vmem:[%s5547_s25 + $0x31b0] sm:$0xff] }
 0x446   : > { %4526 = vmatprep.subr.mxu1 %v1714_v5  ;;  %4456 = vmatpush2.msra.mxu0 %v1457_v27  ;;  %v2121_v38 = vld [vmem:[%s5547_s25 + $0x39b0] sm:$0xff]  ;;  %v1858_v7 = vld [vmem:[%s5547_s25 + $0x3178] sm:$0xff] }
 0x447   : > { %4527 = vmatpush2.msra.mxu1 %v1713_v8  ;;  %4457 = vmatprep.subr.mxu0 %v1450_v17  ;;  %v2114_v21 = vld [vmem:[%s5547_s25 + $0x3978] sm:$0xff]  ;;  %v1857_v3 = vld [vmem:[%s5547_s25 + $0x3170] sm:$0xff] }
 0x448   : > { %4528 = vmatprep.subr.mxu1 %v1706_v10  ;;  %4458 = vmatpush2.msra.mxu0 %v1449_v30  ;;  %v2113_v5 = vld [vmem:[%s5547_s25 + $0x3970] sm:$0xff]  ;;  %v1850_v27 = vld [vmem:[%s5547_s25 + $0x3138] sm:$0xff] }
 0x449   : > { %4529 = vmatpush2.msra.mxu1 %v1705_v4  ;;  %4459 = vmatprep.subr.mxu0 %v1442_v12  ;;  %v2106_v8 = vld [vmem:[%s5547_s25 + $0x3938] sm:$0xff]  ;;  %v1849_v17 = vld [vmem:[%s5547_s25 + $0x3130] sm:$0xff] }
 0x44a   : > { %4530 = vmatprep.subr.mxu1 %v1698_v22  ;;  %4460 = vmatpush2.msra.mxu0 %v1441_v59  ;;  %v2105_v10 = vld [vmem:[%s5547_s25 + $0x3930] sm:$0xff]  ;;  %v1842_v30 = vld [vmem:[%s5547_s25 + $0x30f8] sm:$0xff] }
 0x44b   : > { %4531 = vmatpush2.msra.mxu1 %v1697_v6  ;;  %4461 = vmatprep.subr.mxu0 %v1434_v31  ;;  %v2098_v4 = vld [vmem:[%s5547_s25 + $0x38f8] sm:$0xff]  ;;  %v1841_v12 = vld [vmem:[%s5547_s25 + $0x30f0] sm:$0xff] }
 0x44c   : > { %4532 = vmatprep.subr.mxu1 %v1690_v16  ;;  %4462 = vmatpush2.msra.mxu0 %v1433_v18  ;;  %v2097_v22 = vld [vmem:[%s5547_s25 + $0x38f0] sm:$0xff]  ;;  %v1834_v59 = vld [vmem:[%s5547_s25 + $0x30b8] sm:$0xff] }
 0x44d   : > { %4463 = vmatprep.mubr.f32.mxu0 %v6011_v55  ;;  %4533 = vmatpush2.msra.mxu1 %v1689_v51  ;;  %v1929_v55 = vld [vmem:[%s5547_s25 + $0x33b0] sm:$0xff]  ;;  %v2090_v6 = vld [vmem:[%s5547_s25 + $0x38b8] sm:$0xff] }
 0x44e   : > { %4464 = vmatmul.mubr.f32.vlgmr.msra.gmra.mxu0 %v5996_v44  ;;  %4534 = vmatprep.mubr.f32.mxu1 %v6017_v58  ;;  %v1922_v44 = vld [vmem:[%s5547_s25 + $0x3378] sm:$0xff]  ;;  %v1921_v58 = vld [vmem:[%s5547_s25 + $0x3370] sm:$0xff] }
 0x44f   : > { %4541 = vmatprep.subr.mxu0 %v1938_v15  ;;  %4612 = vmatprep.subr.mxu1 %v2194_v19  ;;  %v1833_v31 = vld [vmem:[%s5547_s25 + $0x30b0] sm:$0xff]  ;;  %v1826_v18 = vld [vmem:[%s5547_s25 + $0x3078] sm:$0xff] }
 0x450   : > { %4535 = vmatmul.mubr.f32.vlgmr.msra.gmra.mxu1 %v6003_v49  ;;  %4542 = vmatpush1.msra.mxu0 %v1937_v23  ;;  %v2170_v49 = vld [vmem:[%s5547_s25 + $0x3b38] sm:$0xff]  ;;  %v2089_v16 = vld [vmem:[%s5547_s25 + $0x38b0] sm:$0xff] }
 0x451   : > { %4613 = vmatpush1.msra.mxu1 %v2193_v25  ;;  %4543 = vmatprep.subr.mxu0 %v1930_v14  ;;  %v2082_v51 = vld [vmem:[%s5547_s25 + $0x3878] sm:$0xff]  ;;  %v1825_v15 = vld [vmem:[%s5547_s25 + $0x3070] sm:$0xff] }
 0x452   : > { %4614 = vmatprep.subr.mxu1 %v2186_v24  ;;  %4544 = vmatpush1.msra.mxu0 %v1929_v55  ;;  %v2081_v19 = vld [vmem:[%s5547_s25 + $0x3870] sm:$0xff]  ;;  %v1818_v23 = vld [vmem:[%s5547_s25 + $0x3038] sm:$0xff] }
 0x453   : > { %4615 = vmatpush1.msra.mxu1 %v2185_v28  ;;  %4545 = vmatprep.subr.mxu0 %v1922_v44  ;;  %v2074_v25 = vld [vmem:[%s5547_s25 + $0x3838] sm:$0xff]  ;;  %v1817_v14 = vld [vmem:[%s5547_s25 + $0x3030] sm:$0xff] }
 0x454   : > { %4616 = vmatprep.subr.mxu1 %v2178_v61  ;;  %4546 = vmatpush1.msra.mxu0 %v1921_v58  ;;  %v2073_v24 = vld [vmem:[%s5547_s25 + $0x3830] sm:$0xff]  ;;  %v2066_v55 = vld [vmem:[%s5547_s25 + $0x37f8] sm:$0xff] }
 0x455   : > { %4617 = vmatpush1.msra.mxu1 %v2177_v32  ;;  %4547 = vmatprep.subr.mxu0 %v1914_v34  ;;  %v2322_v28 = vld [vmem:[%s5547_s25 + $0x3ff8] sm:$0xff]  ;;  %v2065_v44 = vld [vmem:[%s5547_s25 + $0x37f0] sm:$0xff] }
 0x456   : > { %4618 = vmatprep.subr.mxu1 %v2170_v49  ;;  %4548 = vmatpush1.msra.mxu0 %v1913_v37  ;;  %v2321_v61 = vld [vmem:[%s5547_s25 + $0x3ff0] sm:$0xff]  ;;  %v2058_v58 = vld [vmem:[%s5547_s25 + $0x37b8] sm:$0xff] }
 0x457   : > { %4619 = vmatpush1.msra.mxu1 %v2169_v39  ;;  %4549 = vmatprep.subr.mxu0 %v1906_v9  ;;  %v2314_v32 = vld [vmem:[%s5547_s25 + $0x3fb8] sm:$0xff]  ;;  %v2057_v34 = vld [vmem:[%s5547_s25 + $0x37b0] sm:$0xff] }
 0x458   : > { %4620 = vmatprep.subr.mxu1 %v2162_v45  ;;  %4550 = vmatpush1.msra.mxu0 %v1905_v11  ;;  %v2313_v49 = vld [vmem:[%s5547_s25 + $0x3fb0] sm:$0xff]  ;;  %v2050_v37 = vld [vmem:[%s5547_s25 + $0x3778] sm:$0xff] }
 0x459   : > { %4621 = vmatpush1.msra.mxu1 %v2161_v40  ;;  %4551 = vmatprep.subr.mxu0 %v1898_v63  ;;  %v2306_v39 = vld [vmem:[%s5547_s25 + $0x3f78] sm:$0xff]  ;;  %v2049_v9 = vld [vmem:[%s5547_s25 + $0x3770] sm:$0xff] }
 0x45a   : > { %4622 = vmatprep.subr.mxu1 %v2154_v2  ;;  %4552 = vmatpush1.msra.mxu0 %v1897_v35  ;;  %v2305_v45 = vld [vmem:[%s5547_s25 + $0x3f70] sm:$0xff]  ;;  %v2042_v11 = vld [vmem:[%s5547_s25 + $0x3738] sm:$0xff] }
 0x45b   : > { %4623 = vmatpush1.msra.mxu1 %v2153_v41  ;;  %4553 = vmatprep.subr.mxu0 %v1890_v42  ;;  %v2298_v40 = vld [vmem:[%s5547_s25 + $0x3f38] sm:$0xff]  ;;  %v2041_v63 = vld [vmem:[%s5547_s25 + $0x3730] sm:$0xff] }
 0x45c   : > { %4624 = vmatprep.subr.mxu1 %v2146_v46  ;;  %4554 = vmatpush1.msra.mxu0 %v1889_v47  ;;  %v2297_v2 = vld [vmem:[%s5547_s25 + $0x3f30] sm:$0xff]  ;;  %v2034_v35 = vld [vmem:[%s5547_s25 + $0x36f8] sm:$0xff] }
 0x45d   : > { %4625 = vmatpush1.msra.mxu1 %v2145_v48  ;;  %4555 = vmatprep.subr.mxu0 %v1882_v13  ;;  %v2290_v41 = vld [vmem:[%s5547_s25 + $0x3ef8] sm:$0xff]  ;;  %v2033_v42 = vld [vmem:[%s5547_s25 + $0x36f0] sm:$0xff] }
 0x45e   : > { %4626 = vmatprep.subr.mxu1 %v2138_v50  ;;  %4556 = vmatpush1.msra.mxu0 %v1881_v54  ;;  %v2289_v46 = vld [vmem:[%s5547_s25 + $0x3ef0] sm:$0xff]  ;;  %v2026_v47 = vld [vmem:[%s5547_s25 + $0x36b8] sm:$0xff] }
 0x45f   : > { %4627 = vmatpush1.msra.mxu1 %v2137_v29  ;;  %4557 = vmatprep.subr.mxu0 %v1874_v52  ;;  %v2282_v48 = vld [vmem:[%s5547_s25 + $0x3eb8] sm:$0xff]  ;;  %v2025_v13 = vld [vmem:[%s5547_s25 + $0x36b0] sm:$0xff] }
 0x460   : > { %4628 = vmatprep.subr.mxu1 %v2130_v56  ;;  %4558 = vmatpush1.msra.mxu0 %v1873_v57  ;;  %v2281_v50 = vld [vmem:[%s5547_s25 + $0x3eb0] sm:$0xff]  ;;  %v2018_v54 = vld [vmem:[%s5547_s25 + $0x3678] sm:$0xff] }
 0x461   : > { %4629 = vmatpush1.msra.mxu1 %v2129_v60  ;;  %4559 = vmatprep.subr.mxu0 %v1866_v62  ;;  %v2274_v29 = vld [vmem:[%s5547_s25 + $0x3e78] sm:$0xff]  ;;  %v2017_v52 = vld [vmem:[%s5547_s25 + $0x3670] sm:$0xff] }
 0x462   : > { %4630 = vmatprep.subr.mxu1 %v2122_v0  ;;  %4560 = vmatpush1.msra.mxu0 %v1865_v1  ;;  %v2273_v56 = vld [vmem:[%s5547_s25 + $0x3e70] sm:$0xff]  ;;  %v2010_v57 = vld [vmem:[%s5547_s25 + $0x3638] sm:$0xff] }
 0x463   : > { %4631 = vmatpush1.msra.mxu1 %v2121_v38  ;;  %4561 = vmatprep.subr.mxu0 %v1858_v7  ;;  %v2266_v60 = vld [vmem:[%s5547_s25 + $0x3e38] sm:$0xff]  ;;  %v2009_v62 = vld [vmem:[%s5547_s25 + $0x3630] sm:$0xff] }
 0x464   : > { %4632 = vmatprep.subr.mxu1 %v2114_v21  ;;  %4562 = vmatpush1.msra.mxu0 %v1857_v3  ;;  %v2265_v0 = vld [vmem:[%s5547_s25 + $0x3e30] sm:$0xff]  ;;  %v2002_v1 = vld [vmem:[%s5547_s25 + $0x35f8] sm:$0xff] }
 0x465   : > { %4633 = vmatpush1.msra.mxu1 %v2113_v5  ;;  %4563 = vmatprep.subr.mxu0 %v1850_v27  ;;  %v2258_v38 = vld [vmem:[%s5547_s25 + $0x3df8] sm:$0xff]  ;;  %v2001_v7 = vld [vmem:[%s5547_s25 + $0x35f0] sm:$0xff] }
 0x466   : > { %4634 = vmatprep.subr.mxu1 %v2106_v8  ;;  %4564 = vmatpush1.msra.mxu0 %v1849_v17  ;;  %v2257_v21 = vld [vmem:[%s5547_s25 + $0x3df0] sm:$0xff]  ;;  %v1994_v3 = vld [vmem:[%s5547_s25 + $0x35b8] sm:$0xff] }
 0x467   : > { %4635 = vmatpush1.msra.mxu1 %v2105_v10  ;;  %4565 = vmatprep.subr.mxu0 %v1842_v30  ;;  %v2250_v5 = vld [vmem:[%s5547_s25 + $0x3db8] sm:$0xff]  ;;  %v1993_v27 = vld [vmem:[%s5547_s25 + $0x35b0] sm:$0xff] }
 0x468   : > { %4636 = vmatprep.subr.mxu1 %v2098_v4  ;;  %4566 = vmatpush1.msra.mxu0 %v1841_v12  ;;  %v2249_v8 = vld [vmem:[%s5547_s25 + $0x3db0] sm:$0xff]  ;;  %v1986_v17 = vld [vmem:[%s5547_s25 + $0x3578] sm:$0xff] }
 0x469   : > { %4637 = vmatpush1.msra.mxu1 %v2097_v22  ;;  %4567 = vmatprep.subr.mxu0 %v1834_v59  ;;  %v2242_v10 = vld [vmem:[%s5547_s25 + $0x3d78] sm:$0xff]  ;;  %v1985_v30 = vld [vmem:[%s5547_s25 + $0x3570] sm:$0xff] }
 0x46a   : > { %4638 = vmatprep.subr.mxu1 %v2090_v6  ;;  %4568 = vmatpush1.msra.mxu0 %v1833_v31  ;;  %v2241_v4 = vld [vmem:[%s5547_s25 + $0x3d70] sm:$0xff]  ;;  %v1978_v12 = vld [vmem:[%s5547_s25 + $0x3538] sm:$0xff] }
 0x46b   : > { %4639 = vmatpush1.msra.mxu1 %v2089_v16  ;;  %4569 = vmatprep.subr.mxu0 %v1826_v18  ;;  %v2234_v22 = vld [vmem:[%s5547_s25 + $0x3d38] sm:$0xff]  ;;  %v1977_v59 = vld [vmem:[%s5547_s25 + $0x3530] sm:$0xff] }
 0x46c   : > { %4640 = vmatprep.subr.mxu1 %v2082_v51  ;;  %4570 = vmatpush1.msra.mxu0 %v1825_v15  ;;  %v2233_v6 = vld [vmem:[%s5547_s25 + $0x3d30] sm:$0xff]  ;;  %v1970_v31 = vld [vmem:[%s5547_s25 + $0x34f8] sm:$0xff] }
 0x46d   : > { %4641 = vmatpush1.msra.mxu1 %v2081_v19  ;;  %4571 = vmatprep.subr.mxu0 %v1818_v23  ;;  %v2226_v16 = vld [vmem:[%s5547_s25 + $0x3cf8] sm:$0xff]  ;;  %v1969_v18 = vld [vmem:[%s5547_s25 + $0x34f0] sm:$0xff] }
 0x46e   : > { %4642 = vmatprep.subr.mxu1 %v2074_v25  ;;  %4572 = vmatpush1.msra.mxu0 %v1817_v14  ;;  %v2225_v51 = vld [vmem:[%s5547_s25 + $0x3cf0] sm:$0xff]  ;;  %v1962_v15 = vld [vmem:[%s5547_s25 + $0x34b8] sm:$0xff] }
 0x46f   : > { %4643 = vmatpush1.msra.mxu1 %v2073_v24  ;;  %4573 = vmatprep.subr.mxu0 %v2066_v55  ;;  %v2218_v19 = vld [vmem:[%s5547_s25 + $0x3cb8] sm:$0xff]  ;;  %v1961_v23 = vld [vmem:[%s5547_s25 + $0x34b0] sm:$0xff] }
 0x470   : > { %4644 = vmatprep.subr.mxu1 %v2322_v28  ;;  %4574 = vmatpush2.msra.mxu0 %v2065_v44  ;;  %v2217_v25 = vld [vmem:[%s5547_s25 + $0x3cb0] sm:$0xff]  ;;  %v1954_v14 = vld [vmem:[%s5547_s25 + $0x3478] sm:$0xff] }
 0x471   : > { %4645 = vmatpush2.msra.mxu1 %v2321_v61  ;;  %4575 = vmatprep.subr.mxu0 %v2058_v58  ;;  %v2210_v24 = vld [vmem:[%s5547_s25 + $0x3c78] sm:$0xff]  ;;  %v1953_v55 = vld [vmem:[%s5547_s25 + $0x3470] sm:$0xff] }
 0x472   : > { %4646 = vmatprep.subr.mxu1 %v2314_v32  ;;  %4576 = vmatpush2.msra.mxu0 %v2057_v34  ;;  %v2209_v28 = vld [vmem:[%s5547_s25 + $0x3c70] sm:$0xff]  ;;  %v1946_v44 = vld [vmem:[%s5547_s25 + $0x3438] sm:$0xff]  ;;  %v3613_v34 = vpop.f32.mrf.mxu0 }
 0x473   : > { %4647 = vmatpush2.msra.mxu1 %v2313_v49  ;;  %4577 = vmatprep.subr.mxu0 %v2050_v37  ;;  %v2202_v61 = vld [vmem:[%s5547_s25 + $0x3c38] sm:$0xff]  ;;  %v1945_v58 = vld [vmem:[%s5547_s25 + $0x3430] sm:$0xff]  ;;  %v3684_v49 = vpop.f32.mrf.mxu1 }
 0x474   : > { %4648 = vmatprep.subr.mxu1 %v2306_v39  ;;  %4578 = vmatpush2.msra.mxu0 %v2049_v9  ;;  %v2201_v32 = vld [vmem:[%s5547_s25 + $0x3c30] sm:$0xff]  ;;  %v3615_v37 = vpop.f32.mrf.mxu0 }
 0x475   : > { %4649 = vmatpush2.msra.mxu1 %v2305_v45  ;;  %4579 = vmatprep.subr.mxu0 %v2042_v11  ;;  %v3686_v9 = vpop.f32.mrf.mxu1 }
 0x476   : > { %4650 = vmatprep.subr.mxu1 %v2298_v40  ;;  %4580 = vmatpush2.msra.mxu0 %v2041_v63  ;;  %v3755_v39 = vpop.f32.mrf.mxu0 }
 0x477   : > { %4651 = vmatpush2.msra.mxu1 %v2297_v2  ;;  %4581 = vmatprep.subr.mxu0 %v2034_v35  ;;  %v3826_v45 = vpop.f32.mrf.mxu1 }
 0x478   : > { %4652 = vmatprep.subr.mxu1 %v2290_v41  ;;  %4582 = vmatpush2.msra.mxu0 %v2033_v42  ;;  %v3757_v11 = vpop.f32.mrf.mxu0 }
 0x479   : > { %4653 = vmatpush2.msra.mxu1 %v2289_v46  ;;  %4583 = vmatprep.subr.mxu0 %v2026_v47  ;;  %v3828_v63 = vpop.f32.mrf.mxu1 }
 0x47a   : > { %4654 = vmatprep.subr.mxu1 %v2282_v48  ;;  %4584 = vmatpush2.msra.mxu0 %v2025_v13  ;;  %v3897_v40 = vpop.f32.mrf.mxu0 }
 0x47b   : > { %4655 = vmatpush2.msra.mxu1 %v2281_v50  ;;  %4585 = vmatprep.subr.mxu0 %v2018_v54  ;;  %v3968_v2 = vpop.f32.mrf.mxu1  ;;  %v3685_v50 = vadd.f32 %v3684_v49, %v3613_v34 }
 0x47c   : > { %4656 = vmatprep.subr.mxu1 %v2274_v29  ;;  %4586 = vmatpush2.msra.mxu0 %v2017_v52  ;;  %v3899_v35 = vpop.f32.mrf.mxu0 }
 0x47d   : > { %4657 = vmatpush2.msra.mxu1 %v2273_v56  ;;  %4587 = vmatprep.subr.mxu0 %v2010_v57  ;;  %v3756_v52 = vadd.f32 %v3755_v39, %v3685_v50 }
 0x47e   : > { %4658 = vmatprep.subr.mxu1 %v2266_v60  ;;  %4588 = vmatpush2.msra.mxu0 %v2009_v62  ;;  %v4039_v41 = vpop.f32.mrf.mxu0 }
 0x47f   : > { %4659 = vmatpush2.msra.mxu1 %v2265_v0  ;;  %4589 = vmatprep.subr.mxu0 %v2002_v1 }
 0x480   : > { %4660 = vmatprep.subr.mxu1 %v2258_v38  ;;  %4590 = vmatpush2.msra.mxu0 %v2001_v7  ;;  %v4041_v46 = vpop.f32.mrf.mxu0  ;;  %v3827_v7 = vadd.f32 %v3826_v45, %v3756_v52 }
 0x481   : > { %4661 = vmatpush2.msra.mxu1 %v2257_v21  ;;  %4591 = vmatprep.subr.mxu0 %v1994_v3 }
 0x482   : > { %4662 = vmatprep.subr.mxu1 %v2250_v5  ;;  %4592 = vmatpush2.msra.mxu0 %v1993_v27  ;;  %v3898_v27 = vadd.f32 %v3897_v40, %v3827_v7 }
 0x483   : > { %4663 = vmatpush2.msra.mxu1 %v2249_v8  ;;  %4593 = vmatprep.subr.mxu0 %v1986_v17 }
 0x484   : > { %4664 = vmatprep.subr.mxu1 %v2242_v10  ;;  %4594 = vmatpush2.msra.mxu0 %v1985_v30 }
 0x485   : > { %4665 = vmatpush2.msra.mxu1 %v2241_v4  ;;  %4595 = vmatprep.subr.mxu0 %v1978_v12 }
 0x486   : > { %4666 = vmatprep.subr.mxu1 %v2234_v22  ;;  %4596 = vmatpush2.msra.mxu0 %v1977_v59  ;;  %v3969_v22 = vadd.f32 %v3968_v2, %v3898_v27 }
 0x487   : > { %4667 = vmatpush2.msra.mxu1 %v2233_v6  ;;  %4597 = vmatprep.subr.mxu0 %v1970_v31 }
 0x488   : > { %4668 = vmatprep.subr.mxu1 %v2226_v16  ;;  %4598 = vmatpush2.msra.mxu0 %v1969_v18  ;;  %v4040_v16 = vadd.f32 %v4039_v41, %v3969_v22 }
 0x489   : > { %4669 = vmatpush2.msra.mxu1 %v2225_v51  ;;  %4599 = vmatprep.subr.mxu0 %v1962_v15 }
 0x48a   : > { %4670 = vmatprep.subr.mxu1 %v2218_v19  ;;  %4600 = vmatpush2.msra.mxu0 %v1961_v23 }
 0x48b   : > { %4671 = vmatpush2.msra.mxu1 %v2217_v25  ;;  %4601 = vmatprep.subr.mxu0 %v1954_v14 }
 0x48c   : > { %4672 = vmatprep.subr.mxu1 %v2210_v24  ;;  %4602 = vmatpush2.msra.mxu0 %v1953_v55 }
 0x48d   : > { %4673 = vmatpush2.msra.mxu1 %v2209_v28  ;;  %4603 = vmatprep.subr.mxu0 %v1946_v44 }
 0x48e   : > { %4674 = vmatprep.subr.mxu1 %v2202_v61  ;;  %4604 = vmatpush2.msra.mxu0 %v1945_v58 }
 0x48f   : > { %4605 = vmatprep.mubr.f32.mxu0 %v6158_v33  ;;  %4675 = vmatpush2.msra.mxu1 %v2201_v32  ;;  %v3970_v33 = vpop.f32.mrf.mxu1 }
 0x490   : > { %4676 = vmatprep.mubr.f32.mxu1 %v6164_v36  ;;  %4606 = vmatmul.mubr.f32.vlgmr.msra.gmra.mxu0 %v6143_v20  ;;  %v4181_v36 = vpop.f32.mrf.mxu0 }
 0x491   : > { %4677 = vmatmul.mubr.f32.vlgmr.msra.gmra.mxu1 %v6150_v26  ;;  %v4110_v42 = vpop.f32.mrf.mxu1  ;;  %v3687_v26 = vadd.f32 %v3686_v9, %v3615_v37  ;;  %v274_v37 = vld [vmem:[%s5564_s30 + $0x8] sm:$0xff] }
 0x492   : > { %v4183_v48 = vpop.f32.mrf.mxu0  ;;  %v4111_v24 = vadd.f32 %v4110_v42, %v4040_v16 }
 0x493   : > { %v4112_v47 = vpop.f32.mrf.mxu1  ;;  %v3758_v54 = vadd.f32 %v3757_v11, %v3687_v26 }
 0x495   : > { %v4252_v20 = vpop.f32.mrf.mxu1  ;;  %v3829_v62 = vadd.f32 %v3828_v63, %v3758_v54 }
 0x496   : > { %v4253_v56 = vadd.f32 %v4252_v20, %v4181_v36 }
 0x497   : > { %v4254_v29 = vpop.f32.mrf.mxu1  ;;  %v3900_v21 = vadd.f32 %v3899_v35, %v3829_v62 }
 0x498   : > { %v4255_v0 = vadd.f32 %v4254_v29, %v4183_v48 }
 0x499   : > { %v3971_v30 = vadd.f32 %v3970_v33, %v3900_v21 }
 0x49b   : > { %v4042_v59 = vadd.f32 %v4041_v46, %v3971_v30 }
 0x49d   : > { %v4113_v19 = vadd.f32 %v4112_v47, %v4042_v59 }
 0x49f   : > { %v4708_v44 = vcombine.low %v4111_v24, %v4113_v19 }
 0x4a1   : > { %v4716_v34 = vrot.slane %v4708_v44, %v5691_v53 }
 0x4cc   : > { %v4323_v13 = vpop.f32.mrf.mxu0 }
 0x4cd   : > { %v4324_v1 = vadd.f32 %v4323_v13, %v4253_v56 }
 0x4ce   : > { %v4394_v57 = vpop.f32.mrf.mxu1  ;;  %v4325_v60 = vpop.f32.mrf.mxu0 }
 0x4cf   : > { %v4326_v3 = vadd.f32 %v4325_v60, %v4255_v0  ;;  %v4395_v8 = vadd.f32 %v4394_v57, %v4324_v1 }
 0x4d0   : > { %v4396_v5 = vpop.f32.mrf.mxu1 }
 0x4d1   : > { %v4397_v4 = vadd.f32 %v4396_v5, %v4326_v3 }
 0x50e   : > { %v4465_v38 = vpop.f32.mrf.mxu0 }
 0x50f   : > { %v4466_v12 = vadd.f32 %v4465_v38, %v4395_v8 }
 0x510   : > { %v4536_v17 = vpop.f32.mrf.mxu1  ;;  %v4467_v10 = vpop.f32.mrf.mxu0 }
 0x511   : > { %v4468_v6 = vadd.f32 %v4467_v10, %v4397_v4  ;;  %v4537_v18 = vadd.f32 %v4536_v17, %v4466_v12 }
 0x512   : > { %v4538_v31 = vpop.f32.mrf.mxu1 }
 0x513   : > { %v4539_v23 = vadd.f32 %v4538_v31, %v4468_v6 }
 0x550   : > { %v4607_v51 = vpop.f32.mrf.mxu0 }
 0x551   : > { %v4678_v15 = vpop.f32.mrf.mxu1  ;;  %v4608_v25 = vadd.f32 %v4607_v51, %v4537_v18 }
 0x552   : > { %v4609_v14 = vpop.f32.mrf.mxu0 }
 0x553   : > { %v4610_v55 = vadd.f32 %v4609_v14, %v4539_v23  ;;  %v4680_v28 = vpop.f32.mrf.mxu1  ;;  %v4679_v61 = vadd.f32 %v4678_v15, %v4608_v25 }
 0x555   : > { %v4681_v58 = vadd.f32 %v4680_v28, %v4610_v55 }
 0x557   : > { %v4709_v32 = vcombine.low %v4679_v61, %v4681_v58 }
 0x559   : > { %v4723_v49 = vrot.slane %v4709_v32, %v5691_v53 }
 0x55b   : > { %v4724_v39 = vcombine.low %v4716_v34, %v4723_v49  ;;  %4734 = sbr.rel (%p4967_p5) target bundleno = 1392 (0x570), region = 52 }
 0x55d   : > { %v4728_v9 = vadd.f32 %v4724_v39, %v274_v37 }
 0x55f   : > { %4730 = vst [vmem:[%s5564_s30 + $0x8] sm:$0xff] %v4728_v9 }
 0x560   : > { %v4737_v45 = vld [vmem:[%s5557_s8] sm:$0xff]  ;;  %v4741_v11 = vsub.s32 0, %v5675_v43  ;;  %v4745_v40 = vsub.s32 1, %v5675_v43  ;;  %v4749_v63 = vsub.s32 2, %v5675_v43  ;;  %v4753_v2 = vsub.s32 3, %v5675_v43 }
 0x561   : > { %v4757_v35 = vsub.s32 4, %v5675_v43  ;;  %v4761_v41 = vsub.s32 5, %v5675_v43  ;;  %v4765_v33 = vsub.s32 6, %v5675_v43  ;;  %v4769_v42 = vsub.s32 7, %v5675_v43  ;;  %v4735_v43 = vld [vmem:[%s5564_s30] sm:$0xff] }
 0x562   : > { %v4742_v46 = vrot.slane %v4737_v45, %v4741_v11  ;;  %v4746_v36 = vrot.slane %v4737_v45, %v4745_v40  ;;  %v4750_v47 = vrot.slane %v4737_v45, %v4749_v63  ;;  %v4754_v20 = vrot.slane %v4737_v45, %v4753_v2 }
 0x563   : > { %v4758_v48 = vrot.slane %v4737_v45, %v4757_v35  ;;  %v4762_v26 = vrot.slane %v4737_v45, %v4761_v41  ;;  %v4766_v13 = vrot.slane %v4737_v45, %v4765_v33  ;;  %v4770_v50 = vrot.slane %v4737_v45, %v4769_v42 }
 0x564   : > { %v4771_v54 = vcombine.low %v4742_v46, %v4746_v36  ;;  %v4772_v29 = vcombine.low %v4750_v47, %v4754_v20 }
 0x565   : > { %v4788_v52 = vcombine.low %v4758_v48, %v4762_v26  ;;  %v4789_v56 = vcombine.low %v4766_v13, %v4770_v50 }
 0x566   : > { %v4779_v57 = vrot.slane %v4771_v54, %v5691_v53  ;;  %v4786_v60 = vrot.slane %v4772_v29, %v5691_v53  ;;  %v4736_v38 = vld [vmem:[%s5564_s30 + $0x8] sm:$0xff] }
 0x567   : > { %v4796_v62 = vrot.slane %v4788_v52, %v5691_v53  ;;  %v4803_v0 = vrot.slane %v4789_v56, %v5691_v53 }
 0x568   : > { %v4787_v1 = vcombine.low %v4779_v57, %v4786_v60 }
 0x569   : > { %v4804_v7 = vcombine.low %v4796_v62, %v4803_v0 }
 0x56a   : > { %v4807_v21 = vadd.f32 %v4787_v1, %v4735_v43 }
 0x56b   : > { %v4808_v3 = vadd.f32 %v4804_v7, %v4736_v38 }
 0x56c   : > { %v4809_v5 = vmax.f32 %v4807_v21, 0.0 }
 0x56d   : > { %v4810_v27 = vmax.f32 %v4808_v3, 0.0 }
 0x56e   : > { %4811 = vst [vmem:[%s5564_s30] sm:$0xff] %v4809_v5 }
 0x56f   : > { %4812 = vst [vmem:[%s5564_s30 + $0x8] sm:$0xff] %v4810_v27 }
 0x570 PF: > { %s7918_s18 = sld [smem:[#allocation13_spill]]  ;;  %s4828_s6 = sshll.u32 %s5564_s30, 4  ;;  %s4829_s6 = int_to_ptr.vmem [resolvable:$true] %s4828_s6 }
 0x571   : > { %s7919_s0 = sld [smem:[#allocation18_spill]]  ;;  %s4814_s26 = scalar_lea.sflag [#allocation4], %s5554_s1 }
 0x572   : > { %s5185_s25 = scalar_lea.vmem %s4829_s6, 256  ;;  %s5323_s29 = smov [#allocation8]  }
 0x573   : > { %p5186_p10 = scmp.ne.s32.totalorder %s4829_s6, %s5185_s25  ;;  %s5189_s8 = sshll.u32 %s5323_s29, 4  ;;  %s5190_s8 = int_to_ptr.vmem [resolvable:$false] %s5189_s8 }
 0x574   : > { %s5191_s28 = scalar_lea.vmem %s5190_s8, 512  ;;  %p5192_p6 = scmp.lt.s32.totalorder %s4829_s6, %s5190_s8 }
 0x575   : > { %p5187_p11 = pnand %p5186_p10, %p5518_p8  ;;  %p5193_p12 = scmp.lt.s32.totalorder %s5191_s28, %s5185_s25 }
 0x576   : > { %s4975_s11 = sshll.u32 %s7918_s18, 8 }
 0x577   : > { %s4826_s5 = scalar_lea.hbm %s7919_s0, %s4975_s11  ;;  %p5188_p3 = pneg %p5187_p11 }
 0x578   : > { %p5194_p13 = por %p5193_p12, %p5192_p6 }
 0x57a   : > { %p5195_p1 = pnand %p5194_p13, %p5188_p3 }
 0x57c   : > { %5198 = shalt.err (!%p5195_p1)
}
 0x57d   : > { %s5199_s3 = scalar_lea.hbm %s4826_s5, 256  ;;  %s5203_s15 = scalar_lea.hbm %s7919_s0, 512 }
 0x57e   : > { %p5200_p9 = scmp.ne.s32.totalorder %s4826_s5, %s5199_s3  ;;  %p5204_p0 = scmp.lt.s32.totalorder %s4826_s5, %s7919_s0 }
 0x57f   : > { %p5205_p7 = scmp.lt.s32.totalorder %s5203_s15, %s5199_s3 }
 0x580   : > { %p5201_p2 = pnand %p5200_p9, %p5518_p8 }
 0x581   : > { %p5206_p5 = por %p5205_p7, %p5204_p0 }
 0x582   : > { %p5202_p4 = pneg %p5201_p2 }
 0x584   : > { %p5207_p10 = pnand %p5206_p5, %p5202_p4 }
 0x586   : > { %5210 = shalt.err (!%p5207_p10)
}
 0x587   : > { %4984 = dma.vmem_to_hbm [thread:$0]  (%p5518_p8), %s4829_s6, 256, %s4826_s5, %s4814_s26  }
 0x588 PF: > { %p5004_p11 = scmp.ge.s32.totalorder %s5313_s22, 2  ;;  %s4840_s18 = sand.u32 1, %s5273_s12  }
 0x589   : > { %p7920_p3 = scmp.ne.s32.totalorder %s7905_s7, 0  ;;  %s4841_s11 = scalar_lea.sflag [#allocation4], %s4840_s18 }
 0x58b   : > { %p4998_p6 = pnand %p5004_p11, %p7920_p3 }
 0x58d   : > { %p4999_p12 = pneg %p4998_p6 }
 0x58f   : > { %5268 = dma.done.wait (%p4999_p12), %s4841_s11, 256  }
 0x590   : > { %5270 = vsyncadd (%p4999_p12), %s4841_s11, 4294967040  ;;  %s20_s22 = sadd.s32 1, %s5313_s22   ;;  %s7921_s24 = sld [smem:[#allocation14_spill]] }
 0x591   : > { %p17_p13 = scmp.ge.s32.totalorder %s20_s22, 12   ;;  %s7922_s4 = sld [smem:[#allocation15_spill]] }
 0x592   : > { %s7923_s12 = smov %s5277_s13  ;;  %s7924_s13 = smov %s5281_s14 }
 0x593   : > { %s7925_s14 = smov %s5495_s27  ;;  %s7926_s15 = smov %s5289_s16 }
 0x594   : > { %s7927_s16 = smov %s5293_s17  ;;  %s7928_s17 = smov %s5429_s10 }
 0x595   : > { %s7929_s18 = smov %s5305_s20  ;;  %s7930_s19 = smov %s5309_s21 }
 0x596   : > { %s7931_s20 = smov %s7921_s24  ;;  %19 = sbr.rel (!%p17_p13) target bundleno = 14 (0xe), region = 102 }
 0x597   : > { %s7932_s21 = smov %s7922_s4 }
 0x59b   :  { %4846 = vsyncpa [#allocation3], 1 }
 0x59c   :  { %4848 = vsyncpa [#allocation3 + $0x1], 1 }
 0x59d   :  { %4849 = vsyncpa [#allocation6], 1 }
 0x59e   :  { %4851 = vsyncpa [#allocation6 + $0x1], 1 }
 0x59f   :  { %4852 = vsyncpa [#allocation4], 1 }
 0x5a0   :  { %4854 = vsyncpa [#allocation4 + $0x1], 1 }

</bundles_post_ra>
